<compile_context>
chip_gen: v7x
topology: tpu7x:2x2x1
jax: 0.10.0
libtpu: 0.0.40
codegen_flags: <defaults>
</compile_context>

<pallas_src>
import functools

import jax
import jax.numpy as jnp
from jax.experimental import pallas as pl
from jax.experimental.pallas import tpu as pltpu


# ----------------------------------------------------------------------------
# Fused Pallas kernel: one grid step == one image of the batch
# ----------------------------------------------------------------------------
def _fused_basic_block_kernel(x_ref, w1_ref, b1_ref, w2_ref, b2_ref, o_ref,
                              pad_ref, col_ref, *, H, W, C):
    """out = relu( bn2(conv2( relu(bn1(conv1(x))) )) + x )   (one NHWC image)

    x_ref   : (H, W, C)        f32   input block
    w*_ref  : (9*C, C)         bf16  conv weights with the BN scale folded in
    b*_ref  : (1, C)           f32   folded BN bias
    o_ref   : (H, W, C)        f32   output block
    pad_ref : (H+2, W+2, C)    bf16  shared zero-padded activation slab (halo=1)
    col_ref : (H*W, 9*C)       bf16  explicit im2col staging buffer (MXU LHS)
    """
    bf16 = pad_ref.dtype

    # --- (re)zero ONLY the 1-element halo border of the shared padded slab.
    # The interior is fully overwritten below; borders are re-zeroed every grid
    # step so the batch axis can be sharded "parallel" across TensorCores with
    # no cross-iteration scratch assumptions.
    pad_ref[0:1, :, :] = jnp.zeros((1, W + 2, C), bf16)           # top halo row
    pad_ref[H + 1:H + 2, :, :] = jnp.zeros((1, W + 2, C), bf16)   # bottom halo row
    pad_ref[:, 0:1, :] = jnp.zeros((H + 2, 1, C), bf16)           # left halo col
    pad_ref[:, W + 1:W + 2, :] = jnp.zeros((H + 2, 1, C), bf16)   # right halo col

    def im2col():
        # 9 shifted taps -> static, 128-lane-aligned column offsets of col_ref,
        # so each conv is ONE MXU matmul with K = 9*C over a lane-dense bf16 LHS.
        for t in range(9):
            ky, kx = divmod(t, 3)
            col_ref[:, t * C:(t + 1) * C] = (
                pad_ref[ky:ky + H, kx:kx + W, :].reshape(H * W, C))

    # --- conv1 + bn1 + relu (x is cast to bf16 exactly once, on the interior write).
    pad_ref[1:H + 1, 1:W + 1, :] = x_ref[...].astype(bf16)
    im2col()
    y1 = jnp.dot(col_ref[...], w1_ref[...], preferred_element_type=jnp.float32)
    y1 = jnp.maximum(y1 + b1_ref[...], 0.0)                       # (H*W, C) f32

    # --- conv2 + bn2: reuse the SAME padded slab (its halo border is still zero).
    pad_ref[1:H + 1, 1:W + 1, :] = y1.reshape(H, W, C).astype(bf16)
    im2col()
    y2 = jnp.dot(col_ref[...], w2_ref[...], preferred_element_type=jnp.float32)
    y2 = y2 + b2_ref[...]

    # --- residual add (identity read in f32) + final relu.
    out = jnp.maximum(y2 + x_ref[...].reshape(H * W, C), 0.0)
    o_ref[...] = out.reshape(H, W, C).astype(o_ref.dtype)


# ----------------------------------------------------------------------------
# Host-side parameter prep (BN folding, weight layout) + wrapper
# ----------------------------------------------------------------------------
def _fold_bn(gamma, beta, running_mean, running_var, eps=1e-5):
    scale = gamma / jnp.sqrt(running_var + eps)
    bias = beta - running_mean * scale
    return scale, bias


def _prep_conv_bn(w_hwio, bn):
    """Fold the BN scale into the conv weight and flatten taps onto K.

    w_hwio: (3, 3, Cin, Cout).  NOTE: real PyTorch weights are [Cout, Cin, 3, 3]
    and must first be transposed with w.transpose(2, 3, 1, 0).
    Returns ((9*Cin, Cout) bf16, (1, Cout) f32).
    """
    scale, bias = _fold_bn(*bn)
    kh, kw, cin, cout = w_hwio.shape
    w = (w_hwio * scale[None, None, None, :]).reshape(kh * kw * cin, cout)
    return w.astype(jnp.bfloat16), bias.reshape(1, cout).astype(jnp.float32)


def basic_block_forward(x_nchw, params, stride=1):
    if stride != 1:
        raise NotImplementedError(
            "downsample=None BasicBlock requires stride=1 (residual shape match)")
    N, C, H, W = x_nchw.shape
    assert params["w1"].shape == (3, 3, C, C), "Cin must equal Cout when downsample is None"
    assert W % 8 == 0, "W should be a multiple of 8 for clean sublane layout"

    w1, b1 = _prep_conv_bn(params["w1"], params["bn1"])
    w2, b2 = _prep_conv_bn(params["w2"], params["bn2"])

    x = jnp.transpose(x_nchw, (0, 2, 3, 1))            # NCHW -> NHWC (C on lanes)

    kernel = functools.partial(_fused_basic_block_kernel, H=H, W=W, C=C)

    # Per-step VMEM footprint: double-buffered x/out blocks + double-buffered
    # weights + bf16 padded slab + bf16 im2col scratch.  Give 2x headroom;
    # never below the 32 MiB default, capped well under v7x physical VMEM.
    blk_bytes = H * W * C * 4
    w_bytes = 9 * C * C * 2
    scratch_bytes = (H + 2) * (W + 2) * C * 2 + H * W * 9 * C * 2
    per_step = 2 * (2 * blk_bytes) + 2 * (2 * w_bytes) + scratch_bytes
    vmem_limit = int(min(max(2 * per_step, 32 * 1024 * 1024), 96 * 1024 * 1024))

    flops = 2 * (2 * N * H * W * (9 * C) * C)          # two 3x3 convs
    bytes_accessed = (2 * N * blk_bytes                # input read + output write
                      + 2 * w_bytes + 2 * C * 4)       # folded weights + biases

    y = pl.pallas_call(
        kernel,
        out_shape=jax.ShapeDtypeStruct((N, H, W, C), x.dtype),
        grid_spec=pltpu.PrefetchScalarGridSpec(
            num_scalar_prefetch=0,
            grid=(N,),                                               # one image / step
            in_specs=[
                pl.BlockSpec((None, H, W, C), lambda i: (i, 0, 0, 0)),   # x
                pl.BlockSpec((9 * C, C), lambda i: (0, 0)),              # w1 (BN folded)
                pl.BlockSpec((1, C), lambda i: (0, 0)),                  # b1
                pl.BlockSpec((9 * C, C), lambda i: (0, 0)),              # w2 (BN folded)
                pl.BlockSpec((1, C), lambda i: (0, 0)),                  # b2
            ],
            out_specs=pl.BlockSpec((None, H, W, C), lambda i: (i, 0, 0, 0)),
            scratch_shapes=[
                pltpu.VMEM((H + 2, W + 2, C), jnp.bfloat16),   # shared padded slab
                pltpu.VMEM((H * W, 9 * C), jnp.bfloat16),      # im2col staging
            ],
        ),
        compiler_params=pltpu.CompilerParams(
            dimension_semantics=("parallel",),         # shard batch across TCs (v7x)
            vmem_limit_bytes=vmem_limit,
        ),
        cost_estimate=pl.CostEstimate(
            flops=int(flops), transcendentals=0, bytes_accessed=int(bytes_accessed)),
    )(x, w1, b1, w2, b2)

    return jnp.transpose(y, (0, 3, 1, 2))              # NHWC -> NCHW


# ----------------------------------------------------------------------------
# Pure-JAX (XLA) reference for numerical validation
# ----------------------------------------------------------------------------
def reference_forward(x_nchw, params):
    x = jnp.transpose(x_nchw, (0, 2, 3, 1)).astype(jnp.float32)

    def conv_bn(inp, w_hwio, bn):
        s, b = _fold_bn(*bn)
        y = jax.lax.conv_general_dilated(
            inp, w_hwio, window_strides=(1, 1), padding="SAME",
            dimension_numbers=("NHWC", "HWIO", "NHWC"),
            precision=jax.lax.Precision.HIGHEST)
        return y * s + b

    y = jax.nn.relu(conv_bn(x, params["w1"], params["bn1"]))
    y = jax.nn.relu(conv_bn(y, params["w2"], params["bn2"]) + x)
    return jnp.transpose(y, (0, 3, 1, 2))


# ----------------------------------------------------------------------------
# Deterministic parameter init + demo
# ----------------------------------------------------------------------------
def init_params(key, in_channel, out_channel):
    ks = jax.random.split(key, 10)

    def conv_w(k, cin, cout):
        # stored directly as HWIO = (3, 3, Cin, Cout)
        return jax.random.normal(k, (3, 3, cin, cout), jnp.float32) * (1.0 / (3.0 * cin))

    def bn_params(k0, k1, k2, k3, c):
        gamma = 1.0 + 0.1 * jax.random.normal(k0, (c,), jnp.float32)
        beta = 0.1 * jax.random.normal(k1, (c,), jnp.float32)
        rmean = 0.1 * jax.random.normal(k2, (c,), jnp.float32)
        rvar = jax.random.uniform(k3, (c,), jnp.float32, minval=0.5, maxval=1.5)
        return gamma, beta, rmean, rvar

    return {
        "w1": conv_w(ks[0], in_channel, out_channel),
        "bn1": bn_params(ks[1], ks[2], ks[3], ks[4], out_channel),
        "w2": conv_w(ks[5], out_channel, out_channel),
        "bn2": bn_params(ks[6], ks[7], ks[8], ks[9], out_channel),
    }


if __name__ == "__main__":
    key = jax.random.PRNGKey(0)
    k_x, k_p = jax.random.split(key)

    # Small but ResNet-realistic shapes: C=128 keeps the channel (lane) axis
    # fully dense and gives the MXU a K = 9*C = 1152 contraction per conv.
    # N=2 is an even grid extent (balanced across v7x's two TensorCores).
    N, C, H, W = 2, 128, 16, 16
    x = jax.random.normal(k_x, (N, C, H, W), jnp.float32)
    params = init_params(k_p, in_channel=C, out_channel=C)

    fwd = jax.jit(basic_block_forward)
    out = jax.block_until_ready(fwd(x, params))

    assert out.shape == (N, C, H, W), out.shape
    assert bool(jnp.all(out >= 0.0))              # final ReLU
    assert bool(jnp.all(jnp.isfinite(out)))

    # numerical check vs the pure-JAX reference (bf16 MXU feed -> loose-ish tol)
    ref = reference_forward(x, params)
    max_err = float(jnp.max(jnp.abs(out - ref)))
    assert max_err < 3e-2, f"max |err| = {max_err}"

    print("KERNEL_OK")
</pallas_src>

<mosaic_0001>
module attributes {stable_mosaic.version = 11 : i64} {
  func.func @_fused_basic_block_kernel(%arg0: i32, %arg1: memref<1x16x16x128xf32, #tpu.memory_space<vmem>>, %arg2: memref<1152x128xbf16, #tpu.memory_space<vmem>>, %arg3: memref<1x128xf32, #tpu.memory_space<vmem>>, %arg4: memref<1152x128xbf16, #tpu.memory_space<vmem>>, %arg5: memref<1x128xf32, #tpu.memory_space<vmem>>, %arg6: memref<1x16x16x128xf32, #tpu.memory_space<vmem>>, %arg7: memref<18x18x128xbf16, #tpu.memory_space<vmem>>, %arg8: memref<256x1152xbf16, #tpu.memory_space<vmem>>) attributes {dimension_semantics = [#tpu.dimension_semantics<parallel>], iteration_bounds = array<i64: 2>, scalar_prefetch = 0 : i64, scratch_operands = 2 : i64, tpu.core_type = #tpu.core_type<tc>, window_params = [{transform_indices = @transform_0, window_bounds = array<i64: 1, 16, 16, 128>}, {pipeline_mode = #tpu.pipeline_mode<synchronous>, transform_indices = @transform_1, window_bounds = array<i64: 1152, 128>}, {pipeline_mode = #tpu.pipeline_mode<synchronous>, transform_indices = @transform_2, window_bounds = array<i64: 1, 128>}, {pipeline_mode = #tpu.pipeline_mode<synchronous>, transform_indices = @transform_3, window_bounds = array<i64: 1152, 128>}, {pipeline_mode = #tpu.pipeline_mode<synchronous>, transform_indices = @transform_4, window_bounds = array<i64: 1, 128>}, {transform_indices = @transform_5, window_bounds = array<i64: 1, 16, 16, 128>}]} {
    %cst = arith.constant 0.000000e+00 : bf16
    %0 = vector.broadcast %cst : bf16 to vector<1x18x128xbf16>
    %c0 = arith.constant 0 : index
    %c0_0 = arith.constant 0 : index
    %c0_1 = arith.constant 0 : index
    %1 = vector.load %arg7[%c0, %c0_0, %c0_1] : memref<18x18x128xbf16, #tpu.memory_space<vmem>>, vector<1x18x128xbf16>
    tpu.vector_store %arg7[%c0, %c0_0, %c0_1], %0 {strides = array<i32>} : memref<18x18x128xbf16, #tpu.memory_space<vmem>>, vector<1x18x128xbf16>,
    %cst_2 = arith.constant 0.000000e+00 : bf16
    %2 = vector.broadcast %cst_2 : bf16 to vector<1x18x128xbf16>
    %c17 = arith.constant 17 : index
    %c0_3 = arith.constant 0 : index
    %c0_4 = arith.constant 0 : index
    %3 = vector.load %arg7[%c17, %c0_3, %c0_4] : memref<18x18x128xbf16, #tpu.memory_space<vmem>>, vector<1x18x128xbf16>
    tpu.vector_store %arg7[%c17, %c0_3, %c0_4], %2 {strides = array<i32>} : memref<18x18x128xbf16, #tpu.memory_space<vmem>>, vector<1x18x128xbf16>,
    %cst_5 = arith.constant 0.000000e+00 : bf16
    %4 = vector.broadcast %cst_5 : bf16 to vector<18x1x128xbf16>
    %c0_6 = arith.constant 0 : index
    %c0_7 = arith.constant 0 : index
    %c0_8 = arith.constant 0 : index
    %5 = vector.load %arg7[%c0_6, %c0_7, %c0_8] : memref<18x18x128xbf16, #tpu.memory_space<vmem>>, vector<18x1x128xbf16>
    tpu.vector_store %arg7[%c0_6, %c0_7, %c0_8], %4 {strides = array<i32>} : memref<18x18x128xbf16, #tpu.memory_space<vmem>>, vector<18x1x128xbf16>,
    %cst_9 = arith.constant 0.000000e+00 : bf16
    %6 = vector.broadcast %cst_9 : bf16 to vector<18x1x128xbf16>
    %c0_10 = arith.constant 0 : index
    %c17_11 = arith.constant 17 : index
    %c0_12 = arith.constant 0 : index
    %7 = vector.load %arg7[%c0_10, %c17_11, %c0_12] : memref<18x18x128xbf16, #tpu.memory_space<vmem>>, vector<18x1x128xbf16>
    tpu.vector_store %arg7[%c0_10, %c17_11, %c0_12], %6 {strides = array<i32>} : memref<18x18x128xbf16, #tpu.memory_space<vmem>>, vector<18x1x128xbf16>,
    %c0_13 = arith.constant 0 : index
    %c0_14 = arith.constant 0 : index
    %c0_15 = arith.constant 0 : index
    %c0_16 = arith.constant 0 : index
    %8 = vector.load %arg1[%c0_13, %c0_14, %c0_15, %c0_16] : memref<1x16x16x128xf32, #tpu.memory_space<vmem>>, vector<1x16x16x128xf32>
    %9 = vector.shape_cast %8 : vector<1x16x16x128xf32> to vector<16x16x128xf32>
    %10 = arith.truncf %9 : vector<16x16x128xf32> to vector<16x16x128xbf16>
    %c1 = arith.constant 1 : index
    %c1_17 = arith.constant 1 : index
    %c0_18 = arith.constant 0 : index
    %11 = vector.load %arg7[%c1, %c1_17, %c0_18] : memref<18x18x128xbf16, #tpu.memory_space<vmem>>, vector<16x16x128xbf16>
    tpu.vector_store %arg7[%c1, %c1_17, %c0_18], %10 {strides = array<i32>} : memref<18x18x128xbf16, #tpu.memory_space<vmem>>, vector<16x16x128xbf16>,
    %c0_19 = arith.constant 0 : index
    %c0_20 = arith.constant 0 : index
    %c0_21 = arith.constant 0 : index
    %12 = vector.load %arg7[%c0_19, %c0_20, %c0_21] : memref<18x18x128xbf16, #tpu.memory_space<vmem>>, vector<16x16x128xbf16>
    %13 = vector.shape_cast %12 : vector<16x16x128xbf16> to vector<256x128xbf16>
    %c0_22 = arith.constant 0 : index
    %c0_23 = arith.constant 0 : index
    %14 = vector.load %arg8[%c0_22, %c0_23] : memref<256x1152xbf16, #tpu.memory_space<vmem>>, vector<256x128xbf16>
    tpu.vector_store %arg8[%c0_22, %c0_23], %13 {strides = array<i32>} : memref<256x1152xbf16, #tpu.memory_space<vmem>>, vector<256x128xbf16>,
    %c0_24 = arith.constant 0 : index
    %c1_25 = arith.constant 1 : index
    %c0_26 = arith.constant 0 : index
    %15 = vector.load %arg7[%c0_24, %c1_25, %c0_26] : memref<18x18x128xbf16, #tpu.memory_space<vmem>>, vector<16x16x128xbf16>
    %16 = vector.shape_cast %15 : vector<16x16x128xbf16> to vector<256x128xbf16>
    %c0_27 = arith.constant 0 : index
    %c128 = arith.constant 128 : index
    %17 = vector.load %arg8[%c0_27, %c128] : memref<256x1152xbf16, #tpu.memory_space<vmem>>, vector<256x128xbf16>
    tpu.vector_store %arg8[%c0_27, %c128], %16 {strides = array<i32>} : memref<256x1152xbf16, #tpu.memory_space<vmem>>, vector<256x128xbf16>,
    %c0_28 = arith.constant 0 : index
    %c2 = arith.constant 2 : index
    %c0_29 = arith.constant 0 : index
    %18 = vector.load %arg7[%c0_28, %c2, %c0_29] : memref<18x18x128xbf16, #tpu.memory_space<vmem>>, vector<16x16x128xbf16>
    %19 = vector.shape_cast %18 : vector<16x16x128xbf16> to vector<256x128xbf16>
    %c0_30 = arith.constant 0 : index
    %c256 = arith.constant 256 : index
    %20 = vector.load %arg8[%c0_30, %c256] : memref<256x1152xbf16, #tpu.memory_space<vmem>>, vector<256x128xbf16>
    tpu.vector_store %arg8[%c0_30, %c256], %19 {strides = array<i32>} : memref<256x1152xbf16, #tpu.memory_space<vmem>>, vector<256x128xbf16>,
    %c1_31 = arith.constant 1 : index
    %c0_32 = arith.constant 0 : index
    %c0_33 = arith.constant 0 : index
    %21 = vector.load %arg7[%c1_31, %c0_32, %c0_33] : memref<18x18x128xbf16, #tpu.memory_space<vmem>>, vector<16x16x128xbf16>
    %22 = vector.shape_cast %21 : vector<16x16x128xbf16> to vector<256x128xbf16>
    %c0_34 = arith.constant 0 : index
    %c384 = arith.constant 384 : index
    %23 = vector.load %arg8[%c0_34, %c384] : memref<256x1152xbf16, #tpu.memory_space<vmem>>, vector<256x128xbf16>
    tpu.vector_store %arg8[%c0_34, %c384], %22 {strides = array<i32>} : memref<256x1152xbf16, #tpu.memory_space<vmem>>, vector<256x128xbf16>,
    %c1_35 = arith.constant 1 : index
    %c1_36 = arith.constant 1 : index
    %c0_37 = arith.constant 0 : index
    %24 = vector.load %arg7[%c1_35, %c1_36, %c0_37] : memref<18x18x128xbf16, #tpu.memory_space<vmem>>, vector<16x16x128xbf16>
    %25 = vector.shape_cast %24 : vector<16x16x128xbf16> to vector<256x128xbf16>
    %c0_38 = arith.constant 0 : index
    %c512 = arith.constant 512 : index
    %26 = vector.load %arg8[%c0_38, %c512] : memref<256x1152xbf16, #tpu.memory_space<vmem>>, vector<256x128xbf16>
    tpu.vector_store %arg8[%c0_38, %c512], %25 {strides = array<i32>} : memref<256x1152xbf16, #tpu.memory_space<vmem>>, vector<256x128xbf16>,
    %c1_39 = arith.constant 1 : index
    %c2_40 = arith.constant 2 : index
    %c0_41 = arith.constant 0 : index
    %27 = vector.load %arg7[%c1_39, %c2_40, %c0_41] : memref<18x18x128xbf16, #tpu.memory_space<vmem>>, vector<16x16x128xbf16>
    %28 = vector.shape_cast %27 : vector<16x16x128xbf16> to vector<256x128xbf16>
    %c0_42 = arith.constant 0 : index
    %c640 = arith.constant 640 : index
    %29 = vector.load %arg8[%c0_42, %c640] : memref<256x1152xbf16, #tpu.memory_space<vmem>>, vector<256x128xbf16>
    tpu.vector_store %arg8[%c0_42, %c640], %28 {strides = array<i32>} : memref<256x1152xbf16, #tpu.memory_space<vmem>>, vector<256x128xbf16>,
    %c2_43 = arith.constant 2 : index
    %c0_44 = arith.constant 0 : index
    %c0_45 = arith.constant 0 : index
    %30 = vector.load %arg7[%c2_43, %c0_44, %c0_45] : memref<18x18x128xbf16, #tpu.memory_space<vmem>>, vector<16x16x128xbf16>
    %31 = vector.shape_cast %30 : vector<16x16x128xbf16> to vector<256x128xbf16>
    %c0_46 = arith.constant 0 : index
    %c768 = arith.constant 768 : index
    %32 = vector.load %arg8[%c0_46, %c768] : memref<256x1152xbf16, #tpu.memory_space<vmem>>, vector<256x128xbf16>
    tpu.vector_store %arg8[%c0_46, %c768], %31 {strides = array<i32>} : memref<256x1152xbf16, #tpu.memory_space<vmem>>, vector<256x128xbf16>,
    %c2_47 = arith.constant 2 : index
    %c1_48 = arith.constant 1 : index
    %c0_49 = arith.constant 0 : index
    %33 = vector.load %arg7[%c2_47, %c1_48, %c0_49] : memref<18x18x128xbf16, #tpu.memory_space<vmem>>, vector<16x16x128xbf16>
    %34 = vector.shape_cast %33 : vector<16x16x128xbf16> to vector<256x128xbf16>
    %c0_50 = arith.constant 0 : index
    %c896 = arith.constant 896 : index
    %35 = vector.load %arg8[%c0_50, %c896] : memref<256x1152xbf16, #tpu.memory_space<vmem>>, vector<256x128xbf16>
    tpu.vector_store %arg8[%c0_50, %c896], %34 {strides = array<i32>} : memref<256x1152xbf16, #tpu.memory_space<vmem>>, vector<256x128xbf16>,
    %c2_51 = arith.constant 2 : index
    %c2_52 = arith.constant 2 : index
    %c0_53 = arith.constant 0 : index
    %36 = vector.load %arg7[%c2_51, %c2_52, %c0_53] : memref<18x18x128xbf16, #tpu.memory_space<vmem>>, vector<16x16x128xbf16>
    %37 = vector.shape_cast %36 : vector<16x16x128xbf16> to vector<256x128xbf16>
    %c0_54 = arith.constant 0 : index
    %c1024 = arith.constant 1024 : index
    %38 = vector.load %arg8[%c0_54, %c1024] : memref<256x1152xbf16, #tpu.memory_space<vmem>>, vector<256x128xbf16>
    tpu.vector_store %arg8[%c0_54, %c1024], %37 {strides = array<i32>} : memref<256x1152xbf16, #tpu.memory_space<vmem>>, vector<256x128xbf16>,
    %c0_55 = arith.constant 0 : index
    %c0_56 = arith.constant 0 : index
    %39 = vector.load %arg8[%c0_55, %c0_56] : memref<256x1152xbf16, #tpu.memory_space<vmem>>, vector<256x1152xbf16>
    %c0_57 = arith.constant 0 : index
    %c0_58 = arith.constant 0 : index
    %40 = vector.load %arg2[%c0_57, %c0_58] : memref<1152x128xbf16, #tpu.memory_space<vmem>>, vector<1152x128xbf16>
    %cst_59 = arith.constant dense<0.000000e+00> : vector<256x128xf32>
    %41 = tpu.matmul %39, %40, %cst_59 {dimension_numbers = #tpu.dot_dimension_numbers<[1], [0], [0], [1], [0, 0, 1, 1], [], []>} : vector<256x1152xbf16>, vector<1152x128xbf16>, vector<256x128xf32> -> vector<256x128xf32>
    %c0_60 = arith.constant 0 : index
    %c0_61 = arith.constant 0 : index
    %42 = vector.load %arg3[%c0_60, %c0_61] : memref<1x128xf32, #tpu.memory_space<vmem>>, vector<1x128xf32>
    %43 = vector.broadcast %42 : vector<1x128xf32> to vector<256x128xf32>
    %44 = arith.addf %41, %43 : vector<256x128xf32>
    %cst_62 = arith.constant 0.000000e+00 : f32
    %45 = vector.broadcast %cst_62 : f32 to vector<256x128xf32>
    %46 = arith.maximumf %44, %45 : vector<256x128xf32>
    %47 = vector.shape_cast %46 : vector<256x128xf32> to vector<16x16x128xf32>
    %48 = arith.truncf %47 : vector<16x16x128xf32> to vector<16x16x128xbf16>
    %c1_63 = arith.constant 1 : index
    %c1_64 = arith.constant 1 : index
    %c0_65 = arith.constant 0 : index
    %49 = vector.load %arg7[%c1_63, %c1_64, %c0_65] : memref<18x18x128xbf16, #tpu.memory_space<vmem>>, vector<16x16x128xbf16>
    tpu.vector_store %arg7[%c1_63, %c1_64, %c0_65], %48 {strides = array<i32>} : memref<18x18x128xbf16, #tpu.memory_space<vmem>>, vector<16x16x128xbf16>,
    %c0_66 = arith.constant 0 : index
    %c0_67 = arith.constant 0 : index
    %c0_68 = arith.constant 0 : index
    %50 = vector.load %arg7[%c0_66, %c0_67, %c0_68] : memref<18x18x128xbf16, #tpu.memory_space<vmem>>, vector<16x16x128xbf16>
    %51 = vector.shape_cast %50 : vector<16x16x128xbf16> to vector<256x128xbf16>
    %c0_69 = arith.constant 0 : index
    %c0_70 = arith.constant 0 : index
    %52 = vector.load %arg8[%c0_69, %c0_70] : memref<256x1152xbf16, #tpu.memory_space<vmem>>, vector<256x128xbf16>
    tpu.vector_store %arg8[%c0_69, %c0_70], %51 {strides = array<i32>} : memref<256x1152xbf16, #tpu.memory_space<vmem>>, vector<256x128xbf16>,
    %c0_71 = arith.constant 0 : index
    %c1_72 = arith.constant 1 : index
    %c0_73 = arith.constant 0 : index
    %53 = vector.load %arg7[%c0_71, %c1_72, %c0_73] : memref<18x18x128xbf16, #tpu.memory_space<vmem>>, vector<16x16x128xbf16>
    %54 = vector.shape_cast %53 : vector<16x16x128xbf16> to vector<256x128xbf16>
    %c0_74 = arith.constant 0 : index
    %c128_75 = arith.constant 128 : index
    %55 = vector.load %arg8[%c0_74, %c128_75] : memref<256x1152xbf16, #tpu.memory_space<vmem>>, vector<256x128xbf16>
    tpu.vector_store %arg8[%c0_74, %c128_75], %54 {strides = array<i32>} : memref<256x1152xbf16, #tpu.memory_space<vmem>>, vector<256x128xbf16>,
    %c0_76 = arith.constant 0 : index
    %c2_77 = arith.constant 2 : index
    %c0_78 = arith.constant 0 : index
    %56 = vector.load %arg7[%c0_76, %c2_77, %c0_78] : memref<18x18x128xbf16, #tpu.memory_space<vmem>>, vector<16x16x128xbf16>
    %57 = vector.shape_cast %56 : vector<16x16x128xbf16> to vector<256x128xbf16>
    %c0_79 = arith.constant 0 : index
    %c256_80 = arith.constant 256 : index
    %58 = vector.load %arg8[%c0_79, %c256_80] : memref<256x1152xbf16, #tpu.memory_space<vmem>>, vector<256x128xbf16>
    tpu.vector_store %arg8[%c0_79, %c256_80], %57 {strides = array<i32>} : memref<256x1152xbf16, #tpu.memory_space<vmem>>, vector<256x128xbf16>,
    %c1_81 = arith.constant 1 : index
    %c0_82 = arith.constant 0 : index
    %c0_83 = arith.constant 0 : index
    %59 = vector.load %arg7[%c1_81, %c0_82, %c0_83] : memref<18x18x128xbf16, #tpu.memory_space<vmem>>, vector<16x16x128xbf16>
    %60 = vector.shape_cast %59 : vector<16x16x128xbf16> to vector<256x128xbf16>
    %c0_84 = arith.constant 0 : index
    %c384_85 = arith.constant 384 : index
    %61 = vector.load %arg8[%c0_84, %c384_85] : memref<256x1152xbf16, #tpu.memory_space<vmem>>, vector<256x128xbf16>
    tpu.vector_store %arg8[%c0_84, %c384_85], %60 {strides = array<i32>} : memref<256x1152xbf16, #tpu.memory_space<vmem>>, vector<256x128xbf16>,
    %c1_86 = arith.constant 1 : index
    %c1_87 = arith.constant 1 : index
    %c0_88 = arith.constant 0 : index
    %62 = vector.load %arg7[%c1_86, %c1_87, %c0_88] : memref<18x18x128xbf16, #tpu.memory_space<vmem>>, vector<16x16x128xbf16>
    %63 = vector.shape_cast %62 : vector<16x16x128xbf16> to vector<256x128xbf16>
    %c0_89 = arith.constant 0 : index
    %c512_90 = arith.constant 512 : index
    %64 = vector.load %arg8[%c0_89, %c512_90] : memref<256x1152xbf16, #tpu.memory_space<vmem>>, vector<256x128xbf16>
    tpu.vector_store %arg8[%c0_89, %c512_90], %63 {strides = array<i32>} : memref<256x1152xbf16, #tpu.memory_space<vmem>>, vector<256x128xbf16>,
    %c1_91 = arith.constant 1 : index
    %c2_92 = arith.constant 2 : index
    %c0_93 = arith.constant 0 : index
    %65 = vector.load %arg7[%c1_91, %c2_92, %c0_93] : memref<18x18x128xbf16, #tpu.memory_space<vmem>>, vector<16x16x128xbf16>
    %66 = vector.shape_cast %65 : vector<16x16x128xbf16> to vector<256x128xbf16>
    %c0_94 = arith.constant 0 : index
    %c640_95 = arith.constant 640 : index
    %67 = vector.load %arg8[%c0_94, %c640_95] : memref<256x1152xbf16, #tpu.memory_space<vmem>>, vector<256x128xbf16>
    tpu.vector_store %arg8[%c0_94, %c640_95], %66 {strides = array<i32>} : memref<256x1152xbf16, #tpu.memory_space<vmem>>, vector<256x128xbf16>,
    %c2_96 = arith.constant 2 : index
    %c0_97 = arith.constant 0 : index
    %c0_98 = arith.constant 0 : index
    %68 = vector.load %arg7[%c2_96, %c0_97, %c0_98] : memref<18x18x128xbf16, #tpu.memory_space<vmem>>, vector<16x16x128xbf16>
    %69 = vector.shape_cast %68 : vector<16x16x128xbf16> to vector<256x128xbf16>
    %c0_99 = arith.constant 0 : index
    %c768_100 = arith.constant 768 : index
    %70 = vector.load %arg8[%c0_99, %c768_100] : memref<256x1152xbf16, #tpu.memory_space<vmem>>, vector<256x128xbf16>
    tpu.vector_store %arg8[%c0_99, %c768_100], %69 {strides = array<i32>} : memref<256x1152xbf16, #tpu.memory_space<vmem>>, vector<256x128xbf16>,
    %c2_101 = arith.constant 2 : index
    %c1_102 = arith.constant 1 : index
    %c0_103 = arith.constant 0 : index
    %71 = vector.load %arg7[%c2_101, %c1_102, %c0_103] : memref<18x18x128xbf16, #tpu.memory_space<vmem>>, vector<16x16x128xbf16>
    %72 = vector.shape_cast %71 : vector<16x16x128xbf16> to vector<256x128xbf16>
    %c0_104 = arith.constant 0 : index
    %c896_105 = arith.constant 896 : index
    %73 = vector.load %arg8[%c0_104, %c896_105] : memref<256x1152xbf16, #tpu.memory_space<vmem>>, vector<256x128xbf16>
    tpu.vector_store %arg8[%c0_104, %c896_105], %72 {strides = array<i32>} : memref<256x1152xbf16, #tpu.memory_space<vmem>>, vector<256x128xbf16>,
    %c2_106 = arith.constant 2 : index
    %c2_107 = arith.constant 2 : index
    %c0_108 = arith.constant 0 : index
    %74 = vector.load %arg7[%c2_106, %c2_107, %c0_108] : memref<18x18x128xbf16, #tpu.memory_space<vmem>>, vector<16x16x128xbf16>
    %75 = vector.shape_cast %74 : vector<16x16x128xbf16> to vector<256x128xbf16>
    %c0_109 = arith.constant 0 : index
    %c1024_110 = arith.constant 1024 : index
    %76 = vector.load %arg8[%c0_109, %c1024_110] : memref<256x1152xbf16, #tpu.memory_space<vmem>>, vector<256x128xbf16>
    tpu.vector_store %arg8[%c0_109, %c1024_110], %75 {strides = array<i32>} : memref<256x1152xbf16, #tpu.memory_space<vmem>>, vector<256x128xbf16>,
    %c0_111 = arith.constant 0 : index
    %c0_112 = arith.constant 0 : index
    %77 = vector.load %arg8[%c0_111, %c0_112] : memref<256x1152xbf16, #tpu.memory_space<vmem>>, vector<256x1152xbf16>
    %c0_113 = arith.constant 0 : index
    %c0_114 = arith.constant 0 : index
    %78 = vector.load %arg4[%c0_113, %c0_114] : memref<1152x128xbf16, #tpu.memory_space<vmem>>, vector<1152x128xbf16>
    %cst_115 = arith.constant dense<0.000000e+00> : vector<256x128xf32>
    %79 = tpu.matmul %77, %78, %cst_115 {dimension_numbers = #tpu.dot_dimension_numbers<[1], [0], [0], [1], [0, 0, 1, 1], [], []>} : vector<256x1152xbf16>, vector<1152x128xbf16>, vector<256x128xf32> -> vector<256x128xf32>
    %c0_116 = arith.constant 0 : index
    %c0_117 = arith.constant 0 : index
    %80 = vector.load %arg5[%c0_116, %c0_117] : memref<1x128xf32, #tpu.memory_space<vmem>>, vector<1x128xf32>
    %81 = vector.broadcast %80 : vector<1x128xf32> to vector<256x128xf32>
    %82 = arith.addf %79, %81 : vector<256x128xf32>
    %c0_118 = arith.constant 0 : index
    %c0_119 = arith.constant 0 : index
    %c0_120 = arith.constant 0 : index
    %c0_121 = arith.constant 0 : index
    %83 = vector.load %arg1[%c0_118, %c0_119, %c0_120, %c0_121] : memref<1x16x16x128xf32, #tpu.memory_space<vmem>>, vector<1x16x16x128xf32>
    %84 = vector.shape_cast %83 : vector<1x16x16x128xf32> to vector<16x16x128xf32>
    %85 = vector.shape_cast %84 : vector<16x16x128xf32> to vector<256x128xf32>
    %86 = arith.addf %82, %85 : vector<256x128xf32>
    %cst_122 = arith.constant 0.000000e+00 : f32
    %87 = vector.broadcast %cst_122 : f32 to vector<256x128xf32>
    %88 = arith.maximumf %86, %87 : vector<256x128xf32>
    %89 = vector.shape_cast %88 : vector<256x128xf32> to vector<16x16x128xf32>
    %c0_123 = arith.constant 0 : index
    %c0_124 = arith.constant 0 : index
    %c0_125 = arith.constant 0 : index
    %c0_126 = arith.constant 0 : index
    %90 = vector.load %arg6[%c0_123, %c0_124, %c0_125, %c0_126] : memref<1x16x16x128xf32, #tpu.memory_space<vmem>>, vector<1x16x16x128xf32>
    %91 = vector.shape_cast %90 : vector<1x16x16x128xf32> to vector<16x16x128xf32>
    %92 = vector.shape_cast %89 : vector<16x16x128xf32> to vector<1x16x16x128xf32>
    tpu.vector_store %arg6[%c0_123, %c0_124, %c0_125, %c0_126], %92 {strides = array<i32>} : memref<1x16x16x128xf32, #tpu.memory_space<vmem>>, vector<1x16x16x128xf32>,
    return
  }
  func.func @transform_0(%arg0: i32) -> (i32, i32, i32, i32) {
    %c0_i32 = arith.constant 0 : i32
    %c0_i32_0 = arith.constant 0 : i32
    %c0_i32_1 = arith.constant 0 : i32
    %c0_i32_2 = arith.constant 0 : i32
    return %arg0, %c0_i32, %c0_i32_0, %c0_i32_1 : i32, i32, i32, i32
  }
  func.func @transform_1(%arg0: i32) -> (i32, i32) {
    %c0_i32 = arith.constant 0 : i32
    %c0_i32_0 = arith.constant 0 : i32
    %c0_i32_1 = arith.constant 0 : i32
    return %c0_i32, %c0_i32_0 : i32, i32
  }
  func.func @transform_2(%arg0: i32) -> (i32, i32) {
    %c0_i32 = arith.constant 0 : i32
    %c0_i32_0 = arith.constant 0 : i32
    %c0_i32_1 = arith.constant 0 : i32
    return %c0_i32, %c0_i32_0 : i32, i32
  }
  func.func @transform_3(%arg0: i32) -> (i32, i32) {
    %c0_i32 = arith.constant 0 : i32
    %c0_i32_0 = arith.constant 0 : i32
    %c0_i32_1 = arith.constant 0 : i32
    return %c0_i32, %c0_i32_0 : i32, i32
  }
  func.func @transform_4(%arg0: i32) -> (i32, i32) {
    %c0_i32 = arith.constant 0 : i32
    %c0_i32_0 = arith.constant 0 : i32
    %c0_i32_1 = arith.constant 0 : i32
    return %c0_i32, %c0_i32_0 : i32, i32
  }
  func.func @transform_5(%arg0: i32) -> (i32, i32, i32, i32) {
    %c0_i32 = arith.constant 0 : i32
    %c0_i32_0 = arith.constant 0 : i32
    %c0_i32_1 = arith.constant 0 : i32
    %c0_i32_2 = arith.constant 0 : i32
    return %arg0, %c0_i32, %c0_i32_0, %c0_i32_1 : i32, i32, i32, i32
  }
}

</mosaic_0001>

<bundles_post_ra>
// kernel: basic_block_forward.1
= control target key start
LH: loop header
LB: loop body
LE: loop exit
PB: predicated region body
PF: predicated region fallthrough
CT: control target
= control target key end

     0   :  { %10 = vsyncpa [#allocation5], 0  ;;  %s16152_s0 = inlined_call_operand.vmem [shape: f32[2,16,16,128], index: 0, kind: input, shape index: {}]   ;;  %s16153_s1 = inlined_call_operand.vmem [shape: bf16[1152,128], index: 1, kind: input, shape index: {}]   ;;  %s16154_s2 = inlined_call_operand.vmem [shape: f32[1,128], index: 2, kind: input, shape index: {}]   ;;  %s16155_s3 = inlined_call_operand.vmem [shape: bf16[1152,128], index: 3, kind: input, shape index: {}]   ;;  %s16156_s4 = inlined_call_operand.vmem [shape: f32[1,128], index: 4, kind: input, shape index: {}]   ;;  %s16157_s5 = inlined_call_operand.hbm [shape: f32[2,16,16,128], index: 5, kind: output, shape index: {}]  }
   0x1   :  { %12 = vsyncpa [#allocation5 + $0x1], 0  ;;  %s12502_s18 = smov 0   ;;  %s12504_s19 = smov 0  }
   0x2   :  { %s12506_s20 = smov 0   ;;  %s12508_s21 = smov 0  }
   0x3 LB: > { %s12523_s22 = sadd.s32 4294967295, %s12466_s21   ;;  %s10408_s23 = sadd.s32 4294967294, %s12466_s21   ;;  %s12466_s21 = sphi %s12508_s21, %s16327_s21   ;;  %s12462_s20 = sphi %s12506_s20, %s16326_s20   ;;  %s12458_s19 = sphi %s12504_s19, %s16325_s19   ;;  %s12454_s18 = sphi %s12502_s18, %s16324_s18  }
   0x4   : > { %s12527_s24 = sadd.s32 1, %s12466_s21   ;;  %s135_s25 = sadd.s32 1, %s12462_s20 }
   0x5   : > { %s132_s26 = ssub.s32 %s12466_s21, %s12527_s24  ;;  %p145_p0 = scmp.ne.s32.totalorder %s12462_s20, %s12458_s19 }
   0x6   : > { %p133_p1 = scmp.eq.s32.totalorder %s132_s26, 0  ;;  %p146_p2 = scmp.eq.s32.totalorder %s12523_s22, 1 }
   0x7   : > { %p151_p3 = scmp.ne.s32.totalorder %s12458_s19, %s12454_s18  ;;  %p152_p4 = scmp.eq.s32.totalorder %s10408_s23, 1 }
   0x8   : > { %s12538_s27 = scalar_select %p133_p1, %s12462_s20, %s135_s25  }
   0x9   : > { %p12540_p5 = por %p146_p2, %p145_p0  ;;  %p12544_p6 = por %p152_p4, %p151_p3 }
   0xa   : > { %p10411_p7 = scmp.ge.s32.totalorder %s12466_s21, 1  ;;  %p190_p8 = scmp.lt.s32.totalorder %s12466_s21, 3 }
   0xc   : > { %p191_p9 = pnand %p10411_p7, %p190_p8 }
   0xe   : > { %194 = sbr.rel (%p191_p9) target bundleno = 1259 (0x4eb), region = 40 }
  0x15   : > { %v12162_v0 = vld [vmem:[%s16153_s1 + $0x40] sm:$0xff]   ;;  %v12468_v2 = vmov 0   ;;  %v12166_v5 = vld [vmem:[%s16153_s1 + $0x48] sm:$0xff]   ;;  %v12170_v9 = vld [vmem:[%s16153_s1 + $0x50] sm:$0xff]   ;;  %p218_p10 = scmp.lt.s32.totalorder %s12523_s22, 1  ;;  %vm231_vm0 = vcmask 1040384  }
  0x16   : > { %v12163_v1 = vld [vmem:[%s16153_s1] sm:$0xff]   ;;  %224 = vst [vmem:[#allocation2] sm:$0xf] %v12468_v2  ;;  %225 = vst [vmem:[#allocation2 + $0x4] sm:$0xf] %v12468_v2  ;;  %11080 = vmatprep.subr.bf16.mxu0 %v12162_v0  ;;  %v12167_v6 = vld [vmem:[%s16153_s1 + $0x8] sm:$0xff]  }
  0x17   : > { %226 = vst [vmem:[#allocation2 + $0x8] sm:$0x1] %v12468_v2  ;;  %228 = vst [vmem:[#allocation2 + $0xcc] sm:$0xf] %v12468_v2  ;;  %v12164_v3 = vld [vmem:[%s16153_s1 + $0xc0] sm:$0xff]   ;;  %11081 = vmatpush3.bf16.msra.mxu0 %v12163_v1  ;;  %v12168_v7 = vld [vmem:[%s16153_s1 + $0xc8] sm:$0xff]  }
  0x18   : > { %229 = vst [vmem:[#allocation2 + $0xd0] sm:$0xf] %v12468_v2  ;;  %230 = vst [vmem:[#allocation2 + $0xd4] sm:$0x1] %v12468_v2  ;;  %v12165_v4 = vld [vmem:[%s16153_s1 + $0x80] sm:$0xff]   ;;  %11192 = vmatprep.subr.bf16.mxu1 %v12164_v3  ;;  %11082 = vmatprep.subr.bf16.mxu0 %v12166_v5  ;;  %v12169_v8 = vld [vmem:[%s16153_s1 + $0x88] sm:$0xff]  }
  0x19   : > { %11193 = vmatpush3.bf16.msra.mxu1 %v12165_v4  ;;  %v12171_v10 = vld [vmem:[%s16153_s1 + $0x10] sm:$0xff]   ;;  %v12174_v13 = vld [vmem:[%s16153_s1 + $0x58] sm:$0xff]   ;;  %v12178_v17 = vld [vmem:[%s16153_s1 + $0x60] sm:$0xff]   ;;  %s12633_s11 = scalar_select %p218_p10, %s12523_s22, 1  ;;  %vm232_vm1 = vsmask.f32 256 }
  0x1a   : > { %11194 = vmatprep.subr.bf16.mxu1 %v12168_v7  ;;  %v12172_v11 = vld [vmem:[%s16153_s1 + $0xd0] sm:$0xff]   ;;  %v12175_v14 = vld [vmem:[%s16153_s1 + $0x18] sm:$0xff]   ;;  %v12179_v18 = vld [vmem:[%s16153_s1 + $0x20] sm:$0xff]   ;;  %vm288_vm2 = vsmask.f32 7938  ;;  %v16168_v33 = vmov 0 }
  0x1b   : > { %11083 = vmatpush3.bf16.msra.mxu0 %v12167_v6  ;;  %v12173_v12 = vld [vmem:[%s16153_s1 + $0x90] sm:$0xff]   ;;  %v12176_v15 = vld [vmem:[%s16153_s1 + $0xd8] sm:$0xff]   ;;  %v12180_v19 = vld [vmem:[%s16153_s1 + $0xe0] sm:$0xff]   ;;  %s11014_s26 = sshll.u32 %s12633_s11, 8  ;;  %vm795_vm5 = vcmask 1043456   ;;  %vm1664_vm7 = vcmask 1042432  }
  0x1c   : > { %11084 = vmatprep.subr.bf16.mxu0 %v12170_v9  ;;  %v12177_v16 = vld [vmem:[%s16153_s1 + $0x98] sm:$0xff]   ;;  %v12181_v20 = vld [vmem:[%s16153_s1 + $0xa0] sm:$0xff]   ;;  %v12182_v21 = vld [vmem:[%s16153_s1 + $0x68] sm:$0xff]   ;;  %vm1101_vm6 = vsmask.f32 3328  ;;  %s12668_s9 = scalar_lea.vmem %s16152_s0, %s11014_s26  ;;  %vm1665_vm8 = vcmask 1046532  }
  0x1d   : > { %11195 = vmatpush3.bf16.msra.mxu1 %v12169_v8  ;;  %v12183_v22 = vld [vmem:[%s16153_s1 + $0x28] sm:$0xff]   ;;  %v12186_v25 = vld [vmem:[%s16153_s1 + $0x70] sm:$0xff]   ;;  %v12190_v29 = vld [vmem:[%s16153_s1 + $0x78] sm:$0xff]   ;;  %vm1102_vm9 = vsmask.f32 7440  ;;  %v16175_v5 = vmov 0 }
  0x1e   : > { %11196 = vmatprep.subr.bf16.mxu1 %v12172_v11  ;;  %v12184_v23 = vld [vmem:[%s16153_s1 + $0xe8] sm:$0xff]   ;;  %v12187_v26 = vld [vmem:[%s16153_s1 + $0x30] sm:$0xff]   ;;  %v12191_v30 = vld [vmem:[%s16153_s1 + $0x38] sm:$0xff]   ;;  %vm472_vm10 = vsmask.f32 4368  ;;  %s215_s17 = sand.u32 1, %s12458_s19  }
  0x1f   : > { %11085 = vmatpush3.bf16.msra.mxu0 %v12171_v10  ;;  %v12185_v24 = vld [vmem:[%s16153_s1 + $0xa8] sm:$0xff]   ;;  %v12188_v27 = vld [vmem:[%s16153_s1 + $0xf0] sm:$0xff]   ;;  %v12192_v31 = vld [vmem:[%s16153_s1 + $0xf8] sm:$0xff]   ;;  %s10412_s23 = sshll.u32 %s215_s17, 8  ;;  %s11079_s26 = sshll.u32 %s12523_s22, 12 }
  0x20   : > { %11086 = vmatprep.subr.bf16.mxu0 %v12174_v13  ;;  %v12189_v28 = vld [vmem:[%s16153_s1 + $0xb0] sm:$0xff]   ;;  %v234_v32 = vld [vmem:[#allocation2] sm:$0x1]  ;;  %vm12649_vm3 = vmand %vm231_vm0, %vm232_vm1  ;;  %s16010_s25 = scalar_lea.vmem [#allocation4], %s10412_s23  ;;  %s16102_s8 = scalar_lea.hbm %s16157_s5, %s11079_s26 }
  0x21   : > { %11197 = vmatpush3.bf16.msra.mxu1 %v12173_v12  ;;  %v16169_v33 = vsel %vm12649_vm3, 4294967295, %v16168_v33  ;;  %v290_v34 = vld [vmem:[#allocation2 + $0x8] sm:$0x1]  ;;  %v1054_v35 = vld [vmem:[#allocation2 + $0x4] sm:$0xf]  ;;  %v235_v36 = vsel %vm12649_vm3, 0, %v234_v32  ;;  %vm12656_vm4 = vmand %vm231_vm0, %vm288_vm2 }
  0x22   : > { %11198 = vmatprep.subr.bf16.mxu1 %v12176_v15  ;;  %16170 = vst [vmem:[#allocation7_spill] sm:$0xff] %v16169_v33  ;;  %v1114_v38 = vshll.u32 %v1054_v35, 16  ;;  %v1118_v39 = vshrl.u32 %v1054_v35, 16  ;;  %v12193_v40 = vld [vmem:[%s16153_s1 + $0xb8] sm:$0xff]   ;;  %236 = vst [vmem:[#allocation2] sm:$0x1] %v235_v36 }
  0x23   : > { %11087 = vmatpush3.bf16.msra.mxu0 %v12175_v14  ;;  %v291_v41 = vsel %vm12656_vm4, 0, %v290_v34  ;;  %v12195_v44 = vld [vmem:[%s16153_s1 + $0x140] sm:$0xff]   ;;  %v237_v45 = vld [vmem:[#allocation2 + $0xc] sm:$0x1]  ;;  %v293_v48 = vld [vmem:[#allocation2 + $0x14] sm:$0x1] }
  0x24   : > { %11088 = vmatprep.subr.bf16.mxu0 %v12178_v17  ;;  %292 = vst [vmem:[#allocation2 + $0x8] sm:$0x1] %v291_v41  ;;  %v12670_v42 = vrot.slane %v1114_v38, 5  ;;  %v1120_v43 = vrot.slane %v1118_v39, 4  ;;  %v238_v47 = vsel %vm12649_vm3, 0, %v237_v45  ;;  %v344_v49 = vld [vmem:[%s12668_s9] sm:$0xff]  ;;  %vm12686_vm11 = vmor %vm1664_vm7, %vm1665_vm8 }
  0x25   : > { %11199 = vmatpush3.bf16.msra.mxu1 %v12177_v16  ;;  %v345_v50 = vld [vmem:[%s12668_s9 + $0x8] sm:$0xff]  ;;  %239 = vst [vmem:[#allocation2 + $0xc] sm:$0x1] %v238_v47  ;;  %v294_v51 = vsel %vm12656_vm4, 0, %v293_v48  ;;  %v11015_v52 = vpack.c.bf16 %v344_v49, %v344_v49  ;;  %v1568_v54 = vld [vmem:[#allocation2] sm:$0xe]  ;;  %vm12692_vm12 = vmand %vm795_vm5, %vm288_vm2 }
  0x26   : > { %11200 = vmatprep.subr.bf16.mxu1 %v12180_v19  ;;  %v1121_v46 = vor.u32 %v1120_v43, %v12670_v42  ;;  %v11016_v53 = vpack.c.bf16 %v345_v50, %v345_v50  ;;  %295 = vst [vmem:[#allocation2 + $0x14] sm:$0x1] %v294_v51  ;;  %v1569_v59 = vld [vmem:[#allocation2 + $0x4] sm:$0xf]  ;;  %v10479_v62 = vrot.slane %v1568_v54, 9  ;;  %v16176_v5 = vsel %vm12692_vm12, 4294967295, %v16175_v5  ;;  %vm12698_vm13 = vmor %vm232_vm1, %vm472_vm10 }
  0x27   : > { %11089 = vmatpush3.bf16.msra.mxu0 %v12179_v18  ;;  %v475_v56 = vshrl.u32 %v11015_v52, 16  ;;  %v478_v57 = vshll.u32 %v11015_v52, 16  ;;  %16177 = vst [vmem:[#allocation8_spill] sm:$0xff] %v16176_v5  ;;  %v1669_v8 = vrot.slane %v1569_v59, 5  ;;  %v240_v9 = vld [vmem:[#allocation2 + $0x18] sm:$0x1]  ;;  %vm12706_vm14 = vmor %vm1101_vm6, %vm1102_vm9 }
  0x28   : > { %11090 = vmatprep.subr.bf16.mxu0 %v12182_v21  ;;  %v12682_v55 = vrot.slane %v1121_v46, 4  ;;  %v483_v58 = vshrl.u32 %v11016_v53, 16  ;;  %v486_v61 = vshll.u32 %v11016_v53, 16  ;;  %v16178_v12 = vmov 0  ;;  %v346_v15 = vld [vmem:[%s12668_s9 + $0x10] sm:$0xff]  ;;  %v347_v16 = vld [vmem:[%s12668_s9 + $0x18] sm:$0xff] }
  0x29   : > { %11201 = vmatpush3.bf16.msra.mxu1 %v12181_v20  ;;  %v1053_v60 = vld [vmem:[#allocation2] sm:$0xf]  ;;  %v477_v2 = vrot.slane %v475_v56, 7  ;;  %v16179_v12 = vsel %vm12698_vm13, 4294967295, %v16178_v12  ;;  %v16181_v17 = vmov 0  ;;  %v11017_v38 = vpack.c.bf16 %v346_v15, %v346_v15  ;;  %v12201_v53 = vld [vmem:[%s16153_s1 + $0x148] sm:$0xff]  }
  0x2a   : > { %11202 = vmatprep.subr.bf16.mxu1 %v12184_v23  ;;  %v1105_v0 = vshrl.u32 %v1053_v60, 16  ;;  %v1108_v1 = vshll.u32 %v1053_v60, 16  ;;  %v485_v3 = vrot.slane %v483_v58, 7  ;;  %16180 = vst [vmem:[#allocation9_spill] sm:$0xff] %v16179_v12  ;;  %v16182_v17 = vsel %vm12706_vm14, 4294967295, %v16181_v17  ;;  %v348_v34 = vld [vmem:[%s12668_s9 + $0x20] sm:$0xff] }
  0x2b   : > { %11091 = vmatpush3.bf16.msra.mxu0 %v12183_v22  ;;  %v1055_v63 = vld [vmem:[#allocation2 + $0x8] sm:$0x1]  ;;  %v480_v13 = vor.u32 %v478_v57, %v477_v2  ;;  %v481_v14 = vrot.slane %v477_v2, 4  ;;  %16183 = vst [vmem:[#allocation10_spill] sm:$0xff] %v16182_v17  ;;  %v296_v22 = vld [vmem:[#allocation2 + $0x20] sm:$0x1]  ;;  %v11018_v39 = vpack.c.bf16 %v347_v16, %v347_v16  ;;  %v11019_v47 = vpack.c.bf16 %v348_v34, %v348_v34 }
  0x2c   : > { %11092 = vmatprep.subr.bf16.mxu0 %v12186_v25  ;;  %v1124_v6 = vshll.u32 %v1055_v63, 16  ;;  %v1570_v7 = vld [vmem:[#allocation2 + $0x8] sm:$0x1]  ;;  %v1107_v10 = vrot.slane %v1105_v0, 4  ;;  %v1110_v11 = vrot.slane %v1108_v1, 5  ;;  %v488_v19 = vor.u32 %v486_v61, %v485_v3  ;;  %v12194_v41 = vld [vmem:[#allocation2] sm:$0xff]  }
  0x2d   : > { %11203 = vmatpush3.bf16.msra.mxu1 %v12185_v24  ;;  %v490_v20 = vrot.slane %v485_v3, 4  ;;  %v797_v21 = vld [vmem:[#allocation2 + $0xc] sm:$0xf]  ;;  %v801_v25 = vld [vmem:[#allocation2 + $0x14] sm:$0x1]  ;;  %v12197_v43 = vld [vmem:[%s16153_s1 + $0x100] sm:$0xff]  }
  0x2e   : > { %11204 = vmatprep.subr.bf16.mxu1 %v12188_v27  ;;  %v1126_v18 = vrot.slane %v1124_v6, 5  ;;  %v1111_v23 = vor.u32 %v1110_v11, %v1107_v10  ;;  %v798_v24 = vsel %vm12692_vm12, %v480_v13, %v797_v21  ;;  %v1672_v27 = vrot.slane %v1570_v7, 5  ;;  %v243_v32 = vld [vmem:[#allocation2 + $0x24] sm:$0x1]  ;;  %v299_v48 = vld [vmem:[#allocation2 + $0x2c] sm:$0x1] }
  0x2f   : > { %11093 = vmatpush3.bf16.msra.mxu0 %v12187_v26  ;;  %v1671_v26 = vrot.slane %v1669_v8, 4  ;;  %799 = vst [vmem:[#allocation2 + $0xc] sm:$0xf] %v798_v24  ;;  %v297_v45 = vsel %vm12656_vm4, 0, %v296_v22  ;;  %v244_v46 = vsel %vm12649_vm3, 0, %v243_v32  ;;  %v492_v50 = vshrl.u32 %v11017_v38, 16 }
  0x30   : > { %11094 = vmatprep.subr.bf16.mxu0 %v12190_v29  ;;  %v802_v29 = vsel %vm12649_vm3, %v490_v20, %v801_v25  ;;  %v1112_v35 = vrot.slane %v1111_v23, 4  ;;  %v1127_v36 = vsel %vm12706_vm14, %v12682_v55, %v1126_v18  ;;  %v495_v51 = vshll.u32 %v11017_v38, 16  ;;  %298 = vst [vmem:[#allocation2 + $0x20] sm:$0x1] %v297_v45  ;;  %245 = vst [vmem:[#allocation2 + $0x24] sm:$0x1] %v244_v46 }
  0x31   : > { %11205 = vmatpush3.bf16.msra.mxu1 %v12189_v28  ;;  %v489_v28 = vsel %vm12698_vm13, %v481_v14, %v488_v19  ;;  %803 = vst [vmem:[#allocation2 + $0x14] sm:$0x1] %v802_v29  ;;  %v500_v52 = vshrl.u32 %v11018_v39, 16  ;;  %v246_v54 = vld [vmem:[#allocation2 + $0x30] sm:$0x1]  ;;  %v503_v56 = vshll.u32 %v11018_v39, 16 }
  0x32   : > { %11206 = vmatprep.subr.bf16.mxu1 %v12192_v31  ;;  %v241_v31 = vsel %vm12649_vm3, 0, %v240_v9  ;;  %800 = vst [vmem:[#allocation2 + $0x10] sm:$0xf] %v489_v28  ;;  %v1117_v49 = vsel %vm12706_vm14, %v1112_v35, %v12670_v42  ;;  %v509_v58 = vshrl.u32 %v11019_v47, 16  ;;  %v350_v59 = vld [vmem:[%s12668_s9 + $0x30] sm:$0xff]  ;;  %v351_v60 = vld [vmem:[%s12668_s9 + $0x38] sm:$0xff] }
  0x33   : > { %11095 = vmatpush3.bf16.msra.mxu0 %v12191_v30  ;;  %v12718_v30 = vsel %vm12686_vm11, %v10479_v62, %v1669_v8  ;;  %242 = vst [vmem:[#allocation2 + $0x18] sm:$0x1] %v241_v31  ;;  %v10463_v55 = vcombine.low %v1117_v49, %v1127_v36  ;;  %v494_v61 = vrot.slane %v492_v50, 7  ;;  %v502_v62 = vrot.slane %v500_v52, 7  ;;  %v12203_v3 = vld [vmem:[%s16153_s1 + $0x108] sm:$0xff]   ;;  %v12207_v23 = vld [vmem:[%s16153_s1 + $0x150] sm:$0xff]  }
  0x34   : > { %11304 = vmatprep.subr.bf16.mxu0 %v12195_v44  ;;  %v1673_v44 = vsel %vm12686_vm11, %v1671_v26, %v1672_v27  ;;  %v512_v42 = vshll.u32 %v11019_v47, 16  ;;  %v300_v63 = vsel %vm12656_vm4, 0, %v299_v48  ;;  %v12748_v0 = vrot.slane %v509_v58, 7  ;;  %v302_v58 = vld [vmem:[#allocation2 + $0x38] sm:$0x1]  ;;  %s10346_s30 = sshll.u32 %s16010_s25, 4  ;;  %s16104_s30 = int_to_ptr.vmem [resolvable:$true] %s10346_s30 }
  0x35   : > { %11207 = vmatpush3.bf16.msra.mxu1 %v12193_v40  ;;  %v349_v40 = vld [vmem:[%s12668_s9 + $0x28] sm:$0xff]  ;;  %4507 = vmatprep.mubr.bf16.mxu0 %v10463_v55  ;;  %301 = vst [vmem:[#allocation2 + $0x2c] sm:$0x1] %v300_v63  ;;  %v247_v6 = vsel %vm12649_vm3, 0, %v246_v54  ;;  %v10495_v7 = vcombine.low %v12718_v30, %v1673_v44  ;;  %v497_v9 = vor.u32 %v495_v51, %v494_v61  ;;  %v498_v26 = vrot.slane %v494_v61, 4  ;;  %v12209_v63 = vld [vmem:[%s16153_s1 + $0x110] sm:$0xff]  }
  0x36   : > { %v12742_v57 = vpack.c.bf16 %v349_v40, %v349_v40  ;;  %4508 = vmatmul.mubr.bf16.vlgmr.msra.gmra.mrb[0].mxu0 %v12194_v41  ;;  %v1056_v8 = vld [vmem:[#allocation2 + $0xc] sm:$0xf]  ;;  %248 = vst [vmem:[#allocation2 + $0x30] sm:$0x1] %v247_v6  ;;  %v505_v14 = vor.u32 %v503_v56, %v502_v62  ;;  %v12758_v15 = vpack.c.bf16 %v350_v59, %v350_v59  ;;  %v507_v27 = vrot.slane %v502_v62, 4  ;;  %s16111_s22 = scalar_lea.sflag [#allocation5], %s215_s17 }
  0x37   : > { %11305 = vmatpush3.bf16.msra.mxu0 %v12197_v43  ;;  %v1129_v13 = vshrl.u32 %v1056_v8, 16  ;;  %v12760_v16 = vpack.c.bf16 %v351_v60, %v351_v60  ;;  %v1132_v19 = vshll.u32 %v1056_v8, 16  ;;  %v514_v22 = vor.u32 %v512_v42, %v12748_v0  ;;  %v1571_v38 = vld [vmem:[#allocation2 + $0xc] sm:$0xe]  ;;  %v808_v47 = vld [vmem:[#allocation2 + $0x20] sm:$0x1] }
  0x38   : > { %v517_v1 = vshrl.u32 %v12742_v57, 16  ;;  %v520_v2 = vshll.u32 %v12742_v57, 16  ;;  %v1058_v18 = vld [vmem:[#allocation2 + $0x14] sm:$0x1]  ;;  %11306 = vmatprep.subr.bf16.mxu0 %v12201_v53  ;;  %v515_v32 = vrot.slane %v12748_v0, 4  ;;  %v506_v35 = vsel %vm12698_vm13, %v498_v26, %v505_v14  ;;  %s12469_s10 = smov [#allocation4]  }
  0x39   : > { %v12196_v10 = vld [vmem:[#allocation2 + $0xc] sm:$0xff]   ;;  %v1131_v24 = vrot.slane %v1129_v13, 4  ;;  %v1148_v25 = vshll.u32 %v1058_v18, 16  ;;  %v1134_v28 = vrot.slane %v1132_v19, 5  ;;  %807 = vst [vmem:[#allocation2 + $0x1c] sm:$0xf] %v506_v35  ;;  %v809_v49 = vsel %vm12649_vm3, %v507_v27, %v808_v47 }
  0x3a   : > { %v1057_v11 = vld [vmem:[#allocation2 + $0x10] sm:$0xf]  ;;  %4668 = vmatprep.mubr.bf16.mxu1 %v12196_v10  ;;  %v804_v31 = vld [vmem:[#allocation2 + $0x18] sm:$0xf]  ;;  %v519_v40 = vrot.slane %v517_v1, 7  ;;  %v10480_v45 = vrot.slane %v1571_v38, 9 }
  0x3b   : > { %v1138_v20 = vshll.u32 %v1057_v11, 16  ;;  %v1142_v21 = vshrl.u32 %v1057_v11, 16  ;;  %4669 = vmatmul.mubr.bf16.vlgmr.msra.gmra.mrb[0].mxu1 %v10495_v7  ;;  %v1150_v34 = vrot.slane %v1148_v25, 5  ;;  %v805_v36 = vsel %vm12692_vm12, %v497_v9, %v804_v31  ;;  %v1572_v39 = vld [vmem:[#allocation2 + $0x10] sm:$0xf]  ;;  %11307 = vmatpush3.bf16.msra.mxu0 %v12203_v3  ;;  %v12213_v9 = vld [vmem:[%s16153_s1 + $0x158] sm:$0xff]  }
  0x3c   : > { %v1135_v41 = vor.u32 %v1134_v28, %v1131_v24  ;;  %806 = vst [vmem:[#allocation2 + $0x18] sm:$0xf] %v805_v36  ;;  %v1573_v44 = vld [vmem:[#allocation2 + $0x14] sm:$0x1]  ;;  %v1676_v46 = vrot.slane %v1572_v39, 5  ;;  %11308 = vmatprep.subr.bf16.mxu0 %v12207_v23  ;;  %v522_v50 = vor.u32 %v520_v2, %v519_v40  ;;  %v524_v51 = vrot.slane %v519_v40, 4 }
  0x3d   : > { %v1140_v29 = vrot.slane %v1138_v20, 5  ;;  %v1144_v30 = vrot.slane %v1142_v21, 4  ;;  %v1679_v48 = vrot.slane %v1573_v44, 5  ;;  %v811_v52 = vld [vmem:[#allocation2 + $0x24] sm:$0xf]  ;;  %v526_v62 = vshrl.u32 %v12758_v15, 16 }
  0x3e   : > { %v815_v53 = vld [vmem:[#allocation2 + $0x2c] sm:$0x1]  ;;  %v1136_v54 = vrot.slane %v1135_v41, 4  ;;  %v1677_v56 = vsel %vm12686_vm11, %v10480_v45, %v1676_v46  ;;  %v1678_v57 = vrot.slane %v1676_v46, 4  ;;  %810 = vst [vmem:[#allocation2 + $0x20] sm:$0x1] %v809_v49  ;;  %v523_v59 = vsel %vm12698_vm13, %v515_v32, %v522_v50 }
  0x3f   : > { %v1145_v43 = vor.u32 %v1144_v30, %v1140_v29  ;;  %v812_v60 = vsel %vm12692_vm12, %v514_v22, %v811_v52  ;;  %v816_v61 = vsel %vm12649_vm3, %v524_v51, %v815_v53  ;;  %v249_v42 = vld [vmem:[#allocation2 + $0x3c] sm:$0x1]  ;;  %v12198_v2 = vld [vmem:[#allocation2 + $0xc] sm:$0xff]   ;;  %814 = vst [vmem:[#allocation2 + $0x28] sm:$0xf] %v523_v59  ;;  %v529_v6 = vshll.u32 %v12758_v15, 16  ;;  %11309 = vmatpush3.bf16.msra.mxu0 %v12209_v63 }
  0x40   : > { %v1141_v0 = vsel %vm12706_vm14, %v1136_v54, %v1140_v29  ;;  %v1680_v3 = vsel %vm12686_vm11, %v1678_v57, %v1679_v48  ;;  %813 = vst [vmem:[#allocation2 + $0x24] sm:$0xf] %v812_v60  ;;  %817 = vst [vmem:[#allocation2 + $0x2c] sm:$0x1] %v816_v61  ;;  %v12792_v8 = vrot.slane %v526_v62, 7  ;;  %v534_v11 = vshrl.u32 %v12760_v16, 16  ;;  %11310 = vmatprep.subr.bf16.mxu0 %v12213_v9 }
  0x41   : > { %v1146_v55 = vrot.slane %v1145_v43, 4  ;;  %v10496_v10 = vcombine.low %v1677_v56, %v1680_v3  ;;  %v818_v13 = vld [vmem:[#allocation2 + $0x30] sm:$0xf]  ;;  %v303_v14 = vsel %vm12656_vm4, 0, %v302_v58  ;;  %v250_v18 = vsel %vm12649_vm3, 0, %v249_v42  ;;  %v352_v28 = vld [vmem:[%s12668_s9 + $0x40] sm:$0xff] }
  0x42   : > { %v531_v19 = vor.u32 %v529_v6, %v12792_v8  ;;  %v537_v20 = vshll.u32 %v12760_v16, 16  ;;  %304 = vst [vmem:[#allocation2 + $0x38] sm:$0x1] %v303_v14  ;;  %251 = vst [vmem:[#allocation2 + $0x3c] sm:$0x1] %v250_v18  ;;  %v353_v29 = vld [vmem:[%s12668_s9 + $0x48] sm:$0xff]  ;;  %v12809_v54 = vpack.c.bf16 %v352_v28, %v352_v28 }
  0x43   : > { %v1151_v1 = vsel %vm12706_vm14, %v1146_v55, %v1150_v34  ;;  %v12199_v15 = vld [vmem:[#allocation2 + $0x18] sm:$0xff]   ;;  %v532_v32 = vrot.slane %v12792_v8, 4  ;;  %v12811_v55 = vpack.c.bf16 %v353_v29, %v353_v29  ;;  %v354_v60 = vld [vmem:[%s12668_s9 + $0x50] sm:$0xff]  ;;  %s12408_s11 = sshll.u32 %s12469_s10, 4  ;;  %s12409_s11 = int_to_ptr.vmem [resolvable:$false] %s12408_s11 }
  0x44   : > { %v10464_v7 = vcombine.low %v1141_v0, %v1151_v1  ;;  %v1059_v21 = vld [vmem:[#allocation2 + $0x18] sm:$0xf]  ;;  %v1060_v22 = vld [vmem:[#allocation2 + $0x1c] sm:$0xf]  ;;  %4676 = vmatprep.mubr.bf16.mxu1 %v12199_v15  ;;  %v819_v34 = vsel %vm12692_vm12, %v531_v19, %v818_v13  ;;  %v12824_v29 = vpack.c.bf16 %v354_v60, %v354_v60  ;;  %s12410_s12 = scalar_lea.vmem %s12409_s11, 8192  ;;  %p12411_p0 = scmp.lt.s32.totalorder %s16104_s30, %s12409_s11 }
  0x45   : > { %v1061_v23 = vld [vmem:[#allocation2 + $0x20] sm:$0x1]  ;;  %v1153_v24 = vshrl.u32 %v1059_v21, 16  ;;  %v1156_v25 = vshll.u32 %v1059_v21, 16  ;;  %v1162_v26 = vshll.u32 %v1060_v22, 16  ;;  %v1166_v27 = vshrl.u32 %v1060_v22, 16  ;;  %4677 = vmatmul.mubr.bf16.gmra.mrb[4].mxu1 %v10496_v10 }
  0x46   : > { %4515 = vmatprep.mubr.bf16.mxu0 %v10464_v7  ;;  %v1172_v30 = vshll.u32 %v1061_v23, 16  ;;  %v1574_v31 = vld [vmem:[#allocation2 + $0x18] sm:$0xe]  ;;  %820 = vst [vmem:[#allocation2 + $0x30] sm:$0xf] %v819_v34  ;;  %v536_v22 = vrot.slane %v534_v11, 7 }
  0x47   : > { %4516 = vmatmul.mubr.bf16.gmra.mrb[4].mxu0 %v12198_v2  ;;  %v1155_v35 = vrot.slane %v1153_v24, 4  ;;  %v1158_v36 = vrot.slane %v1156_v25, 5  ;;  %v1164_v38 = vrot.slane %v1162_v26, 5  ;;  %v1168_v39 = vrot.slane %v1166_v27, 4  ;;  %v12202_v41 = vld [vmem:[#allocation2 + $0x24] sm:$0xff]   ;;  %v12200_v2 = vld [vmem:[#allocation2 + $0x18] sm:$0xff]  }
  0x48   : > { %v1174_v40 = vrot.slane %v1172_v30, 5  ;;  %v1575_v43 = vld [vmem:[#allocation2 + $0x1c] sm:$0xf]  ;;  %v1576_v46 = vld [vmem:[#allocation2 + $0x20] sm:$0x1]  ;;  %v10481_v47 = vrot.slane %v1574_v31, 9  ;;  %4684 = vmatprep.mubr.bf16.mxu1 %v12202_v41  ;;  %v539_v31 = vor.u32 %v537_v20, %v536_v22 }
  0x49   : > { %v1159_v44 = vor.u32 %v1158_v36, %v1155_v35  ;;  %v1169_v45 = vor.u32 %v1168_v39, %v1164_v38  ;;  %v1683_v48 = vrot.slane %v1575_v43, 5  ;;  %v1062_v49 = vld [vmem:[#allocation2 + $0x24] sm:$0xf]  ;;  %v1686_v50 = vrot.slane %v1576_v46, 5  ;;  %v1063_v51 = vld [vmem:[#allocation2 + $0x28] sm:$0xf] }
  0x4a   : > { %v1064_v52 = vld [vmem:[#allocation2 + $0x2c] sm:$0x1]  ;;  %v1177_v53 = vshrl.u32 %v1062_v49, 16  ;;  %v1180_v62 = vshll.u32 %v1062_v49, 16  ;;  %v1186_v42 = vshll.u32 %v1063_v51, 16  ;;  %v1190_v63 = vshrl.u32 %v1063_v51, 16 }
  0x4b   : > { %v1160_v56 = vrot.slane %v1159_v44, 4  ;;  %v1170_v57 = vrot.slane %v1169_v45, 4  ;;  %v1684_v58 = vsel %vm12686_vm11, %v10481_v47, %v1683_v48  ;;  %v1685_v59 = vrot.slane %v1683_v48, 4  ;;  %v1577_v7 = vld [vmem:[#allocation2 + $0x24] sm:$0xe]  ;;  %v355_v36 = vld [vmem:[%s12668_s9 + $0x58] sm:$0xff] }
  0x4c   : > { %v1179_v61 = vrot.slane %v1177_v53, 4  ;;  %v1196_v6 = vshll.u32 %v1064_v52, 16  ;;  %v1578_v9 = vld [vmem:[#allocation2 + $0x28] sm:$0xf]  ;;  %v1182_v14 = vrot.slane %v1180_v62, 5  ;;  %v1188_v18 = vrot.slane %v1186_v42, 5 }
  0x4d   : > { %v1165_v0 = vsel %vm12706_vm14, %v1160_v56, %v1164_v38  ;;  %v1175_v1 = vsel %vm12706_vm14, %v1170_v57, %v1174_v40  ;;  %v1687_v3 = vsel %vm12686_vm11, %v1685_v59, %v1686_v50  ;;  %v1579_v15 = vld [vmem:[#allocation2 + $0x2c] sm:$0x1]  ;;  %v1192_v19 = vrot.slane %v1190_v63, 4  ;;  %v822_v24 = vld [vmem:[#allocation2 + $0x38] sm:$0x1] }
  0x4e   : > { %v10465_v10 = vcombine.low %v1165_v0, %v1175_v1  ;;  %v10497_v13 = vcombine.low %v1684_v58, %v1687_v3  ;;  %v1198_v21 = vrot.slane %v1196_v6, 5  ;;  %v10482_v23 = vrot.slane %v1577_v7, 9  ;;  %v1065_v28 = vld [vmem:[#allocation2 + $0x30] sm:$0xf]  ;;  %v305_v41 = vld [vmem:[#allocation2 + $0x44] sm:$0x1] }
  0x4f   : > { %v1183_v25 = vor.u32 %v1182_v14, %v1179_v61  ;;  %v1690_v26 = vrot.slane %v1578_v9, 5  ;;  %v1693_v27 = vrot.slane %v1579_v15, 5  ;;  %v1193_v30 = vor.u32 %v1192_v19, %v1188_v18  ;;  %v12215_v43 = vld [vmem:[%s16153_s1 + $0x118] sm:$0xff]   ;;  %v252_v46 = vld [vmem:[#allocation2 + $0x48] sm:$0x1]  ;;  %v12219_v6 = vld [vmem:[%s16153_s1 + $0x160] sm:$0xff]  }
  0x50   : > { %4523 = vmatprep.mubr.bf16.mxu0 %v10465_v10  ;;  %4685 = vmatmul.mubr.bf16.gmra.mrb[8].mxu1 %v10497_v13  ;;  %v541_v34 = vrot.slane %v536_v22, 4  ;;  %v1201_v35 = vshrl.u32 %v1065_v28, 16  ;;  %v1204_v40 = vshll.u32 %v1065_v28, 16  ;;  %v540_v16 = vsel %vm12698_vm13, %v532_v32, %v539_v31  ;;  %v12204_v32 = vld [vmem:[#allocation2 + $0x24] sm:$0xff]   ;;  %v1580_v53 = vld [vmem:[#allocation2 + $0x30] sm:$0xe] }
  0x51   : > { %4524 = vmatmul.mubr.bf16.gmra.mrb[8].mxu0 %v12200_v2  ;;  %v1184_v38 = vrot.slane %v1183_v25, 4  ;;  %v12831_v11 = vsel %vm12686_vm11, %v10482_v23, %v1690_v26  ;;  %v1692_v39 = vrot.slane %v1690_v26, 4  ;;  %v1194_v44 = vrot.slane %v1193_v30, 4  ;;  %821 = vst [vmem:[#allocation2 + $0x34] sm:$0xf] %v540_v16  ;;  %v356_v14 = vld [vmem:[%s12668_s9 + $0x60] sm:$0xff] }
  0x52   : > { %v823_v20 = vsel %vm12649_vm3, %v541_v34, %v822_v24  ;;  %v1203_v45 = vrot.slane %v1201_v35, 4  ;;  %v1206_v49 = vrot.slane %v1204_v40, 5  ;;  %v543_v50 = vshrl.u32 %v12809_v54, 16  ;;  %11311 = vmatpush3.bf16.msra.mxu0 %v12215_v43  ;;  %v825_v61 = vld [vmem:[#allocation2 + $0x3c] sm:$0xf] }
  0x53   : > { %v1189_v47 = vsel %vm12706_vm14, %v1184_v38, %v1188_v18  ;;  %v1694_v48 = vsel %vm12686_vm11, %v1692_v39, %v1693_v27  ;;  %824 = vst [vmem:[#allocation2 + $0x38] sm:$0x1] %v823_v20  ;;  %v1199_v8 = vsel %vm12706_vm14, %v1194_v44, %v1198_v21  ;;  %v546_v51 = vshll.u32 %v12809_v54, 16  ;;  %v308_v62 = vld [vmem:[#allocation2 + $0x50] sm:$0x1]  ;;  %11312 = vmatprep.subr.bf16.mxu0 %v12219_v6 }
  0x54   : > { %v551_v52 = vshrl.u32 %v12811_v55, 16  ;;  %v11026_v56 = vpack.c.bf16 %v355_v36, %v355_v36  ;;  %v10466_v57 = vcombine.low %v1189_v47, %v1199_v8  ;;  %v1207_v58 = vor.u32 %v1206_v49, %v1203_v45  ;;  %v255_v22 = vld [vmem:[#allocation2 + $0x54] sm:$0x1]  ;;  %v357_v8 = vld [vmem:[%s12668_s9 + $0x68] sm:$0xff] }
  0x55   : > { %v545_v59 = vrot.slane %v543_v50, 7  ;;  %v554_v60 = vshll.u32 %v12811_v55, 16  ;;  %v10498_v42 = vcombine.low %v12831_v11, %v1694_v48  ;;  %v306_v0 = vsel %vm12656_vm4, 0, %v305_v41 }
  0x56   : > { %v553_v63 = vrot.slane %v551_v52, 7  ;;  %v253_v54 = vsel %vm12649_vm3, 0, %v252_v46  ;;  %4531 = vmatprep.mubr.bf16.mxu0 %v10466_v57  ;;  %v10483_v3 = vrot.slane %v1580_v53, 9  ;;  %307 = vst [vmem:[#allocation2 + $0x44] sm:$0x1] %v306_v0  ;;  %v560_v55 = vshrl.u32 %v12824_v29, 16 }
  0x57   : > { %v548_v1 = vor.u32 %v546_v51, %v545_v59  ;;  %v549_v2 = vrot.slane %v545_v59, 4  ;;  %254 = vst [vmem:[#allocation2 + $0x48] sm:$0x1] %v253_v54  ;;  %v12861_v7 = vrot.slane %v1207_v58, 4  ;;  %v563_v10 = vshll.u32 %v12824_v29, 16 }
  0x58   : > { %v556_v9 = vor.u32 %v554_v60, %v553_v63  ;;  %v568_v13 = vshrl.u32 %v11026_v56, 16  ;;  %v562_v15 = vrot.slane %v560_v55, 7  ;;  %v571_v19 = vshll.u32 %v11026_v56, 16  ;;  %v12205_v23 = vld [vmem:[#allocation2 + $0x30] sm:$0xff]  }
  0x59   : > { %4532 = vmatmul.mubr.bf16.gmra.mrb[12].mxu0 %v12204_v32  ;;  %v826_v18 = vsel %vm12692_vm12, %v548_v1, %v825_v61  ;;  %v309_v21 = vsel %vm12656_vm4, 0, %v308_v62  ;;  %v1066_v24 = vld [vmem:[#allocation2 + $0x34] sm:$0xf]  ;;  %v12873_v30 = vpack.c.bf16 %v356_v14, %v356_v14  ;;  %4692 = vmatprep.mubr.bf16.mxu1 %v12205_v23  ;;  %v558_v34 = vrot.slane %v553_v63, 4  ;;  %v12221_v32 = vld [vmem:[%s16153_s1 + $0x120] sm:$0xff]  }
  0x5a   : > { %v557_v25 = vsel %vm12698_vm13, %v549_v2, %v556_v9  ;;  %827 = vst [vmem:[#allocation2 + $0x3c] sm:$0xf] %v826_v18  ;;  %v12871_v26 = vrot.slane %v568_v13, 7  ;;  %310 = vst [vmem:[#allocation2 + $0x50] sm:$0x1] %v309_v21  ;;  %v1210_v28 = vshll.u32 %v1066_v24, 16  ;;  %v565_v38 = vor.u32 %v563_v10, %v562_v15  ;;  %4693 = vmatmul.mubr.bf16.gmra.mrb[12].mxu1 %v10498_v42 }
  0x5b   : > { %v1067_v27 = vld [vmem:[#allocation2 + $0x38] sm:$0x1]  ;;  %v1214_v29 = vshrl.u32 %v1066_v24, 16  ;;  %828 = vst [vmem:[#allocation2 + $0x40] sm:$0xf] %v557_v25  ;;  %v566_v20 = vrot.slane %v562_v15, 4  ;;  %11313 = vmatpush3.bf16.msra.mxu0 %v12221_v32  ;;  %v12898_v54 = vpack.c.bf16 %v357_v8, %v357_v8 }
  0x5c   : > { %v1220_v31 = vshll.u32 %v1067_v27, 16  ;;  %v1581_v35 = vld [vmem:[#allocation2 + $0x34] sm:$0xf]  ;;  %v1582_v36 = vld [vmem:[#allocation2 + $0x38] sm:$0x1]  ;;  %v573_v11 = vor.u32 %v571_v19, %v12871_v26  ;;  %v1212_v39 = vrot.slane %v1210_v28, 5 }
  0x5d   : > { %v1216_v40 = vrot.slane %v1214_v29, 4  ;;  %v1697_v41 = vrot.slane %v1581_v35, 5  ;;  %v1700_v43 = vrot.slane %v1582_v36, 5  ;;  %v829_v16 = vld [vmem:[#allocation2 + $0x44] sm:$0x1]  ;;  %v256_v45 = vsel %vm12649_vm3, 0, %v255_v22 }
  0x5e   : > { %v1222_v44 = vrot.slane %v1220_v31, 5  ;;  %v575_v49 = vrot.slane %v12871_v26, 4  ;;  %v832_v50 = vld [vmem:[#allocation2 + $0x48] sm:$0xf]  ;;  %257 = vst [vmem:[#allocation2 + $0x54] sm:$0x1] %v256_v45  ;;  %v830_v51 = vsel %vm12649_vm3, %v558_v34, %v829_v16  ;;  %v574_v52 = vsel %vm12698_vm13, %v566_v20, %v573_v11 }
  0x5f   : > { %v1217_v46 = vor.u32 %v1216_v40, %v1212_v39  ;;  %v1698_v47 = vsel %vm12686_vm11, %v10483_v3, %v1697_v41  ;;  %v1699_v48 = vrot.slane %v1697_v41, 4  ;;  %v833_v53 = vsel %vm12692_vm12, %v565_v38, %v832_v50  ;;  %831 = vst [vmem:[#allocation2 + $0x44] sm:$0x1] %v830_v51  ;;  %835 = vst [vmem:[#allocation2 + $0x4c] sm:$0xf] %v574_v52  ;;  %v12206_v2 = vld [vmem:[#allocation2 + $0x30] sm:$0xff]  }
  0x60   : > { %v577_v56 = vshrl.u32 %v12873_v30, 16  ;;  %v1213_v57 = vsel %vm12706_vm14, %v12861_v7, %v1212_v39  ;;  %834 = vst [vmem:[#allocation2 + $0x48] sm:$0xf] %v833_v53  ;;  %v580_v61 = vshll.u32 %v12873_v30, 16  ;;  %v585_v26 = vshrl.u32 %v12898_v54, 16  ;;  %v12225_v27 = vld [vmem:[%s16153_s1 + $0x168] sm:$0xff]  }
  0x61   : > { %v1218_v58 = vrot.slane %v1217_v46, 4  ;;  %v1701_v59 = vsel %vm12686_vm11, %v1699_v48, %v1700_v43  ;;  %v1068_v60 = vld [vmem:[#allocation2 + $0x3c] sm:$0xf]  ;;  %v836_v23 = vld [vmem:[#allocation2 + $0x50] sm:$0x1]  ;;  %v588_v31 = vshll.u32 %v12898_v54, 16  ;;  %11314 = vmatprep.subr.bf16.mxu0 %v12225_v27 }
  0x62   : > { %v12208_v62 = vld [vmem:[#allocation2 + $0x3c] sm:$0xff]   ;;  %v10499_v42 = vcombine.low %v1698_v47, %v1701_v59  ;;  %v1225_v0 = vshrl.u32 %v1068_v60, 16  ;;  %v1228_v3 = vshll.u32 %v1068_v60, 16  ;;  %v12902_v13 = vrot.slane %v577_v56, 7  ;;  %v358_v35 = vld [vmem:[%s12668_s9 + $0x70] sm:$0xff] }
  0x63   : > { %v1069_v63 = vld [vmem:[#allocation2 + $0x40] sm:$0xf]  ;;  %v1223_v1 = vsel %vm12706_vm14, %v1218_v58, %v1222_v44  ;;  %4700 = vmatprep.mubr.bf16.mxu1 %v12208_v62  ;;  %v1583_v10 = vld [vmem:[#allocation2 + $0x3c] sm:$0xe]  ;;  %v837_v30 = vsel %vm12649_vm3, %v575_v49, %v836_v23  ;;  %v12919_v48 = vpack.c.bf16 %v358_v35, %v358_v35  ;;  %v12926_v58 = vrot.slane %v585_v26, 7 }
  0x64   : > { %v1234_v55 = vshll.u32 %v1069_v63, 16  ;;  %v1238_v6 = vshrl.u32 %v1069_v63, 16  ;;  %v10467_v7 = vcombine.low %v1213_v57, %v1223_v1  ;;  %v1227_v9 = vrot.slane %v1225_v0, 4  ;;  %4701 = vmatmul.mubr.bf16.gmra.mrb[16].mxu1 %v10499_v42  ;;  %v1584_v19 = vld [vmem:[#allocation2 + $0x40] sm:$0xf]  ;;  %v359_v47 = vld [vmem:[%s12668_s9 + $0x78] sm:$0xff] }
  0x65   : > { %v1230_v14 = vrot.slane %v1228_v3, 5  ;;  %v10484_v21 = vrot.slane %v1583_v10, 9  ;;  %v1704_v22 = vrot.slane %v1584_v19, 5  ;;  %v582_v24 = vor.u32 %v580_v61, %v12902_v13  ;;  %v839_v34 = vld [vmem:[#allocation2 + $0x54] sm:$0xf]  ;;  %v360_v51 = vld [vmem:[%s12668_s9 + $0x80] sm:$0xff] }
  0x66   : > { %v1236_v18 = vrot.slane %v1234_v55, 5  ;;  %v1240_v15 = vrot.slane %v1238_v6, 4  ;;  %4539 = vmatprep.mubr.bf16.mxu0 %v10467_v7  ;;  %v583_v25 = vrot.slane %v12902_v13, 4  ;;  %v1070_v36 = vld [vmem:[#allocation2 + $0x44] sm:$0x1]  ;;  %v12210_v52 = vld [vmem:[#allocation2 + $0x3c] sm:$0xff]   ;;  %v590_v3 = vor.u32 %v588_v31, %v12926_v58 }
  0x67   : > { %4540 = vmatmul.mubr.bf16.gmra.mrb[16].mxu0 %v12206_v2  ;;  %v1231_v28 = vor.u32 %v1230_v14, %v1227_v9  ;;  %838 = vst [vmem:[#allocation2 + $0x50] sm:$0x1] %v837_v30  ;;  %v840_v38 = vsel %vm12692_vm12, %v582_v24, %v839_v34  ;;  %v1244_v40 = vshll.u32 %v1070_v36, 16  ;;  %v12211_v41 = vld [vmem:[#allocation2 + $0x48] sm:$0xff]   ;;  %v1585_v43 = vld [vmem:[#allocation2 + $0x44] sm:$0x1]  ;;  %v1705_v44 = vsel %vm12686_vm11, %v10484_v21, %v1704_v22 }
  0x68   : > { %v1241_v29 = vor.u32 %v1240_v15, %v1236_v18  ;;  %841 = vst [vmem:[#allocation2 + $0x54] sm:$0xf] %v840_v38  ;;  %v1706_v16 = vrot.slane %v1704_v22, 4  ;;  %v1707_v20 = vrot.slane %v1585_v43, 5  ;;  %v1071_v45 = vld [vmem:[#allocation2 + $0x48] sm:$0xf]  ;;  %4708 = vmatprep.mubr.bf16.mxu1 %v12211_v41  ;;  %v12931_v13 = vpack.c.bf16 %v359_v47, %v359_v47 }
  0x69   : > { %v1232_v11 = vrot.slane %v1231_v28, 4  ;;  %v1072_v46 = vld [vmem:[#allocation2 + $0x4c] sm:$0xf]  ;;  %v1246_v50 = vrot.slane %v1244_v40, 5  ;;  %v1249_v8 = vshrl.u32 %v1071_v45, 16  ;;  %v1252_v32 = vshll.u32 %v1071_v45, 16 }
  0x6a   : > { %v1242_v39 = vrot.slane %v1241_v29, 4  ;;  %v1708_v53 = vsel %vm12686_vm11, %v1706_v16, %v1707_v20  ;;  %v1258_v56 = vshll.u32 %v1072_v46, 16  ;;  %v1262_v57 = vshrl.u32 %v1072_v46, 16  ;;  %v311_v59 = vld [vmem:[#allocation2 + $0x5c] sm:$0x1]  ;;  %v361_v14 = vld [vmem:[%s12668_s9 + $0x88] sm:$0xff] }
  0x6b   : > { %v1237_v49 = vsel %vm12706_vm14, %v1232_v11, %v1236_v18  ;;  %v10500_v61 = vcombine.low %v1705_v44, %v1708_v53  ;;  %v1251_v62 = vrot.slane %v1249_v8, 4  ;;  %v1254_v42 = vrot.slane %v1252_v32, 5  ;;  %v1586_v63 = vld [vmem:[#allocation2 + $0x48] sm:$0xe]  ;;  %v1587_v0 = vld [vmem:[#allocation2 + $0x4c] sm:$0xf] }
  0x6c   : > { %v1247_v60 = vsel %vm12706_vm14, %v1242_v39, %v1246_v50  ;;  %v1260_v1 = vrot.slane %v1258_v56, 5  ;;  %v1264_v2 = vrot.slane %v1262_v57, 4  ;;  %v258_v55 = vld [vmem:[#allocation2 + $0x60] sm:$0x1]  ;;  %v10485_v10 = vrot.slane %v1586_v63, 9  ;;  %v12212_v45 = vld [vmem:[#allocation2 + $0x48] sm:$0xff]  }
  0x6d   : > { %v10468_v54 = vcombine.low %v1237_v49, %v1247_v60  ;;  %4709 = vmatmul.mubr.bf16.gmra.mrb[20].mxu1 %v10500_v61  ;;  %v1255_v7 = vor.u32 %v1254_v42, %v1251_v62  ;;  %v12934_v18 = vpack.c.bf16 %v360_v51, %v360_v51  ;;  %v591_v21 = vsel %vm12698_vm13, %v583_v25, %v590_v3  ;;  %v12227_v25 = vld [vmem:[%s16153_s1 + $0x128] sm:$0xff]   ;;  %v362_v50 = vld [vmem:[%s12668_s9 + $0x90] sm:$0xff]  ;;  %v363_v8 = vld [vmem:[%s12668_s9 + $0x98] sm:$0xff] }
  0x6e   : > { %v1073_v6 = vld [vmem:[#allocation2 + $0x50] sm:$0x1]  ;;  %v1265_v15 = vor.u32 %v1264_v2, %v1260_v1  ;;  %v1711_v22 = vrot.slane %v1587_v0, 5  ;;  %842 = vst [vmem:[#allocation2 + $0x58] sm:$0xf] %v591_v21  ;;  %v312_v27 = vsel %vm12656_vm4, 0, %v311_v59  ;;  %v12940_v34 = vpack.c.bf16 %v361_v14, %v361_v14  ;;  %11315 = vmatpush3.bf16.msra.mxu0 %v12227_v25 }
  0x6f   : > { %v1588_v9 = vld [vmem:[#allocation2 + $0x50] sm:$0x1]  ;;  %4547 = vmatprep.mubr.bf16.mxu0 %v10468_v54  ;;  %v1268_v19 = vshll.u32 %v1073_v6, 16  ;;  %v1074_v23 = vld [vmem:[#allocation2 + $0x54] sm:$0xf]  ;;  %v1256_v24 = vrot.slane %v1255_v7, 4  ;;  %v12971_v0 = vpack.c.bf16 %v362_v50, %v362_v50  ;;  %v12973_v54 = vpack.c.bf16 %v363_v8, %v363_v8 }
  0x70   : > { %4548 = vmatmul.mubr.bf16.gmra.mrb[20].mxu0 %v12210_v52  ;;  %v1714_v26 = vrot.slane %v1588_v9, 5  ;;  %v1273_v28 = vshrl.u32 %v1074_v23, 16  ;;  %v1266_v29 = vrot.slane %v1265_v15, 4  ;;  %v1713_v31 = vrot.slane %v1711_v22, 4  ;;  %313 = vst [vmem:[#allocation2 + $0x5c] sm:$0x1] %v312_v27 }
  0x71   : > { %v1270_v30 = vrot.slane %v1268_v19, 5  ;;  %v1261_v35 = vsel %vm12706_vm14, %v1256_v24, %v1260_v1  ;;  %v1712_v36 = vsel %vm12686_vm11, %v10485_v10, %v1711_v22  ;;  %v1276_v38 = vshll.u32 %v1074_v23, 16  ;;  %v314_v39 = vld [vmem:[#allocation2 + $0x68] sm:$0x1]  ;;  %v261_v40 = vld [vmem:[#allocation2 + $0x6c] sm:$0x1] }
  0x72   : > { %v259_v11 = vsel %vm12649_vm3, 0, %v258_v55  ;;  %v1715_v43 = vsel %vm12686_vm11, %v1713_v31, %v1714_v26  ;;  %v594_v44 = vshrl.u32 %v12919_v48, 16  ;;  %v597_v16 = vshll.u32 %v12919_v48, 16  ;;  %v12231_v48 = vld [vmem:[%s16153_s1 + $0x170] sm:$0xff]   ;;  %v264_v19 = vld [vmem:[#allocation2 + $0x78] sm:$0x1] }
  0x73   : > { %v1271_v41 = vsel %vm12706_vm14, %v1266_v29, %v1270_v30  ;;  %260 = vst [vmem:[#allocation2 + $0x60] sm:$0x1] %v259_v11  ;;  %v1275_v46 = vrot.slane %v1273_v28, 4  ;;  %v1278_v47 = vrot.slane %v1276_v38, 5  ;;  %v602_v49 = vshrl.u32 %v12931_v13, 16  ;;  %11316 = vmatprep.subr.bf16.mxu0 %v12231_v48 }
  0x74   : > { %v10469_v20 = vcombine.low %v1261_v35, %v1271_v41  ;;  %v592_v32 = vrot.slane %v12926_v58, 4  ;;  %v596_v51 = vrot.slane %v594_v44, 7  ;;  %v605_v52 = vshll.u32 %v12931_v13, 16  ;;  %v364_v58 = vld [vmem:[%s12668_s9 + $0xa0] sm:$0xff]  ;;  %v12975_v7 = vld [vmem:[#allocation2 + $0x54] sm:$0xe] }
  0x75   : > { %v315_v53 = vsel %vm12656_vm4, 0, %v314_v39  ;;  %v10501_v56 = vcombine.low %v1712_v36, %v1715_v43  ;;  %v604_v57 = vrot.slane %v602_v49, 7  ;;  %v262_v59 = vsel %vm12649_vm3, 0, %v261_v40  ;;  %v12214_v61 = vld [vmem:[#allocation2 + $0x54] sm:$0xff]   ;;  %v320_v25 = vld [vmem:[#allocation2 + $0x80] sm:$0x1] }
  0x76   : > { %4555 = vmatprep.mubr.bf16.mxu0 %v10469_v20  ;;  %316 = vst [vmem:[#allocation2 + $0x68] sm:$0x1] %v315_v53  ;;  %v611_v60 = vshrl.u32 %v12934_v18, 16  ;;  %v1075_v62 = vld [vmem:[#allocation2 + $0x58] sm:$0xf]  ;;  %v599_v42 = vor.u32 %v597_v16, %v596_v51  ;;  %v600_v63 = vrot.slane %v596_v51, 4  ;;  %v1279_v2 = vor.u32 %v1278_v47, %v1275_v46  ;;  %4716 = vmatprep.mubr.bf16.mxu1 %v12214_v61 }
  0x77   : > { %263 = vst [vmem:[#allocation2 + $0x6c] sm:$0x1] %v262_v59  ;;  %v843_v1 = vld [vmem:[#allocation2 + $0x5c] sm:$0x1]  ;;  %v1282_v3 = vshll.u32 %v1075_v62, 16  ;;  %v1286_v55 = vshrl.u32 %v1075_v62, 16  ;;  %v607_v6 = vor.u32 %v605_v52, %v604_v57  ;;  %v12979_v21 = vpack.c.bf16 %v364_v58, %v364_v58  ;;  %4717 = vmatmul.mubr.bf16.gmra.mrb[24].mxu1 %v10501_v56 }
  0x78   : > { %4556 = vmatmul.mubr.bf16.gmra.mrb[24].mxu0 %v12212_v45  ;;  %v317_v9 = vld [vmem:[#allocation2 + $0x74] sm:$0x1]  ;;  %v844_v10 = vsel %vm12649_vm3, %v592_v32, %v843_v1  ;;  %v609_v13 = vrot.slane %v604_v57, 4  ;;  %v1590_v14 = vld [vmem:[#allocation2 + $0x58] sm:$0xf]  ;;  %v613_v15 = vrot.slane %v611_v60, 7 }
  0x79   : > { %845 = vst [vmem:[#allocation2 + $0x5c] sm:$0x1] %v844_v10  ;;  %v12981_v22 = vrot.slane %v1282_v3, 5  ;;  %v1288_v23 = vrot.slane %v1286_v55, 4  ;;  %v608_v24 = vsel %vm12698_vm13, %v600_v63, %v607_v6  ;;  %v1718_v27 = vrot.slane %v1590_v14, 5  ;;  %v12233_v35 = vld [vmem:[%s16153_s1 + $0x130] sm:$0xff]  }
  0x7a   : > { %v846_v26 = vld [vmem:[#allocation2 + $0x60] sm:$0xf]  ;;  %849 = vst [vmem:[#allocation2 + $0x64] sm:$0xf] %v608_v24  ;;  %v10486_v29 = vrot.slane %v12975_v7, 9  ;;  %v614_v30 = vshll.u32 %v12934_v18, 16  ;;  %11317 = vmatpush3.bf16.msra.mxu0 %v12233_v35 }
  0x7b   : > { %v847_v28 = vsel %vm12692_vm12, %v599_v42, %v846_v26  ;;  %v619_v31 = vshrl.u32 %v12940_v34, 16  ;;  %v12993_v36 = vrot.slane %v1279_v2, 4  ;;  %v1289_v38 = vor.u32 %v1288_v23, %v12981_v22  ;;  %v267_v40 = vld [vmem:[#allocation2 + $0x84] sm:$0x1]  ;;  %v365_v3 = vld [vmem:[%s12668_s9 + $0xa8] sm:$0xff] }
  0x7c   : > { %848 = vst [vmem:[#allocation2 + $0x60] sm:$0xf] %v847_v28  ;;  %v1720_v11 = vrot.slane %v1718_v27, 4  ;;  %v617_v39 = vrot.slane %v613_v15, 4  ;;  %v12234_v41 = vld [vmem:[%s16153_s1 + $0x1c0] sm:$0xff]   ;;  %v616_v43 = vor.u32 %v614_v30, %v613_v15  ;;  %v622_v16 = vshll.u32 %v12940_v34, 16 }
  0x7d   : > { %v850_v18 = vld [vmem:[#allocation2 + $0x68] sm:$0x1]  ;;  %v12999_v44 = vrot.slane %v619_v31, 7  ;;  %v318_v20 = vsel %vm12656_vm4, 0, %v317_v9  ;;  %v12235_v45 = vld [vmem:[%s16153_s1 + $0x180] sm:$0xff]   ;;  %v1290_v46 = vrot.slane %v1289_v38, 4  ;;  %11416 = vmatprep.subr.bf16.mxu1 %v12234_v41  ;;  %v1285_v55 = vsel %vm12706_vm14, %v12993_v36, %v12981_v22 }
  0x7e   : > { %v851_v47 = vsel %vm12649_vm3, %v609_v13, %v850_v18  ;;  %v853_v49 = vld [vmem:[#allocation2 + $0x6c] sm:$0xf]  ;;  %319 = vst [vmem:[#allocation2 + $0x74] sm:$0x1] %v318_v20  ;;  %v265_v50 = vsel %vm12649_vm3, 0, %v264_v19  ;;  %v628_v8 = vshrl.u32 %v12971_v0, 16  ;;  %11417 = vmatpush3.bf16.msra.mxu1 %v12235_v45 }
  0x7f   : > { %v12236_v34 = vld [vmem:[%s16153_s1 + $0x1c8] sm:$0xff]   ;;  %852 = vst [vmem:[#allocation2 + $0x68] sm:$0x1] %v851_v47  ;;  %v624_v32 = vor.u32 %v622_v16, %v12999_v44  ;;  %v626_v51 = vrot.slane %v12999_v44, 4  ;;  %v854_v52 = vsel %vm12692_vm12, %v616_v43, %v853_v49  ;;  %266 = vst [vmem:[#allocation2 + $0x78] sm:$0x1] %v265_v50 }
  0x80   : > { %v631_v53 = vshll.u32 %v12971_v0, 16  ;;  %855 = vst [vmem:[#allocation2 + $0x6c] sm:$0xf] %v854_v52  ;;  %v13020_v48 = vrot.slane %v628_v8, 7  ;;  %v636_v56 = vshrl.u32 %v12973_v54, 16  ;;  %v639_v57 = vshll.u32 %v12973_v54, 16  ;;  %11418 = vmatprep.subr.bf16.mxu1 %v12236_v34 }
  0x81   : > { %v321_v59 = vsel %vm12656_vm4, 0, %v320_v25  ;;  %v1076_v60 = vld [vmem:[#allocation2 + $0x5c] sm:$0x1]  ;;  %v625_v61 = vsel %vm12698_vm13, %v617_v39, %v624_v32  ;;  %v268_v62 = vsel %vm12649_vm3, 0, %v267_v40  ;;  %v645_v42 = vshrl.u32 %v12979_v21, 16  ;;  %v12216_v13 = vld [vmem:[#allocation2 + $0x54] sm:$0xff]  }
  0x82   : > { %v1591_v58 = vld [vmem:[#allocation2 + $0x5c] sm:$0x1]  ;;  %322 = vst [vmem:[#allocation2 + $0x80] sm:$0x1] %v321_v59  ;;  %v1292_v63 = vshll.u32 %v1076_v60, 16  ;;  %v1719_v0 = vsel %vm12686_vm11, %v10486_v29, %v1718_v27  ;;  %v12237_v44 = vld [vmem:[%s16153_s1 + $0x188] sm:$0xff]   ;;  %v633_v49 = vor.u32 %v631_v53, %v13020_v48 }
  0x83   : > { %v1721_v1 = vrot.slane %v1591_v58, 5  ;;  %v1078_v2 = vld [vmem:[#allocation2 + $0x64] sm:$0xf]  ;;  %856 = vst [vmem:[#allocation2 + $0x70] sm:$0xf] %v625_v61  ;;  %11419 = vmatpush3.bf16.msra.mxu1 %v12237_v44 }
  0x84   : > { %269 = vst [vmem:[#allocation2 + $0x84] sm:$0x1] %v268_v62  ;;  %v12217_v6 = vld [vmem:[#allocation2 + $0x60] sm:$0xff]   ;;  %v1306_v9 = vshll.u32 %v1078_v2, 16  ;;  %v1294_v10 = vrot.slane %v1292_v63, 5  ;;  %v1310_v26 = vshrl.u32 %v1078_v2, 16 }
  0x85   : > { %v1077_v7 = vld [vmem:[#allocation2 + $0x60] sm:$0xf]  ;;  %v1722_v14 = vsel %vm12686_vm11, %v1720_v11, %v1721_v1  ;;  %4724 = vmatprep.mubr.bf16.mxu1 %v12217_v6  ;;  %v1593_v31 = vld [vmem:[#allocation2 + $0x64] sm:$0xf]  ;;  %v13042_v11 = vpack.c.bf16 %v365_v3, %v365_v3  ;;  %v857_v43 = vld [vmem:[#allocation2 + $0x74] sm:$0x1] }
  0x86   : > { %v1297_v15 = vshrl.u32 %v1077_v7, 16  ;;  %v1300_v19 = vshll.u32 %v1077_v7, 16  ;;  %v10502_v23 = vcombine.low %v1719_v0, %v1722_v14  ;;  %v1308_v24 = vrot.slane %v1306_v9, 5  ;;  %v1592_v27 = vld [vmem:[#allocation2 + $0x60] sm:$0xe]  ;;  %v366_v1 = vld [vmem:[%s12668_s9 + $0xb0] sm:$0xff] }
  0x87   : > { %v1295_v28 = vsel %vm12706_vm14, %v1290_v46, %v1294_v10  ;;  %v1079_v29 = vld [vmem:[#allocation2 + $0x68] sm:$0x1]  ;;  %v1312_v35 = vrot.slane %v1310_v26, 4  ;;  %v10487_v40 = vrot.slane %v1592_v27, 9  ;;  %v1725_v41 = vrot.slane %v1593_v31, 5 }
  0x88   : > { %v1299_v22 = vrot.slane %v1297_v15, 4  ;;  %v1302_v30 = vrot.slane %v1300_v19, 5  ;;  %v10470_v25 = vcombine.low %v1285_v55, %v1295_v28  ;;  %4725 = vmatmul.mubr.bf16.gmra.mrb[28].mxu1 %v10502_v23  ;;  %v1316_v36 = vshll.u32 %v1079_v29, 16  ;;  %v1594_v38 = vld [vmem:[#allocation2 + $0x68] sm:$0x1]  ;;  %v367_v23 = vld [vmem:[%s12668_s9 + $0xb8] sm:$0xff] }
  0x89   : > { %v1728_v18 = vrot.slane %v1594_v38, 5  ;;  %v1313_v16 = vor.u32 %v1312_v35, %v1308_v24  ;;  %v858_v46 = vsel %vm12649_vm3, %v626_v51, %v857_v43  ;;  %v1080_v47 = vld [vmem:[#allocation2 + $0x6c] sm:$0xf]  ;;  %v1726_v8 = vsel %vm12686_vm11, %v10487_v40, %v1725_v41  ;;  %v860_v0 = vld [vmem:[#allocation2 + $0x78] sm:$0xf] }
  0x8a   : > { %v1303_v39 = vor.u32 %v1302_v30, %v1299_v22  ;;  %4563 = vmatprep.mubr.bf16.mxu0 %v10470_v25  ;;  %v1318_v20 = vrot.slane %v1316_v36, 5  ;;  %v12220_v45 = vld [vmem:[#allocation2 + $0x6c] sm:$0xff]   ;;  %v1727_v34 = vrot.slane %v1725_v41, 4  ;;  %859 = vst [vmem:[#allocation2 + $0x74] sm:$0x1] %v858_v46  ;;  %v1321_v52 = vshrl.u32 %v1080_v47, 16 }
  0x8b   : > { %4564 = vmatmul.mubr.bf16.gmra.mrb[28].mxu0 %v12216_v13  ;;  %v1081_v32 = vld [vmem:[#allocation2 + $0x70] sm:$0xf]  ;;  %v1314_v59 = vrot.slane %v1313_v16, 4  ;;  %4732 = vmatprep.mubr.bf16.mxu1 %v12220_v45  ;;  %v1324_v60 = vshll.u32 %v1080_v47, 16  ;;  %v634_v63 = vrot.slane %v13020_v48, 4  ;;  %v12218_v13 = vld [vmem:[#allocation2 + $0x60] sm:$0xff]   ;;  %v861_v19 = vsel %vm12692_vm12, %v633_v49, %v860_v0 }
  0x8c   : > { %v1304_v50 = vrot.slane %v1303_v39, 4  ;;  %v1330_v58 = vshll.u32 %v1081_v32, 16  ;;  %v1334_v61 = vshrl.u32 %v1081_v32, 16  ;;  %v1729_v53 = vsel %vm12686_vm11, %v1727_v34, %v1728_v18  ;;  %v1595_v7 = vld [vmem:[#allocation2 + $0x6c] sm:$0xe]  ;;  %v12240_v45 = vld [vmem:[%s16153_s1 + $0x1d0] sm:$0xff]  }
  0x8d   : > { %v1323_v62 = vrot.slane %v1321_v52, 4  ;;  %v1319_v2 = vsel %vm12706_vm14, %v1314_v59, %v1318_v20  ;;  %v10503_v3 = vcombine.low %v1726_v8, %v1729_v53  ;;  %v1326_v55 = vrot.slane %v1324_v60, 5  ;;  %v1596_v9 = vld [vmem:[#allocation2 + $0x70] sm:$0xf]  ;;  %v864_v48 = vld [vmem:[#allocation2 + $0x80] sm:$0x1]  ;;  %11420 = vmatprep.subr.bf16.mxu1 %v12240_v45 }
  0x8e   : > { %v1309_v51 = vsel %vm12706_vm14, %v1304_v50, %v1308_v24  ;;  %v1332_v6 = vrot.slane %v1330_v58, 5  ;;  %v1336_v14 = vrot.slane %v1334_v61, 4  ;;  %v638_v15 = vrot.slane %v636_v56, 7  ;;  %862 = vst [vmem:[#allocation2 + $0x78] sm:$0xf] %v861_v19  ;;  %v12241_v8 = vld [vmem:[%s16153_s1 + $0x190] sm:$0xff]  }
  0x8f   : > { %v10471_v10 = vcombine.low %v1309_v51, %v1319_v2  ;;  %v1327_v24 = vor.u32 %v1326_v55, %v1323_v62  ;;  %v10488_v26 = vrot.slane %v1595_v7, 9  ;;  %v1732_v27 = vrot.slane %v1596_v9, 5  ;;  %v867_v31 = vld [vmem:[#allocation2 + $0x84] sm:$0xf]  ;;  %v323_v25 = vld [vmem:[#allocation2 + $0x8c] sm:$0x1]  ;;  %11421 = vmatpush3.bf16.msra.mxu1 %v12241_v8 }
  0x90   : > { %4733 = vmatmul.mubr.bf16.gmra.mrb[32].mxu1 %v10503_v3  ;;  %v13067_v28 = vrot.slane %v645_v42, 7  ;;  %v1337_v29 = vor.u32 %v1336_v14, %v1332_v6  ;;  %v641_v22 = vor.u32 %v639_v57, %v638_v15  ;;  %v643_v56 = vrot.slane %v638_v15, 4  ;;  %v270_v35 = vld [vmem:[#allocation2 + $0x90] sm:$0x1]  ;;  %v12242_v0 = vld [vmem:[%s16153_s1 + $0x1d8] sm:$0xff]  }
  0x91   : > { %4571 = vmatprep.mubr.bf16.mxu0 %v10471_v10  ;;  %v648_v30 = vshll.u32 %v12979_v21, 16  ;;  %v1082_v36 = vld [vmem:[#allocation2 + $0x74] sm:$0x1]  ;;  %v1328_v38 = vrot.slane %v1327_v24, 4  ;;  %v1734_v40 = vrot.slane %v1732_v27, 4  ;;  %v13072_v41 = vpack.c.bf16 %v366_v1, %v366_v1  ;;  %v12222_v34 = vld [vmem:[#allocation2 + $0x6c] sm:$0xff]   ;;  %11422 = vmatprep.subr.bf16.mxu1 %v12242_v0 }
  0x92   : > { %v1597_v39 = vld [vmem:[#allocation2 + $0x74] sm:$0x1]  ;;  %v13074_v18 = vpack.c.bf16 %v367_v23, %v367_v23  ;;  %v1338_v42 = vrot.slane %v1337_v29, 4  ;;  %v1340_v43 = vshll.u32 %v1082_v36, 16  ;;  %v642_v54 = vsel %vm12698_vm13, %v634_v63, %v641_v22  ;;  %v12243_v14 = vld [vmem:[%s16153_s1 + $0x198] sm:$0xff]  }
  0x93   : > { %4572 = vmatmul.mubr.bf16.gmra.mrb[32].mxu0 %v12218_v13  ;;  %v1735_v57 = vrot.slane %v1597_v39, 5  ;;  %v1333_v21 = vsel %vm12706_vm14, %v1328_v38, %v1332_v6  ;;  %863 = vst [vmem:[#allocation2 + $0x7c] sm:$0xf] %v642_v54  ;;  %v1733_v44 = vsel %vm12686_vm11, %v10488_v26, %v1732_v27  ;;  %v865_v16 = vsel %vm12649_vm3, %v643_v56, %v864_v48  ;;  %v368_v13 = vld [vmem:[%s12668_s9 + $0xc0] sm:$0xff]  ;;  %v326_v8 = vld [vmem:[#allocation2 + $0x98] sm:$0x1] }
  0x94   : > { %v650_v20 = vor.u32 %v648_v30, %v13067_v28  ;;  %v1342_v46 = vrot.slane %v1340_v43, 5  ;;  %866 = vst [vmem:[#allocation2 + $0x80] sm:$0x1] %v865_v16  ;;  %v651_v49 = vrot.slane %v13067_v28, 4  ;;  %v653_v50 = vshrl.u32 %v13042_v11, 16  ;;  %11423 = vmatpush3.bf16.msra.mxu1 %v12243_v14 }
  0x95   : > { %v1736_v47 = vsel %vm12686_vm11, %v1734_v40, %v1735_v57  ;;  %v656_v32 = vshll.u32 %v13042_v11, 16  ;;  %v324_v59 = vsel %vm12656_vm4, 0, %v323_v25  ;;  %v271_v60 = vsel %vm12649_vm3, 0, %v270_v35  ;;  %v1083_v61 = vld [vmem:[#allocation2 + $0x78] sm:$0xf] }
  0x96   : > { %v868_v52 = vsel %vm12692_vm12, %v650_v20, %v867_v31  ;;  %v1343_v58 = vsel %vm12706_vm14, %v1338_v42, %v1342_v46  ;;  %325 = vst [vmem:[#allocation2 + $0x8c] sm:$0x1] %v324_v59  ;;  %272 = vst [vmem:[#allocation2 + $0x90] sm:$0x1] %v271_v60  ;;  %v1345_v51 = vshrl.u32 %v1083_v61, 16  ;;  %v1348_v53 = vshll.u32 %v1083_v61, 16 }
  0x97   : > { %869 = vst [vmem:[#allocation2 + $0x84] sm:$0xf] %v868_v52  ;;  %v10472_v11 = vcombine.low %v1333_v21, %v1343_v58  ;;  %v655_v62 = vrot.slane %v653_v50, 7  ;;  %v1598_v63 = vld [vmem:[#allocation2 + $0x78] sm:$0xe]  ;;  %v10504_v1 = vcombine.low %v1733_v44, %v1736_v47  ;;  %v662_v3 = vshrl.u32 %v13072_v41, 16 }
  0x98   : > { %v10489_v2 = vrot.slane %v1598_v63, 9  ;;  %v665_v55 = vshll.u32 %v13072_v41, 16  ;;  %v1347_v6 = vrot.slane %v1345_v51, 4  ;;  %v1350_v7 = vrot.slane %v1348_v53, 5  ;;  %v12245_v20 = vld [vmem:[%s16153_s1 + $0x178] sm:$0xff]  }
  0x99   : > { %4579 = vmatprep.mubr.bf16.mxu0 %v10472_v11  ;;  %v658_v9 = vor.u32 %v656_v32, %v655_v62  ;;  %v670_v10 = vshrl.u32 %v13074_v18, 16  ;;  %v13114_v48 = vrot.slane %v662_v3, 7  ;;  %v660_v22 = vrot.slane %v655_v62, 4  ;;  %v369_v32 = vld [vmem:[%s12668_s9 + $0xc8] sm:$0xff]  ;;  %11318 = vmatprep.subr.bf16.mxu0 %v12245_v20 }
  0x9a   : > { %v12223_v15 = vld [vmem:[#allocation2 + $0x78] sm:$0xff]   ;;  %v1351_v24 = vor.u32 %v1350_v7, %v1347_v6  ;;  %v13119_v43 = vpack.c.bf16 %v368_v13, %v368_v13  ;;  %v673_v61 = vshll.u32 %v13074_v18, 16 }
  0x9b   : > { %4580 = vmatmul.mubr.bf16.gmra.mrb[36].mxu0 %v12222_v34  ;;  %v1084_v19 = vld [vmem:[#allocation2 + $0x7c] sm:$0xf]  ;;  %v1085_v23 = vld [vmem:[#allocation2 + $0x80] sm:$0x1]  ;;  %v659_v28 = vsel %vm12698_vm13, %v651_v49, %v658_v9  ;;  %4740 = vmatprep.mubr.bf16.mxu1 %v12223_v15  ;;  %v667_v42 = vor.u32 %v665_v55, %v13114_v48  ;;  %v668_v49 = vrot.slane %v13114_v48, 4  ;;  %v13134_v58 = vrot.slane %v670_v10, 7 }
  0x9c   : > { %v1354_v26 = vshll.u32 %v1084_v19, 16  ;;  %v1358_v27 = vshrl.u32 %v1084_v19, 16  ;;  %v1364_v29 = vshll.u32 %v1085_v23, 16  ;;  %870 = vst [vmem:[#allocation2 + $0x88] sm:$0xf] %v659_v28  ;;  %4741 = vmatmul.mubr.bf16.gmra.mrb[36].mxu1 %v10504_v1  ;;  %v1352_v31 = vrot.slane %v1351_v24, 4 }
  0x9d   : > { %v1599_v56 = vld [vmem:[#allocation2 + $0x7c] sm:$0xf]  ;;  %v1600_v30 = vld [vmem:[#allocation2 + $0x80] sm:$0x1]  ;;  %v871_v40 = vld [vmem:[#allocation2 + $0x8c] sm:$0x1]  ;;  %v11040_v55 = vpack.c.bf16 %v369_v32, %v369_v32 }
  0x9e   : > { %v1356_v25 = vrot.slane %v1354_v26, 5  ;;  %v1360_v35 = vrot.slane %v1358_v27, 4  ;;  %v1739_v36 = vrot.slane %v1599_v56, 5  ;;  %v1366_v38 = vrot.slane %v1364_v29, 5  ;;  %v1086_v41 = vld [vmem:[#allocation2 + $0x84] sm:$0xf] }
  0x9f   : > { %v1742_v39 = vrot.slane %v1600_v30, 5  ;;  %v874_v16 = vld [vmem:[#allocation2 + $0x90] sm:$0xf]  ;;  %v872_v45 = vsel %vm12649_vm3, %v660_v22, %v871_v40  ;;  %v1369_v46 = vshrl.u32 %v1086_v41, 16  ;;  %v1372_v47 = vshll.u32 %v1086_v41, 16  ;;  %v12224_v59 = vld [vmem:[#allocation2 + $0x78] sm:$0xff]  }
  0xa0   : > { %v1357_v54 = vsel %vm12706_vm14, %v1352_v31, %v1356_v25  ;;  %v1361_v57 = vor.u32 %v1360_v35, %v1356_v25  ;;  %v1740_v21 = vsel %vm12686_vm11, %v10489_v2, %v1739_v36  ;;  %v1741_v44 = vrot.slane %v1739_v36, 4  ;;  %v1601_v50 = vld [vmem:[#allocation2 + $0x84] sm:$0xe]  ;;  %v273_v34 = vld [vmem:[#allocation2 + $0x9c] sm:$0x1]  ;;  %v370_v23 = vld [vmem:[%s12668_s9 + $0xd0] sm:$0xff] }
  0xa1   : > { %873 = vst [vmem:[#allocation2 + $0x8c] sm:$0x1] %v872_v45  ;;  %v1371_v51 = vrot.slane %v1369_v46, 4  ;;  %v1374_v53 = vrot.slane %v1372_v47, 5  ;;  %v875_v62 = vsel %vm12692_vm12, %v667_v42, %v874_v16  ;;  %v675_v2 = vor.u32 %v673_v61, %v13134_v58  ;;  %v12247_v10 = vld [vmem:[%s16153_s1 + $0x138] sm:$0xff]   ;;  %v12248_v24 = vld [vmem:[%s16153_s1 + $0x1e0] sm:$0xff]  }
  0xa2   : > { %v1362_v52 = vrot.slane %v1361_v57, 4  ;;  %v1743_v60 = vsel %vm12686_vm11, %v1741_v44, %v1742_v39  ;;  %v677_v3 = vrot.slane %v13134_v58, 4  ;;  %876 = vst [vmem:[#allocation2 + $0x90] sm:$0xf] %v875_v62  ;;  %v10490_v15 = vrot.slane %v1601_v50, 9  ;;  %11424 = vmatprep.subr.bf16.mxu1 %v12248_v24  ;;  %v371_v41 = vld [vmem:[%s12668_s9 + $0xd8] sm:$0xff]  ;;  %11319 = vmatpush3.bf16.msra.mxu0 %v12247_v10 }
  0xa3   : > { %v10505_v11 = vcombine.low %v1740_v21, %v1743_v60  ;;  %v12226_v0 = vld [vmem:[#allocation2 + $0x84] sm:$0xff]   ;;  %v1375_v6 = vor.u32 %v1374_v53, %v1371_v51  ;;  %v676_v13 = vsel %vm12698_vm13, %v668_v49, %v675_v2  ;;  %v327_v19 = vsel %vm12656_vm4, 0, %v326_v8 }
  0xa4   : > { %v1367_v63 = vsel %vm12706_vm14, %v1362_v52, %v1366_v38  ;;  %v1087_v1 = vld [vmem:[#allocation2 + $0x88] sm:$0xf]  ;;  %4748 = vmatprep.mubr.bf16.mxu1 %v12226_v0  ;;  %v274_v48 = vsel %vm12649_vm3, 0, %v273_v34  ;;  %877 = vst [vmem:[#allocation2 + $0x94] sm:$0xf] %v676_v13  ;;  %v679_v22 = vshrl.u32 %v13119_v43, 16  ;;  %v13170_v46 = vpack.c.bf16 %v370_v23, %v370_v23 }
  0xa5   : > { %v10473_v18 = vcombine.low %v1357_v54, %v1367_v63  ;;  %v1378_v7 = vshll.u32 %v1087_v1, 16  ;;  %v1382_v9 = vshrl.u32 %v1087_v1, 16  ;;  %v1602_v14 = vld [vmem:[#allocation2 + $0x88] sm:$0xf]  ;;  %4749 = vmatmul.mubr.bf16.gmra.mrb[40].mxu1 %v10505_v11  ;;  %v1376_v26 = vrot.slane %v1375_v6, 4  ;;  %v12249_v42 = vld [vmem:[%s16153_s1 + $0x1a0] sm:$0xff]  }
  0xa6   : > { %v1746_v29 = vrot.slane %v1602_v14, 5  ;;  %328 = vst [vmem:[#allocation2 + $0x98] sm:$0x1] %v327_v19  ;;  %275 = vst [vmem:[#allocation2 + $0x9c] sm:$0x1] %v274_v48  ;;  %v682_v56 = vshll.u32 %v13119_v43, 16  ;;  %11425 = vmatpush3.bf16.msra.mxu1 %v12249_v42 }
  0xa7   : > { %4587 = vmatprep.mubr.bf16.mxu0 %v10473_v18  ;;  %v1380_v27 = vrot.slane %v1378_v7, 5  ;;  %v1384_v28 = vrot.slane %v1382_v9, 4  ;;  %v687_v30 = vshrl.u32 %v11040_v55, 16  ;;  %v690_v31 = vshll.u32 %v11040_v55, 16  ;;  %v329_v25 = vld [vmem:[#allocation2 + $0xa4] sm:$0x1] }
  0xa8   : > { %4588 = vmatmul.mubr.bf16.gmra.mrb[40].mxu0 %v12224_v59  ;;  %v1088_v35 = vld [vmem:[#allocation2 + $0x8c] sm:$0x1]  ;;  %v1747_v39 = vsel %vm12686_vm11, %v10490_v15, %v1746_v29  ;;  %v1748_v40 = vrot.slane %v1746_v29, 4  ;;  %v681_v57 = vrot.slane %v679_v22, 7  ;;  %v330_v45 = vsel %vm12656_vm4, 0, %v329_v25  ;;  %v372_v47 = vld [vmem:[%s12668_s9 + $0xe0] sm:$0xff] }
  0xa9   : > { %v1385_v36 = vor.u32 %v1384_v28, %v1380_v27  ;;  %v1603_v38 = vld [vmem:[#allocation2 + $0x8c] sm:$0x1]  ;;  %v1388_v54 = vshll.u32 %v1088_v35, 16  ;;  %v13164_v21 = vrot.slane %v687_v30, 7  ;;  %v1381_v44 = vsel %vm12706_vm14, %v1376_v26, %v1380_v27  ;;  %v1089_v20 = vld [vmem:[#allocation2 + $0x90] sm:$0xf] }
  0xaa   : > { %v1749_v43 = vrot.slane %v1603_v38, 5  ;;  %v12228_v50 = vld [vmem:[#allocation2 + $0x84] sm:$0xff]   ;;  %v1393_v34 = vshrl.u32 %v1089_v20, 16  ;;  %v1396_v32 = vshll.u32 %v1089_v20, 16  ;;  %331 = vst [vmem:[#allocation2 + $0xa4] sm:$0x1] %v330_v45  ;;  %v684_v61 = vor.u32 %v682_v56, %v681_v57 }
  0xab   : > { %v1386_v16 = vrot.slane %v1385_v36, 4  ;;  %v1390_v49 = vrot.slane %v1388_v54, 5  ;;  %v276_v52 = vld [vmem:[#allocation2 + $0xa8] sm:$0x1]  ;;  %v685_v11 = vrot.slane %v681_v57, 4  ;;  %v692_v51 = vor.u32 %v690_v31, %v13164_v21  ;;  %v12229_v0 = vld [vmem:[#allocation2 + $0x90] sm:$0xff]  }
  0xac   : > { %v1750_v8 = vsel %vm12686_vm11, %v1748_v40, %v1749_v43  ;;  %v12250_v59 = vld [vmem:[%s16153_s1 + $0x1e8] sm:$0xff]   ;;  %v1604_v53 = vld [vmem:[#allocation2 + $0x90] sm:$0xe]  ;;  %v1395_v2 = vrot.slane %v1393_v34, 4  ;;  %v11042_v55 = vpack.c.bf16 %v371_v41, %v371_v41  ;;  %v1090_v7 = vld [vmem:[#allocation2 + $0x94] sm:$0xf]  ;;  %4756 = vmatprep.mubr.bf16.mxu1 %v12229_v0  ;;  %v13191_v48 = vpack.c.bf16 %v372_v47, %v372_v47 }
  0xad   : > { %v10506_v60 = vcombine.low %v1747_v39, %v1750_v8  ;;  %v12251_v62 = vld [vmem:[%s16153_s1 + $0x1a8] sm:$0xff]   ;;  %v1391_v63 = vsel %vm12706_vm14, %v1386_v16, %v1390_v49  ;;  %v878_v1 = vld [vmem:[#allocation2 + $0x98] sm:$0x1]  ;;  %11426 = vmatprep.subr.bf16.mxu1 %v12250_v59  ;;  %v1398_v9 = vrot.slane %v1396_v32, 5  ;;  %v693_v10 = vsel %vm12698_vm13, %v685_v11, %v692_v51  ;;  %v881_v19 = vld [vmem:[#allocation2 + $0x9c] sm:$0xf] }
  0xae   : > { %v10474_v18 = vcombine.low %v1381_v44, %v1391_v63  ;;  %v879_v6 = vsel %vm12649_vm3, %v677_v3, %v878_v1  ;;  %11427 = vmatpush3.bf16.msra.mxu1 %v12251_v62  ;;  %v1402_v13 = vshll.u32 %v1090_v7, 16  ;;  %v1406_v14 = vshrl.u32 %v1090_v7, 16  ;;  %884 = vst [vmem:[#allocation2 + $0xa0] sm:$0xf] %v693_v10  ;;  %v1605_v23 = vld [vmem:[#allocation2 + $0x94] sm:$0xf] }
  0xaf   : > { %880 = vst [vmem:[#allocation2 + $0x98] sm:$0x1] %v879_v6  ;;  %v694_v15 = vrot.slane %v13164_v21, 4  ;;  %4757 = vmatmul.mubr.bf16.gmra.mrb[44].mxu1 %v10506_v60  ;;  %v1399_v58 = vor.u32 %v1398_v9, %v1395_v2  ;;  %v882_v3 = vsel %vm12692_vm12, %v684_v61, %v881_v19  ;;  %v277_v24 = vsel %vm12649_vm3, 0, %v276_v52  ;;  %v332_v27 = vld [vmem:[#allocation2 + $0xb0] sm:$0x1] }
  0xb0   : > { %4595 = vmatprep.mubr.bf16.mxu0 %v10474_v18  ;;  %v696_v26 = vshrl.u32 %v13170_v46, 16  ;;  %v1404_v28 = vrot.slane %v1402_v13, 5  ;;  %v1408_v29 = vrot.slane %v1406_v14, 4  ;;  %883 = vst [vmem:[#allocation2 + $0x9c] sm:$0xf] %v882_v3  ;;  %v10491_v22 = vrot.slane %v1604_v53, 9 }
  0xb1   : > { %4596 = vmatmul.mubr.bf16.gmra.mrb[44].mxu0 %v12228_v50  ;;  %v1753_v56 = vrot.slane %v1605_v23, 5  ;;  %278 = vst [vmem:[#allocation2 + $0xa8] sm:$0x1] %v277_v24  ;;  %v885_v30 = vld [vmem:[#allocation2 + $0xa4] sm:$0x1]  ;;  %v699_v25 = vshll.u32 %v13170_v46, 16 }
  0xb2   : > { %v698_v31 = vrot.slane %v696_v26, 7  ;;  %v704_v35 = vshrl.u32 %v11042_v55, 16  ;;  %v707_v36 = vshll.u32 %v11042_v55, 16  ;;  %v1400_v38 = vrot.slane %v1399_v58, 4  ;;  %v279_v42 = vld [vmem:[#allocation2 + $0xb4] sm:$0x1] }
  0xb3   : > { %v1409_v39 = vor.u32 %v1408_v29, %v1404_v28  ;;  %v1755_v40 = vrot.slane %v1753_v56, 4  ;;  %v886_v41 = vsel %vm12649_vm3, %v694_v15, %v885_v30  ;;  %v333_v21 = vsel %vm12656_vm4, 0, %v332_v27  ;;  %v373_v63 = vld [vmem:[%s12668_s9 + $0xe8] sm:$0xff]  ;;  %v12230_v0 = vld [vmem:[#allocation2 + $0x90] sm:$0xff]  }
  0xb4   : > { %887 = vst [vmem:[#allocation2 + $0xa4] sm:$0x1] %v886_v41  ;;  %v702_v54 = vrot.slane %v698_v31, 4  ;;  %v706_v43 = vrot.slane %v704_v35, 7  ;;  %v280_v44 = vsel %vm12649_vm3, 0, %v279_v42  ;;  %v713_v16 = vshrl.u32 %v13191_v48, 16 }
  0xb5   : > { %v1410_v57 = vrot.slane %v1409_v39, 4  ;;  %334 = vst [vmem:[#allocation2 + $0xb0] sm:$0x1] %v333_v21  ;;  %281 = vst [vmem:[#allocation2 + $0xb4] sm:$0x1] %v280_v44  ;;  %v1754_v49 = vsel %vm12686_vm11, %v10491_v22, %v1753_v56  ;;  %v701_v34 = vor.u32 %v699_v25, %v698_v31  ;;  %v1405_v32 = vsel %vm12706_vm14, %v1400_v38, %v1404_v28  ;;  %v374_v19 = vld [vmem:[%s12668_s9 + $0xf0] sm:$0xff] }
  0xb6   : > { %v1091_v20 = vld [vmem:[#allocation2 + $0x98] sm:$0x1]  ;;  %v709_v46 = vor.u32 %v707_v36, %v706_v43  ;;  %v1093_v8 = vld [vmem:[#allocation2 + $0xa0] sm:$0xf]  ;;  %v711_v18 = vrot.slane %v706_v43, 4  ;;  %v13220_v27 = vpack.c.bf16 %v373_v63, %v373_v63  ;;  %v12254_v31 = vld [vmem:[%s16153_s1 + $0x1f0] sm:$0xff]  }
  0xb7   : > { %v1606_v45 = vld [vmem:[#allocation2 + $0x98] sm:$0x1]  ;;  %v1412_v47 = vshll.u32 %v1091_v20, 16  ;;  %v12232_v52 = vld [vmem:[#allocation2 + $0x9c] sm:$0xff]   ;;  %v1426_v60 = vshll.u32 %v1093_v8, 16  ;;  %v1430_v55 = vshrl.u32 %v1093_v8, 16  ;;  %11428 = vmatprep.subr.bf16.mxu1 %v12254_v31 }
  0xb8   : > { %v1756_v50 = vrot.slane %v1606_v45, 5  ;;  %v1092_v59 = vld [vmem:[#allocation2 + $0x9c] sm:$0xf]  ;;  %v710_v61 = vsel %vm12698_vm13, %v702_v54, %v709_v46  ;;  %4764 = vmatprep.mubr.bf16.mxu1 %v12232_v52  ;;  %v888_v6 = vld [vmem:[#allocation2 + $0xa8] sm:$0xf]  ;;  %v13227_v38 = vrot.slane %v713_v16, 7  ;;  %v13236_v16 = vpack.c.bf16 %v374_v19, %v374_v19 }
  0xb9   : > { %v1414_v11 = vrot.slane %v1412_v47, 5  ;;  %v1417_v53 = vshrl.u32 %v1092_v59, 16  ;;  %v1420_v62 = vshll.u32 %v1092_v59, 16  ;;  %891 = vst [vmem:[#allocation2 + $0xac] sm:$0xf] %v710_v61  ;;  %v1428_v2 = vrot.slane %v1426_v60, 5 }
  0xba   : > { %v1757_v51 = vsel %vm12686_vm11, %v1755_v40, %v1756_v50  ;;  %v889_v14 = vsel %vm12692_vm12, %v701_v34, %v888_v6  ;;  %v1607_v15 = vld [vmem:[#allocation2 + $0x9c] sm:$0xe]  ;;  %v1432_v3 = vrot.slane %v1430_v55, 4  ;;  %v1608_v24 = vld [vmem:[#allocation2 + $0xa0] sm:$0xf]  ;;  %v716_v42 = vshll.u32 %v13191_v48, 16 }
  0xbb   : > { %v10507_v1 = vcombine.low %v1754_v49, %v1757_v51  ;;  %v1415_v7 = vsel %vm12706_vm14, %v1410_v57, %v1414_v11  ;;  %v1094_v9 = vld [vmem:[#allocation2 + $0xa4] sm:$0x1]  ;;  %v1419_v10 = vrot.slane %v1417_v53, 4  ;;  %v1422_v13 = vrot.slane %v1420_v62, 5  ;;  %890 = vst [vmem:[#allocation2 + $0xa8] sm:$0xf] %v889_v14 }
  0xbc   : > { %v10475_v58 = vcombine.low %v1405_v32, %v1415_v7  ;;  %v1436_v23 = vshll.u32 %v1094_v9, 16  ;;  %v1609_v26 = vld [vmem:[#allocation2 + $0xa4] sm:$0x1]  ;;  %v10492_v29 = vrot.slane %v1607_v15, 9  ;;  %v1760_v22 = vrot.slane %v1608_v24, 5  ;;  %v12255_v43 = vld [vmem:[%s16153_s1 + $0x1b0] sm:$0xff]  }
  0xbd   : > { %4765 = vmatmul.mubr.bf16.gmra.mrb[48].mxu1 %v10507_v1  ;;  %v1423_v28 = vor.u32 %v1422_v13, %v1419_v10  ;;  %v1763_v56 = vrot.slane %v1609_v26, 5  ;;  %v892_v30 = vld [vmem:[#allocation2 + $0xb0] sm:$0x1]  ;;  %v1433_v25 = vor.u32 %v1432_v3, %v1428_v2  ;;  %v895_v54 = vld [vmem:[#allocation2 + $0xb4] sm:$0xf]  ;;  %v719_v44 = vrot.slane %v13227_v38, 4 }
  0xbe   : > { %4603 = vmatprep.mubr.bf16.mxu0 %v10475_v58  ;;  %v1438_v35 = vrot.slane %v1436_v23, 5  ;;  %v893_v36 = vsel %vm12649_vm3, %v711_v18, %v892_v30  ;;  %v1761_v40 = vsel %vm12686_vm11, %v10492_v29, %v1760_v22  ;;  %v1762_v41 = vrot.slane %v1760_v22, 4  ;;  %v12238_v45 = vld [vmem:[#allocation2 + $0x9c] sm:$0xff]   ;;  %11429 = vmatpush3.bf16.msra.mxu1 %v12255_v43 }
  0xbf   : > { %4604 = vmatmul.mubr.bf16.gmra.mrb[48].mxu0 %v12230_v0  ;;  %v1424_v39 = vrot.slane %v1423_v28, 4  ;;  %894 = vst [vmem:[#allocation2 + $0xb0] sm:$0x1] %v893_v36  ;;  %v1434_v57 = vrot.slane %v1433_v25, 4  ;;  %v718_v34 = vor.u32 %v716_v42, %v13227_v38  ;;  %v721_v32 = vshrl.u32 %v13220_v27, 16  ;;  %v12256_v52 = vld [vmem:[%s16153_s1 + $0x1f8] sm:$0xff]  }
  0xc0   : > { %v1096_v21 = vld [vmem:[#allocation2 + $0xac] sm:$0xf]  ;;  %v1764_v46 = vsel %vm12686_vm11, %v1762_v41, %v1763_v56  ;;  %v375_v0 = vld [vmem:[%s12668_s9 + $0xf8] sm:$0xff]  ;;  %11430 = vmatprep.subr.bf16.mxu1 %v12256_v52  ;;  %v730_v6 = vshrl.u32 %v13236_v16, 16  ;;  %v13263_v22 = vld [vmem:[%s16153_s1 + $0x200] sm:$0xff]   ;;  %v733_v41 = vshll.u32 %v13236_v16, 16 }
  0xc1   : > { %v1429_v20 = vsel %vm12706_vm14, %v1424_v39, %v1428_v2  ;;  %v1450_v48 = vshll.u32 %v1096_v21, 16  ;;  %v1454_v47 = vshrl.u32 %v1096_v21, 16  ;;  %v1611_v49 = vld [vmem:[#allocation2 + $0xac] sm:$0xf]  ;;  %v1439_v50 = vsel %vm12706_vm14, %v1434_v57, %v1438_v35  ;;  %v335_v3 = vld [vmem:[#allocation2 + $0xbc] sm:$0x1]  ;;  %12024 = vmatprep.subr.bf16.mxu0 %v13263_v22 }
  0xc2   : > { %v10508_v8 = vcombine.low %v1761_v40, %v1764_v46  ;;  %v10476_v59 = vcombine.low %v1429_v20, %v1439_v50  ;;  %v12239_v60 = vld [vmem:[#allocation2 + $0xa8] sm:$0xff]   ;;  %v896_v63 = vsel %vm12692_vm12, %v718_v34, %v895_v54  ;;  %v13252_v1 = vrot.slane %v721_v32, 7  ;;  %v12257_v24 = vld [vmem:[%s16153_s1 + $0x1b8] sm:$0xff]   ;;  %v282_v25 = vld [vmem:[#allocation2 + $0xc0] sm:$0x1] }
  0xc3   : > { %v1095_v61 = vld [vmem:[#allocation2 + $0xa8] sm:$0xf]  ;;  %v1452_v11 = vrot.slane %v1450_v48, 5  ;;  %v1456_v62 = vrot.slane %v1454_v47, 4  ;;  %4772 = vmatprep.mubr.bf16.mxu1 %v12239_v60  ;;  %v724_v2 = vshll.u32 %v13220_v27, 16  ;;  %v1767_v18 = vrot.slane %v1611_v49, 5  ;;  %11431 = vmatpush3.bf16.msra.mxu1 %v12257_v24 }
  0xc4   : > { %v1441_v51 = vshrl.u32 %v1095_v61, 16  ;;  %v1444_v53 = vshll.u32 %v1095_v61, 16  ;;  %4611 = vmatprep.mubr.bf16.mxu0 %v10476_v59  ;;  %897 = vst [vmem:[#allocation2 + $0xb4] sm:$0xf] %v896_v63  ;;  %v1610_v55 = vld [vmem:[#allocation2 + $0xa8] sm:$0xe]  ;;  %v11046_v23 = vpack.c.bf16 %v375_v0, %v375_v0 }
  0xc5   : > { %4773 = vmatmul.mubr.bf16.gmra.mrb[52].mxu1 %v10508_v8  ;;  %v1457_v13 = vor.u32 %v1456_v62, %v1452_v11  ;;  %v726_v19 = vor.u32 %v724_v2, %v13252_v1  ;;  %v10493_v58 = vrot.slane %v1610_v55, 9  ;;  %v1769_v28 = vrot.slane %v1767_v18, 4  ;;  %v12244_v36 = vld [vmem:[#allocation2 + $0xa8] sm:$0xff]   ;;  %v2516_v60 = vld [vmem:[#allocation2 + $0x10] sm:$0xf] }
  0xc6   : > { %v1097_v7 = vld [vmem:[#allocation2 + $0xb0] sm:$0x1]  ;;  %v1443_v9 = vrot.slane %v1441_v51, 4  ;;  %v1446_v10 = vrot.slane %v1444_v53, 5  ;;  %v336_v31 = vsel %vm12656_vm4, 0, %v335_v3  ;;  %v283_v38 = vsel %vm12649_vm3, 0, %v282_v25 }
  0xc7   : > { %v1612_v14 = vld [vmem:[#allocation2 + $0xb0] sm:$0x1]  ;;  %4612 = vmatmul.mubr.bf16.gmra.mrb[52].mxu0 %v12238_v45  ;;  %v1460_v15 = vshll.u32 %v1097_v7, 16  ;;  %v1458_v27 = vrot.slane %v1457_v13, 4  ;;  %v727_v30 = vsel %vm12698_vm13, %v719_v44, %v726_v19  ;;  %337 = vst [vmem:[#allocation2 + $0xbc] sm:$0x1] %v336_v31  ;;  %v1768_v43 = vsel %vm12686_vm11, %v10493_v58, %v1767_v18 }
  0xc8   : > { %v1447_v26 = vor.u32 %v1446_v10, %v1443_v9  ;;  %v1770_v29 = vrot.slane %v1612_v14, 5  ;;  %898 = vst [vmem:[#allocation2 + $0xb8] sm:$0xf] %v727_v30  ;;  %v732_v39 = vrot.slane %v730_v6, 7  ;;  %284 = vst [vmem:[#allocation2 + $0xc0] sm:$0x1] %v283_v38 }
  0xc9   : > { %v1462_v56 = vrot.slane %v1460_v15, 5  ;;  %v738_v42 = vshrl.u32 %v11046_v23, 16  ;;  %v728_v46 = vrot.slane %v13252_v1, 4  ;;  %v741_v16 = vshll.u32 %v11046_v23, 16  ;;  %v2515_v59 = vld [vmem:[#allocation2 + $0xc] sm:$0xe] }
  0xca   : > { %v1448_v35 = vrot.slane %v1447_v26, 4  ;;  %v1771_v44 = vsel %vm12686_vm11, %v1769_v28, %v1770_v29  ;;  %v736_v48 = vrot.slane %v732_v39, 4  ;;  %v735_v32 = vor.u32 %v733_v41, %v732_v39  ;;  %v2517_v61 = vld [vmem:[#allocation2 + $0x14] sm:$0x1]  ;;  %v2003_v23 = vld [vmem:[#allocation2 + $0xc] sm:$0xf] }
  0xcb   : > { %v1463_v40 = vsel %vm12706_vm14, %v1458_v27, %v1462_v56  ;;  %v1098_v57 = vld [vmem:[#allocation2 + $0xb4] sm:$0xf]  ;;  %v13282_v47 = vrot.slane %v738_v42, 7  ;;  %v10509_v34 = vcombine.low %v1768_v43, %v1771_v44  ;;  %v2613_v62 = vrot.slane %v2516_v60, 5  ;;  %v2004_v24 = vld [vmem:[#allocation2 + $0x10] sm:$0xf] }
  0xcc   : > { %v1453_v54 = vsel %vm12706_vm14, %v1448_v35, %v1452_v11  ;;  %v1465_v20 = vshrl.u32 %v1098_v57, 16  ;;  %v1468_v45 = vshll.u32 %v1098_v57, 16  ;;  %v1613_v8 = vld [vmem:[#allocation2 + $0xb4] sm:$0xe]  ;;  %v10543_v6 = vrot.slane %v2515_v59, 9 }
  0xcd   : > { %v10477_v21 = vcombine.low %v1453_v54, %v1463_v40  ;;  %v743_v52 = vor.u32 %v741_v16, %v13282_v47  ;;  %v2616_v7 = vrot.slane %v2517_v61, 5  ;;  %v10494_v13 = vrot.slane %v1613_v8, 9  ;;  %v2005_v26 = vld [vmem:[#allocation2 + $0x14] sm:$0x1]  ;;  %v2948_v35 = vld [vmem:[#allocation2 + $0x18] sm:$0xf] }
  0xce   : > { %v1467_v49 = vrot.slane %v1465_v20, 4  ;;  %v1470_v50 = vrot.slane %v1468_v45, 5  ;;  %v899_v51 = vld [vmem:[#allocation2 + $0xbc] sm:$0x1]  ;;  %v2615_v14 = vrot.slane %v2613_v62, 4  ;;  %v13293_v28 = vsel %vm12686_vm11, %v10543_v6, %v2613_v62 }
  0xcf   : > { %4619 = vmatprep.mubr.bf16.mxu0 %v10477_v21  ;;  %v12246_v11 = vld [vmem:[#allocation2 + $0xb4] sm:$0xff]   ;;  %v900_v63 = vsel %vm12649_vm3, %v728_v46, %v899_v51  ;;  %v744_v1 = vsel %vm12698_vm13, %v736_v48, %v743_v52  ;;  %v902_v18 = vld [vmem:[#allocation2 + $0xc0] sm:$0xf]  ;;  %v2052_v30 = vshrl.u32 %v2003_v23, 16  ;;  %v2055_v31 = vshll.u32 %v2003_v23, 16 }
  0xd0   : > { %4620 = vmatmul.mubr.bf16.gmra.mrb[56].mxu0 %v12244_v36  ;;  %v1471_v53 = vor.u32 %v1470_v50, %v1467_v49  ;;  %v1099_v0 = vld [vmem:[#allocation2 + $0xb8] sm:$0xf]  ;;  %4780 = vmatprep.mubr.bf16.mxu1 %v12246_v11  ;;  %901 = vst [vmem:[#allocation2 + $0xbc] sm:$0x1] %v900_v63  ;;  %905 = vst [vmem:[#allocation2 + $0xc4] sm:$0xf] %v744_v1  ;;  %v903_v9 = vsel %vm12692_vm12, %v735_v32, %v902_v18 }
  0xd1   : > { %v1474_v2 = vshll.u32 %v1099_v0, 16  ;;  %v1478_v55 = vshrl.u32 %v1099_v0, 16  ;;  %4781 = vmatmul.mubr.bf16.gmra.mrb[56].mxu1 %v10509_v34  ;;  %v1614_v10 = vld [vmem:[#allocation2 + $0xb8] sm:$0xf]  ;;  %904 = vst [vmem:[#allocation2 + $0xc0] sm:$0xf] %v903_v9  ;;  %v13297_v29 = vsel %vm12686_vm11, %v2615_v14, %v2616_v7 }
  0xd2   : > { %v1472_v15 = vrot.slane %v1471_v53, 4  ;;  %v1774_v3 = vrot.slane %v1614_v10, 5  ;;  %v2061_v25 = vshll.u32 %v2004_v24, 16  ;;  %v2065_v38 = vshrl.u32 %v2004_v24, 16  ;;  %v2949_v40 = vld [vmem:[#allocation2 + $0x1c] sm:$0xf] }
  0xd3   : > { %v1476_v19 = vrot.slane %v1474_v2, 5  ;;  %v1480_v58 = vrot.slane %v1478_v55, 4  ;;  %v2071_v39 = vshll.u32 %v2005_v26, 16  ;;  %v2997_v41 = vshrl.u32 %v2948_v35, 16  ;;  %v2950_v46 = vld [vmem:[#allocation2 + $0x20] sm:$0x1] }
  0xd4   : > { %v1776_v56 = vrot.slane %v1774_v3, 4  ;;  %v1775_v57 = vsel %vm12686_vm11, %v10494_v13, %v1774_v3  ;;  %v2054_v20 = vrot.slane %v2052_v30, 4  ;;  %v2057_v45 = vrot.slane %v2055_v31, 5  ;;  %v2518_v53 = vld [vmem:[#allocation2 + $0x18] sm:$0xe] }
  0xd5   : > { %v1481_v27 = vor.u32 %v1480_v58, %v1476_v19  ;;  %v1477_v54 = vsel %vm12706_vm14, %v1472_v15, %v1476_v19  ;;  %v10559_v16 = vcombine.low %v13293_v28, %v13297_v29  ;;  %v2063_v49 = vrot.slane %v2061_v25, 5  ;;  %v2519_v62 = vld [vmem:[#allocation2 + $0x1c] sm:$0xf]  ;;  %v12252_v0 = vld [vmem:[#allocation2 + $0xb4] sm:$0xff]   ;;  %v2520_v18 = vld [vmem:[#allocation2 + $0x20] sm:$0x1] }
  0xd6   : > { %v2067_v50 = vrot.slane %v2065_v38, 4  ;;  %v2073_v8 = vrot.slane %v2071_v39, 5  ;;  %v2058_v52 = vor.u32 %v2057_v45, %v2054_v20  ;;  %v2999_v59 = vrot.slane %v2997_v41, 4  ;;  %v2006_v13 = vld [vmem:[#allocation2 + $0x18] sm:$0xf] }
  0xd7   : > { %v1482_v36 = vrot.slane %v1481_v27, 4  ;;  %v1100_v42 = vld [vmem:[#allocation2 + $0xbc] sm:$0x1]  ;;  %v3000_v11 = vshll.u32 %v2948_v35, 16  ;;  %v3006_v51 = vshll.u32 %v2949_v40, 16  ;;  %v3010_v2 = vshrl.u32 %v2949_v40, 16 }
  0xd8   : > { %v1615_v43 = vld [vmem:[#allocation2 + $0xbc] sm:$0x1]  ;;  %v1484_v21 = vshll.u32 %v1100_v42, 16  ;;  %v12253_v48 = vld [vmem:[#allocation2 + $0xc0] sm:$0xff]   ;;  %v2068_v61 = vor.u32 %v2067_v50, %v2063_v49  ;;  %v2059_v1 = vrot.slane %v2058_v52, 4  ;;  %v3016_v55 = vshll.u32 %v2950_v46, 16 }
  0xd9   : > { %v1777_v44 = vrot.slane %v1615_v43, 5  ;;  %4788 = vmatprep.mubr.bf16.mxu1 %v12253_v48  ;;  %v3002_v9 = vrot.slane %v3000_v11, 5  ;;  %v3008_v10 = vrot.slane %v3006_v51, 5  ;;  %v3012_v15 = vrot.slane %v3010_v2, 4  ;;  %v2007_v3 = vld [vmem:[#allocation2 + $0x1c] sm:$0xf] }
  0xda   : > { %v1486_v34 = vrot.slane %v1484_v21, 5  ;;  %v2069_v7 = vrot.slane %v2068_v61, 4  ;;  %v2064_v14 = vsel %vm12706_vm14, %v2059_v1, %v2063_v49  ;;  %v3018_v19 = vrot.slane %v3016_v55, 5  ;;  %v2951_v25 = vld [vmem:[#allocation2 + $0x24] sm:$0xf]  ;;  %v12259_v48 = vld [vmem:[#allocation2 + $0x18] sm:$0xff]  }
  0xdb   : > { %v1778_v32 = vsel %vm12686_vm11, %v1776_v56, %v1777_v44  ;;  %v10544_v58 = vrot.slane %v2518_v53, 9  ;;  %v3003_v24 = vor.u32 %v3002_v9, %v2999_v59  ;;  %v2620_v26 = vrot.slane %v2519_v62, 5  ;;  %v2008_v56 = vld [vmem:[#allocation2 + $0x20] sm:$0x1]  ;;  %v2952_v20 = vld [vmem:[#allocation2 + $0x28] sm:$0xf] }
  0xdc   : > { %v10510_v60 = vcombine.low %v1775_v57, %v1778_v32  ;;  %v1487_v63 = vsel %vm12706_vm14, %v1482_v36, %v1486_v34  ;;  %v2074_v23 = vsel %vm12706_vm14, %v2069_v7, %v2073_v8  ;;  %v2623_v27 = vrot.slane %v2520_v18, 5  ;;  %v2953_v45 = vld [vmem:[#allocation2 + $0x2c] sm:$0x1]  ;;  %v2521_v8 = vld [vmem:[#allocation2 + $0x24] sm:$0xe] }
  0xdd   : > { %v10478_v6 = vcombine.low %v1477_v54, %v1487_v63  ;;  %v10527_v28 = vcombine.low %v2064_v14, %v2074_v23  ;;  %v3013_v29 = vor.u32 %v3012_v15, %v3008_v10  ;;  %v2076_v30 = vshrl.u32 %v2006_v13, 16  ;;  %v2522_v34 = vld [vmem:[#allocation2 + $0x28] sm:$0xf]  ;;  %v2523_v61 = vld [vmem:[#allocation2 + $0x2c] sm:$0x1] }
  0xde   : > { %4789 = vmatmul.mubr.bf16.gmra.mrb[60].mxu1 %v10510_v60  ;;  %v2079_v31 = vshll.u32 %v2006_v13, 16  ;;  %v3004_v35 = vrot.slane %v3003_v24, 4  ;;  %v2621_v36 = vsel %vm12686_vm11, %v10544_v58, %v2620_v26  ;;  %v2622_v38 = vrot.slane %v2620_v26, 4  ;;  %v2009_v63 = vld [vmem:[#allocation2 + $0x24] sm:$0xf] }
  0xdf   : > { %4627 = vmatprep.mubr.bf16.mxu0 %v10478_v6  ;;  %v2085_v39 = vshll.u32 %v2007_v3, 16  ;;  %v3014_v40 = vrot.slane %v3013_v29, 4  ;;  %v2078_v41 = vrot.slane %v2076_v30, 4  ;;  %v2089_v54 = vshrl.u32 %v2007_v3, 16  ;;  %v2010_v58 = vld [vmem:[#allocation2 + $0x28] sm:$0xf] }
  0xe0   : > { %4628 = vmatmul.mubr.bf16.gmra.mrb[60].mxu0 %v12252_v0  ;;  %v2081_v42 = vrot.slane %v2079_v31, 5  ;;  %v3009_v43 = vsel %vm12706_vm14, %v3004_v35, %v3008_v10  ;;  %v2624_v57 = vsel %vm12686_vm11, %v2622_v38, %v2623_v27  ;;  %v2095_v44 = vshll.u32 %v2008_v56, 16  ;;  %v12261_v0 = vld [vmem:[%s16153_s1 + $0x208] sm:$0xff]   ;;  %v2954_v38 = vld [vmem:[#allocation2 + $0x30] sm:$0xf] }
  0xe1   : > { %4829 = vmatprep.mubr.bf16.mxu0 %v10559_v16  ;;  %v2087_v21 = vrot.slane %v2085_v39, 5  ;;  %v3019_v46 = vsel %vm12706_vm14, %v3014_v40, %v3018_v19  ;;  %v10560_v16 = vcombine.low %v2621_v36, %v2624_v57  ;;  %v2091_v50 = vrot.slane %v2089_v54, 4  ;;  %v2011_v24 = vld [vmem:[#allocation2 + $0x2c] sm:$0x1]  ;;  %v2955_v54 = vld [vmem:[#allocation2 + $0x34] sm:$0xf] }
  0xe2   : > { %v2082_v49 = vor.u32 %v2081_v42, %v2078_v41  ;;  %v10591_v32 = vcombine.low %v3009_v43, %v3019_v46  ;;  %v2097_v52 = vrot.slane %v2095_v44, 5  ;;  %v3021_v59 = vshrl.u32 %v2951_v25, 16  ;;  %v12260_v57 = vld [vmem:[#allocation2 + $0x24] sm:$0xff]   ;;  %v2524_v46 = vld [vmem:[#allocation2 + $0x30] sm:$0xe] }
  0xe3   : > { %v3024_v60 = vshll.u32 %v2951_v25, 16  ;;  %v2092_v51 = vor.u32 %v2091_v50, %v2087_v21  ;;  %v3030_v53 = vshll.u32 %v2952_v20, 16  ;;  %v3034_v62 = vshrl.u32 %v2952_v20, 16  ;;  %v2552_v12 = vld [vmem:[#allocation2 + $0xa0] sm:$0xf] }
  0xe4   : > { %v2083_v11 = vrot.slane %v2082_v49, 4  ;;  %4990 = vmatprep.mubr.bf16.mxu1 %v10591_v32  ;;  %v3023_v1 = vrot.slane %v3021_v59, 4  ;;  %v3040_v55 = vshll.u32 %v2953_v45, 16  ;;  %v10545_v18 = vrot.slane %v2521_v8, 9  ;;  %v2956_v45 = vld [vmem:[#allocation2 + $0x38] sm:$0x1] }
  0xe5   : > { %v3026_v2 = vrot.slane %v3024_v60, 5  ;;  %v2093_v7 = vrot.slane %v2092_v51, 4  ;;  %v3032_v9 = vrot.slane %v3030_v53, 5  ;;  %v3036_v10 = vrot.slane %v3034_v62, 4  ;;  %v2525_v8 = vld [vmem:[#allocation2 + $0x34] sm:$0xf] }
  0xe6   : > { %4991 = vmatmul.mubr.bf16.vlgmr.msra.gmra.mrb[64].mxu1 %v12259_v48  ;;  %v2088_v6 = vsel %vm12706_vm14, %v2083_v11, %v2087_v21  ;;  %v3042_v14 = vrot.slane %v3040_v55, 5  ;;  %v2627_v15 = vrot.slane %v2522_v34, 5  ;;  %v2630_v19 = vrot.slane %v2523_v61, 5  ;;  %v12267_v34 = vld [vmem:[%s16153_s1 + $0x218] sm:$0xff]  }
  0xe7   : > { %v3027_v13 = vor.u32 %v3026_v2, %v3023_v1  ;;  %v2098_v3 = vsel %vm12706_vm14, %v2093_v7, %v2097_v52  ;;  %v3037_v23 = vor.u32 %v3036_v10, %v3032_v9  ;;  %v2100_v26 = vshrl.u32 %v2009_v63, 16  ;;  %v2526_v61 = vld [vmem:[#allocation2 + $0x38] sm:$0x1] }
  0xe8   : > { %4830 = vmatmul.mubr.bf16.vlgmr.msra.gmra.mrb[64].mxu0 %v10527_v28  ;;  %v2103_v27 = vshll.u32 %v2009_v63, 16  ;;  %v12264_v28 = vld [vmem:[%s16153_s1 + $0x210] sm:$0xff]   ;;  %v10528_v29 = vcombine.low %v2088_v6, %v2098_v3  ;;  %v2628_v56 = vsel %vm12686_vm11, %v10545_v18, %v2627_v15  ;;  %v2629_v30 = vrot.slane %v2627_v15, 4  ;;  %v12270_v6 = vld [vmem:[%s16153_s1 + $0x220] sm:$0xff]  }
  0xe9   : > { %12025 = vmatpush3.bf16.msra.mxu0 %v13263_v22  ;;  %4837 = vmatprep.mubr.bf16.mxu0 %v10560_v16  ;;  %v3028_v22 = vrot.slane %v3027_v13, 4  ;;  %v3038_v31 = vrot.slane %v3037_v23, 4  ;;  %v2102_v25 = vrot.slane %v2100_v26, 4  ;;  %v2109_v36 = vshll.u32 %v2010_v58, 16  ;;  %v2012_v63 = vld [vmem:[#allocation2 + $0x30] sm:$0xf] }
  0xea   : > { %12026 = vmatprep.subr.bf16.mxu0 %v12261_v0  ;;  %v2105_v35 = vrot.slane %v2103_v27, 5  ;;  %v2631_v40 = vsel %vm12686_vm11, %v2629_v30, %v2630_v19  ;;  %v2113_v41 = vshrl.u32 %v2010_v58, 16  ;;  %v2119_v42 = vshll.u32 %v2011_v24, 16  ;;  %v2013_v18 = vld [vmem:[#allocation2 + $0x34] sm:$0xf] }
  0xeb   : > { %v3033_v39 = vsel %vm12706_vm14, %v3028_v22, %v3032_v9  ;;  %v3043_v43 = vsel %vm12706_vm14, %v3038_v31, %v3042_v14  ;;  %v10561_v21 = vcombine.low %v2628_v56, %v2631_v40  ;;  %v2111_v20 = vrot.slane %v2109_v36, 5  ;;  %v2014_v26 = vld [vmem:[#allocation2 + $0x38] sm:$0x1]  ;;  %v2958_v31 = vld [vmem:[#allocation2 + $0x40] sm:$0xf]  ;;  %v12273_v40 = vld [vmem:[%s16153_s1 + $0x228] sm:$0xff]  }
  0xec   : > { %v2106_v44 = vor.u32 %v2105_v35, %v2102_v25  ;;  %v10592_v48 = vcombine.low %v3033_v39, %v3043_v43  ;;  %v2115_v16 = vrot.slane %v2113_v41, 4  ;;  %v2121_v49 = vrot.slane %v2119_v42, 5  ;;  %v2959_v39 = vld [vmem:[#allocation2 + $0x44] sm:$0x1] }
  0xed   : > { %12027 = vmatpush3.bf16.msra.mxu0 %v12261_v0  ;;  %v3045_v50 = vshrl.u32 %v2954_v38, 16  ;;  %v3048_v52 = vshll.u32 %v2954_v38, 16  ;;  %v3054_v59 = vshll.u32 %v2955_v54, 16  ;;  %v3058_v60 = vshrl.u32 %v2955_v54, 16  ;;  %v12262_v54 = vld [vmem:[#allocation2 + $0x30] sm:$0xff]  }
  0xee   : > { %12028 = vmatprep.subr.bf16.mxu0 %v12264_v28  ;;  %v2107_v32 = vrot.slane %v2106_v44, 4  ;;  %4998 = vmatprep.mubr.bf16.mxu1 %v10592_v48  ;;  %v2116_v11 = vor.u32 %v2115_v16, %v2111_v20  ;;  %v3064_v53 = vshll.u32 %v2956_v45, 16  ;;  %v10546_v62 = vrot.slane %v2524_v46, 9  ;;  %v2528_v48 = vld [vmem:[#allocation2 + $0x40] sm:$0xf] }
  0xef   : > { %v3047_v51 = vrot.slane %v3045_v50, 4  ;;  %4999 = vmatmul.mubr.bf16.gmra.mrb[68].mxu1 %v12260_v57  ;;  %v3050_v1 = vrot.slane %v3048_v52, 5  ;;  %v3056_v2 = vrot.slane %v3054_v59, 5  ;;  %v3060_v55 = vrot.slane %v3058_v60, 4 }
  0xf0   : > { %4838 = vmatmul.mubr.bf16.gmra.mrb[68].mxu0 %v10528_v29  ;;  %v2112_v0 = vsel %vm12706_vm14, %v2107_v32, %v2111_v20  ;;  %v2117_v7 = vrot.slane %v2116_v11, 4  ;;  %v3066_v9 = vrot.slane %v3064_v53, 5  ;;  %v2634_v10 = vrot.slane %v2525_v8, 5  ;;  %v12276_v11 = vld [vmem:[%s16153_s1 + $0x230] sm:$0xff]  }
  0xf1   : > { %4845 = vmatprep.mubr.bf16.mxu0 %v10561_v21  ;;  %12029 = vmatpush3.bf16.msra.mxu0 %v12264_v28  ;;  %v2637_v13 = vrot.slane %v2526_v61, 5  ;;  %v3051_v14 = vor.u32 %v3050_v1, %v3047_v51  ;;  %v3061_v15 = vor.u32 %v3060_v55, %v3056_v2  ;;  %v2124_v19 = vshrl.u32 %v2012_v63, 16  ;;  %v2957_v28 = vld [vmem:[#allocation2 + $0x3c] sm:$0xf] }
  0xf2   : > { %12030 = vmatprep.subr.bf16.mxu0 %v12267_v34  ;;  %v2127_v58 = vshll.u32 %v2012_v63, 16  ;;  %v2122_v3 = vsel %vm12706_vm14, %v2117_v7, %v2121_v49  ;;  %v2635_v23 = vsel %vm12686_vm11, %v10546_v62, %v2634_v10  ;;  %v2636_v24 = vrot.slane %v2634_v10, 4  ;;  %v2527_v21 = vld [vmem:[#allocation2 + $0x3c] sm:$0xe] }
  0xf3   : > { %v2133_v27 = vshll.u32 %v2013_v18, 16  ;;  %v10529_v29 = vcombine.low %v2112_v0, %v2122_v3  ;;  %v3052_v22 = vrot.slane %v3051_v14, 4  ;;  %v3062_v56 = vrot.slane %v3061_v15, 4  ;;  %v2015_v61 = vld [vmem:[#allocation2 + $0x3c] sm:$0xf] }
  0xf4   : > { %v2126_v30 = vrot.slane %v2124_v19, 4  ;;  %v2638_v25 = vsel %vm12686_vm11, %v2636_v24, %v2637_v13  ;;  %v2129_v35 = vrot.slane %v2127_v58, 5  ;;  %v2137_v38 = vshrl.u32 %v2013_v18, 16  ;;  %v2017_v19 = vld [vmem:[#allocation2 + $0x44] sm:$0x1] }
  0xf5   : > { %12031 = vmatpush3.bf16.msra.mxu0 %v12267_v34  ;;  %v2135_v36 = vrot.slane %v2133_v27, 5  ;;  %v3057_v41 = vsel %vm12706_vm14, %v3052_v22, %v3056_v2  ;;  %v3067_v42 = vsel %vm12706_vm14, %v3062_v56, %v3066_v9  ;;  %v10562_v43 = vcombine.low %v2635_v23, %v2638_v25  ;;  %v2529_v34 = vld [vmem:[#allocation2 + $0x44] sm:$0x1]  ;;  %v2016_v9 = vld [vmem:[#allocation2 + $0x40] sm:$0xf] }
  0xf6   : > { %12032 = vmatprep.subr.bf16.mxu0 %v12270_v6  ;;  %v2143_v57 = vshll.u32 %v2014_v26, 16  ;;  %v10593_v44 = vcombine.low %v3057_v41, %v3067_v42  ;;  %v2130_v20 = vor.u32 %v2129_v35, %v2126_v30  ;;  %v2139_v45 = vrot.slane %v2137_v38, 4  ;;  %v2960_v27 = vld [vmem:[#allocation2 + $0x48] sm:$0xf] }
  0xf7   : > { %v3069_v46 = vshrl.u32 %v2957_v28, 16  ;;  %v3072_v49 = vshll.u32 %v2957_v28, 16  ;;  %v3078_v50 = vshll.u32 %v2958_v31, 16  ;;  %v3082_v8 = vshrl.u32 %v2958_v31, 16  ;;  %v12279_v28 = vld [vmem:[%s16153_s1 + $0x238] sm:$0xff]  }
  0xf8   : > { %4846 = vmatmul.mubr.bf16.gmra.mrb[72].mxu0 %v10529_v29  ;;  %v2145_v16 = vrot.slane %v2143_v57, 5  ;;  %5006 = vmatprep.mubr.bf16.mxu1 %v10593_v44  ;;  %v2131_v32 = vrot.slane %v2130_v20, 4  ;;  %v2140_v52 = vor.u32 %v2139_v45, %v2135_v36  ;;  %v3088_v60 = vshll.u32 %v2959_v39, 16  ;;  %v2961_v31 = vld [vmem:[#allocation2 + $0x4c] sm:$0xf] }
  0xf9   : > { %4853 = vmatprep.mubr.bf16.mxu0 %v10562_v43  ;;  %12033 = vmatpush3.bf16.msra.mxu0 %v12270_v6  ;;  %v3071_v59 = vrot.slane %v3069_v46, 4  ;;  %v3074_v51 = vrot.slane %v3072_v49, 5  ;;  %v3080_v53 = vrot.slane %v3078_v50, 5  ;;  %v3084_v62 = vrot.slane %v3082_v8, 4  ;;  %v2530_v41 = vld [vmem:[#allocation2 + $0x48] sm:$0xe] }
  0xfa   : > { %12034 = vmatprep.subr.bf16.mxu0 %v12273_v40  ;;  %5007 = vmatmul.mubr.bf16.gmra.mrb[72].mxu1 %v12262_v54  ;;  %v10547_v63 = vrot.slane %v2527_v21, 9  ;;  %v2136_v0 = vsel %vm12706_vm14, %v2131_v32, %v2135_v36  ;;  %v2141_v1 = vrot.slane %v2140_v52, 4  ;;  %v3090_v2 = vrot.slane %v3088_v60, 5  ;;  %v12263_v36 = vld [vmem:[#allocation2 + $0x3c] sm:$0xff]   ;;  %v2531_v21 = vld [vmem:[#allocation2 + $0x4c] sm:$0xf] }
  0xfb   : > { %v2641_v55 = vrot.slane %v2528_v48, 5  ;;  %v3075_v18 = vor.u32 %v3074_v51, %v3071_v59  ;;  %v3085_v6 = vor.u32 %v3084_v62, %v3080_v53  ;;  %v2644_v7 = vrot.slane %v2529_v34, 5  ;;  %v2532_v44 = vld [vmem:[#allocation2 + $0x50] sm:$0x1]  ;;  %v2018_v34 = vld [vmem:[#allocation2 + $0x48] sm:$0xf] }
  0xfc   : > { %v2148_v10 = vshrl.u32 %v2015_v61, 16  ;;  %v2146_v13 = vsel %vm12706_vm14, %v2141_v1, %v2145_v16  ;;  %v2151_v58 = vshll.u32 %v2015_v61, 16  ;;  %v2157_v56 = vshll.u32 %v2016_v9, 16 }
  0xfd   : > { %12035 = vmatpush3.bf16.msra.mxu0 %v12273_v40  ;;  %v2642_v14 = vsel %vm12686_vm11, %v10547_v63, %v2641_v55  ;;  %v2643_v15 = vrot.slane %v2641_v55, 4  ;;  %v10530_v3 = vcombine.low %v2136_v0, %v2146_v13  ;;  %v3076_v23 = vrot.slane %v3075_v18, 4  ;;  %v2962_v40 = vld [vmem:[#allocation2 + $0x50] sm:$0x1] }
  0xfe   : > { %12036 = vmatprep.subr.bf16.mxu0 %v12276_v11  ;;  %v3086_v24 = vrot.slane %v3085_v6, 4  ;;  %v2150_v26 = vrot.slane %v2148_v10, 4  ;;  %v2153_v22 = vrot.slane %v2151_v58, 5  ;;  %v2161_v30 = vshrl.u32 %v2016_v9, 16  ;;  %v2020_v10 = vld [vmem:[#allocation2 + $0x50] sm:$0x1] }
  0xff   : > { %v2645_v29 = vsel %vm12686_vm11, %v2643_v15, %v2644_v7  ;;  %v3081_v25 = vsel %vm12706_vm14, %v3076_v23, %v3080_v53  ;;  %v2167_v39 = vshll.u32 %v2017_v19, 16  ;;  %v2159_v43 = vrot.slane %v2157_v56, 5  ;;  %v2963_v15 = vld [vmem:[#allocation2 + $0x54] sm:$0xf] }
 0x100   : > { %4854 = vmatmul.mubr.bf16.gmra.mrb[76].mxu0 %v10530_v3  ;;  %v3091_v35 = vsel %vm12706_vm14, %v3086_v24, %v3090_v2  ;;  %v10563_v38 = vcombine.low %v2642_v14, %v2645_v29  ;;  %v2154_v54 = vor.u32 %v2153_v22, %v2150_v26  ;;  %v2163_v57 = vrot.slane %v2161_v30, 4  ;;  %v12265_v26 = vld [vmem:[#allocation2 + $0x48] sm:$0xff]   ;;  %v2964_v22 = vld [vmem:[#allocation2 + $0x58] sm:$0xf] }
 0x101   : > { %v10594_v42 = vcombine.low %v3081_v25, %v3091_v35  ;;  %12037 = vmatpush3.bf16.msra.mxu0 %v12276_v11  ;;  %v2169_v20 = vrot.slane %v2167_v39, 5  ;;  %v3093_v45 = vshrl.u32 %v2960_v27, 16  ;;  %v3096_v46 = vshll.u32 %v2960_v27, 16  ;;  %v2019_v11 = vld [vmem:[#allocation2 + $0x4c] sm:$0xf] }
 0x102   : > { %4861 = vmatprep.mubr.bf16.mxu0 %v10563_v38  ;;  %v3102_v48 = vshll.u32 %v2961_v31, 16  ;;  %12038 = vmatprep.subr.bf16.mxu0 %v12279_v28  ;;  %v2155_v16 = vrot.slane %v2154_v54, 4  ;;  %v2164_v49 = vor.u32 %v2163_v57, %v2159_v43  ;;  %v3106_v50 = vshrl.u32 %v2961_v31, 16  ;;  %v2965_v35 = vld [vmem:[#allocation2 + $0x5c] sm:$0x1] }
 0x103   : > { %5014 = vmatprep.mubr.bf16.mxu1 %v10594_v42  ;;  %v3112_v8 = vshll.u32 %v2962_v40, 16  ;;  %v3095_v52 = vrot.slane %v3093_v45, 4  ;;  %v3098_v59 = vrot.slane %v3096_v46, 5  ;;  %v10548_v61 = vrot.slane %v2530_v41, 9 }
 0x104   : > { %5015 = vmatmul.mubr.bf16.gmra.mrb[76].mxu1 %v12263_v36  ;;  %v3104_v60 = vrot.slane %v3102_v48, 5  ;;  %v2160_v51 = vsel %vm12706_vm14, %v2155_v16, %v2159_v43  ;;  %v2165_v53 = vrot.slane %v2164_v49, 4  ;;  %v3108_v62 = vrot.slane %v3106_v50, 4  ;;  %v2533_v36 = vld [vmem:[#allocation2 + $0x54] sm:$0xe] }
 0x105   : > { %v3114_v63 = vrot.slane %v3112_v8, 5  ;;  %12039 = vmatpush3.bf16.msra.mxu0 %v12279_v28  ;;  %v3099_v1 = vor.u32 %v3098_v59, %v3095_v52  ;;  %v2648_v2 = vrot.slane %v2531_v21, 5  ;;  %v2651_v55 = vrot.slane %v2532_v44, 5  ;;  %v2534_v44 = vld [vmem:[#allocation2 + $0x58] sm:$0xf] }
 0x106   : > { %v2172_v18 = vshrl.u32 %v2018_v34, 16  ;;  %v2170_v7 = vsel %vm12706_vm14, %v2165_v53, %v2169_v20  ;;  %v3109_v9 = vor.u32 %v3108_v62, %v3104_v60  ;;  %v2175_v13 = vshll.u32 %v2018_v34, 16  ;;  %v2535_v49 = vld [vmem:[#allocation2 + $0x5c] sm:$0x1]  ;;  %v2021_v59 = vld [vmem:[#allocation2 + $0x54] sm:$0xf] }
 0x107   : > { %v2181_v14 = vshll.u32 %v2019_v11, 16  ;;  %v10531_v19 = vcombine.low %v2160_v51, %v2170_v7  ;;  %v3100_v58 = vrot.slane %v3099_v1, 4  ;;  %v2649_v3 = vsel %vm12686_vm11, %v10548_v61, %v2648_v2  ;;  %v2022_v62 = vld [vmem:[#allocation2 + $0x58] sm:$0xf] }
 0x108   : > { %v2650_v23 = vrot.slane %v2648_v2, 4  ;;  %v3110_v24 = vrot.slane %v3109_v9, 4  ;;  %v2174_v27 = vrot.slane %v2172_v18, 4  ;;  %v2177_v28 = vrot.slane %v2175_v13, 5 }
 0x109   : > { %v13379_v32 = vpop.f32.mrb[0].mxu0  ;;  %v2183_v29 = vrot.slane %v2181_v14, 5  ;;  %4862 = vmatmul.mubr.bf16.gmra.mrb[80].mxu0 %v10531_v19  ;;  %v3105_v56 = vsel %vm12706_vm14, %v3100_v58, %v3104_v60  ;;  %v2185_v31 = vshrl.u32 %v2019_v11, 16  ;;  %v2191_v25 = vshll.u32 %v2020_v10, 16  ;;  %v2023_v14 = vld [vmem:[#allocation2 + $0x5c] sm:$0x1] }
 0x10a   : > { %v13383_v0 = vpop.f32.mrb[1].mxu0  ;;  %v2652_v30 = vsel %vm12686_vm11, %v2650_v23, %v2651_v55  ;;  %v3115_v38 = vsel %vm12706_vm14, %v3110_v24, %v3114_v63  ;;  %v2178_v40 = vor.u32 %v2177_v28, %v2174_v27  ;;  %v3117_v41 = vshrl.u32 %v2963_v15, 16  ;;  %v2966_v24 = vld [vmem:[#allocation2 + $0x60] sm:$0xf] }
 0x10b   : > { %v13385_v6 = vpop.f32.mrb[2].mxu0  ;;  %v10564_v39 = vcombine.low %v2649_v3, %v2652_v30  ;;  %v10595_v54 = vcombine.low %v3105_v56, %v3115_v38  ;;  %v2187_v43 = vrot.slane %v2185_v31, 4  ;;  %v2193_v57 = vrot.slane %v2191_v25, 5  ;;  %v2967_v30 = vld [vmem:[#allocation2 + $0x64] sm:$0xf] }
 0x10c   : > { %v3120_v21 = vshll.u32 %v2963_v15, 16  ;;  %v13399_v20 = vpop.f32.mrb[3].mxu0  ;;  %v2179_v45 = vrot.slane %v2178_v40, 4  ;;  %v3119_v46 = vrot.slane %v3117_v41, 4  ;;  %v3126_v48 = vshll.u32 %v2964_v22, 16 }
 0x10d   : > { %4869 = vmatprep.mubr.bf16.mxu0 %v10564_v39  ;;  %v3130_v16 = vshrl.u32 %v2964_v22, 16  ;;  %5022 = vmatprep.mubr.bf16.mxu1 %v10595_v54  ;;  %v2188_v50 = vor.u32 %v2187_v43, %v2183_v29  ;;  %v3136_v34 = vshll.u32 %v2965_v35, 16  ;;  %v10549_v52 = vrot.slane %v2533_v36, 9  ;;  %v2968_v38 = vld [vmem:[#allocation2 + $0x68] sm:$0x1] }
 0x10e   : > { %v13397_v42 = vpop.f32.mrb[0].mxu1  ;;  %v3122_v8 = vrot.slane %v3120_v21, 5  ;;  %5023 = vmatmul.mubr.bf16.gmra.mrb[80].mxu1 %v12265_v26  ;;  %v2184_v61 = vsel %vm12706_vm14, %v2179_v45, %v2183_v29  ;;  %v3128_v11 = vrot.slane %v3126_v48, 5  ;;  %v2655_v53 = vrot.slane %v2534_v44, 5  ;;  %v12266_v29 = vld [vmem:[#allocation2 + $0x54] sm:$0xff]  }
 0x10f   : > { %v13401_v60 = vpop.f32.mrb[1].mxu1  ;;  %v3132_v51 = vrot.slane %v3130_v16, 4  ;;  %v2189_v1 = vrot.slane %v2188_v50, 4  ;;  %v3138_v55 = vrot.slane %v3136_v34, 5  ;;  %v2658_v18 = vrot.slane %v2535_v49, 5 }
 0x110   : > { %v13405_v63 = vpop.f32.mrb[2].mxu1  ;;  %v3123_v2 = vor.u32 %v3122_v8, %v3119_v46  ;;  %v2656_v10 = vsel %vm12686_vm11, %v10549_v52, %v2655_v53  ;;  %v2657_v13 = vrot.slane %v2655_v53, 4  ;;  %v2196_v15 = vshrl.u32 %v2021_v59, 16  ;;  %v2536_v43 = vld [vmem:[#allocation2 + $0x60] sm:$0xe] }
 0x111   : > { %v13407_v7 = vpop.f32.mrb[3].mxu1  ;;  %v3133_v9 = vor.u32 %v3132_v51, %v3128_v11  ;;  %v2194_v19 = vsel %vm12706_vm14, %v2189_v1, %v2193_v57  ;;  %v2199_v3 = vshll.u32 %v2021_v59, 16  ;;  %v2205_v23 = vshll.u32 %v2022_v62, 16  ;;  %v2537_v48 = vld [vmem:[#allocation2 + $0x64] sm:$0xf] }
 0x112   : > { %v3124_v58 = vrot.slane %v3123_v2, 4  ;;  %v10532_v27 = vcombine.low %v2184_v61, %v2194_v19  ;;  %v2659_v22 = vsel %vm12686_vm11, %v2657_v13, %v2658_v18  ;;  %v2198_v56 = vrot.slane %v2196_v15, 4  ;;  %v2538_v16 = vld [vmem:[#allocation2 + $0x68] sm:$0x1]  ;;  %v2024_v52 = vld [vmem:[#allocation2 + $0x60] sm:$0xf] }
 0x113   : > { %v3134_v28 = vrot.slane %v3133_v9, 4  ;;  %v10565_v25 = vcombine.low %v2656_v10, %v2659_v22  ;;  %v2201_v35 = vrot.slane %v2199_v3, 5  ;;  %v2207_v36 = vrot.slane %v2205_v23, 5  ;;  %v2025_v53 = vld [vmem:[#allocation2 + $0x64] sm:$0xf] }
 0x114   : > { %v3129_v31 = vsel %vm12706_vm14, %v3124_v58, %v3128_v11  ;;  %4870 = vmatmul.mubr.bf16.gmra.mrb[84].mxu0 %v10532_v27  ;;  %v2209_v40 = vshrl.u32 %v2022_v62, 16  ;;  %v2215_v41 = vshll.u32 %v2023_v14, 16  ;;  %v3141_v54 = vshrl.u32 %v2966_v24, 16  ;;  %v2026_v23 = vld [vmem:[#allocation2 + $0x68] sm:$0x1] }
 0x115   : > { %v3139_v39 = vsel %vm12706_vm14, %v3134_v28, %v3138_v55  ;;  %4877 = vmatprep.mubr.bf16.mxu0 %v10565_v25  ;;  %v2202_v44 = vor.u32 %v2201_v35, %v2198_v56  ;;  %v3144_v45 = vshll.u32 %v2966_v24, 16  ;;  %v3150_v46 = vshll.u32 %v2967_v30, 16  ;;  %v2969_v25 = vld [vmem:[#allocation2 + $0x6c] sm:$0xf] }
 0x116   : > { %v10596_v21 = vcombine.low %v3129_v31, %v3139_v39  ;;  %v2211_v49 = vrot.slane %v2209_v40, 4  ;;  %v2217_v50 = vrot.slane %v2215_v41, 5  ;;  %v3143_v8 = vrot.slane %v3141_v54, 4  ;;  %v2970_v41 = vld [vmem:[#allocation2 + $0x70] sm:$0xf] }
 0x117   : > { %v3154_v34 = vshrl.u32 %v2967_v30, 16  ;;  %v2203_v59 = vrot.slane %v2202_v44, 4  ;;  %v3146_v61 = vrot.slane %v3144_v45, 5  ;;  %v3152_v11 = vrot.slane %v3150_v46, 5  ;;  %v2971_v46 = vld [vmem:[#allocation2 + $0x74] sm:$0x1] }
 0x118   : > { %5030 = vmatprep.mubr.bf16.mxu1 %v10596_v21  ;;  %v3160_v51 = vshll.u32 %v2968_v38, 16  ;;  %v2212_v62 = vor.u32 %v2211_v49, %v2207_v36  ;;  %v10550_v2 = vrot.slane %v2536_v43, 9  ;;  %v2662_v55 = vrot.slane %v2537_v48, 5  ;;  %v12268_v38 = vld [vmem:[#allocation2 + $0x60] sm:$0xff]   ;;  %v13435_v54 = vpop.f32.mrb[4].mxu1 }
 0x119   : > { %5031 = vmatmul.mubr.bf16.gmra.mrb[84].mxu1 %v12266_v29  ;;  %v3156_v1 = vrot.slane %v3154_v34, 4  ;;  %v2208_v9 = vsel %vm12706_vm14, %v2203_v59, %v2207_v36  ;;  %v3147_v10 = vor.u32 %v3146_v61, %v3143_v8  ;;  %v2665_v14 = vrot.slane %v2538_v16, 5  ;;  %v2539_v34 = vld [vmem:[#allocation2 + $0x6c] sm:$0xe] }
 0x11a   : > { %v13413_v26 = vpop.f32.mrb[4].mxu0  ;;  %v3162_v13 = vrot.slane %v3160_v51, 5  ;;  %v2213_v15 = vrot.slane %v2212_v62, 4  ;;  %v2663_v58 = vsel %vm12686_vm11, %v10550_v2, %v2662_v55  ;;  %v2664_v3 = vrot.slane %v2662_v55, 4  ;;  %v2541_v62 = vld [vmem:[#allocation2 + $0x74] sm:$0x1] }
 0x11b   : > { %v13421_v57 = vpop.f32.mrb[5].mxu0  ;;  %v3157_v19 = vor.u32 %v3156_v1, %v3152_v11  ;;  %v3148_v24 = vrot.slane %v3147_v10, 4  ;;  %v2220_v27 = vshrl.u32 %v2024_v52, 16  ;;  %v2223_v28 = vshll.u32 %v2024_v52, 16  ;;  %v13441_v52 = vpop.f32.mrb[5].mxu1 }
 0x11c   : > { %v13423_v18 = vpop.f32.mrb[6].mxu0  ;;  %v2229_v29 = vshll.u32 %v2025_v53, 16  ;;  %v2218_v22 = vsel %vm12706_vm14, %v2213_v15, %v2217_v50  ;;  %v2666_v30 = vsel %vm12686_vm11, %v2664_v3, %v2665_v14  ;;  %v2233_v31 = vshrl.u32 %v2025_v53, 16  ;;  %v2540_v53 = vld [vmem:[#allocation2 + $0x70] sm:$0xf] }
 0x11d   : > { %v3158_v56 = vrot.slane %v3157_v19, 4  ;;  %v10533_v35 = vcombine.low %v2208_v9, %v2218_v22  ;;  %v3153_v36 = vsel %vm12706_vm14, %v3148_v24, %v3152_v11  ;;  %v10566_v39 = vcombine.low %v2663_v58, %v2666_v30  ;;  %v13439_v48 = vpop.f32.mrb[7].mxu0  ;;  %v2027_v10 = vld [vmem:[#allocation2 + $0x6c] sm:$0xf]  ;;  %v2028_v58 = vld [vmem:[#allocation2 + $0x70] sm:$0xf] }
 0x11e   : > { %v2222_v40 = vrot.slane %v2220_v27, 4  ;;  %v2225_v21 = vrot.slane %v2223_v28, 5  ;;  %v2231_v44 = vrot.slane %v2229_v29, 5  ;;  %v2235_v45 = vrot.slane %v2233_v31, 4  ;;  %v13443_v28 = vpop.f32.mrb[6].mxu1 }
 0x11f   : > { %v3163_v43 = vsel %vm12706_vm14, %v3158_v56, %v3162_v13  ;;  %4878 = vmatmul.mubr.bf16.gmra.mrb[88].mxu0 %v10533_v35  ;;  %v2239_v49 = vshll.u32 %v2026_v23, 16  ;;  %v3165_v50 = vshrl.u32 %v2969_v25, 16  ;;  %v3168_v8 = vshll.u32 %v2969_v25, 16  ;;  %v2029_v31 = vld [vmem:[#allocation2 + $0x74] sm:$0x1]  ;;  %v13449_v25 = vpop.f32.mrb[7].mxu1 }
 0x120   : > { %v10597_v16 = vcombine.low %v3153_v36, %v3163_v43  ;;  %4885 = vmatprep.mubr.bf16.mxu0 %v10566_v39  ;;  %v2226_v59 = vor.u32 %v2225_v21, %v2222_v40  ;;  %v2236_v61 = vor.u32 %v2235_v45, %v2231_v44  ;;  %v3174_v11 = vshll.u32 %v2970_v41, 16  ;;  %v2972_v40 = vld [vmem:[#allocation2 + $0x78] sm:$0xf]  ;;  %v12269_v43 = vld [vmem:[#allocation2 + $0x6c] sm:$0xff]  }
 0x121   : > { %v3178_v51 = vshrl.u32 %v2970_v41, 16  ;;  %v2241_v1 = vrot.slane %v2239_v49, 5  ;;  %v3167_v2 = vrot.slane %v3165_v50, 4  ;;  %v3170_v55 = vrot.slane %v3168_v8, 5 }
 0x122   : > { %5038 = vmatprep.mubr.bf16.mxu1 %v10597_v16  ;;  %v3184_v9 = vshll.u32 %v2971_v46, 16  ;;  %v2227_v13 = vrot.slane %v2226_v59, 4  ;;  %v2237_v14 = vrot.slane %v2236_v61, 4  ;;  %v3176_v15 = vrot.slane %v3174_v11, 5  ;;  %v2973_v46 = vld [vmem:[#allocation2 + $0x7c] sm:$0xf] }
 0x123   : > { %5039 = vmatmul.mubr.bf16.gmra.mrb[88].mxu1 %v12268_v38  ;;  %v3180_v19 = vrot.slane %v3178_v51, 4  ;;  %v3171_v3 = vor.u32 %v3170_v55, %v3167_v2  ;;  %v10551_v24 = vrot.slane %v2539_v34, 9  ;;  %v2669_v27 = vrot.slane %v2540_v53, 5  ;;  %v2974_v34 = vld [vmem:[#allocation2 + $0x80] sm:$0x1] }
 0x124   : > { %v3186_v23 = vrot.slane %v3184_v9, 5  ;;  %v2232_v29 = vsel %vm12706_vm14, %v2227_v13, %v2231_v44  ;;  %v2242_v22 = vsel %vm12706_vm14, %v2237_v14, %v2241_v1  ;;  %v2672_v30 = vrot.slane %v2541_v62, 5  ;;  %v2542_v59 = vld [vmem:[#allocation2 + $0x78] sm:$0xe]  ;;  %v2543_v9 = vld [vmem:[#allocation2 + $0x7c] sm:$0xf] }
 0x125   : > { %v3181_v56 = vor.u32 %v3180_v19, %v3176_v15  ;;  %v10534_v35 = vcombine.low %v2232_v29, %v2242_v22  ;;  %v3172_v36 = vrot.slane %v3171_v3, 4  ;;  %v2670_v38 = vsel %vm12686_vm11, %v10551_v24, %v2669_v27  ;;  %v2030_v22 = vld [vmem:[#allocation2 + $0x78] sm:$0xf] }
 0x126   : > { %v2671_v39 = vrot.slane %v2669_v27, 4  ;;  %v2244_v21 = vshrl.u32 %v2027_v10, 16  ;;  %v2247_v45 = vshll.u32 %v2027_v10, 16  ;;  %v2253_v44 = vshll.u32 %v2028_v58, 16  ;;  %v13459_v10 = vpop.f32.mrb[8].mxu0 }
 0x127   : > { %v3182_v41 = vrot.slane %v3181_v56, 4  ;;  %4886 = vmatmul.mubr.bf16.gmra.mrb[92].mxu0 %v10534_v35  ;;  %v3177_v16 = vsel %vm12706_vm14, %v3172_v36, %v3176_v15  ;;  %v2257_v50 = vshrl.u32 %v2028_v58, 16  ;;  %v2263_v8 = vshll.u32 %v2029_v31, 16  ;;  %v2544_v58 = vld [vmem:[#allocation2 + $0x80] sm:$0x1]  ;;  %v13461_v3 = vpop.f32.mrb[9].mxu0 }
 0x128   : > { %v2673_v49 = vsel %vm12686_vm11, %v2671_v39, %v2672_v30  ;;  %v2246_v51 = vrot.slane %v2244_v21, 4  ;;  %v2249_v53 = vrot.slane %v2247_v45, 5  ;;  %v2255_v1 = vrot.slane %v2253_v44, 5  ;;  %v13463_v56 = vpop.f32.mrb[10].mxu0 }
 0x129   : > { %v3187_v61 = vsel %vm12706_vm14, %v3182_v41, %v3186_v23  ;;  %v10567_v11 = vcombine.low %v2670_v38, %v2673_v49  ;;  %v2259_v2 = vrot.slane %v2257_v50, 4  ;;  %v2265_v55 = vrot.slane %v2263_v8, 5 }
 0x12a   : > { %v10598_v62 = vcombine.low %v3177_v16, %v3187_v61  ;;  %v2250_v13 = vor.u32 %v2249_v53, %v2246_v51  ;;  %v3189_v14 = vshrl.u32 %v2972_v40, 16  ;;  %v3192_v15 = vshll.u32 %v2972_v40, 16 }
 0x12b   : > { %4893 = vmatprep.mubr.bf16.mxu0 %v10567_v11  ;;  %v3198_v19 = vshll.u32 %v2973_v46, 16  ;;  %v2260_v23 = vor.u32 %v2259_v2, %v2255_v1  ;;  %v3202_v24 = vshrl.u32 %v2973_v46, 16  ;;  %v3208_v27 = vshll.u32 %v2974_v34, 16  ;;  %v2031_v46 = vld [vmem:[#allocation2 + $0x7c] sm:$0xf] }
 0x12c   : > { %5046 = vmatprep.mubr.bf16.mxu1 %v10598_v62  ;;  %v10552_v29 = vrot.slane %v2542_v59, 9  ;;  %v2251_v30 = vrot.slane %v2250_v13, 4  ;;  %v3191_v31 = vrot.slane %v3189_v14, 4  ;;  %v3194_v35 = vrot.slane %v3192_v15, 5  ;;  %v2032_v34 = vld [vmem:[#allocation2 + $0x80] sm:$0x1] }
 0x12d   : > { %5047 = vmatmul.mubr.bf16.gmra.mrb[92].mxu1 %v12269_v43  ;;  %v3200_v36 = vrot.slane %v3198_v19, 5  ;;  %v2261_v38 = vrot.slane %v2260_v23, 4  ;;  %v3204_v39 = vrot.slane %v3202_v24, 4  ;;  %v3210_v40 = vrot.slane %v3208_v27, 5  ;;  %v13471_v59 = vpop.f32.mrb[8].mxu1 }
 0x12e   : > { %v2676_v41 = vrot.slane %v2543_v9, 5  ;;  %v2256_v21 = vsel %vm12706_vm14, %v2251_v30, %v2255_v1  ;;  %v3195_v45 = vor.u32 %v3194_v35, %v3191_v31  ;;  %v2679_v44 = vrot.slane %v2544_v58, 5  ;;  %v2975_v62 = vld [vmem:[#allocation2 + $0x84] sm:$0xf]  ;;  %v13473_v1 = vpop.f32.mrb[11].mxu0  ;;  %v12271_v9 = vld [vmem:[#allocation2 + $0x78] sm:$0xff]  }
 0x12f   : > { %v2268_v16 = vshrl.u32 %v2030_v22, 16  ;;  %v2266_v49 = vsel %vm12706_vm14, %v2261_v38, %v2265_v55  ;;  %v3205_v50 = vor.u32 %v3204_v39, %v3200_v36  ;;  %v2271_v53 = vshll.u32 %v2030_v22, 16  ;;  %v2976_v15 = vld [vmem:[#allocation2 + $0x88] sm:$0xf]  ;;  %v13477_v19 = vpop.f32.mrb[9].mxu1 }
 0x130   : > { %v2677_v43 = vsel %vm12686_vm11, %v10552_v29, %v2676_v41  ;;  %v2678_v8 = vrot.slane %v2676_v41, 4  ;;  %v10535_v61 = vcombine.low %v2256_v21, %v2266_v49  ;;  %v3196_v11 = vrot.slane %v3195_v45, 4  ;;  %v2977_v29 = vld [vmem:[#allocation2 + $0x8c] sm:$0x1]  ;;  %v2545_v22 = vld [vmem:[#allocation2 + $0x84] sm:$0xe] }
 0x131   : > { %v2270_v51 = vrot.slane %v2268_v16, 4  ;;  %v3206_v2 = vrot.slane %v3205_v50, 4  ;;  %v2277_v13 = vshll.u32 %v2031_v46, 16  ;;  %v2281_v14 = vshrl.u32 %v2031_v46, 16  ;;  %v2546_v39 = vld [vmem:[#allocation2 + $0x88] sm:$0xf] }
 0x132   : > { %v2680_v55 = vsel %vm12686_vm11, %v2678_v8, %v2679_v44  ;;  %4894 = vmatmul.mubr.bf16.gmra.mrb[96].mxu0 %v10535_v61  ;;  %v3201_v58 = vsel %vm12706_vm14, %v3196_v11, %v3200_v36  ;;  %v2273_v24 = vrot.slane %v2271_v53, 5  ;;  %v2287_v27 = vshll.u32 %v2032_v34, 16  ;;  %v13483_v41 = vpop.f32.mrb[10].mxu1  ;;  %v2547_v36 = vld [vmem:[#allocation2 + $0x8c] sm:$0x1] }
 0x133   : > { %v10568_v23 = vcombine.low %v2677_v43, %v2680_v55  ;;  %v3211_v30 = vsel %vm12706_vm14, %v3206_v2, %v3210_v40  ;;  %v2279_v31 = vrot.slane %v2277_v13, 5  ;;  %v2283_v35 = vrot.slane %v2281_v14, 4  ;;  %v13485_v8 = vpop.f32.mrb[11].mxu1 }
 0x134   : > { %v3213_v38 = vshrl.u32 %v2975_v62, 16  ;;  %v10599_v21 = vcombine.low %v3201_v58, %v3211_v30  ;;  %v2274_v45 = vor.u32 %v2273_v24, %v2270_v51  ;;  %v2289_v44 = vrot.slane %v2287_v27, 5  ;;  %v2033_v51 = vld [vmem:[#allocation2 + $0x84] sm:$0xf]  ;;  %v2978_v30 = vld [vmem:[#allocation2 + $0x90] sm:$0xf] }
 0x135   : > { %4901 = vmatprep.mubr.bf16.mxu0 %v10568_v23  ;;  %v3216_v46 = vshll.u32 %v2975_v62, 16  ;;  %v2284_v16 = vor.u32 %v2283_v35, %v2279_v31  ;;  %v3222_v50 = vshll.u32 %v2976_v15, 16  ;;  %v3226_v43 = vshrl.u32 %v2976_v15, 16  ;;  %v2034_v15 = vld [vmem:[#allocation2 + $0x88] sm:$0xf]  ;;  %v13493_v35 = vpop.f32.mrb[12].mxu0 }
 0x136   : > { %v3215_v49 = vrot.slane %v3213_v38, 4  ;;  %5054 = vmatprep.mubr.bf16.mxu1 %v10599_v21  ;;  %v2275_v40 = vrot.slane %v2274_v45, 4  ;;  %v3232_v61 = vshll.u32 %v2977_v29, 16  ;;  %v10553_v11 = vrot.slane %v2545_v22, 9  ;;  %v2035_v22 = vld [vmem:[#allocation2 + $0x8c] sm:$0x1] }
 0x137   : > { %v3218_v34 = vrot.slane %v3216_v46, 5  ;;  %5055 = vmatmul.mubr.bf16.gmra.mrb[96].mxu1 %v12271_v9  ;;  %v2285_v53 = vrot.slane %v2284_v16, 4  ;;  %v3224_v2 = vrot.slane %v3222_v50, 5  ;;  %v3228_v55 = vrot.slane %v3226_v43, 4  ;;  %v13495_v45 = vpop.f32.mrb[13].mxu0  ;;  %v12272_v43 = vld [vmem:[#allocation2 + $0x84] sm:$0xff]  }
 0x138   : > { %v2683_v13 = vrot.slane %v2546_v39, 5  ;;  %v2280_v62 = vsel %vm12706_vm14, %v2275_v40, %v2279_v31  ;;  %v3234_v58 = vrot.slane %v3232_v61, 5  ;;  %v2686_v23 = vrot.slane %v2547_v36, 5 }
 0x139   : > { %v3219_v14 = vor.u32 %v3218_v34, %v3215_v49  ;;  %v2290_v24 = vsel %vm12706_vm14, %v2285_v53, %v2289_v44  ;;  %v3229_v27 = vor.u32 %v3228_v55, %v3224_v2  ;;  %v2292_v21 = vshrl.u32 %v2033_v51, 16  ;;  %v13499_v49 = vpop.f32.mrb[14].mxu0 }
 0x13a   : > { %v2684_v29 = vsel %vm12686_vm11, %v10553_v11, %v2683_v13  ;;  %v2685_v9 = vrot.slane %v2683_v13, 4  ;;  %v10536_v38 = vcombine.low %v2280_v62, %v2290_v24  ;;  %v2295_v31 = vshll.u32 %v2033_v51, 16  ;;  %v2979_v11 = vld [vmem:[#allocation2 + $0x94] sm:$0xf]  ;;  %v2980_v62 = vld [vmem:[#allocation2 + $0x98] sm:$0x1] }
 0x13b   : > { %v3220_v39 = vrot.slane %v3219_v14, 4  ;;  %v3230_v46 = vrot.slane %v3229_v27, 4  ;;  %v2301_v44 = vshll.u32 %v2034_v15, 16  ;;  %v2305_v16 = vshrl.u32 %v2034_v15, 16  ;;  %v13505_v14 = vpop.f32.mrb[12].mxu1 }
 0x13c   : > { %v2687_v36 = vsel %vm12686_vm11, %v2685_v9, %v2686_v23  ;;  %4902 = vmatmul.mubr.bf16.gmra.mrb[100].mxu0 %v10536_v38  ;;  %v2294_v34 = vrot.slane %v2292_v21, 4  ;;  %v2297_v61 = vrot.slane %v2295_v31, 5  ;;  %v2311_v51 = vshll.u32 %v2035_v22, 16 }
 0x13d   : > { %v3225_v50 = vsel %vm12706_vm14, %v3220_v39, %v3224_v2  ;;  %v10569_v40 = vcombine.low %v2684_v29, %v2687_v36  ;;  %v3235_v53 = vsel %vm12706_vm14, %v3230_v46, %v3234_v58  ;;  %v2303_v55 = vrot.slane %v2301_v44, 5  ;;  %v13507_v39 = vpop.f32.mrb[15].mxu0 }
 0x13e   : > { %v2307_v13 = vrot.slane %v2305_v16, 4  ;;  %v10600_v23 = vcombine.low %v3225_v50, %v3235_v53  ;;  %v2298_v15 = vor.u32 %v2297_v61, %v2294_v34  ;;  %v3237_v24 = vshrl.u32 %v2978_v30, 16  ;;  %v13513_v50 = vpop.f32.mrb[13].mxu1 }
 0x13f   : > { %4909 = vmatprep.mubr.bf16.mxu0 %v10569_v40  ;;  %v3240_v27 = vshll.u32 %v2978_v30, 16  ;;  %v2313_v9 = vrot.slane %v2311_v51, 5  ;;  %v3246_v29 = vshll.u32 %v2979_v11, 16  ;;  %v3250_v38 = vshrl.u32 %v2979_v11, 16  ;;  %v2548_v30 = vld [vmem:[#allocation2 + $0x90] sm:$0xe] }
 0x140   : > { %v2308_v2 = vor.u32 %v2307_v13, %v2303_v55  ;;  %5062 = vmatprep.mubr.bf16.mxu1 %v10600_v23  ;;  %v2299_v21 = vrot.slane %v2298_v15, 4  ;;  %v3239_v58 = vrot.slane %v3237_v24, 4  ;;  %v3256_v46 = vshll.u32 %v2980_v62, 16  ;;  %v2549_v11 = vld [vmem:[#allocation2 + $0x94] sm:$0xf]  ;;  %v13521_v53 = vpop.f32.mrb[14].mxu1 }
 0x141   : > { %v3242_v31 = vrot.slane %v3240_v27, 5  ;;  %5063 = vmatmul.mubr.bf16.gmra.mrb[100].mxu1 %v12272_v43  ;;  %v3248_v36 = vrot.slane %v3246_v29, 5  ;;  %v3252_v44 = vrot.slane %v3250_v38, 4  ;;  %v13511_v16 = vadd.f32 %v13383_v0, %v13379_v32  ;;  %v2550_v43 = vld [vmem:[#allocation2 + $0x98] sm:$0x1] }
 0x142   : > { %v2309_v22 = vrot.slane %v2308_v2, 4  ;;  %v2304_v40 = vsel %vm12706_vm14, %v2299_v21, %v2303_v55  ;;  %v13519_v61 = vadd.f32 %v13399_v20, %v13385_v6  ;;  %v3258_v0 = vrot.slane %v3256_v46, 5  ;;  %v2036_v62 = vld [vmem:[#allocation2 + $0x90] sm:$0xf]  ;;  %v2037_v55 = vld [vmem:[#allocation2 + $0x94] sm:$0xf] }
 0x143   : > { %v3243_v34 = vor.u32 %v3242_v31, %v3239_v58  ;;  %v3253_v32 = vor.u32 %v3252_v44, %v3248_v36  ;;  %v13527_v51 = vadd.f32 %v13401_v60, %v13397_v42  ;;  %v10554_v24 = vrot.slane %v2548_v30, 9  ;;  %v2038_v6 = vld [vmem:[#allocation2 + $0x98] sm:$0x1]  ;;  %v2981_v58 = vld [vmem:[#allocation2 + $0x9c] sm:$0xf]  ;;  %v12274_v46 = vld [vmem:[#allocation2 + $0x90] sm:$0xff]  }
 0x144   : > { %v2314_v13 = vsel %vm12706_vm14, %v2309_v22, %v2313_v9  ;;  %v2690_v27 = vrot.slane %v2549_v11, 5  ;;  %v2693_v2 = vrot.slane %v2550_v43, 5  ;;  %v13531_v29 = vadd.f32 %v13407_v7, %v13405_v63  ;;  %v13533_v9 = vpop.f32.mrb[15].mxu1  ;;  %v2982_v7 = vld [vmem:[#allocation2 + $0xa0] sm:$0xf]  ;;  %v13541_v43 = vpop.f32.mrb[16].mxu0 }
 0x145   : > { %16184 = vst [vmem:[#allocation11_spill] sm:$0xff] %v13527_v51  ;;  %v10537_v23 = vcombine.low %v2304_v40, %v2314_v13  ;;  %v3244_v15 = vrot.slane %v3243_v34, 4  ;;  %v3254_v20 = vrot.slane %v3253_v32, 4  ;;  %v2316_v60 = vshrl.u32 %v2036_v62, 16 }
 0x146   : > { %16185 = vst [vmem:[#allocation12_spill] sm:$0xff] %v13531_v29  ;;  %v2319_v38 = vshll.u32 %v2036_v62, 16  ;;  %v2325_v21 = vshll.u32 %v2037_v55, 16  ;;  %v2691_v22 = vsel %vm12686_vm11, %v10554_v24, %v2690_v27  ;;  %v2692_v44 = vrot.slane %v2690_v27, 4  ;;  %v2983_v62 = vld [vmem:[#allocation2 + $0xa4] sm:$0x1] }
 0x147   : > { %4910 = vmatmul.mubr.bf16.gmra.mrb[104].mxu0 %v10537_v23  ;;  %v3249_v42 = vsel %vm12706_vm14, %v3244_v15, %v3248_v36  ;;  %v3259_v31 = vsel %vm12706_vm14, %v3254_v20, %v3258_v0  ;;  %v2329_v63 = vshrl.u32 %v2037_v55, 16  ;;  %v2318_v40 = vrot.slane %v2316_v60, 4  ;;  %v13545_v23 = vpop.f32.mrb[17].mxu0 }
 0x148   : > { %v10601_v30 = vcombine.low %v3249_v42, %v3259_v31  ;;  %v2321_v34 = vrot.slane %v2319_v38, 5  ;;  %v2327_v11 = vrot.slane %v2325_v21, 5  ;;  %v2694_v36 = vsel %vm12686_vm11, %v2692_v44, %v2693_v2  ;;  %v2551_v21 = vld [vmem:[#allocation2 + $0x9c] sm:$0xe]  ;;  %v13547_v31 = vpop.f32.mrb[18].mxu0 }
 0x149   : > { %v2331_v13 = vrot.slane %v2329_v63, 4  ;;  %v2335_v32 = vshll.u32 %v2038_v6, 16  ;;  %v3261_v0 = vshrl.u32 %v2981_v58, 16  ;;  %v10570_v15 = vcombine.low %v2691_v22, %v2694_v36  ;;  %v2553_v22 = vld [vmem:[#allocation2 + $0xa4] sm:$0x1] }
 0x14a   : > { %5070 = vmatprep.mubr.bf16.mxu1 %v10601_v30  ;;  %v2322_v24 = vor.u32 %v2321_v34, %v2318_v40  ;;  %v3264_v55 = vshll.u32 %v2981_v58, 16  ;;  %v3270_v20 = vshll.u32 %v2982_v7, 16  ;;  %v3274_v38 = vshrl.u32 %v2982_v7, 16  ;;  %v2039_v7 = vld [vmem:[#allocation2 + $0x9c] sm:$0xf] }
 0x14b   : > { %5071 = vmatmul.mubr.bf16.gmra.mrb[104].mxu1 %v12274_v46  ;;  %v2332_v27 = vor.u32 %v2331_v13, %v2327_v11  ;;  %v2337_v42 = vrot.slane %v2335_v32, 5  ;;  %v3263_v60 = vrot.slane %v3261_v0, 4  ;;  %4917 = vmatprep.mubr.bf16.mxu0 %v10570_v15  ;;  %v3280_v63 = vshll.u32 %v2983_v62, 16  ;;  %v13563_v13 = vpop.f32.mrb[16].mxu1  ;;  %v13567_v62 = vpop.f32.mrb[19].mxu0 }
 0x14c   : > { %v2323_v2 = vrot.slane %v2322_v24, 4  ;;  %v3266_v6 = vrot.slane %v3264_v55, 5  ;;  %v3272_v44 = vrot.slane %v3270_v20, 5  ;;  %v3276_v30 = vrot.slane %v3274_v38, 4  ;;  %v2040_v24 = vld [vmem:[#allocation2 + $0xa0] sm:$0xf] }
 0x14d   : > { %v2333_v5 = vrot.slane %v2332_v27, 4  ;;  %v13551_v58 = vadd.f32 %v13421_v57, %v13413_v26  ;;  %v13555_v46 = vadd.f32 %v13439_v48, %v13423_v18  ;;  %v13561_v36 = vadd.f32 %v13441_v52, %v13435_v54  ;;  %v13569_v18 = vpop.f32.mrb[17].mxu1  ;;  %v12275_v52 = vld [vmem:[#allocation2 + $0x9c] sm:$0xff]  }
 0x14e   : > { %v2328_v40 = vsel %vm12706_vm14, %v2323_v2, %v2327_v11  ;;  %v3267_v34 = vor.u32 %v3266_v6, %v3263_v60  ;;  %v3277_v57 = vor.u32 %v3276_v30, %v3272_v44  ;;  %v3282_v32 = vrot.slane %v3280_v63, 5  ;;  %v13571_v55 = vpop.f32.mrb[18].mxu1  ;;  %v2984_v6 = vld [vmem:[#allocation2 + $0xa8] sm:$0xf]  ;;  %v2985_v63 = vld [vmem:[#allocation2 + $0xac] sm:$0xf] }
 0x14f   : > { %16186 = vst [vmem:[#allocation13_spill] sm:$0xff] %v13551_v58  ;;  %16187 = vst [vmem:[#allocation14_spill] sm:$0xff] %v13555_v46  ;;  %v2338_v26 = vsel %vm12706_vm14, %v2333_v5, %v2337_v42  ;;  %v10555_v15 = vrot.slane %v2551_v21, 9  ;;  %v2697_v11 = vrot.slane %v2552_v12, 5  ;;  %v2700_v20 = vrot.slane %v2553_v22, 5  ;;  %v13577_v60 = vpop.f32.mrb[19].mxu1 }
 0x150   : > { %16188 = vst [vmem:[#allocation15_spill] sm:$0xff] %v13561_v36  ;;  %v10538_v48 = vcombine.low %v2328_v40, %v2338_v26  ;;  %v3268_v0 = vrot.slane %v3267_v34, 4  ;;  %v3278_v54 = vrot.slane %v3277_v57, 4  ;;  %v13575_v27 = vadd.f32 %v13449_v25, %v13443_v28  ;;  %v2041_v5 = vld [vmem:[#allocation2 + $0xa4] sm:$0x1]  ;;  %v13585_v34 = vpop.f32.mrb[20].mxu0 }
 0x151   : > { %v2340_v42 = vshrl.u32 %v2039_v7, 16  ;;  %v2698_v12 = vsel %vm12686_vm11, %v10555_v15, %v2697_v11  ;;  %v2699_v21 = vrot.slane %v2697_v11, 4  ;;  %v2343_v2 = vshll.u32 %v2039_v7, 16  ;;  %v2986_v40 = vld [vmem:[#allocation2 + $0xb0] sm:$0x1]  ;;  %v13591_v7 = vpop.f32.mrb[20].mxu1 }
 0x152   : > { %16189 = vst [vmem:[#allocation16_spill] sm:$0xff] %v13575_v27  ;;  %4918 = vmatmul.mubr.bf16.gmra.mrb[108].mxu0 %v10538_v48  ;;  %v3273_v38 = vsel %vm12706_vm14, %v3268_v0, %v3272_v44  ;;  %v3283_v30 = vsel %vm12706_vm14, %v3278_v54, %v3282_v32  ;;  %v2349_v25 = vshll.u32 %v2040_v24, 16  ;;  %v2353_v22 = vshrl.u32 %v2040_v24, 16  ;;  %v13589_v0 = vpop.f32.mrb[21].mxu0  ;;  %v13595_v24 = vpop.f32.mrb[21].mxu1 }
 0x153   : > { %v2342_v28 = vrot.slane %v2340_v42, 4  ;;  %v10602_v26 = vcombine.low %v3273_v38, %v3283_v30  ;;  %v2701_v44 = vsel %vm12686_vm11, %v2699_v21, %v2700_v20  ;;  %v2345_v57 = vrot.slane %v2343_v2, 5  ;;  %v13593_v54 = vpop.f32.mrb[22].mxu0 }
 0x154   : > { %v2359_v48 = vshll.u32 %v2041_v5, 16  ;;  %v10571_v15 = vcombine.low %v2698_v12, %v2701_v44  ;;  %v2351_v11 = vrot.slane %v2349_v25, 5  ;;  %v2355_v27 = vrot.slane %v2353_v22, 4  ;;  %v13597_v20 = vpop.f32.mrb[23].mxu0  ;;  %v13599_v5 = vpop.f32.mrb[22].mxu1 }
 0x155   : > { %v3285_v32 = vshrl.u32 %v2984_v6, 16  ;;  %5078 = vmatprep.mubr.bf16.mxu1 %v10602_v26  ;;  %v2346_v42 = vor.u32 %v2345_v57, %v2342_v28  ;;  %v3288_v30 = vshll.u32 %v2984_v6, 16  ;;  %v3294_v36 = vshll.u32 %v2985_v63, 16  ;;  %v2554_v22 = vld [vmem:[#allocation2 + $0xa8] sm:$0xe]  ;;  %v13601_v44 = vpop.f32.mrb[23].mxu1 }
 0x156   : > { %v2361_v38 = vrot.slane %v2359_v48, 5  ;;  %5079 = vmatmul.mubr.bf16.gmra.mrb[108].mxu1 %v12275_v52  ;;  %4925 = vmatprep.mubr.bf16.mxu0 %v10571_v15  ;;  %v2356_v21 = vor.u32 %v2355_v27, %v2351_v11  ;;  %v3298_v2 = vshrl.u32 %v2985_v63, 16  ;;  %v3304_v25 = vshll.u32 %v2986_v40, 16  ;;  %v2555_v28 = vld [vmem:[#allocation2 + $0xac] sm:$0xf]  ;;  %v13607_v57 = vpop.f32.mrb[24].mxu0 }
 0x157   : > { %v3287_v12 = vrot.slane %v3285_v32, 4  ;;  %v2347_v29 = vrot.slane %v2346_v42, 4  ;;  %v3290_v51 = vrot.slane %v3288_v30, 5  ;;  %v3296_v26 = vrot.slane %v3294_v36, 5  ;;  %v2556_v63 = vld [vmem:[#allocation2 + $0xb0] sm:$0x1] }
 0x158   : > { %v13605_v6 = vadd.f32 %v13461_v3, %v13459_v10  ;;  %v2357_v48 = vrot.slane %v2356_v21, 4  ;;  %v3300_v52 = vrot.slane %v3298_v2, 4  ;;  %v13611_v27 = vadd.f32 %v13473_v1, %v13463_v56  ;;  %v13613_v40 = vpop.f32.mrb[25].mxu0  ;;  %v2042_v3 = vld [vmem:[#allocation2 + $0xa8] sm:$0xf]  ;;  %v13625_v2 = vpop.f32.mrb[24].mxu1 }
 0x159   : > { %v2352_v15 = vsel %vm12706_vm14, %v2347_v29, %v2351_v11  ;;  %v3291_v36 = vor.u32 %v3290_v51, %v3287_v12  ;;  %v13619_v10 = vadd.f32 %v13477_v19, %v13471_v59  ;;  %v2043_v32 = vld [vmem:[#allocation2 + $0xac] sm:$0xf]  ;;  %v3306_v21 = vrot.slane %v3304_v25, 5  ;;  %v13623_v1 = vpop.f32.mrb[26].mxu0  ;;  %16193 = vst [vmem:[#allocation20_spill] sm:$0xff] %v13625_v2  ;;  %v12282_v51 = vld [vmem:[%s16155_s3 + $0x40] sm:$0xff]  }
 0x15a   : > { %16190 = vst [vmem:[#allocation17_spill] sm:$0xff] %v13605_v6  ;;  %16191 = vst [vmem:[#allocation18_spill] sm:$0xff] %v13611_v27  ;;  %v2362_v42 = vsel %vm12706_vm14, %v2357_v48, %v2361_v38  ;;  %v3301_v30 = vor.u32 %v3300_v52, %v3296_v26  ;;  %v10556_v56 = vrot.slane %v2554_v22, 9  ;;  %v2704_v59 = vrot.slane %v2555_v28, 5  ;;  %v13630_v12 = vpop.f32.mrb[27].mxu0  ;;  %v12283_v38 = vld [vmem:[%s16155_s3] sm:$0xff]   ;;  %11552 = vmatprep.subr.bf16.mxu1 %v12282_v51 }
 0x15b   : > { %16192 = vst [vmem:[#allocation19_spill] sm:$0xff] %v13619_v10  ;;  %v10539_v29 = vcombine.low %v2352_v15, %v2362_v42  ;;  %v3292_v11 = vrot.slane %v3291_v36, 4  ;;  %v2707_v19 = vrot.slane %v2556_v63, 5  ;;  %v13632_v10 = vpop.f32.mrb[25].mxu1  ;;  %v12277_v22 = vld [vmem:[#allocation2 + $0xa8] sm:$0xff]   ;;  %v13639_v48 = vadd.f32 %v13485_v8, %v13483_v41  ;;  %11553 = vmatpush3.bf16.msra.mxu1 %v12283_v38 }
 0x15c   : > { %16194 = vst [vmem:[#allocation21_spill] sm:$0xff] %v13632_v10  ;;  %v3302_v25 = vrot.slane %v3301_v30, 4  ;;  %v2044_v52 = vld [vmem:[#allocation2 + $0xb0] sm:$0x1]  ;;  %v2364_v27 = vshrl.u32 %v2042_v3, 16  ;;  %v2367_v15 = vshll.u32 %v2042_v3, 16  ;;  %v2705_v63 = vsel %vm12686_vm11, %v10556_v56, %v2704_v59 }
 0x15d   : > { %16195 = vst [vmem:[#allocation22_spill] sm:$0xff] %v13639_v48  ;;  %v13641_v36 = vpop.f32.mrb[26].mxu1  ;;  %4926 = vmatmul.mubr.bf16.gmra.mrb[112].mxu0 %v10539_v29  ;;  %v3297_v28 = vsel %vm12706_vm14, %v3292_v11, %v3296_v26  ;;  %v2706_v42 = vrot.slane %v2704_v59, 4  ;;  %v2373_v30 = vshll.u32 %v2043_v32, 16  ;;  %v2987_v6 = vld [vmem:[#allocation2 + $0xb4] sm:$0xf]  ;;  %v13820_v37 = vadd.f32 %v13595_v24, %v13591_v7 }
 0x15e   : > { %16196 = vst [vmem:[#allocation23_spill] sm:$0xff] %v13641_v36  ;;  %v13647_v46 = vpop.f32.mrb[27].mxu1  ;;  %v13649_v41 = vpop.f32.mrb[28].mxu0  ;;  %v3307_v8 = vsel %vm12706_vm14, %v3302_v25, %v3306_v21  ;;  %v2366_v3 = vrot.slane %v2364_v27, 4  ;;  %v2369_v51 = vrot.slane %v2367_v15, 5  ;;  %v2377_v29 = vshrl.u32 %v2043_v32, 16 }
 0x15f   : > { %16197 = vst [vmem:[#allocation24_spill] sm:$0xff] %v13647_v46  ;;  %16198 = vst [vmem:[#allocation25_spill] sm:$0xff] %v13649_v41  ;;  %v2988_v48 = vld [vmem:[#allocation2 + $0xb8] sm:$0xf]  ;;  %v13653_v58 = vpop.f32.mrb[29].mxu0  ;;  %v10603_v26 = vcombine.low %v3297_v28, %v3307_v8  ;;  %v2708_v56 = vsel %vm12686_vm11, %v2706_v42, %v2707_v19  ;;  %v2375_v11 = vrot.slane %v2373_v30, 5 }
 0x160   : > { %v2383_v59 = vshll.u32 %v2044_v52, 16  ;;  %v2989_v36 = vld [vmem:[#allocation2 + $0xbc] sm:$0x1]  ;;  %v10572_v46 = vcombine.low %v2705_v63, %v2708_v56  ;;  %v2370_v10 = vor.u32 %v2369_v51, %v2366_v3  ;;  %v2379_v41 = vrot.slane %v2377_v29, 4  ;;  %v13657_v2 = vpop.f32.mrb[30].mxu0  ;;  %v13659_v21 = vpop.f32.mrb[28].mxu1 }
 0x161   : > { %v3309_v38 = vshrl.u32 %v2987_v6, 16  ;;  %5086 = vmatprep.mubr.bf16.mxu1 %v10603_v26  ;;  %v3312_v32 = vshll.u32 %v2987_v6, 16  ;;  %v3318_v25 = vshll.u32 %v2988_v48, 16  ;;  %v3322_v15 = vshrl.u32 %v2988_v48, 16  ;;  %v13661_v28 = vpop.f32.mrb[31].mxu0  ;;  %v13663_v8 = vpop.f32.mrb[29].mxu1 }
 0x162   : > { %v2385_v27 = vrot.slane %v2383_v59, 5  ;;  %5087 = vmatmul.mubr.bf16.gmra.mrb[112].mxu1 %v12277_v22  ;;  %4933 = vmatprep.mubr.bf16.mxu0 %v10572_v46  ;;  %v2371_v19 = vrot.slane %v2370_v10, 4  ;;  %v2380_v52 = vor.u32 %v2379_v41, %v2375_v11  ;;  %v3328_v42 = vshll.u32 %v2989_v36, 16  ;;  %v2557_v30 = vld [vmem:[#allocation2 + $0xb4] sm:$0xe]  ;;  %v13665_v3 = vpop.f32.mrb[30].mxu1 }
 0x163   : > { %v3311_v63 = vrot.slane %v3309_v38, 4  ;;  %v3314_v51 = vrot.slane %v3312_v32, 5  ;;  %v3320_v29 = vrot.slane %v3318_v25, 5  ;;  %v3324_v26 = vrot.slane %v3322_v15, 4  ;;  %v2558_v48 = vld [vmem:[#allocation2 + $0xb8] sm:$0xf] }
 0x164   : > { %v13669_v6 = vadd.f32 %v13495_v45, %v13493_v35  ;;  %v13671_v56 = vpop.f32.mrb[31].mxu1  ;;  %v2376_v46 = vsel %vm12706_vm14, %v2371_v19, %v2375_v11  ;;  %v2381_v10 = vrot.slane %v2380_v52, 4  ;;  %v13677_v22 = vadd.f32 %v13507_v39, %v13499_v49  ;;  %v2559_v36 = vld [vmem:[#allocation2 + $0xbc] sm:$0x1]  ;;  %v2045_v35 = vld [vmem:[#allocation2 + $0xb4] sm:$0xf] }
 0x165   : > { %v3315_v41 = vor.u32 %v3314_v51, %v3311_v63  ;;  %v3325_v59 = vor.u32 %v3324_v26, %v3320_v29  ;;  %v3330_v38 = vrot.slane %v3328_v42, 5  ;;  %v13681_v32 = vadd.f32 %v13513_v50, %v13505_v14  ;;  %v13685_v25 = vpop.f32.mrb[32].mxu1  ;;  %v2046_v49 = vld [vmem:[#allocation2 + $0xb8] sm:$0xf]  ;;  %16218 = vst [vmem:[#allocation45_spill] sm:$0xff] %v13820_v37 }
 0x166   : > { %v13683_v45 = vpop.f32.mrb[32].mxu0  ;;  %16200 = vst [vmem:[#allocation27_spill] sm:$0xff] %v13685_v25  ;;  %v2386_v11 = vsel %vm12706_vm14, %v2381_v10, %v2385_v27  ;;  %v10557_v15 = vrot.slane %v2557_v30, 9  ;;  %v2711_v19 = vrot.slane %v2558_v48, 5  ;;  %v13691_v52 = vpop.f32.mrb[33].mxu1  ;;  %v12278_v14 = vld [vmem:[#allocation2 + $0xb4] sm:$0xff]   ;;  %v13701_v30 = vadd.f32 %v13533_v9, %v13521_v53 }
 0x167   : > { %16199 = vst [vmem:[#allocation26_spill] sm:$0xff] %v13681_v32  ;;  %v13689_v39 = vpop.f32.mrb[33].mxu0  ;;  %16202 = vst [vmem:[#allocation29_spill] sm:$0xff] %v13691_v52  ;;  %v10540_v63 = vcombine.low %v2376_v46, %v2386_v11  ;;  %v3316_v42 = vrot.slane %v3315_v41, 4  ;;  %v3326_v51 = vrot.slane %v3325_v59, 4  ;;  %v2714_v50 = vrot.slane %v2559_v36, 5 }
 0x168   : > { %16201 = vst [vmem:[#allocation28_spill] sm:$0xff] %v13689_v39  ;;  %v13693_v26 = vpop.f32.mrb[34].mxu0  ;;  %v13695_v32 = vpop.f32.mrb[34].mxu1  ;;  %v2712_v25 = vsel %vm12686_vm11, %v10557_v15, %v2711_v19  ;;  %v2713_v27 = vrot.slane %v2711_v19, 4  ;;  %16205 = vst [vmem:[#allocation32_spill] sm:$0xff] %v13701_v30  ;;  %v2388_v10 = vshrl.u32 %v2045_v35, 16 }
 0x169   : > { %16203 = vst [vmem:[#allocation30_spill] sm:$0xff] %v13693_v26  ;;  %16204 = vst [vmem:[#allocation31_spill] sm:$0xff] %v13695_v32  ;;  %v2047_v48 = vld [vmem:[#allocation2 + $0xbc] sm:$0x1]  ;;  %v13703_v52 = vpop.f32.mrb[35].mxu0  ;;  %v13705_v46 = vpop.f32.mrb[35].mxu1  ;;  %4934 = vmatmul.mubr.bf16.gmra.mrb[116].mxu0 %v10540_v63  ;;  %v3321_v36 = vsel %vm12706_vm14, %v3316_v42, %v3320_v29  ;;  %v3331_v41 = vsel %vm12706_vm14, %v3326_v51, %v3330_v38 }
 0x16a   : > { %16206 = vst [vmem:[#allocation33_spill] sm:$0xff] %v13703_v52  ;;  %16207 = vst [vmem:[#allocation34_spill] sm:$0xff] %v13705_v46  ;;  %v2391_v59 = vshll.u32 %v2045_v35, 16  ;;  %v2397_v11 = vshll.u32 %v2046_v49, 16  ;;  %v338_v15 = vld [vmem:[#allocation2 + $0xc8] sm:$0x1]  ;;  %v10604_v32 = vcombine.low %v3321_v36, %v3331_v41  ;;  %v2715_v53 = vsel %vm12686_vm11, %v2713_v27, %v2714_v50 }
 0x16b   : > { %v2990_v19 = vld [vmem:[#allocation2 + $0xc0] sm:$0xf]  ;;  %v2390_v9 = vrot.slane %v2388_v10, 4  ;;  %v2401_v30 = vshrl.u32 %v2046_v49, 16  ;;  %v2991_v52 = vld [vmem:[#allocation2 + $0xc4] sm:$0xf]  ;;  %v10573_v46 = vcombine.low %v2712_v25, %v2715_v53 }
 0x16c   : > { %v2393_v29 = vrot.slane %v2391_v59, 5  ;;  %v2399_v42 = vrot.slane %v2397_v11, 5  ;;  %v2407_v39 = vshll.u32 %v2047_v48, 16  ;;  %5094 = vmatprep.mubr.bf16.mxu1 %v10604_v32  ;;  %v339_v50 = vsel %vm12656_vm4, 0, %v338_v15 }
 0x16d   : > { %v2403_v51 = vrot.slane %v2401_v30, 4  ;;  %v3333_v27 = vshrl.u32 %v2990_v19, 16  ;;  %v3336_v49 = vshll.u32 %v2990_v19, 16  ;;  %5095 = vmatmul.mubr.bf16.gmra.mrb[116].mxu1 %v12278_v14  ;;  %4941 = vmatprep.mubr.bf16.mxu0 %v10573_v46  ;;  %340 = vst [vmem:[#allocation2 + $0xc8] sm:$0x1] %v339_v50  ;;  %v3342_v48 = vshll.u32 %v2991_v52, 16 }
 0x16e   : > { %v13713_v26 = vpop.f32.mrb[36].mxu0  ;;  %v2394_v25 = vor.u32 %v2393_v29, %v2390_v9  ;;  %v2409_v41 = vrot.slane %v2407_v39, 5  ;;  %v3346_v59 = vshrl.u32 %v2991_v52, 16  ;;  %v13731_v15 = vadd.f32 %v13545_v23, %v13541_v43  ;;  %v13733_v19 = vld [vmem:[#allocation2 + $0xc0] sm:$0xe] }
 0x16f   : > { %v13715_v63 = vpop.f32.mrb[36].mxu1  ;;  %v13717_v38 = vpop.f32.mrb[37].mxu0  ;;  %v2404_v32 = vor.u32 %v2403_v51, %v2399_v42  ;;  %v3335_v30 = vrot.slane %v3333_v27, 4  ;;  %v3338_v53 = vrot.slane %v3336_v49, 5  ;;  %v13738_v14 = vld [vmem:[%s16154_s2] ss:$0 sm:$0xff]  ;;  %v13744_v9 = vadd.f32 %v13567_v62, %v13547_v31 }
 0x170   : > { %16208 = vst [vmem:[#allocation35_spill] sm:$0xff] %v13715_v63  ;;  %v13719_v35 = vpop.f32.mrb[37].mxu1  ;;  %v13723_v10 = vpop.f32.mrb[38].mxu0  ;;  %v2395_v39 = vrot.slane %v2394_v25, 4  ;;  %v13740_v46 = vrot.slane %v3342_v48, 5  ;;  %v3348_v52 = vrot.slane %v3346_v59, 4  ;;  %v13752_v50 = vadd.f32 %v13569_v18, %v13563_v13 }
 0x171   : > { %16209 = vst [vmem:[#allocation36_spill] sm:$0xff] %v13719_v35  ;;  %v13725_v36 = vpop.f32.mrb[38].mxu1  ;;  %v13727_v11 = vpop.f32.mrb[39].mxu0  ;;  %v13746_v29 = vld [vmem:[#allocation2 + $0xc4] sm:$0xf]  ;;  %v2405_v43 = vrot.slane %v2404_v32, 4  ;;  %v3339_v23 = vor.u32 %v3338_v53, %v3335_v30 }
 0x172   : > { %16210 = vst [vmem:[#allocation37_spill] sm:$0xff] %v13725_v36  ;;  %v13748_v51 = vpop.f32.mrb[39].mxu1  ;;  %16212 = vst [vmem:[#allocation39_spill] sm:$0xff] %v13752_v50  ;;  %v2048_v27 = vld [vmem:[#allocation2 + $0xc0] sm:$0xf]  ;;  %v12284_v25 = vld [vmem:[%s16155_s3 + $0x48] sm:$0xff]   ;;  %v2400_v31 = vsel %vm12706_vm14, %v2395_v39, %v2399_v42  ;;  %v3349_v62 = vor.u32 %v3348_v52, %v13740_v46 }
 0x173   : > { %16211 = vst [vmem:[#allocation38_spill] sm:$0xff] %v13748_v51  ;;  %v2049_v49 = vld [vmem:[#allocation2 + $0xc4] sm:$0xf]  ;;  %v745_v48 = vrot.slane %v13282_v47, 4  ;;  %v285_v59 = vld [vmem:[#allocation2 + $0xcc] sm:$0x1]  ;;  %v2410_v18 = vsel %vm12706_vm14, %v2405_v43, %v2409_v41  ;;  %v13771_v47 = vadd.f32 %v13577_v60, %v13571_v55  ;;  %11554 = vmatprep.subr.bf16.mxu1 %v12284_v25  ;;  %v13786_v55 = vadd.f32 %v13519_v61, %v13738_v14 }
 0x174   : > { %v341_v32 = vld [vmem:[#allocation2 + $0xd4] sm:$0x1]  ;;  %v12285_v13 = vld [vmem:[%s16155_s3 + $0x8] sm:$0xff]   ;;  %v13766_v30 = vrot.slane %v3339_v23, 4  ;;  %v10558_v53 = vrot.slane %v13733_v19, 9  ;;  %v10541_v52 = vcombine.low %v2400_v31, %v2410_v18  ;;  %v2718_v50 = vrot.slane %v13746_v29, 5 }
 0x175   : > { %16213 = vst [vmem:[#allocation40_spill] sm:$0xff] %v13771_v47  ;;  %v2994_v42 = vld [vmem:[#allocation2 + $0xd0] sm:$0xf]  ;;  %v2412_v51 = vshrl.u32 %v2048_v27, 16  ;;  %v2415_v36 = vshll.u32 %v2048_v27, 16  ;;  %11555 = vmatpush3.bf16.msra.mxu1 %v12285_v13  ;;  %v13782_v19 = vadd.f32 %v13511_v16, %v13738_v14  ;;  %16215 = vst [vmem:[#allocation42_spill] sm:$0xff] %v13786_v55 }
 0x176   : > { %v3460_v35 = vld [vmem:[#allocation2 + $0x18] sm:$0xe]  ;;  %v906_v60 = vld [vmem:[#allocation2 + $0xc8] sm:$0x1]  ;;  %v13788_v43 = vrot.slane %v3349_v62, 4  ;;  %v2421_v29 = vshll.u32 %v2049_v49, 16  ;;  %4942 = vmatmul.mubr.bf16.gmra.mrb[120].mxu0 %v10541_v52 }
 0x177   : > { %16214 = vst [vmem:[#allocation41_spill] sm:$0xff] %v13782_v19  ;;  %v907_v25 = vsel %vm12649_vm3, %v745_v48, %v906_v60  ;;  %v2414_v31 = vrot.slane %v2412_v51, 4  ;;  %v2417_v13 = vrot.slane %v2415_v36, 5  ;;  %v2425_v16 = vshrl.u32 %v2049_v49, 16  ;;  %v3461_v60 = vld [vmem:[#allocation2 + $0x1c] sm:$0xf] }
 0x178   : > { %v13773_v39 = vpop.f32.mrb[40].mxu1  ;;  %908 = vst [vmem:[#allocation2 + $0xc8] sm:$0x1] %v907_v25  ;;  %v13800_v61 = vrot.slane %v2421_v29, 5  ;;  %v286_v62 = vsel %vm12649_vm3, 0, %v285_v59  ;;  %v342_v55 = vsel %vm12656_vm4, 0, %v341_v32  ;;  %v13810_v49 = vadd.f32 %v13589_v0, %v13585_v34 }
 0x179   : > { %v13778_v41 = vpop.f32.mrb[41].mxu1  ;;  %v3366_v52 = vshll.u32 %v2994_v42, 16  ;;  %v2418_v48 = vor.u32 %v2417_v13, %v2414_v31  ;;  %v2427_v51 = vrot.slane %v2425_v16, 4  ;;  %287 = vst [vmem:[#allocation2 + $0xcc] sm:$0x1] %v286_v62  ;;  %v3370_v36 = vshrl.u32 %v2994_v42, 16 }
 0x17a   : > { %v13792_v27 = vpop.f32.mrb[42].mxu1  ;;  %343 = vst [vmem:[#allocation2 + $0xd4] sm:$0x1] %v342_v55  ;;  %v13816_v59 = vadd.f32 %v13597_v20, %v13593_v54  ;;  %v3462_v32 = vld [vmem:[#allocation2 + $0x20] sm:$0x1]  ;;  %v10607_v25 = vrot.slane %v3460_v35, 9  ;;  %v3345_v34 = vsel %vm12706_vm14, %v13766_v30, %v13740_v46  ;;  %v2719_v0 = vsel %vm12686_vm11, %v10558_v53, %v2718_v50 }
 0x17b   : > { %v13776_v63 = vpop.f32.mrb[40].mxu0  ;;  %16216 = vst [vmem:[#allocation43_spill] sm:$0xff] %v13792_v27  ;;  %v13798_v47 = vpop.f32.mrb[43].mxu1  ;;  %v13812_v29 = vrot.slane %v3366_v52, 5  ;;  %v13822_v31 = vld [vmem:[#allocation2 + $0x24] sm:$0xe]  ;;  %v2428_v42 = vor.u32 %v2427_v51, %v13800_v61  ;;  %v13837_v13 = vadd.f32 %v13601_v44, %v13599_v5 }
 0x17c   : > { %v13790_v23 = vpop.f32.mrb[41].mxu0  ;;  %16217 = vst [vmem:[#allocation44_spill] sm:$0xff] %v13798_v47  ;;  %v3372_v54 = vrot.slane %v3370_v36, 4  ;;  %v13831_v20 = vld [vmem:[#allocation2 + $0x28] sm:$0xf]  ;;  %v2720_v7 = vrot.slane %v2718_v50, 4 }
 0x17d   : > { %v13796_v18 = vpop.f32.mrb[42].mxu0  ;;  %v13833_v55 = vld [vmem:[#allocation2 + $0x2c] sm:$0x1]  ;;  %v2419_v24 = vrot.slane %v2418_v48, 4  ;;  %v3558_v35 = vrot.slane %v3461_v60, 5  ;;  %16219 = vst [vmem:[#allocation46_spill] sm:$0xff] %v13837_v13  ;;  %v13851_v60 = vadd.f32 %v13613_v40, %v13607_v57 }
 0x17e   : > { %v13806_v19 = vpop.f32.mrb[43].mxu0  ;;  %v2429_v16 = vrot.slane %v2428_v42, 4  ;;  %v3373_v46 = vor.u32 %v3372_v54, %v13812_v29  ;;  %v3561_v30 = vrot.slane %v3462_v32, 5  ;;  %v10608_v53 = vrot.slane %v13822_v31, 9  ;;  %v16222_v31 = vld [vmem:[#allocation21_spill] sm:$0xff]  ;;  %v16224_v54 = vld [vmem:[#allocation23_spill] sm:$0xff] }
 0x17f   : > { %v13843_v62 = vsel %vm12686_vm11, %v10607_v25, %v3558_v35  ;;  %v3560_v52 = vrot.slane %v3558_v35, 4  ;;  %v3565_v51 = vrot.slane %v13831_v20, 5  ;;  %v2992_v36 = vld [vmem:[#allocation2 + $0xc8] sm:$0x1]  ;;  %v13855_v32 = vadd.f32 %v13630_v12, %v13623_v1  ;;  %v16221_v25 = vld [vmem:[#allocation20_spill] sm:$0xff] }
 0x180   : > { %v2562_v5 = vld [vmem:[#allocation2 + $0xc8] sm:$0x1]  ;;  %v13859_v42 = vadd.f32 %v16222_v31, %v16221_v25  ;;  %v16225_v20 = vld [vmem:[#allocation24_spill] sm:$0xff]  ;;  %v3352_v50 = vshll.u32 %v2992_v36, 16  ;;  %v2993_v37 = vld [vmem:[#allocation2 + $0xcc] sm:$0xf]  ;;  %v2424_v57 = vsel %vm12706_vm14, %v2419_v24, %v13800_v61 }
 0x181   : > { %v2050_v44 = vld [vmem:[#allocation2 + $0xc8] sm:$0x1]  ;;  %v13863_v35 = vadd.f32 %v16225_v20, %v16224_v54  ;;  %v2721_v33 = vrot.slane %v2562_v5, 5  ;;  %v2995_v40 = vld [vmem:[#allocation2 + $0xd4] sm:$0x1]  ;;  %v3357_v1 = vshrl.u32 %v2993_v37, 16  ;;  %v3562_v25 = vsel %vm12686_vm11, %v3560_v52, %v3561_v30 }
 0x182   : > { %v13847_v48 = vpop.f32.mrb[44].mxu1  ;;  %16223 = vst [vmem:[#allocation20_spill] sm:$0xff] %v13859_v42  ;;  %v2431_v13 = vshll.u32 %v2050_v44, 16  ;;  %v3360_v12 = vshll.u32 %v2993_v37, 16  ;;  %v3466_v31 = vld [vmem:[#allocation2 + $0x30] sm:$0xe]  ;;  %v10623_v37 = vcombine.low %v13843_v62, %v3562_v25 }
 0x183   : > { %16220 = vst [vmem:[#allocation47_spill] sm:$0xff] %v13847_v48  ;;  %16226 = vst [vmem:[#allocation21_spill] sm:$0xff] %v13863_v35  ;;  %v13865_v48 = vrot.slane %v3373_v46, 4  ;;  %v3354_v42 = vrot.slane %v3352_v50, 5  ;;  %v12280_v54 = vld [vmem:[#allocation2 + $0xc0] sm:$0xff]   ;;  %v2722_v36 = vsel %vm12686_vm11, %v2720_v7, %v2721_v33  ;;  %v3376_v44 = vshll.u32 %v2995_v40, 16 }
 0x184   : > { %v2433_v5 = vrot.slane %v2431_v13, 5  ;;  %v3467_v46 = vld [vmem:[#allocation2 + $0x34] sm:$0xf]  ;;  %v13874_v20 = vpop.f32.mrb[44].mxu0  ;;  %v13876_v35 = vpop.f32.mrb[45].mxu1  ;;  %v10574_v61 = vcombine.low %v2719_v0, %v2722_v36  ;;  %v3359_v24 = vrot.slane %v3357_v1, 4 }
 0x185   : > { %v3362_v47 = vrot.slane %v3360_v12, 5  ;;  %v3468_v27 = vld [vmem:[#allocation2 + $0x38] sm:$0x1]  ;;  %v13879_v30 = vpop.f32.mrb[45].mxu0  ;;  %v13881_v52 = vpop.f32.mrb[46].mxu1  ;;  %v3355_v33 = vsel %vm12706_vm14, %v13788_v43, %v3354_v42  ;;  %v3378_v13 = vrot.slane %v3376_v44, 5 }
 0x186   : > { %16227 = vst [vmem:[#allocation23_spill] sm:$0xff] %v13881_v52  ;;  %v2434_v7 = vsel %vm12706_vm14, %v2429_v16, %v2433_v5  ;;  %v3567_v50 = vrot.slane %v3565_v51, 4  ;;  %v13888_v40 = vld [vmem:[#allocation2 + $0x3c] sm:$0xe]  ;;  %v13890_v0 = vpop.f32.mrb[46].mxu0  ;;  %v13892_v1 = vpop.f32.mrb[47].mxu1  ;;  %v10605_v25 = vcombine.low %v3345_v34, %v3355_v33  ;;  %4949 = vmatprep.mubr.bf16.mxu0 %v10574_v61 }
 0x187   : > { %16228 = vst [vmem:[#allocation24_spill] sm:$0xff] %v13892_v1  ;;  %v16229_v62 = vld [vmem:[#allocation13_spill] sm:$0xff]  ;;  %v10542_v36 = vcombine.low %v2424_v57, %v2434_v7  ;;  %v3363_v52 = vor.u32 %v3362_v47, %v3359_v24  ;;  %v13898_v43 = vld [vmem:[#allocation2 + $0x40] sm:$0xf]  ;;  %v13900_v42 = vld [vmem:[#allocation2 + $0x44] sm:$0x1]  ;;  %v3566_v47 = vsel %vm12686_vm11, %v10608_v53, %v3565_v51  ;;  %v3379_v33 = vsel %vm12706_vm14, %v13865_v48, %v3378_v13 }
 0x188   : > { %v13896_v12 = vadd.f32 %v16229_v62, %v13738_v14  ;;  %v13902_v16 = vpop.f32.mrb[47].mxu0  ;;  %v12286_v5 = vld [vmem:[%s16155_s3 + $0x50] sm:$0xff]   ;;  %v16232_v62 = vld [vmem:[#allocation17_spill] sm:$0xff]  ;;  %v10609_v57 = vrot.slane %v3466_v31, 9  ;;  %5102 = vmatprep.mubr.bf16.mxu1 %v10605_v25  ;;  %v3572_v7 = vrot.slane %v3467_v46, 5  ;;  %v16233_v53 = vrot.slane %v13833_v55, 5 }
 0x189   : > { %v16230_v44 = vld [vmem:[#allocation14_spill] sm:$0xff]  ;;  %v13913_v34 = vadd.f32 %v16232_v62, %v13738_v14  ;;  %4950 = vmatmul.mubr.bf16.gmra.mrb[124].mxu0 %v10542_v36  ;;  %v3364_v24 = vrot.slane %v3363_v52, 4  ;;  %v3473_v62 = vld [vmem:[#allocation2 + $0x4c] sm:$0xf]  ;;  %5103 = vmatmul.mubr.bf16.gmra.mrb[120].mxu1 %v12280_v54  ;;  %v10610_v31 = vrot.slane %v13888_v40, 9  ;;  %v3579_v25 = vrot.slane %v13898_v43, 5 }
 0x18a   : > { %v13909_v1 = vadd.f32 %v16230_v44, %v13738_v14  ;;  %v12287_v61 = vld [vmem:[%s16155_s3 + $0x10] sm:$0xff]   ;;  %v3575_v44 = vrot.slane %v3468_v27, 5  ;;  %12040 = vmatprep.mubr.bf16.mxu0 %v10623_v37  ;;  %v3569_v51 = vsel %vm12686_vm11, %v3567_v50, %v16233_v53  ;;  %v16234_v52 = vld [vmem:[#allocation25_spill] sm:$0xff]  ;;  %v3573_v54 = vsel %vm12686_vm11, %v10609_v57, %v3572_v7  ;;  %v13942_v37 = vld [vmem:[#allocation2 + $0x58] sm:$0xf]  ;;  %11556 = vmatprep.subr.bf16.mxu1 %v12286_v5 }
 0x18b   : > { %v13931_v36 = vadd.f32 %v13653_v58, %v16234_v52  ;;  %v3474_v48 = vld [vmem:[#allocation2 + $0x50] sm:$0x1]  ;;  %v3369_v27 = vsel %vm12706_vm14, %v3364_v24, %v13812_v29  ;;  %v3574_v55 = vrot.slane %v3572_v7, 4  ;;  %v13940_v46 = vadd.f32 %v13661_v28, %v13657_v2  ;;  %11557 = vmatpush3.bf16.msra.mxu1 %v12287_v61 }
 0x18c   : > { %16231 = vst [vmem:[#allocation13_spill] sm:$0xff] %v13909_v1  ;;  %v3472_v1 = vld [vmem:[#allocation2 + $0x48] sm:$0xe]  ;;  %v16235_v13 = vld [vmem:[#allocation18_spill] sm:$0xff]  ;;  %v13950_v50 = vadd.f32 %v13669_v6, %v13738_v14  ;;  %v10606_v29 = vcombine.low %v3369_v27, %v3379_v33  ;;  %v3582_v43 = vrot.slane %v13900_v42, 5  ;;  %v10624_v2 = vcombine.low %v3566_v47, %v3569_v51 }
 0x18d   : > { %v13946_v58 = vadd.f32 %v16235_v13, %v13738_v14  ;;  %v12281_v40 = vld [vmem:[#allocation2 + $0xcc] sm:$0xff]   ;;  %v3576_v28 = vsel %vm12686_vm11, %v3574_v55, %v3575_v44  ;;  %v3581_v5 = vrot.slane %v3579_v25, 4  ;;  %v13959_v24 = vadd.f32 %v13663_v8, %v13659_v21  ;;  %v3475_v42 = vld [vmem:[#allocation2 + $0x54] sm:$0xe]  ;;  %v13963_v27 = vld [vmem:[#allocation2 + $0x5c] sm:$0x1] }
 0x18e   : > { %5110 = vmatprep.mubr.bf16.mxu1 %v10606_v29  ;;  %v10625_v6 = vcombine.low %v3573_v54, %v3576_v28  ;;  %v10611_v33 = vrot.slane %v3472_v1, 9  ;;  %v3586_v53 = vrot.slane %v3473_v62, 5  ;;  %v3589_v52 = vrot.slane %v3474_v48, 5  ;;  %v13983_v44 = vld [vmem:[#allocation2 + $0x60] sm:$0xe]  ;;  %v16241_v28 = vld [vmem:[#allocation30_spill] sm:$0xff] }
 0x18f   : > { %16236 = vst [vmem:[#allocation14_spill] sm:$0xff] %v13959_v24  ;;  %v13969_v47 = vadd.f32 %v13677_v22, %v13738_v14  ;;  %v13973_v21 = vadd.f32 %v13731_v15, %v13738_v14  ;;  %v13977_v8 = vadd.f32 %v13744_v9, %v13738_v14  ;;  %v13981_v1 = vadd.f32 %v13671_v56, %v13665_v3  ;;  %v13985_v62 = vld [vmem:[#allocation2 + $0x64] sm:$0xf]  ;;  %v13998_v3 = vld [vmem:[#allocation2 + $0x68] sm:$0x1] }
 0x190   : > { %v13953_v57 = vpop.f32.mrb[48].mxu1  ;;  %v13993_v15 = vadd.f32 %v13810_v49, %v13738_v14  ;;  %v3588_v48 = vrot.slane %v3586_v53, 4  ;;  %v3593_v9 = vrot.slane %v13942_v37, 5  ;;  %v16240_v54 = vld [vmem:[#allocation28_spill] sm:$0xff]  ;;  %v3580_v13 = vsel %vm12686_vm11, %v10610_v31, %v3579_v25  ;;  %v16242_v49 = vld [vmem:[#allocation33_spill] sm:$0xff] }
 0x191   : > { %v13961_v7 = vpop.f32.mrb[49].mxu1  ;;  %16237 = vst [vmem:[#allocation17_spill] sm:$0xff] %v13977_v8  ;;  %16238 = vst [vmem:[#allocation25_spill] sm:$0xff] %v13981_v1  ;;  %v11146_v55 = vadd.f32 %v16240_v54, %v13683_v45  ;;  %12041 = vmatmul.mubr.bf16.vlgmr.msra.gmra.mrb[128].mxu0 %v10624_v2  ;;  %v3583_v29 = vsel %vm12686_vm11, %v3581_v5, %v3582_v43  ;;  %v11149_v17 = vadd.f32 %v16242_v49, %v16241_v28  ;;  %v16243_v1 = vld [vmem:[#allocation27_spill] sm:$0xff]  ;;  %v16244_v24 = vld [vmem:[#allocation29_spill] sm:$0xff] }
 0x192   : > { %v13965_v61 = vpop.f32.mrb[50].mxu1  ;;  %v13987_v51 = vpop.f32.mrb[48].mxu0  ;;  %16239 = vst [vmem:[#allocation18_spill] sm:$0xff] %v13993_v15  ;;  %v11258_v37 = vadd.f32 %v16244_v24, %v16243_v1  ;;  %5111 = vmatmul.mubr.bf16.gmra.mrb[124].mxu1 %v12281_v40  ;;  %12044 = vmatprep.mubr.bf16.mxu0 %v10625_v6  ;;  %v3587_v45 = vsel %vm12686_vm11, %v10611_v33, %v3586_v53  ;;  %v3600_v25 = vrot.slane %v13985_v62, 5  ;;  %v14018_v43 = vld [vmem:[#allocation2 + $0x70] sm:$0xf] }
 0x193   : > { %v13989_v22 = vpop.f32.mrb[51].mxu1  ;;  %v14000_v56 = vpop.f32.mrb[49].mxu0  ;;  %v3590_v2 = vsel %vm12686_vm11, %v3588_v48, %v3589_v52  ;;  %v4574_v31 = vadd.f32 %v11146_v55, %v13738_v14  ;;  %v14024_v24 = vadd.f32 %v13816_v59, %v13738_v14  ;;  %v10612_v40 = vrot.slane %v3475_v42, 9  ;;  %v14031_v62 = vld [vmem:[#allocation2 + $0x6c] sm:$0xe]  ;;  %v16247_v49 = vld [vmem:[#allocation31_spill] sm:$0xff] }
 0x194   : > { %v14010_v15 = vpop.f32.mrb[50].mxu0  ;;  %v3596_v6 = vrot.slane %v13963_v27, 5  ;;  %v4577_v33 = vadd.f32 %v11149_v17, %v13738_v14  ;;  %v10626_v53 = vcombine.low %v3580_v13, %v3583_v29  ;;  %v3595_v1 = vrot.slane %v3593_v9, 4  ;;  %v14033_v54 = vld [vmem:[#allocation2 + $0x74] sm:$0x1]  ;;  %v16249_v29 = vld [vmem:[#allocation35_spill] sm:$0xff] }
 0x195   : > { %v14020_v5 = vpop.f32.mrb[51].mxu0  ;;  %16245 = vst [vmem:[#allocation28_spill] sm:$0xff] %v14024_v24  ;;  %v14028_v52 = vadd.f32 %v11258_v37, %v4574_v31  ;;  %v10613_v48 = vrot.slane %v13983_v44, 9  ;;  %v10627_v55 = vcombine.low %v3587_v45, %v3590_v2  ;;  %v3602_v28 = vrot.slane %v3600_v25, 4  ;;  %v16248_v42 = vld [vmem:[#allocation34_spill] sm:$0xff]  ;;  %v16250_v37 = vld [vmem:[#allocation36_spill] sm:$0xff] }
 0x196   : > { %v3603_v59 = vrot.slane %v13998_v3, 5  ;;  %v11261_v24 = vadd.f32 %v16248_v42, %v16247_v49  ;;  %v14038_v27 = vld [vmem:[#allocation2 + $0x7c] sm:$0xf]  ;;  %v3607_v17 = vrot.slane %v14018_v43, 5  ;;  %v11152_v13 = vadd.f32 %v13717_v38, %v13713_v26  ;;  %v14047_v45 = vld [vmem:[#allocation2 + $0x78] sm:$0xe] }
 0x197   : > { %16246 = vst [vmem:[#allocation30_spill] sm:$0xff] %v14028_v52  ;;  %v11155_v44 = vadd.f32 %v13727_v11, %v13723_v10  ;;  %v11264_v31 = vadd.f32 %v16250_v37, %v16249_v29  ;;  %v14053_v3 = vadd.f32 %v13851_v60, %v13738_v14  ;;  %v14057_v43 = vadd.f32 %v13855_v32, %v13738_v14  ;;  %v3486_v10 = vld [vmem:[#allocation2 + $0x80] sm:$0x1]  ;;  %v14065_v11 = vld [vmem:[#allocation2 + $0x88] sm:$0xf] }
 0x198   : > { %v14049_v2 = vpop.f32.mrb[52].mxu1  ;;  %v14061_v26 = vadd.f32 %v13931_v36, %v13738_v14  ;;  %v14063_v38 = vadd.f32 %v11261_v24, %v4577_v33  ;;  %v3594_v60 = vsel %vm12686_vm11, %v10612_v40, %v3593_v9  ;;  %v4582_v29 = vadd.f32 %v11152_v13, %v13738_v14  ;;  %v16256_v9 = vld [vmem:[#allocation38_spill] sm:$0xff]  ;;  %v14086_v13 = vld [vmem:[#allocation2 + $0x84] sm:$0xe] }
 0x199   : > { %16251 = vst [vmem:[#allocation33_spill] sm:$0xff] %v14053_v3  ;;  %16252 = vst [vmem:[#allocation27_spill] sm:$0xff] %v14057_v43  ;;  %v14069_v42 = vpop.f32.mrb[53].mxu1  ;;  %v4585_v32 = vadd.f32 %v11155_v44, %v13738_v14  ;;  %v3614_v37 = vrot.slane %v14038_v27, 5  ;;  %12045 = vmatmul.mubr.bf16.gmra.mrb[132].mxu0 %v10626_v53  ;;  %v3597_v33 = vsel %vm12686_vm11, %v3595_v1, %v3596_v6  ;;  %v3610_v52 = vrot.slane %v14033_v54, 5 }
 0x19a   : > { %16253 = vst [vmem:[#allocation29_spill] sm:$0xff] %v14061_v26  ;;  %16254 = vst [vmem:[#allocation31_spill] sm:$0xff] %v14063_v38  ;;  %v14067_v49 = vpop.f32.mrb[52].mxu0  ;;  %v14078_v24 = vpop.f32.mrb[54].mxu1  ;;  %v10614_v38 = vrot.slane %v14031_v62, 9  ;;  %v16255_v26 = vld [vmem:[#allocation37_spill] sm:$0xff]  ;;  %12048 = vmatprep.mubr.bf16.mxu0 %v10627_v55  ;;  %v3601_v53 = vsel %vm12686_vm11, %v10613_v48, %v3600_v25  ;;  %v3604_v6 = vsel %vm12686_vm11, %v3602_v28, %v3603_v59 }
 0x19b   : > { %v14076_v36 = vpop.f32.mrb[53].mxu0  ;;  %v11267_v40 = vadd.f32 %v16256_v9, %v16255_v26  ;;  %v14090_v27 = vpop.f32.mrb[55].mxu1  ;;  %v3609_v1 = vrot.slane %v3607_v17, 4  ;;  %v14096_v62 = vadd.f32 %v11264_v31, %v4582_v29  ;;  %v3489_v54 = vld [vmem:[#allocation2 + $0x8c] sm:$0x1]  ;;  %v10615_v26 = vrot.slane %v14047_v45, 9 }
 0x19c   : > { %v14088_v44 = vpop.f32.mrb[54].mxu0  ;;  %v3621_v3 = vrot.slane %v14065_v11, 5  ;;  %v11158_v55 = vadd.f32 %v13790_v23, %v13776_v63  ;;  %v14106_v8 = vld [vmem:[#allocation2 + $0x94] sm:$0xf]  ;;  %v12288_v25 = vld [vmem:[%s16155_s3 + $0x58] sm:$0xff]   ;;  %v3616_v28 = vrot.slane %v3614_v37, 4  ;;  %v11161_v31 = vadd.f32 %v13806_v19, %v13796_v18 }
 0x19d   : > { %16257 = vst [vmem:[#allocation34_spill] sm:$0xff] %v14096_v62  ;;  %v14098_v43 = vpop.f32.mrb[55].mxu0  ;;  %v14101_v9 = vadd.f32 %v11267_v40, %v4585_v32  ;;  %v12289_v48 = vld [vmem:[%s16155_s3 + $0x18] sm:$0xff]   ;;  %v3617_v59 = vrot.slane %v3486_v10, 5  ;;  %v11270_v45 = vadd.f32 %v13778_v41, %v13773_v39  ;;  %v14118_v11 = vld [vmem:[#allocation2 + $0x90] sm:$0xe]  ;;  %v14124_v23 = vadd.f32 %v13940_v46, %v13738_v14  ;;  %11558 = vmatprep.subr.bf16.mxu1 %v12288_v25 }
 0x19e   : > { %v14120_v63 = vld [vmem:[#allocation2 + $0x98] sm:$0x1]  ;;  %v10628_v29 = vcombine.low %v3594_v60, %v3597_v33  ;;  %v10629_v32 = vcombine.low %v3601_v53, %v3604_v6  ;;  %v4590_v40 = vadd.f32 %v11158_v55, %v13738_v14  ;;  %v14129_v10 = vld [vmem:[#allocation2 + $0xa0] sm:$0xf]  ;;  %v14133_v39 = vsel %vm12686_vm11, %v10614_v38, %v3607_v17  ;;  %v14139_v60 = vld [vmem:[#allocation2 + $0xac] sm:$0xf]  ;;  %11559 = vmatpush3.bf16.msra.mxu1 %v12289_v48 }
 0x19f   : > { %16258 = vst [vmem:[#allocation35_spill] sm:$0xff] %v14101_v9  ;;  %16259 = vst [vmem:[#allocation36_spill] sm:$0xff] %v14124_v23  ;;  %v14127_v9 = vld [vmem:[#allocation2 + $0x9c] sm:$0xe]  ;;  %v10616_v41 = vrot.slane %v14086_v13, 9  ;;  %v4593_v19 = vadd.f32 %v11161_v31, %v13738_v14  ;;  %v16261_v46 = vld [vmem:[#allocation44_spill] sm:$0xff]  ;;  %v3611_v33 = vsel %vm12686_vm11, %v3609_v1, %v3610_v52  ;;  %v3615_v17 = vsel %vm12686_vm11, %v10615_v26, %v3614_v37 }
 0x1a0   : > { %v16260_v18 = vld [vmem:[#allocation43_spill] sm:$0xff]  ;;  %v3623_v53 = vrot.slane %v3621_v3, 4  ;;  %v3624_v6 = vrot.slane %v3489_v54, 5  ;;  %v14143_v55 = vadd.f32 %v11270_v45, %v4590_v40  ;;  %v3618_v38 = vsel %vm12686_vm11, %v3616_v28, %v3617_v59  ;;  %v14152_v31 = vld [vmem:[#allocation2 + $0xa4] sm:$0x1] }
 0x1a1   : > { %v11273_v62 = vadd.f32 %v16261_v46, %v16260_v18  ;;  %v3628_v13 = vrot.slane %v14106_v8, 5  ;;  %v14154_v48 = vld [vmem:[#allocation2 + $0xa8] sm:$0xe]  ;;  %12049 = vmatmul.mubr.bf16.gmra.mrb[136].mxu0 %v10628_v29  ;;  %v10617_v52 = vrot.slane %v14118_v11, 9  ;;  %v3631_v1 = vrot.slane %v14120_v63, 5  ;;  %v16264_v11 = vld [vmem:[#allocation47_spill] sm:$0xff] }
 0x1a2   : > { %16262 = vst [vmem:[#allocation37_spill] sm:$0xff] %v14143_v55  ;;  %v3635_v37 = vrot.slane %v14129_v10, 5  ;;  %v11164_v54 = vadd.f32 %v13879_v30, %v13874_v20  ;;  %v14163_v26 = vld [vmem:[#allocation2 + $0xb0] sm:$0x1]  ;;  %v14165_v8 = vld [vmem:[#allocation2 + $0xb8] sm:$0xf]  ;;  %12052 = vmatprep.mubr.bf16.mxu0 %v10629_v32  ;;  %v10630_v28 = vcombine.low %v14133_v39, %v3611_v33  ;;  %v11167_v45 = vadd.f32 %v13902_v16, %v13890_v0 }
 0x1a3   : > { %v14150_v25 = vadd.f32 %v11273_v62, %v4593_v19  ;;  %v14156_v18 = vpop.f32.mrb[56].mxu0  ;;  %v10618_v59 = vrot.slane %v14127_v9, 9  ;;  %v11276_v63 = vadd.f32 %v13876_v35, %v16264_v11  ;;  %v10631_v20 = vcombine.low %v3615_v17, %v3618_v38  ;;  %v14183_v10 = vld [vmem:[#allocation2 + $0xb4] sm:$0xe]  ;;  %v14185_v9 = vld [vmem:[#allocation2 + $0xbc] sm:$0x1] }
 0x1a4   : > { %v14167_v62 = vpop.f32.mrb[57].mxu0  ;;  %v14179_v30 = vsel %vm12686_vm11, %v10616_v41, %v3621_v3  ;;  %v4598_v40 = vadd.f32 %v11164_v54, %v13738_v14  ;;  %v3642_v32 = vrot.slane %v14139_v60, 5  ;;  %v14189_v0 = vsel %vm12686_vm11, %v3623_v53, %v3624_v6  ;;  %v16265_v19 = vld [vmem:[#allocation23_spill] sm:$0xff]  ;;  %v16266_v46 = vld [vmem:[#allocation24_spill] sm:$0xff]  ;;  %v11292_v60 = vpop.f32.mrb[56].mxu1 }
 0x1a5   : > { %16263 = vst [vmem:[#allocation38_spill] sm:$0xff] %v14150_v25  ;;  %v14175_v29 = vpop.f32.mrb[58].mxu0  ;;  %v3630_v35 = vrot.slane %v3628_v13, 4  ;;  %v4601_v16 = vadd.f32 %v11167_v45, %v13738_v14  ;;  %v11279_v3 = vadd.f32 %v16266_v46, %v16265_v19  ;;  %v14194_v41 = vld [vmem:[#allocation2 + $0xc0] sm:$0xe]  ;;  %v3637_v17 = vrot.slane %v3635_v37, 4 }
 0x1a6   : > { %v11184_v39 = vpop.f32.mrb[59].mxu0  ;;  %v14196_v33 = vld [vmem:[#allocation2 + $0xc4] sm:$0xf]  ;;  %v3638_v38 = vrot.slane %v14152_v31, 5  ;;  %v14199_v54 = vadd.f32 %v11276_v63, %v4598_v40  ;;  %v10619_v11 = vrot.slane %v14154_v48, 9  ;;  %v11293_v6 = vpop.f32.mrb[57].mxu1  ;;  %v11170_v46 = vadd.f32 %v14000_v56, %v13987_v51 }
 0x1a7   : > { %v14202_v53 = vld [vmem:[#allocation2 + $0xd0] sm:$0xf]  ;;  %v3645_v45 = vrot.slane %v14163_v26, 5  ;;  %v14205_v25 = vadd.f32 %v11279_v3, %v4601_v16  ;;  %v14210_v55 = vld [vmem:[#allocation2 + $0xc8] sm:$0x1]  ;;  %v11295_v31 = vpop.f32.mrb[58].mxu1  ;;  %v3629_v48 = vsel %vm12686_vm11, %v10617_v52, %v3628_v13  ;;  %v11173_v40 = vadd.f32 %v14020_v5, %v14010_v15 }
 0x1a8   : > { %v14212_v23 = vld [vmem:[#allocation2 + $0xcc] sm:$0xe]  ;;  %v3644_v63 = vrot.slane %v3642_v32, 4  ;;  %v11282_v26 = vadd.f32 %v13961_v7, %v13953_v57  ;;  %v11296_v16 = vpop.f32.mrb[59].mxu1  ;;  %v14222_v3 = vsel %vm12686_vm11, %v10618_v59, %v3635_v37  ;;  %v10620_v51 = vrot.slane %v14183_v10, 9 }
 0x1a9   : > { %v3652_v56 = vrot.slane %v14185_v9, 5  ;;  %v4606_v19 = vadd.f32 %v11170_v46, %v13738_v14  ;;  %12053 = vmatmul.mubr.bf16.gmra.mrb[140].mxu0 %v10630_v28  ;;  %v4609_v13 = vadd.f32 %v11173_v40, %v13738_v14  ;;  %v3656_v15 = vrot.slane %v14196_v33, 5 }
 0x1aa   : > { %v11285_v57 = vadd.f32 %v13989_v22, %v13965_v61  ;;  %12056 = vmatprep.mubr.bf16.mxu0 %v10631_v20  ;;  %v3632_v7 = vsel %vm12686_vm11, %v3630_v35, %v3631_v1  ;;  %v16267_v5 = vrot.slane %v14165_v8, 5  ;;  %v3663_v28 = vrot.slane %v14202_v53, 5 }
 0x1ab   : > { %v14238_v59 = vadd.f32 %v11282_v26, %v4606_v19  ;;  %v14243_v46 = vsel %vm12686_vm11, %v3637_v17, %v3638_v38  ;;  %v3659_v40 = vrot.slane %v14210_v55, 5  ;;  %v10622_v61 = vrot.slane %v14212_v23, 9 }
 0x1ac   : > { %v14236_v37 = vrot.slane %v16267_v5, 4  ;;  %v14246_v52 = vadd.f32 %v11285_v57, %v4609_v13  ;;  %v10632_v22 = vcombine.low %v14179_v30, %v14189_v0  ;;  %v14253_v1 = vrot.slane %v3656_v15, 4  ;;  %v14283_v57 = vld [vmem:[#allocation2 + $0xd4] sm:$0x1] }
 0x1ad   : > { %v14257_v20 = vrot.slane %v3663_v28, 4  ;;  %v11176_v35 = vadd.f32 %v14076_v36, %v14067_v49  ;;  %v10633_v17 = vcombine.low %v3629_v48, %v3632_v7  ;;  %v11179_v38 = vadd.f32 %v14098_v43, %v14088_v44 }
 0x1ae   : > { %v11288_v19 = vadd.f32 %v14069_v42, %v14049_v2  ;;  %v11291_v30 = vadd.f32 %v14090_v27, %v14078_v24  ;;  %v10634_v0 = vcombine.low %v14222_v3, %v14243_v46  ;;  %v3643_v26 = vsel %vm12686_vm11, %v10619_v11, %v3642_v32  ;;  %v16268_v32 = vld [vmem:[#allocation41_spill] sm:$0xff]  ;;  %v16269_v11 = vld [vmem:[#allocation11_spill] sm:$0xff] }
 0x1af   : > { %v4614_v13 = vadd.f32 %v11176_v35, %v13738_v14  ;;  %v11182_v49 = vadd.f32 %v14167_v62, %v14156_v18  ;;  %v3646_v43 = vsel %vm12686_vm11, %v3644_v63, %v3645_v45  ;;  %v4617_v36 = vadd.f32 %v11179_v38, %v13738_v14  ;;  %v16270_v63 = vld [vmem:[#allocation42_spill] sm:$0xff]  ;;  %v16274_v35 = vld [vmem:[#allocation16_spill] sm:$0xff] }
 0x1b0   : > { %v11185_v2 = vadd.f32 %v11184_v39, %v14175_v29  ;;  %v11294_v42 = vadd.f32 %v11293_v6, %v11292_v60  ;;  %v11297_v27 = vadd.f32 %v11296_v16, %v11295_v31  ;;  %v4671_v3 = vadd.f32 %v16269_v11, %v16268_v32  ;;  %v16271_v29 = vld [vmem:[#allocation12_spill] sm:$0xff]  ;;  %v16272_v60 = vld [vmem:[#allocation15_spill] sm:$0xff] }
 0x1b1   : > { %v14278_v24 = vadd.f32 %v11288_v19, %v4614_v13  ;;  %v4622_v44 = vadd.f32 %v11182_v49, %v13738_v14  ;;  %v11298_v48 = vpop.f32.mrb[60].mxu1  ;;  %12057 = vmatmul.mubr.bf16.gmra.mrb[144].mxu0 %v10632_v22  ;;  %v14285_v18 = vadd.f32 %v11291_v30, %v4617_v36  ;;  %v4674_v39 = vadd.f32 %v16271_v29, %v16270_v63  ;;  %v12290_v31 = vld [vmem:[%s16155_s3 + $0x60] sm:$0xff]   ;;  %v16273_v22 = vld [vmem:[#allocation13_spill] sm:$0xff]  ;;  %v16276_v36 = vld [vmem:[#allocation22_spill] sm:$0xff] }
 0x1b2   : > { %v4625_v62 = vadd.f32 %v11185_v2, %v13738_v14  ;;  %v11299_v45 = vpop.f32.mrb[61].mxu1  ;;  %v14292_v6 = vadd.f32 %v16272_v60, %v13896_v12  ;;  %v12291_v16 = vld [vmem:[%s16155_s3 + $0x20] sm:$0xff]   ;;  %12060 = vmatprep.mubr.bf16.mxu0 %v10633_v17  ;;  %v14304_v38 = vadd.f32 %v16274_v35, %v16273_v22  ;;  %v16275_v12 = vld [vmem:[#allocation19_spill] sm:$0xff]  ;;  %v14314_v2 = vadd.f32 %v16276_v36, %v13946_v58  ;;  %v16277_v17 = vld [vmem:[#allocation26_spill] sm:$0xff] }
 0x1b3   : > { %v14300_v7 = vadd.f32 %v11294_v42, %v4622_v44  ;;  %v11300_v5 = vadd.f32 %v11299_v45, %v11298_v48  ;;  %v11301_v46 = vpop.f32.mrb[62].mxu1  ;;  %v14308_v19 = vadd.f32 %v16275_v12, %v13913_v34  ;;  %v11186_v13 = vpop.f32.mrb[60].mxu0  ;;  %v14318_v42 = vadd.f32 %v16277_v17, %v13950_v50  ;;  %v16278_v44 = vld [vmem:[#allocation32_spill] sm:$0xff]  ;;  %11560 = vmatprep.subr.bf16.mxu1 %v12290_v31  ;;  %v16282_v58 = vld [vmem:[#allocation18_spill] sm:$0xff]  ;;  %v16283_v29 = vld [vmem:[#allocation45_spill] sm:$0xff] }
 0x1b4   : > { %v14310_v30 = vadd.f32 %v11297_v27, %v4625_v62  ;;  %v11302_v49 = vpop.f32.mrb[63].mxu1  ;;  %v14322_v48 = vadd.f32 %v16278_v44, %v13969_v47  ;;  %v11187_v32 = vpop.f32.mrb[61].mxu0  ;;  %v16279_v27 = vld [vmem:[#allocation39_spill] sm:$0xff]  ;;  %v16280_v62 = vld [vmem:[#allocation17_spill] sm:$0xff]  ;;  %v16281_v45 = vld [vmem:[#allocation40_spill] sm:$0xff]  ;;  %v14334_v60 = vadd.f32 %v16283_v29, %v16282_v58  ;;  %11561 = vmatpush3.bf16.msra.mxu1 %v12291_v16  ;;  %v10635_v44 = vcombine.low %v3643_v26, %v3646_v43 }
 0x1b5   : > { %v11303_v34 = vadd.f32 %v11302_v49, %v11301_v46  ;;  %v14326_v11 = vadd.f32 %v16279_v27, %v13973_v21  ;;  %v14330_v63 = vadd.f32 %v16281_v45, %v16280_v62  ;;  %v11188_v50 = vadd.f32 %v11187_v32, %v11186_v13  ;;  %v11189_v22 = vpop.f32.mrb[62].mxu0  ;;  %v16284_v47 = vld [vmem:[#allocation28_spill] sm:$0xff]  ;;  %v16285_v35 = vld [vmem:[#allocation46_spill] sm:$0xff]  ;;  %v16286_v46 = vld [vmem:[#allocation33_spill] sm:$0xff] }
 0x1b6   : > { %v14338_v31 = vadd.f32 %v16285_v35, %v16284_v47  ;;  %v16287_v12 = vld [vmem:[#allocation20_spill] sm:$0xff]  ;;  %v16288_v21 = vld [vmem:[#allocation27_spill] sm:$0xff]  ;;  %v16289_v36 = vld [vmem:[#allocation21_spill] sm:$0xff]  ;;  %v3666_v27 = vrot.slane %v14283_v57, 5  ;;  %v11190_v62 = vpop.f32.mrb[63].mxu0  ;;  %v16294_v26 = vrot.slane %v14165_v8, 5  ;;  %v3653_v57 = vsel %vm12686_vm11, %v14236_v37, %v3652_v56 }
 0x1b7   : > { %v14342_v49 = vadd.f32 %v16287_v12, %v16286_v46  ;;  %v14346_v17 = vadd.f32 %v16289_v36, %v16288_v21  ;;  %v16290_v45 = vld [vmem:[#allocation29_spill] sm:$0xff]  ;;  %v16291_v16 = vld [vmem:[#allocation14_spill] sm:$0xff]  ;;  %v16292_v32 = vld [vmem:[#allocation36_spill] sm:$0xff]  ;;  %v4630_v47 = vadd.f32 %v11188_v50, %v13738_v14  ;;  %v11191_v35 = vadd.f32 %v11190_v62, %v11189_v22 }
 0x1b8   : > { %v14351_v13 = vadd.f32 %v16291_v16, %v16290_v45  ;;  %v16293_v58 = vld [vmem:[#allocation25_spill] sm:$0xff]  ;;  %v3650_v43 = vsel %vm12686_vm11, %v10620_v51, %v16294_v26  ;;  %v3660_v8 = vsel %vm12686_vm11, %v14253_v1, %v3659_v40  ;;  %v3664_v1 = vsel %vm12686_vm11, %v10622_v61, %v3663_v28 }
 0x1b9   : > { %v14355_v29 = vadd.f32 %v16293_v58, %v16292_v32  ;;  %12061 = vmatmul.mubr.bf16.gmra.mrb[148].mxu0 %v10634_v0  ;;  %v4633_v46 = vadd.f32 %v11191_v35, %v13738_v14  ;;  %v14359_v12 = vadd.f32 %v11300_v5, %v4630_v47  ;;  %v16295_v14 = vrot.slane %v14194_v41, 9  ;;  %v11432_v51 = vpop.f32.mrb[64].mxu1  ;;  %v12292_v61 = vld [vmem:[%s16155_s3 + $0x68] sm:$0xff]  }
 0x1ba   : > { %12064 = vmatprep.mubr.bf16.mxu0 %v10635_v44  ;;  %v11433_v50 = vpop.f32.mrb[65].mxu1  ;;  %v10636_v56 = vcombine.low %v3650_v43, %v3653_v57  ;;  %11562 = vmatprep.subr.bf16.mxu1 %v12292_v61 }
 0x1bb   : > { %v3657_v0 = vsel %vm12686_vm11, %v16295_v14, %v3656_v15  ;;  %v14383_v10 = vadd.f32 %v11303_v34, %v4633_v46  ;;  %v11320_v9 = vpop.f32.mrb[64].mxu0  ;;  %v11434_v22 = vadd.f32 %v11433_v50, %v11432_v51  ;;  %v11435_v41 = vpop.f32.mrb[66].mxu1  ;;  %v3667_v34 = vsel %vm12686_vm11, %v14257_v20, %v3666_v27  ;;  %v12293_v20 = vld [vmem:[%s16155_s3 + $0x28] sm:$0xff]  }
 0x1bc   : > { %v11321_v5 = vpop.f32.mrb[65].mxu0  ;;  %v10637_v21 = vcombine.low %v3657_v0, %v3660_v8  ;;  %v11436_v15 = vpop.f32.mrb[67].mxu1  ;;  %v10638_v58 = vcombine.low %v3664_v1, %v3667_v34  ;;  %11563 = vmatpush3.bf16.msra.mxu1 %v12293_v20 }
 0x1bd   : > { %v11322_v37 = vadd.f32 %v11321_v5, %v11320_v9  ;;  %v11323_v33 = vpop.f32.mrb[66].mxu0  ;;  %v11437_v62 = vadd.f32 %v11436_v15, %v11435_v41 }
 0x1be   : > { %v11324_v36 = vpop.f32.mrb[67].mxu0 }
 0x1bf   : > { %v4832_v44 = vadd.f32 %v11322_v37, %v4671_v3  ;;  %v11325_v55 = vadd.f32 %v11324_v36, %v11323_v33 }
 0x1c1   : > { %12065 = vmatmul.mubr.bf16.gmra.mrb[152].mxu0 %v10636_v56  ;;  %v4835_v45 = vadd.f32 %v11325_v55, %v4674_v39  ;;  %v14385_v40 = vadd.f32 %v11434_v22, %v4832_v44 }
 0x1c2   : > { %12068 = vmatprep.mubr.bf16.mxu0 %v10637_v21  ;;  %v11438_v35 = vpop.f32.mrb[68].mxu1 }
 0x1c3   : > { %v11326_v16 = vpop.f32.mrb[68].mxu0  ;;  %v14396_v3 = vadd.f32 %v11437_v62, %v4835_v45  ;;  %v11439_v26 = vpop.f32.mrb[69].mxu1 }
 0x1c4   : > { %v11327_v32 = vpop.f32.mrb[69].mxu0  ;;  %v11440_v43 = vadd.f32 %v11439_v26, %v11438_v35  ;;  %v11441_v57 = vpop.f32.mrb[70].mxu1 }
 0x1c5   : > { %v11328_v39 = vadd.f32 %v11327_v32, %v11326_v16  ;;  %v11329_v47 = vpop.f32.mrb[70].mxu0  ;;  %v11442_v28 = vpop.f32.mrb[71].mxu1 }
 0x1c6   : > { %v11330_v46 = vpop.f32.mrb[71].mxu0  ;;  %v11443_v14 = vadd.f32 %v11442_v28, %v11441_v57 }
 0x1c7   : > { %v4840_v53 = vadd.f32 %v11328_v39, %v14292_v6  ;;  %v11331_v23 = vadd.f32 %v11330_v46, %v11329_v47 }
 0x1c9   : > { %12069 = vmatmul.mubr.bf16.gmra.mrb[156].mxu0 %v10638_v58  ;;  %v4843_v27 = vadd.f32 %v11331_v23, %v14304_v38  ;;  %v14406_v0 = vadd.f32 %v11440_v43, %v4840_v53 }
 0x1cb   : > { %v11332_v6 = vpop.f32.mrb[72].mxu0  ;;  %v14408_v8 = vadd.f32 %v11443_v14, %v4843_v27 }
 0x1cc   : > { %v11333_v9 = vpop.f32.mrb[73].mxu0 }
 0x1cd   : > { %v11334_v51 = vadd.f32 %v11333_v9, %v11332_v6  ;;  %v11335_v5 = vpop.f32.mrb[74].mxu0  ;;  %v11444_v37 = vpop.f32.mrb[72].mxu1 }
 0x1ce   : > { %v11336_v50 = vpop.f32.mrb[75].mxu0  ;;  %v11445_v22 = vpop.f32.mrb[73].mxu1 }
 0x1cf   : > { %v4848_v56 = vadd.f32 %v11334_v51, %v14308_v19  ;;  %v11337_v33 = vadd.f32 %v11336_v50, %v11335_v5  ;;  %v11446_v38 = vadd.f32 %v11445_v22, %v11444_v37  ;;  %v11447_v21 = vpop.f32.mrb[74].mxu1  ;;  %v12294_v50 = vld [vmem:[%s16155_s3 + $0xc0] sm:$0xff]  }
 0x1d0   : > { %v11448_v36 = vpop.f32.mrb[75].mxu1  ;;  %11664 = vmatprep.subr.bf16.mxu0 %v12294_v50  ;;  %v12303_v50 = vld [vmem:[%s16155_s3 + $0x98] sm:$0xff]  }
 0x1d1   : > { %v4851_v41 = vadd.f32 %v11337_v33, %v14314_v2  ;;  %v11449_v15 = vadd.f32 %v11448_v36, %v11447_v21  ;;  %v14412_v44 = vadd.f32 %v11446_v38, %v4848_v56  ;;  %v12297_v33 = vld [vmem:[%s16155_s3 + $0x30] sm:$0xff]  }
 0x1d3   : > { %v11338_v55 = vpop.f32.mrb[76].mxu0  ;;  %v14414_v62 = vadd.f32 %v11449_v15, %v4851_v41 }
 0x1d4   : > { %v11339_v45 = vpop.f32.mrb[77].mxu0 }
 0x1d5   : > { %v11340_v1 = vadd.f32 %v11339_v45, %v11338_v55  ;;  %v11341_v34 = vpop.f32.mrb[78].mxu0 }
 0x1d6   : > { %v11342_v16 = vpop.f32.mrb[79].mxu0 }
 0x1d7   : > { %v4856_v19 = vadd.f32 %v11340_v1, %v14318_v42  ;;  %v11450_v32 = vpop.f32.mrb[76].mxu1  ;;  %v11343_v58 = vadd.f32 %v11342_v16, %v11341_v34 }
 0x1d8   : > { %v11451_v39 = vpop.f32.mrb[77].mxu1 }
 0x1d9   : > { %v4859_v2 = vadd.f32 %v11343_v58, %v14322_v48  ;;  %v11452_v47 = vadd.f32 %v11451_v39, %v11450_v32  ;;  %v11453_v35 = vpop.f32.mrb[78].mxu1 }
 0x1da   : > { %v11454_v46 = vpop.f32.mrb[79].mxu1 }
 0x1db   : > { %v11455_v26 = vadd.f32 %v11454_v46, %v11453_v35  ;;  %v14418_v53 = vadd.f32 %v11452_v47, %v4856_v19  ;;  %v12299_v35 = vld [vmem:[%s16155_s3 + $0x88] sm:$0xff]  }
 0x1dc   : > { %v11344_v23 = vpop.f32.mrb[80].mxu0 }
 0x1dd   : > { %v14420_v43 = vadd.f32 %v11455_v26, %v4859_v2  ;;  %v11345_v57 = vpop.f32.mrb[81].mxu0  ;;  %v12298_v2 = vld [vmem:[%s16155_s3 + $0xc8] sm:$0xff]   ;;  %v12301_v26 = vld [vmem:[%s16155_s3 + $0x90] sm:$0xff]  }
 0x1de   : > { %v11346_v28 = vadd.f32 %v11345_v57, %v11344_v23  ;;  %v11347_v61 = vpop.f32.mrb[82].mxu0 }
 0x1df   : > { %v11348_v20 = vpop.f32.mrb[83].mxu0 }
 0x1e0   : > { %v4864_v42 = vadd.f32 %v11346_v28, %v14326_v11  ;;  %v11349_v27 = vadd.f32 %v11348_v20, %v11347_v61  ;;  %v12295_v11 = vld [vmem:[%s16155_s3 + $0x70] sm:$0xff]  }
 0x1e1   : > { %v11456_v14 = vpop.f32.mrb[80].mxu1  ;;  %11564 = vmatprep.subr.bf16.mxu1 %v12295_v11 }
 0x1e2   : > { %v4867_v6 = vadd.f32 %v11349_v27, %v14330_v63  ;;  %v11457_v48 = vpop.f32.mrb[81].mxu1  ;;  %v12296_v63 = vld [vmem:[%s16155_s3 + $0x80] sm:$0xff]   ;;  %11565 = vmatpush3.bf16.msra.mxu1 %v12297_v33 }
 0x1e3   : > { %v11458_v9 = vadd.f32 %v11457_v48, %v11456_v14  ;;  %v11459_v51 = vpop.f32.mrb[82].mxu1  ;;  %11665 = vmatpush3.bf16.msra.mxu0 %v12296_v63 }
 0x1e4   : > { %v11460_v5 = vpop.f32.mrb[83].mxu1  ;;  %11666 = vmatprep.subr.bf16.mxu0 %v12298_v2 }
 0x1e5   : > { %v11461_v56 = vadd.f32 %v11460_v5, %v11459_v51  ;;  %v14427_v37 = vadd.f32 %v11458_v9, %v4864_v42  ;;  %v12302_v9 = vld [vmem:[%s16155_s3 + $0xd8] sm:$0xff]  }
 0x1e7   : > { %v11350_v22 = vpop.f32.mrb[84].mxu0  ;;  %v14438_v41 = vadd.f32 %v11461_v56, %v4867_v6  ;;  %11667 = vmatpush3.bf16.msra.mxu0 %v12299_v35 }
 0x1e8   : > { %v11351_v38 = vpop.f32.mrb[85].mxu0 }
 0x1e9   : > { %v11352_v21 = vadd.f32 %v11351_v38, %v11350_v22  ;;  %v11353_v36 = vpop.f32.mrb[86].mxu0 }
 0x1ea   : > { %v11354_v15 = vpop.f32.mrb[87].mxu0 }
 0x1eb   : > { %v4872_v55 = vadd.f32 %v11352_v21, %v14334_v60  ;;  %v11355_v1 = vadd.f32 %v11354_v15, %v11353_v36 }
 0x1ec   : > { %v11462_v45 = vpop.f32.mrb[84].mxu1 }
 0x1ed   : > { %v11463_v34 = vpop.f32.mrb[85].mxu1  ;;  %v4875_v16 = vadd.f32 %v11355_v1, %v14338_v31  ;;  %v12300_v31 = vld [vmem:[%s16155_s3 + $0xd0] sm:$0xff]  }
 0x1ee   : > { %v11464_v19 = vadd.f32 %v11463_v34, %v11462_v45  ;;  %v11465_v32 = vpop.f32.mrb[86].mxu1  ;;  %11668 = vmatprep.subr.bf16.mxu0 %v12300_v31  ;;  %v12305_v45 = vld [vmem:[%s16155_s3 + $0x78] sm:$0xff]  }
 0x1ef   : > { %v11466_v58 = vpop.f32.mrb[87].mxu1  ;;  %11669 = vmatpush3.bf16.msra.mxu0 %v12301_v26  ;;  %11566 = vmatprep.subr.bf16.mxu1 %v12305_v45 }
 0x1f0   : > { %v11467_v39 = vadd.f32 %v11466_v58, %v11465_v32  ;;  %v14445_v47 = vadd.f32 %v11464_v19, %v4872_v55  ;;  %11670 = vmatprep.subr.bf16.mxu0 %v12302_v9  ;;  %v12304_v55 = vld [vmem:[%s16155_s3 + $0xe0] sm:$0xff]   ;;  %v12308_v58 = vld [vmem:[%s16155_s3 + $0xe8] sm:$0xff]  }
 0x1f2   : > { %v14450_v60 = vadd.f32 %v11467_v39, %v4875_v16  ;;  %v11356_v46 = vpop.f32.mrb[88].mxu0  ;;  %v12306_v16 = vld [vmem:[%s16155_s3 + $0xa0] sm:$0xff]  }
 0x1f3   : > { %v11357_v23 = vpop.f32.mrb[89].mxu0  ;;  %11671 = vmatpush3.bf16.msra.mxu0 %v12303_v50  ;;  %v12313_v50 = vld [vmem:[%s16155_s3 + $0xb8] sm:$0xff]  }
 0x1f4   : > { %v11358_v57 = vadd.f32 %v11357_v23, %v11356_v46  ;;  %v11359_v28 = vpop.f32.mrb[90].mxu0  ;;  %11672 = vmatprep.subr.bf16.mxu0 %v12304_v55 }
 0x1f5   : > { %v11360_v20 = vpop.f32.mrb[91].mxu0 }
 0x1f6   : > { %v11468_v61 = vpop.f32.mrb[88].mxu1  ;;  %v4880_v42 = vadd.f32 %v11358_v57, %v14342_v49  ;;  %v11361_v27 = vadd.f32 %v11360_v20, %v11359_v28  ;;  %v12311_v20 = vld [vmem:[%s16155_s3 + $0xb0] sm:$0xff]  }
 0x1f7   : > { %v11469_v14 = vpop.f32.mrb[89].mxu1  ;;  %11673 = vmatpush3.bf16.msra.mxu0 %v12306_v16 }
 0x1f8   : > { %v11470_v6 = vadd.f32 %v11469_v14, %v11468_v61  ;;  %v11471_v48 = vpop.f32.mrb[90].mxu1  ;;  %v4883_v51 = vadd.f32 %v11361_v27, %v14346_v17  ;;  %11674 = vmatprep.subr.bf16.mxu0 %v12308_v58  ;;  %v12310_v61 = vld [vmem:[%s16155_s3 + $0xf0] sm:$0xff]  }
 0x1f9   : > { %v11472_v5 = vpop.f32.mrb[91].mxu1 }
 0x1fa   : > { %v11473_v56 = vadd.f32 %v11472_v5, %v11471_v48  ;;  %v14466_v11 = vadd.f32 %v11470_v6, %v4880_v42  ;;  %v11362_v49 = vpop.f32.mrb[92].mxu0  ;;  %v16296_v42 = vld [vmem:[#allocation30_spill] sm:$0xff]  ;;  %v16297_v48 = vld [vmem:[#allocation31_spill] sm:$0xff] }
 0x1fb   : > { %v11363_v63 = vpop.f32.mrb[93].mxu0  ;;  %v12312_v5 = vld [vmem:[%s16155_s3 + $0xf8] sm:$0xff]  }
 0x1fc   : > { %v14468_v33 = vadd.f32 %v11473_v56, %v4883_v51  ;;  %v11364_v22 = vadd.f32 %v11363_v63, %v11362_v49  ;;  %v11365_v38 = vpop.f32.mrb[94].mxu0 }
 0x1fd   : > { %v11366_v21 = vpop.f32.mrb[95].mxu0 }
 0x1fe   : > { %v4888_v36 = vadd.f32 %v11364_v22, %v14351_v13  ;;  %v11367_v17 = vadd.f32 %v11366_v21, %v11365_v38  ;;  %v12307_v13 = vld [vmem:[%s16155_s3 + $0x38] sm:$0xff]  }
 0x1ff   : > { %11567 = vmatpush3.bf16.msra.mxu1 %v12307_v13 }
 0x200   : > { %v11474_v15 = vpop.f32.mrb[92].mxu1  ;;  %v4891_v1 = vadd.f32 %v11367_v17, %v14355_v29  ;;  %v12309_v29 = vld [vmem:[%s16155_s3 + $0xa8] sm:$0xff]   ;;  %v5984_v17 = vld [vmem:[#allocation2] sm:$0xf] }
 0x201   : > { %v11475_v34 = vpop.f32.mrb[93].mxu1  ;;  %11675 = vmatpush3.bf16.msra.mxu0 %v12309_v29  ;;  %v6033_v16 = vshrl.u32 %v5984_v17, 16  ;;  %v6036_v13 = vshll.u32 %v5984_v17, 16  ;;  %v12317_v29 = vld [vmem:[%s16155_s3 + $0x140] sm:$0xff]  }
 0x202   : > { %v11476_v19 = vadd.f32 %v11475_v34, %v11474_v15  ;;  %v11477_v32 = vpop.f32.mrb[94].mxu1  ;;  %11676 = vmatprep.subr.bf16.mxu0 %v12310_v61  ;;  %v5985_v15 = vld [vmem:[#allocation2 + $0x4] sm:$0xf]  ;;  %v5986_v34 = vld [vmem:[#allocation2 + $0x8] sm:$0x1]  ;;  %11776 = vmatprep.subr.bf16.mxu1 %v12317_v29 }
 0x203   : > { %v11478_v39 = vpop.f32.mrb[95].mxu1  ;;  %v6046_v58 = vshrl.u32 %v5985_v15, 16 }
 0x204   : > { %v11479_v2 = vadd.f32 %v11478_v39, %v11477_v32  ;;  %v14490_v35 = vadd.f32 %v11476_v19, %v4888_v36  ;;  %v6042_v19 = vshll.u32 %v5985_v15, 16  ;;  %v6052_v39 = vshll.u32 %v5986_v34, 16 }
 0x205   : > { %v11368_v46 = vpop.f32.mrb[96].mxu0  ;;  %11677 = vmatpush3.bf16.msra.mxu0 %v12311_v20  ;;  %v6048_v20 = vrot.slane %v6046_v58, 4 }
 0x206   : > { %v14492_v31 = vadd.f32 %v11479_v2, %v4891_v1  ;;  %v11369_v26 = vpop.f32.mrb[97].mxu0  ;;  %11678 = vmatprep.subr.bf16.mxu0 %v12312_v5  ;;  %v16298_v2 = vld [vmem:[#allocation34_spill] sm:$0xff]  ;;  %v6044_v61 = vrot.slane %v6042_v19, 5  ;;  %v6054_v5 = vrot.slane %v6052_v39, 5  ;;  %v16301_v39 = vld [vmem:[#allocation37_spill] sm:$0xff] }
 0x207   : > { %v11370_v23 = vadd.f32 %v11369_v26, %v11368_v46  ;;  %v11371_v57 = vpop.f32.mrb[98].mxu0 }
 0x208   : > { %v11372_v28 = vpop.f32.mrb[99].mxu0 }
 0x209   : > { %v4896_v27 = vadd.f32 %v11370_v23, %v16296_v42  ;;  %v11373_v14 = vadd.f32 %v11372_v28, %v11371_v57  ;;  %11679 = vmatpush3.bf16.msra.mxu0 %v12313_v50  ;;  %v6035_v23 = vrot.slane %v6033_v16, 4  ;;  %v6038_v57 = vrot.slane %v6036_v13, 5  ;;  %v16299_v42 = vld [vmem:[#allocation35_spill] sm:$0xff] }
 0x20a   : > { %v11480_v6 = vpop.f32.mrb[96].mxu1 }
 0x20b   : > { %v4899_v9 = vadd.f32 %v11373_v14, %v16297_v48  ;;  %v11481_v51 = vpop.f32.mrb[97].mxu1 }
 0x20c   : > { %v11482_v56 = vadd.f32 %v11481_v51, %v11480_v6  ;;  %v11483_v49 = vpop.f32.mrb[98].mxu1  ;;  %v6039_v6 = vor.u32 %v6038_v57, %v6035_v23  ;;  %v6049_v51 = vor.u32 %v6048_v20, %v6044_v61 }
 0x20d   : > { %v11484_v63 = vpop.f32.mrb[99].mxu1 }
 0x20e   : > { %v11485_v22 = vadd.f32 %v11484_v63, %v11483_v49  ;;  %v14508_v38 = vadd.f32 %v11482_v56, %v4896_v27  ;;  %v6040_v56 = vrot.slane %v6039_v6, 4  ;;  %v6050_v63 = vrot.slane %v6049_v51, 4 }
 0x20f   : > { %v11374_v21 = vpop.f32.mrb[100].mxu0 }
 0x210   : > { %v11375_v36 = vpop.f32.mrb[101].mxu0  ;;  %v14510_v55 = vadd.f32 %v11485_v22, %v4899_v9  ;;  %v6045_v17 = vsel %vm12706_vm14, %v6040_v56, %v6044_v61 }
 0x211   : > { %v11376_v45 = vadd.f32 %v11375_v36, %v11374_v21  ;;  %v11377_v1 = vpop.f32.mrb[102].mxu0 }
 0x212   : > { %v11378_v32 = vpop.f32.mrb[103].mxu0 }
 0x213   : > { %v4904_v46 = vadd.f32 %v11376_v45, %v16298_v2  ;;  %v11379_v26 = vadd.f32 %v11378_v32, %v11377_v1  ;;  %v6055_v45 = vsel %vm12706_vm14, %v6050_v63, %v6054_v5  ;;  %v12314_v1 = vld [vmem:[#allocation2] sm:$0xff]  }
 0x214   : > { %v11486_v28 = vpop.f32.mrb[100].mxu1  ;;  %v10760_v19 = vcombine.low %v6045_v17, %v6055_v45  ;;  %v12318_v32 = vld [vmem:[%s16155_s3 + $0x100] sm:$0xff]  }
 0x215   : > { %v4907_v27 = vadd.f32 %v11379_v26, %v16299_v42  ;;  %v11487_v14 = vpop.f32.mrb[101].mxu1  ;;  %v16302_v26 = vld [vmem:[#allocation38_spill] sm:$0xff] }
 0x216   : > { %v11488_v48 = vadd.f32 %v11487_v14, %v11486_v28  ;;  %v11489_v9 = vpop.f32.mrb[102].mxu1  ;;  %9431 = vmatprep.mubr.bf16.mxu1 %v10760_v19 }
 0x217   : > { %v11490_v50 = vpop.f32.mrb[103].mxu1  ;;  %9432 = vmatmul.mubr.bf16.vlgmr.msra.gmra.mrb[128].mxu1 %v12314_v1  ;;  %v12323_v1 = vld [vmem:[%s16155_s3 + $0x148] sm:$0xff]  }
 0x218   : > { %v11491_v49 = vadd.f32 %v11490_v50, %v11489_v9  ;;  %v14517_v22 = vadd.f32 %v11488_v48, %v4904_v46  ;;  %11777 = vmatpush3.bf16.msra.mxu1 %v12318_v32 }
 0x219   : > { %11778 = vmatprep.subr.bf16.mxu1 %v12323_v1 }
 0x21a   : > { %v11380_v21 = vpop.f32.mrb[104].mxu0  ;;  %v14523_v34 = vadd.f32 %v11491_v49, %v4907_v27 }
 0x21b   : > { %v11381_v15 = vpop.f32.mrb[105].mxu0 }
 0x21c   : > { %v11382_v16 = vadd.f32 %v11381_v15, %v11380_v21  ;;  %v11383_v13 = vpop.f32.mrb[106].mxu0 }
 0x21d   : > { %v11384_v58 = vpop.f32.mrb[107].mxu0 }
 0x21e   : > { %v4912_v29 = vadd.f32 %v11382_v16, %v16301_v39  ;;  %v11385_v2 = vadd.f32 %v11384_v58, %v11383_v13  ;;  %v11492_v46 = vpop.f32.mrb[104].mxu1 }
 0x21f   : > { %v11493_v57 = vpop.f32.mrb[105].mxu1 }
 0x220   : > { %v4915_v23 = vadd.f32 %v11385_v2, %v16302_v26  ;;  %v11494_v28 = vadd.f32 %v11493_v57, %v11492_v46  ;;  %v11495_v61 = vpop.f32.mrb[106].mxu1  ;;  %v12324_v57 = vld [vmem:[%s16155_s3 + $0x108] sm:$0xff]  }
 0x221   : > { %v11496_v20 = vpop.f32.mrb[107].mxu1  ;;  %11779 = vmatpush3.bf16.msra.mxu1 %v12324_v57 }
 0x222   : > { %v11497_v42 = vadd.f32 %v11496_v20, %v11495_v61  ;;  %v14530_v27 = vadd.f32 %v11494_v28, %v4912_v29 }
 0x224   : > { %v14532_v14 = vadd.f32 %v11497_v42, %v4915_v23 }
 0x225   : > { %v11386_v6 = vpop.f32.mrb[108].mxu0 }
 0x226   : > { %v11387_v48 = vpop.f32.mrb[109].mxu0 }
 0x227   : > { %v11388_v9 = vadd.f32 %v11387_v48, %v11386_v6  ;;  %v11389_v51 = vpop.f32.mrb[110].mxu0 }
 0x228   : > { %v11390_v5 = vpop.f32.mrb[111].mxu0 }
 0x229   : > { %v4920_v50 = vadd.f32 %v11388_v9, %v14199_v54  ;;  %v11391_v56 = vadd.f32 %v11390_v5, %v11389_v51  ;;  %v11498_v49 = vpop.f32.mrb[108].mxu1 }
 0x22a   : > { %v11499_v21 = vpop.f32.mrb[109].mxu1 }
 0x22b   : > { %v4923_v63 = vadd.f32 %v11391_v56, %v14205_v25  ;;  %v11500_v17 = vadd.f32 %v11499_v21, %v11498_v49  ;;  %v11501_v15 = vpop.f32.mrb[110].mxu1 }
 0x22c   : > { %v11502_v45 = vpop.f32.mrb[111].mxu1 }
 0x22d   : > { %v11503_v16 = vadd.f32 %v11502_v45, %v11501_v15  ;;  %v14539_v13 = vadd.f32 %v11500_v17, %v4920_v50 }
 0x22f   : > { %v14541_v19 = vadd.f32 %v11503_v16, %v4923_v63 }
 0x230   : > { %v11392_v32 = vpop.f32.mrb[112].mxu0 }
 0x231   : > { %v11393_v54 = vpop.f32.mrb[113].mxu0 }
 0x232   : > { %v11394_v58 = vadd.f32 %v11393_v54, %v11392_v32  ;;  %v11395_v39 = vpop.f32.mrb[114].mxu0 }
 0x233   : > { %v11396_v29 = vpop.f32.mrb[115].mxu0 }
 0x234   : > { %v4928_v25 = vadd.f32 %v11394_v58, %v14238_v59  ;;  %v11397_v2 = vadd.f32 %v11396_v29, %v11395_v39 }
 0x235   : > { %v11504_v46 = vpop.f32.mrb[112].mxu1 }
 0x236   : > { %v4931_v26 = vadd.f32 %v11397_v2, %v14246_v52  ;;  %v11505_v23 = vpop.f32.mrb[113].mxu1 }
 0x237   : > { %v11506_v28 = vadd.f32 %v11505_v23, %v11504_v46  ;;  %v11507_v61 = vpop.f32.mrb[114].mxu1 }
 0x238   : > { %v11508_v20 = vpop.f32.mrb[115].mxu1 }
 0x239   : > { %v11509_v42 = vadd.f32 %v11508_v20, %v11507_v61  ;;  %v14548_v6 = vadd.f32 %v11506_v28, %v4928_v25 }
 0x23b   : > { %v14550_v48 = vadd.f32 %v11509_v42, %v4931_v26  ;;  %v12330_v26 = vld [vmem:[%s16155_s3 + $0x110] sm:$0xff]  }
 0x23c   : > { %v11398_v9 = vpop.f32.mrb[116].mxu0 }
 0x23d   : > { %v11399_v59 = vpop.f32.mrb[117].mxu0 }
 0x23e   : > { %v11400_v51 = vadd.f32 %v11399_v59, %v11398_v9  ;;  %v11401_v5 = vpop.f32.mrb[118].mxu0 }
 0x23f   : > { %v11402_v50 = vpop.f32.mrb[119].mxu0 }
 0x240   : > { %v4936_v52 = vadd.f32 %v11400_v51, %v14278_v24  ;;  %v11510_v56 = vpop.f32.mrb[116].mxu1  ;;  %v11403_v49 = vadd.f32 %v11402_v50, %v11401_v5  ;;  %v12329_v24 = vld [vmem:[%s16155_s3 + $0x150] sm:$0xff]  }
 0x241   : > { %v11511_v63 = vpop.f32.mrb[117].mxu1  ;;  %11780 = vmatprep.subr.bf16.mxu1 %v12329_v24 }
 0x242   : > { %v4939_v21 = vadd.f32 %v11403_v49, %v14285_v18  ;;  %v11512_v17 = vadd.f32 %v11511_v63, %v11510_v56  ;;  %v11513_v15 = vpop.f32.mrb[118].mxu1  ;;  %11781 = vmatpush3.bf16.msra.mxu1 %v12330_v26  ;;  %v12335_v49 = vld [vmem:[%s16155_s3 + $0x158] sm:$0xff]   ;;  %v6496_v63 = vld [vmem:[#allocation2] sm:$0xe]  ;;  %v14581_v26 = vld [vmem:[#allocation2 + $0x8] sm:$0x1] }
 0x243   : > { %v11514_v45 = vpop.f32.mrb[119].mxu1  ;;  %11782 = vmatprep.subr.bf16.mxu1 %v12335_v49 }
 0x244   : > { %v11515_v1 = vadd.f32 %v11514_v45, %v11513_v15  ;;  %v14554_v16 = vadd.f32 %v11512_v17, %v4936_v52  ;;  %v6497_v15 = vld [vmem:[#allocation2 + $0x4] sm:$0xf] }
 0x246   : > { %v14556_v32 = vadd.f32 %v11515_v1, %v4939_v21 }
 0x249   : > { %v11404_v54 = vpop.f32.mrb[120].mxu0 }
 0x24a   : > { %v11405_v58 = vpop.f32.mrb[121].mxu0 }
 0x24b   : > { %v11406_v39 = vadd.f32 %v11405_v58, %v11404_v54  ;;  %v11407_v29 = vpop.f32.mrb[122].mxu0 }
 0x24c   : > { %v11408_v25 = vpop.f32.mrb[123].mxu0 }
 0x24d   : > { %v4944_v2 = vadd.f32 %v11406_v39, %v14300_v7  ;;  %v11409_v18 = vadd.f32 %v11408_v25, %v11407_v29  ;;  %v10776_v29 = vrot.slane %v6496_v63, 9 }
 0x24f   : > { %v4947_v46 = vadd.f32 %v11409_v18, %v14310_v30 }
 0x25c   : > { %v11410_v23 = vpop.f32.mrb[124].mxu0  ;;  %v11516_v57 = vpop.f32.mrb[120].mxu1 }
 0x25d   : > { %v11411_v28 = vpop.f32.mrb[125].mxu0  ;;  %v11517_v61 = vpop.f32.mrb[121].mxu1 }
 0x25e   : > { %v11412_v20 = vadd.f32 %v11411_v28, %v11410_v23  ;;  %v11413_v42 = vpop.f32.mrb[126].mxu0  ;;  %v11518_v9 = vadd.f32 %v11517_v61, %v11516_v57  ;;  %v11519_v59 = vpop.f32.mrb[122].mxu1  ;;  %v6594_v23 = vrot.slane %v6497_v15, 5 }
 0x25f   : > { %v11414_v51 = vpop.f32.mrb[127].mxu0  ;;  %v11520_v5 = vpop.f32.mrb[123].mxu1 }
 0x260   : > { %v4952_v7 = vadd.f32 %v11412_v20, %v14359_v12  ;;  %v11415_v50 = vadd.f32 %v11414_v51, %v11413_v42  ;;  %v11521_v52 = vadd.f32 %v11520_v5, %v11519_v59  ;;  %v14567_v30 = vadd.f32 %v11518_v9, %v4944_v2  ;;  %v12336_v12 = vld [vmem:[%s16155_s3 + $0x118] sm:$0xff]  }
 0x261   : > { %11783 = vmatpush3.bf16.msra.mxu1 %v12336_v12  ;;  %v14588_v51 = vsel %vm12686_vm11, %v10776_v29, %v6594_v23 }
 0x262   : > { %v4955_v56 = vadd.f32 %v11415_v50, %v14383_v10  ;;  %v14573_v21 = vadd.f32 %v11521_v52, %v4947_v46  ;;  %v6596_v52 = vrot.slane %v6594_v23, 4 }
 0x264   : > { %v12042_v17 = vpop.f32.mrb[128].mxu0 }
 0x265   : > { %v11522_v45 = vpop.f32.mrb[124].mxu1  ;;  %v5162_v1 = vadd.f32 %v12042_v17, %v14406_v0  ;;  %v5153_v54 = vpop.f32.mrb[129].mxu0 }
 0x266   : > { %v11523_v58 = vpop.f32.mrb[125].mxu1  ;;  %v5154_v10 = vadd.f32 %v5153_v54, %v14385_v40  ;;  %v12043_v39 = vpop.f32.mrb[130].mxu0 }
 0x267   : > { %v11524_v25 = vadd.f32 %v11523_v58, %v11522_v45  ;;  %v11525_v24 = vpop.f32.mrb[126].mxu1  ;;  %v5282_v2 = vmax.f32 %v5162_v1, 0.0  ;;  %v5165_v18 = vadd.f32 %v12043_v39, %v14408_v8  ;;  %v5156_v46 = vpop.f32.mrb[131].mxu0  ;;  %v6597_v8 = vrot.slane %v14581_v26, 5  ;;  %v5735_v39 = vld [vmem:[#allocation2 + $0x18] sm:$0xf] }
 0x268   : > { %v11526_v57 = vpop.f32.mrb[127].mxu1  ;;  %v5280_v28 = vmax.f32 %v5154_v10, 0.0  ;;  %v5157_v0 = vadd.f32 %v5156_v46, %v14396_v3  ;;  %v12339_v3 = vld [vmem:[%s16155_s3 + $0x1c0] sm:$0xff]   ;;  %v5728_v26 = vld [vmem:[#allocation2 + $0xc] sm:$0xf] }
 0x269   : > { %v11527_v61 = vadd.f32 %v11526_v57, %v11525_v24  ;;  %v11049_v20 = vpack.c.bf16 %v5282_v2, %v5282_v2  ;;  %v5283_v42 = vmax.f32 %v5165_v18, 0.0  ;;  %v14584_v40 = vadd.f32 %v11524_v25, %v4952_v7  ;;  %11888 = vmatprep.subr.bf16.mxu0 %v12339_v3  ;;  %v5732_v3 = vld [vmem:[#allocation2 + $0x14] sm:$0x1] }
 0x26a   : > { %v11047_v9 = vpack.c.bf16 %v5280_v28, %v5280_v28  ;;  %v5281_v59 = vmax.f32 %v5157_v0, 0.0 }
 0x26b   : > { %v5426_v5 = vshrl.u32 %v11049_v20, 16  ;;  %v11050_v50 = vpack.c.bf16 %v5283_v42, %v5283_v42  ;;  %v14591_v49 = vadd.f32 %v11527_v61, %v4955_v56  ;;  %v5429_v63 = vshll.u32 %v11049_v20, 16  ;;  %v5739_v20 = vld [vmem:[#allocation2 + $0x20] sm:$0x1] }
 0x26c   : > { %v5409_v7 = vshrl.u32 %v11047_v9, 16  ;;  %v5412_v17 = vshll.u32 %v11047_v9, 16  ;;  %v11048_v15 = vpack.c.bf16 %v5281_v59, %v5281_v59  ;;  %v12046_v12 = vpop.f32.mrb[132].mxu0 }
 0x26d   : > { %v5428_v45 = vrot.slane %v5426_v5, 7  ;;  %v5434_v1 = vshrl.u32 %v11050_v50, 16  ;;  %v5437_v54 = vshll.u32 %v11050_v50, 16  ;;  %v5178_v58 = vadd.f32 %v12046_v12, %v14418_v53  ;;  %v5169_v10 = vpop.f32.mrb[133].mxu0 }
 0x26e   : > { %v5411_v29 = vrot.slane %v5409_v7, 7  ;;  %v5417_v56 = vshrl.u32 %v11048_v15, 16  ;;  %v5420_v25 = vshll.u32 %v11048_v15, 16  ;;  %v5170_v24 = vadd.f32 %v5169_v10, %v14412_v44  ;;  %v12047_v2 = vpop.f32.mrb[134].mxu0 }
 0x26f   : > { %v5431_v18 = vor.u32 %v5429_v63, %v5428_v45  ;;  %v5432_v46 = vrot.slane %v5428_v45, 4  ;;  %v5436_v23 = vrot.slane %v5434_v1, 7  ;;  %v5286_v57 = vmax.f32 %v5178_v58, 0.0  ;;  %v5172_v28 = vpop.f32.mrb[135].mxu0 }
 0x270   : > { %v5414_v0 = vor.u32 %v5412_v17, %v5411_v29  ;;  %v5415_v61 = vrot.slane %v5411_v29, 4  ;;  %v5419_v42 = vrot.slane %v5417_v56, 7  ;;  %v5284_v53 = vmax.f32 %v5170_v24, 0.0  ;;  %v12343_v17 = vld [vmem:[%s16155_s3 + $0x160] sm:$0xff]  }
 0x271   : > { %v5736_v59 = vsel %vm12692_vm12, %v5431_v18, %v5735_v39  ;;  %v5439_v5 = vor.u32 %v5437_v54, %v5436_v23  ;;  %v5441_v50 = vrot.slane %v5436_v23, 4  ;;  %v11053_v7 = vpack.c.bf16 %v5286_v57, %v5286_v57  ;;  %v12344_v29 = vld [vmem:[%s16155_s3 + $0x120] sm:$0xff]   ;;  %11784 = vmatprep.subr.bf16.mxu1 %v12343_v17 }
 0x272   : > { %5737 = vst [vmem:[#allocation2 + $0x18] sm:$0xf] %v5736_v59  ;;  %v5729_v44 = vsel %vm12692_vm12, %v5414_v0, %v5728_v26  ;;  %v5422_v63 = vor.u32 %v5420_v25, %v5419_v42  ;;  %v5424_v15 = vrot.slane %v5419_v42, 4  ;;  %v11051_v12 = vpack.c.bf16 %v5284_v53, %v5284_v53  ;;  %11785 = vmatpush3.bf16.msra.mxu1 %v12344_v29  ;;  %v5749_v0 = vld [vmem:[#allocation2 + $0x30] sm:$0xf] }
 0x273   : > { %5730 = vst [vmem:[#allocation2 + $0xc] sm:$0xf] %v5729_v44  ;;  %v5440_v1 = vsel %vm12698_vm13, %v5432_v46, %v5439_v5  ;;  %v5740_v54 = vsel %vm12649_vm3, %v5441_v50, %v5739_v20  ;;  %v5460_v10 = vshrl.u32 %v11053_v7, 16  ;;  %v14611_v39 = vsel %vm12686_vm11, %v6596_v52, %v6597_v8 }
 0x274   : > { %5741 = vst [vmem:[#allocation2 + $0x20] sm:$0x1] %v5740_v54  ;;  %5738 = vst [vmem:[#allocation2 + $0x1c] sm:$0xf] %v5440_v1  ;;  %v5423_v56 = vsel %vm12698_vm13, %v5415_v61, %v5422_v63  ;;  %v5733_v25 = vsel %vm12649_vm3, %v5424_v15, %v5732_v3  ;;  %v5463_v24 = vshll.u32 %v11053_v7, 16  ;;  %v5443_v18 = vshrl.u32 %v11051_v12, 16 }
 0x275   : > { %v12050_v46 = vpop.f32.mrb[136].mxu0  ;;  %5731 = vst [vmem:[#allocation2 + $0x10] sm:$0xf] %v5423_v56  ;;  %5734 = vst [vmem:[#allocation2 + $0x14] sm:$0x1] %v5733_v25  ;;  %v14620_v8 = vrot.slane %v5460_v10, 7  ;;  %v5181_v52 = vadd.f32 %v12047_v2, %v14420_v43  ;;  %v5173_v26 = vadd.f32 %v5172_v28, %v14414_v62  ;;  %v10792_v59 = vcombine.low %v14588_v51, %v14611_v39 }
 0x276   : > { %v5194_v23 = vadd.f32 %v12050_v46, %v14445_v47  ;;  %v5185_v57 = vpop.f32.mrb[137].mxu0  ;;  %v14625_v61 = vrot.slane %v5443_v18, 7  ;;  %v5446_v20 = vshll.u32 %v11051_v12, 16  ;;  %v5742_v2 = vld [vmem:[#allocation2 + $0x24] sm:$0xf] }
 0x277   : > { %v5186_v42 = vadd.f32 %v5185_v57, %v14427_v37  ;;  %v12051_v53 = vpop.f32.mrb[138].mxu0  ;;  %v5465_v5 = vor.u32 %v5463_v24, %v14620_v8  ;;  %v5466_v43 = vrot.slane %v14620_v8, 4  ;;  %v5287_v62 = vmax.f32 %v5181_v52, 0.0  ;;  %v12340_v10 = vld [vmem:[%s16155_s3 + $0x180] sm:$0xff]   ;;  %v5753_v24 = vld [vmem:[#allocation2 + $0x38] sm:$0x1] }
 0x278   : > { %v5285_v28 = vmax.f32 %v5173_v26, 0.0  ;;  %v5188_v47 = vpop.f32.mrb[139].mxu0  ;;  %v5448_v50 = vor.u32 %v5446_v20, %v14625_v61  ;;  %v5449_v3 = vrot.slane %v14625_v61, 4  ;;  %v5290_v7 = vmax.f32 %v5194_v23, 0.0  ;;  %v5746_v18 = vld [vmem:[#allocation2 + $0x2c] sm:$0x1] }
 0x279   : > { %v5288_v44 = vmax.f32 %v5186_v42, 0.0  ;;  %v5750_v37 = vsel %vm12692_vm12, %v5465_v5, %v5749_v0  ;;  %v11054_v63 = vpack.c.bf16 %v5287_v62, %v5287_v62  ;;  %v5197_v51 = vadd.f32 %v12051_v53, %v14450_v60 }
 0x27a   : > { %v11052_v15 = vpack.c.bf16 %v5285_v28, %v5285_v28  ;;  %5751 = vst [vmem:[#allocation2 + $0x30] sm:$0xf] %v5750_v37  ;;  %v5743_v12 = vsel %vm12692_vm12, %v5448_v50, %v5742_v2  ;;  %v11057_v17 = vpack.c.bf16 %v5290_v7, %v5290_v7  ;;  %v5189_v54 = vadd.f32 %v5188_v47, %v14438_v41  ;;  %v5763_v41 = vld [vmem:[#allocation2 + $0x48] sm:$0xf] }
 0x27b   : > { %v11055_v1 = vpack.c.bf16 %v5288_v44, %v5288_v44  ;;  %5744 = vst [vmem:[#allocation2 + $0x24] sm:$0xf] %v5743_v12  ;;  %v5468_v39 = vshrl.u32 %v11054_v63, 16  ;;  %v5471_v29 = vshll.u32 %v11054_v63, 16  ;;  %v5291_v61 = vmax.f32 %v5197_v51, 0.0  ;;  %v12316_v47 = vld [vmem:[#allocation2 + $0x18] sm:$0xff]  }
 0x27c   : > { %v5451_v56 = vshrl.u32 %v11052_v15, 16  ;;  %v5454_v25 = vshll.u32 %v11052_v15, 16  ;;  %v5494_v60 = vshrl.u32 %v11057_v17, 16  ;;  %v5497_v46 = vshll.u32 %v11057_v17, 16  ;;  %v12054_v26 = vpop.f32.mrb[140].mxu0  ;;  %v12315_v23 = vld [vmem:[#allocation2 + $0xc] sm:$0xff]  }
 0x27d   : > { %v5477_v8 = vshrl.u32 %v11055_v1, 16  ;;  %v5480_v52 = vshll.u32 %v11055_v1, 16  ;;  %v5470_v57 = vrot.slane %v5468_v39, 7  ;;  %v5289_v20 = vmax.f32 %v5189_v54, 0.0  ;;  %v5201_v42 = vpop.f32.mrb[141].mxu0  ;;  %9592 = vmatprep.mubr.bf16.mxu0 %v12315_v23 }
 0x27e   : > { %v5453_v0 = vrot.slane %v5451_v56, 7  ;;  %v14643_v53 = vrot.slane %v5494_v60, 7  ;;  %v5210_v2 = vadd.f32 %v12054_v26, %v14490_v35  ;;  %v5202_v62 = vadd.f32 %v5201_v42, %v14466_v11  ;;  %v12055_v28 = vpop.f32.mrb[142].mxu0  ;;  %v5756_v63 = vld [vmem:[#allocation2 + $0x3c] sm:$0xf]  ;;  %9593 = vmatmul.mubr.bf16.vlgmr.msra.gmra.mrb[160].mxu0 %v10792_v59  ;;  %v12347_v26 = vld [vmem:[%s16155_s3 + $0x1c8] sm:$0xff]  }
 0x27f   : > { %v14645_v5 = vrot.slane %v5477_v8, 7  ;;  %v5473_v50 = vor.u32 %v5471_v29, %v5470_v57  ;;  %v5475_v7 = vrot.slane %v5470_v57, 4  ;;  %v5204_v15 = vpop.f32.mrb[143].mxu0  ;;  %9600 = vmatprep.mubr.bf16.mxu0 %v12316_v47  ;;  %11889 = vmatpush3.bf16.msra.mxu0 %v12340_v10  ;;  %v11056_v29 = vpack.c.bf16 %v5289_v20, %v5289_v20  ;;  %v5767_v23 = vld [vmem:[#allocation2 + $0x50] sm:$0x1] }
 0x280   : > { %v5456_v44 = vor.u32 %v5454_v25, %v5453_v0  ;;  %v5458_v37 = vrot.slane %v5453_v0, 4  ;;  %v5499_v51 = vor.u32 %v5497_v46, %v14643_v53  ;;  %v5500_v12 = vrot.slane %v14643_v53, 4  ;;  %v5760_v57 = vld [vmem:[#allocation2 + $0x44] sm:$0x1]  ;;  %11890 = vmatprep.subr.bf16.mxu0 %v12347_v26 }
 0x281   : > { %v5482_v17 = vor.u32 %v5480_v52, %v14645_v5  ;;  %v5483_v35 = vrot.slane %v14645_v5, 4  ;;  %v5474_v11 = vsel %vm12698_vm13, %v5466_v43, %v5473_v50  ;;  %v5754_v1 = vsel %vm12649_vm3, %v5475_v7, %v5753_v24 }
 0x282   : > { %v5457_v54 = vsel %vm12698_vm13, %v5449_v3, %v5456_v44  ;;  %v5747_v59 = vsel %vm12649_vm3, %v5458_v37, %v5746_v18  ;;  %5755 = vst [vmem:[#allocation2 + $0x38] sm:$0x1] %v5754_v1  ;;  %5752 = vst [vmem:[#allocation2 + $0x34] sm:$0xf] %v5474_v11  ;;  %v5764_v39 = vsel %vm12692_vm12, %v5499_v51, %v5763_v41  ;;  %v5294_v56 = vmax.f32 %v5210_v2, 0.0 }
 0x283   : > { %5748 = vst [vmem:[#allocation2 + $0x2c] sm:$0x1] %v5747_v59  ;;  %5745 = vst [vmem:[#allocation2 + $0x28] sm:$0xf] %v5457_v54  ;;  %v5757_v10 = vsel %vm12692_vm12, %v5482_v17, %v5756_v63  ;;  %v11058_v43 = vpack.c.bf16 %v5291_v61, %v5291_v61  ;;  %v5292_v25 = vmax.f32 %v5202_v62, 0.0  ;;  %v5213_v3 = vadd.f32 %v12055_v28, %v14492_v31  ;;  %v12351_v28 = vld [vmem:[%s16155_s3 + $0x168] sm:$0xff]  }
 0x284   : > { %5765 = vst [vmem:[#allocation2 + $0x48] sm:$0xf] %v5764_v39  ;;  %5758 = vst [vmem:[#allocation2 + $0x3c] sm:$0xf] %v5757_v10  ;;  %v5205_v24 = vadd.f32 %v5204_v15, %v14468_v33  ;;  %v5485_v46 = vshrl.u32 %v11056_v29, 16  ;;  %v5488_v8 = vshll.u32 %v11056_v29, 16  ;;  %v11061_v0 = vpack.c.bf16 %v5294_v56, %v5294_v56  ;;  %11786 = vmatprep.subr.bf16.mxu1 %v12351_v28 }
 0x285   : > { %v5502_v18 = vshrl.u32 %v11058_v43, 16  ;;  %v5505_v60 = vshll.u32 %v11058_v43, 16  ;;  %v12058_v52 = vpop.f32.mrb[144].mxu0  ;;  %v11059_v41 = vpack.c.bf16 %v5292_v25, %v5292_v25  ;;  %v5295_v61 = vmax.f32 %v5213_v3, 0.0  ;;  %v12348_v33 = vld [vmem:[%s16155_s3 + $0x188] sm:$0xff]  }
 0x286   : > { %v5293_v20 = vmax.f32 %v5205_v24, 0.0  ;;  %v5217_v42 = vpop.f32.mrb[145].mxu0  ;;  %v5487_v53 = vrot.slane %v5485_v46, 7  ;;  %v5226_v5 = vadd.f32 %v12058_v52, %v14517_v22  ;;  %v5528_v47 = vshrl.u32 %v11061_v0, 16  ;;  %11891 = vmatpush3.bf16.msra.mxu0 %v12348_v33  ;;  %v12352_v63 = vld [vmem:[%s16155_s3 + $0x128] sm:$0xff]  }
 0x287   : > { %v5504_v31 = vrot.slane %v5502_v18, 7  ;;  %v5218_v2 = vadd.f32 %v5217_v42, %v14508_v38  ;;  %v12059_v62 = vpop.f32.mrb[146].mxu0  ;;  %v5531_v50 = vshll.u32 %v11061_v0, 16  ;;  %v5511_v7 = vshrl.u32 %v11059_v41, 16  ;;  %11787 = vmatpush3.bf16.msra.mxu1 %v12352_v63  ;;  %v5777_v29 = vld [vmem:[#allocation2 + $0x60] sm:$0xf] }
 0x288   : > { %v5514_v44 = vshll.u32 %v11059_v41, 16  ;;  %v5220_v37 = vpop.f32.mrb[147].mxu0  ;;  %v5490_v51 = vor.u32 %v5488_v8, %v5487_v53  ;;  %v5492_v38 = vrot.slane %v5487_v53, 4  ;;  %v5530_v17 = vrot.slane %v5528_v47, 7  ;;  %v5770_v56 = vld [vmem:[#allocation2 + $0x54] sm:$0xf] }
 0x289   : > { %v5507_v15 = vor.u32 %v5505_v60, %v5504_v31  ;;  %v5509_v22 = vrot.slane %v5504_v31, 4  ;;  %v5513_v11 = vrot.slane %v5511_v7, 7  ;;  %v11062_v1 = vpack.c.bf16 %v5295_v61, %v5295_v61  ;;  %v5774_v0 = vld [vmem:[#allocation2 + $0x5c] sm:$0x1]  ;;  %v12355_v47 = vld [vmem:[%s16155_s3 + $0x1d0] sm:$0xff]  }
 0x28a   : > { %v11060_v54 = vpack.c.bf16 %v5293_v20, %v5293_v20  ;;  %v5491_v10 = vsel %vm12698_vm13, %v5483_v35, %v5490_v51  ;;  %v5761_v43 = vsel %vm12649_vm3, %v5492_v38, %v5760_v57  ;;  %v5533_v25 = vor.u32 %v5531_v50, %v5530_v17  ;;  %v5781_v57 = vld [vmem:[#allocation2 + $0x68] sm:$0x1]  ;;  %v12356_v63 = vld [vmem:[%s16155_s3 + $0x190] sm:$0xff]   ;;  %11892 = vmatprep.subr.bf16.mxu0 %v12355_v47  ;;  %v5990_v47 = vld [vmem:[#allocation2 + $0x18] sm:$0xf] }
 0x28b   : > { %v5508_v59 = vsel %vm12698_vm13, %v5500_v12, %v5507_v15  ;;  %v5768_v39 = vsel %vm12649_vm3, %v5509_v22, %v5767_v23  ;;  %5762 = vst [vmem:[#allocation2 + $0x44] sm:$0x1] %v5761_v43  ;;  %5759 = vst [vmem:[#allocation2 + $0x40] sm:$0xf] %v5491_v10  ;;  %v5534_v3 = vrot.slane %v5530_v17, 4  ;;  %v5516_v24 = vor.u32 %v5514_v44, %v5513_v11 }
 0x28c   : > { %5769 = vst [vmem:[#allocation2 + $0x50] sm:$0x1] %v5768_v39  ;;  %5766 = vst [vmem:[#allocation2 + $0x4c] sm:$0xf] %v5508_v59  ;;  %v5517_v18 = vrot.slane %v5513_v11, 4  ;;  %v5536_v60 = vshrl.u32 %v11062_v1, 16  ;;  %v5778_v35 = vsel %vm12692_vm12, %v5533_v25, %v5777_v29  ;;  %v5229_v31 = vadd.f32 %v12059_v62, %v14523_v34  ;;  %11893 = vmatpush3.bf16.msra.mxu0 %v12356_v63 }
 0x28d   : > { %v5987_v12 = vld [vmem:[#allocation2 + $0xc] sm:$0xf]  ;;  %v5539_v46 = vshll.u32 %v11062_v1, 16  ;;  %v5519_v8 = vshrl.u32 %v11060_v54, 16  ;;  %v5522_v52 = vshll.u32 %v11060_v54, 16  ;;  %v14689_v26 = vpop.f32.mrb[148].mxu0  ;;  %v5771_v23 = vsel %vm12692_vm12, %v5516_v24, %v5770_v56 }
 0x28e   : > { %v5298_v41 = vmax.f32 %v5226_v5, 0.0  ;;  %v5296_v61 = vmax.f32 %v5218_v2, 0.0  ;;  %v14695_v20 = vpop.f32.mrb[149].mxu0  ;;  %5779 = vst [vmem:[#allocation2 + $0x60] sm:$0xf] %v5778_v35  ;;  %v5538_v42 = vrot.slane %v5536_v60, 7  ;;  %v5221_v53 = vadd.f32 %v5220_v37, %v14510_v55 }
 0x28f   : > { %5772 = vst [vmem:[#allocation2 + $0x54] sm:$0xf] %v5771_v23  ;;  %v5521_v33 = vrot.slane %v5519_v8, 7  ;;  %v14699_v28 = vpop.f32.mrb[150].mxu0  ;;  %v6057_v5 = vshrl.u32 %v5987_v12, 16  ;;  %v6060_v2 = vshll.u32 %v5987_v12, 16 }
 0x290   : > { %v11065_v50 = vpack.c.bf16 %v5298_v41, %v5298_v41  ;;  %v11063_v7 = vpack.c.bf16 %v5296_v61, %v5296_v61  ;;  %v14704_v44 = vpop.f32.mrb[151].mxu0  ;;  %v5541_v15 = vor.u32 %v5539_v46, %v5538_v42  ;;  %v5543_v34 = vrot.slane %v5538_v42, 4  ;;  %v5988_v17 = vld [vmem:[#allocation2 + $0x10] sm:$0xf]  ;;  %v5791_v39 = vld [vmem:[#allocation2 + $0x78] sm:$0xf] }
 0x291   : > { %v5524_v62 = vor.u32 %v5522_v52, %v5521_v33  ;;  %v5526_v55 = vrot.slane %v5521_v33, 4  ;;  %v5784_v10 = vld [vmem:[#allocation2 + $0x6c] sm:$0xf]  ;;  %v5299_v56 = vmax.f32 %v5229_v31, 0.0  ;;  %v5297_v25 = vmax.f32 %v5221_v53, 0.0 }
 0x292   : > { %v5562_v37 = vshrl.u32 %v11065_v50, 16  ;;  %v5565_v22 = vshll.u32 %v11065_v50, 16  ;;  %v5545_v51 = vshrl.u32 %v11063_v7, 16  ;;  %v5548_v38 = vshll.u32 %v11063_v7, 16  ;;  %v6499_v46 = vld [vmem:[#allocation2 + $0xc] sm:$0xe] }
 0x293   : > { %v5542_v11 = vsel %vm12698_vm13, %v5534_v3, %v5541_v15  ;;  %v5782_v1 = vsel %vm12649_vm3, %v5543_v34, %v5781_v57  ;;  %v5525_v54 = vsel %vm12698_vm13, %v5517_v18, %v5524_v62  ;;  %v5775_v59 = vsel %vm12649_vm3, %v5526_v55, %v5774_v0  ;;  %v5989_v3 = vld [vmem:[#allocation2 + $0x14] sm:$0x1]  ;;  %v6500_v0 = vld [vmem:[#allocation2 + $0x10] sm:$0xf]  ;;  %v6514_v45 = vld [vmem:[#allocation2 + $0x48] sm:$0xe] }
 0x294   : > { %5783 = vst [vmem:[#allocation2 + $0x68] sm:$0x1] %v5782_v1  ;;  %5780 = vst [vmem:[#allocation2 + $0x64] sm:$0xf] %v5542_v11  ;;  %v14717_v43 = vrot.slane %v5562_v37, 7  ;;  %v14719_v29 = vrot.slane %v5545_v51, 7  ;;  %v11066_v61 = vpack.c.bf16 %v5299_v56, %v5299_v56  ;;  %v11064_v42 = vpack.c.bf16 %v5297_v25, %v5297_v25 }
 0x295   : > { %5776 = vst [vmem:[#allocation2 + $0x5c] sm:$0x1] %v5775_v59  ;;  %5773 = vst [vmem:[#allocation2 + $0x58] sm:$0xf] %v5525_v54  ;;  %v6059_v24 = vrot.slane %v6057_v5, 4  ;;  %v6062_v12 = vrot.slane %v6060_v2, 5 }
 0x296   : > { %v6066_v60 = vshll.u32 %v5988_v17, 16  ;;  %v6070_v18 = vshrl.u32 %v5988_v17, 16  ;;  %v14721_v8 = vpop.f32.mrb[152].mxu0  ;;  %v5567_v52 = vor.u32 %v5565_v22, %v14717_v43  ;;  %v5568_v35 = vrot.slane %v14717_v43, 4  ;;  %v6501_v53 = vld [vmem:[#allocation2 + $0x14] sm:$0x1] }
 0x297   : > { %v5550_v23 = vor.u32 %v5548_v38, %v14719_v29  ;;  %v5551_v57 = vrot.slane %v14719_v29, 4  ;;  %v14727_v41 = vpop.f32.mrb[153].mxu0  ;;  %v6063_v33 = vor.u32 %v6062_v12, %v6059_v24  ;;  %v6076_v63 = vshll.u32 %v5989_v3, 16  ;;  %v12359_v11 = vld [vmem:[%s16155_s3 + $0x170] sm:$0xff]   ;;  %v5795_v54 = vld [vmem:[#allocation2 + $0x80] sm:$0x1] }
 0x298   : > { %v6068_v31 = vrot.slane %v6066_v60, 5  ;;  %v14729_v50 = vpop.f32.mrb[154].mxu0  ;;  %v5792_v7 = vsel %vm12692_vm12, %v5567_v52, %v5791_v39  ;;  %v6072_v2 = vrot.slane %v6070_v18, 4  ;;  %v5570_v34 = vshrl.u32 %v11066_v61, 16  ;;  %v5788_v43 = vld [vmem:[#allocation2 + $0x74] sm:$0x1]  ;;  %11788 = vmatprep.subr.bf16.mxu1 %v12359_v11 }
 0x299   : > { %v5785_v5 = vsel %vm12692_vm12, %v5550_v23, %v5784_v10  ;;  %v14735_v15 = vpop.f32.mrb[155].mxu0  ;;  %5793 = vst [vmem:[#allocation2 + $0x78] sm:$0xf] %v5792_v7  ;;  %v5573_v62 = vshll.u32 %v11066_v61, 16  ;;  %v5553_v55 = vshrl.u32 %v11064_v42, 16  ;;  %v5556_v37 = vshll.u32 %v11064_v42, 16 }
 0x29a   : > { %5786 = vst [vmem:[#allocation2 + $0x6c] sm:$0xf] %v5785_v5  ;;  %v6064_v22 = vrot.slane %v6063_v33, 4  ;;  %v6073_v51 = vor.u32 %v6072_v2, %v6068_v31  ;;  %v6078_v38 = vrot.slane %v6076_v63, 5  ;;  %v10777_v17 = vrot.slane %v6499_v46, 9  ;;  %v12319_v2 = vld [vmem:[#allocation2 + $0xc] sm:$0xff]  }
 0x29b   : > { %v5572_v1 = vrot.slane %v5570_v34, 7  ;;  %v5555_v59 = vrot.slane %v5553_v55, 7  ;;  %v6601_v39 = vrot.slane %v6500_v0, 5  ;;  %v6604_v10 = vrot.slane %v6501_v53, 5  ;;  %v5991_v46 = vld [vmem:[#allocation2 + $0x1c] sm:$0xf] }
 0x29c   : > { %v6069_v29 = vsel %vm12706_vm14, %v6064_v22, %v6068_v31  ;;  %v6074_v56 = vrot.slane %v6073_v51, 4  ;;  %v6081_v25 = vshrl.u32 %v5990_v47, 16  ;;  %v6084_v3 = vshll.u32 %v5990_v47, 16  ;;  %v14742_v52 = vpop.f32.mrb[156].mxu0  ;;  %v5992_v42 = vld [vmem:[#allocation2 + $0x20] sm:$0x1] }
 0x29d   : > { %v5575_v24 = vor.u32 %v5573_v62, %v5572_v1  ;;  %v5577_v12 = vrot.slane %v5572_v1, 4  ;;  %v5558_v60 = vor.u32 %v5556_v37, %v5555_v59  ;;  %v5560_v18 = vrot.slane %v5555_v59, 4  ;;  %v14748_v31 = vpop.f32.mrb[157].mxu0  ;;  %v14758_v63 = vld [vmem:[#allocation2 + $0x18] sm:$0xe]  ;;  %v12360_v51 = vld [vmem:[%s16155_s3 + $0x130] sm:$0xff]  }
 0x29e   : > { %v6079_v23 = vsel %vm12706_vm14, %v6074_v56, %v6078_v38  ;;  %v6602_v0 = vsel %vm12686_vm11, %v10777_v17, %v6601_v39  ;;  %v6603_v61 = vrot.slane %v6601_v39, 4  ;;  %v6083_v33 = vrot.slane %v6081_v25, 4  ;;  %v14760_v34 = vpop.f32.mrb[158].mxu0  ;;  %v14764_v22 = vld [vmem:[#allocation2 + $0x1c] sm:$0xf]  ;;  %11789 = vmatpush3.bf16.msra.mxu1 %v12360_v51 }
 0x29f   : > { %v5576_v53 = vsel %vm12698_vm13, %v5568_v35, %v5575_v24  ;;  %v5796_v47 = vsel %vm12649_vm3, %v5577_v12, %v5795_v54  ;;  %v5559_v7 = vsel %vm12698_vm13, %v5551_v57, %v5558_v60  ;;  %v5789_v5 = vsel %vm12649_vm3, %v5560_v18, %v5788_v43  ;;  %v14766_v57 = vpop.f32.mrb[159].mxu0  ;;  %v12320_v54 = vld [vmem:[#allocation2 + $0x24] sm:$0xff]  }
 0x2a0   : > { %5797 = vst [vmem:[#allocation2 + $0x80] sm:$0x1] %v5796_v47  ;;  %5794 = vst [vmem:[#allocation2 + $0x7c] sm:$0xf] %v5576_v53  ;;  %v10761_v62 = vcombine.low %v6069_v29, %v6079_v23  ;;  %v6605_v35 = vsel %vm12686_vm11, %v6603_v61, %v6604_v10  ;;  %v6086_v55 = vrot.slane %v6084_v3, 5  ;;  %v6090_v37 = vshll.u32 %v5991_v46, 16 }
 0x2a1   : > { %5790 = vst [vmem:[#allocation2 + $0x74] sm:$0x1] %v5789_v5  ;;  %5787 = vst [vmem:[#allocation2 + $0x70] sm:$0xf] %v5559_v7  ;;  %v10793_v38 = vcombine.low %v6602_v0, %v6605_v35  ;;  %v6094_v17 = vshrl.u32 %v5991_v46, 16  ;;  %v6100_v11 = vshll.u32 %v5992_v42, 16  ;;  %v5242_v1 = vadd.f32 %v14689_v26, %v14539_v13 }
 0x2a2   : > { %9439 = vmatprep.mubr.bf16.mxu1 %v10761_v62  ;;  %v6087_v59 = vor.u32 %v6086_v55, %v6083_v33  ;;  %v6092_v39 = vrot.slane %v6090_v37, 5  ;;  %v5234_v10 = vadd.f32 %v14695_v20, %v14530_v27  ;;  %v5245_v43 = vadd.f32 %v14699_v28, %v14541_v19  ;;  %v12363_v29 = vld [vmem:[%s16155_s3 + $0x1d8] sm:$0xff]   ;;  %v6504_v3 = vld [vmem:[#allocation2 + $0x20] sm:$0x1]  ;;  %v5805_v7 = vld [vmem:[#allocation2 + $0x90] sm:$0xf] }
 0x2a3   : > { %9601 = vmatmul.mubr.bf16.gmra.mrb[164].mxu0 %v10793_v38  ;;  %9440 = vmatmul.mubr.bf16.gmra.mrb[132].mxu1 %v12319_v2  ;;  %v6096_v56 = vrot.slane %v6094_v17, 4  ;;  %v6102_v25 = vrot.slane %v6100_v11, 5  ;;  %v5302_v13 = vmax.f32 %v5242_v1, 0.0  ;;  %v5237_v26 = vadd.f32 %v14704_v44, %v14532_v14  ;;  %v12364_v27 = vld [vmem:[%s16155_s3 + $0x198] sm:$0xff]   ;;  %v12365_v61 = vld [vmem:[%s16155_s3 + $0x1e0] sm:$0xff]  }
 0x2a4   : > { %9608 = vmatprep.mubr.bf16.mxu0 %v12320_v54  ;;  %v6088_v19 = vrot.slane %v6087_v59, 4  ;;  %v5300_v20 = vmax.f32 %v5234_v10, 0.0  ;;  %v5303_v28 = vmax.f32 %v5245_v43, 0.0  ;;  %v10778_v24 = vrot.slane %v14758_v63, 9  ;;  %11894 = vmatprep.subr.bf16.mxu0 %v12363_v29  ;;  %v5798_v17 = vld [vmem:[#allocation2 + $0x84] sm:$0xf] }
 0x2a5   : > { %v6097_v12 = vor.u32 %v6096_v56, %v6092_v39  ;;  %v11069_v60 = vpack.c.bf16 %v5302_v13, %v5302_v13  ;;  %v5301_v18 = vmax.f32 %v5237_v26, 0.0  ;;  %v6608_v46 = vrot.slane %v14764_v22, 5  ;;  %11895 = vmatpush3.bf16.msra.mxu0 %v12364_v27  ;;  %v5809_v1 = vld [vmem:[#allocation2 + $0x98] sm:$0x1]  ;;  %v5802_v43 = vld [vmem:[#allocation2 + $0x8c] sm:$0x1] }
 0x2a6   : > { %v6093_v14 = vsel %vm12706_vm14, %v6088_v19, %v6092_v39  ;;  %v11067_v44 = vpack.c.bf16 %v5300_v20, %v5300_v20  ;;  %v11070_v23 = vpack.c.bf16 %v5303_v28, %v5303_v28  ;;  %v6611_v0 = vrot.slane %v6504_v3, 5  ;;  %11896 = vmatprep.subr.bf16.mxu0 %v12365_v61  ;;  %v12321_v56 = vld [vmem:[#allocation2 + $0x18] sm:$0xff]   ;;  %v5993_v27 = vld [vmem:[#allocation2 + $0x24] sm:$0xf]  ;;  %v5994_v19 = vld [vmem:[#allocation2 + $0x28] sm:$0xf] }
 0x2a7   : > { %v6098_v42 = vrot.slane %v6097_v12, 4  ;;  %v5596_v33 = vshrl.u32 %v11069_v60, 16  ;;  %v5599_v53 = vshll.u32 %v11069_v60, 16  ;;  %v11068_v47 = vpack.c.bf16 %v5301_v18, %v5301_v18  ;;  %v5995_v60 = vld [vmem:[#allocation2 + $0x2c] sm:$0x1]  ;;  %v12322_v61 = vld [vmem:[#allocation2 + $0x30] sm:$0xff]  }
 0x2a8   : > { %v5579_v5 = vshrl.u32 %v11067_v44, 16  ;;  %v5582_v2 = vshll.u32 %v11067_v44, 16  ;;  %v5604_v63 = vshrl.u32 %v11070_v23, 16  ;;  %v5607_v62 = vshll.u32 %v11070_v23, 16 }
 0x2a9   : > { %v6103_v35 = vsel %vm12706_vm14, %v6098_v42, %v6102_v25  ;;  %v5598_v55 = vrot.slane %v5596_v33, 7  ;;  %v5587_v37 = vshrl.u32 %v11068_v47, 16  ;;  %v5590_v22 = vshll.u32 %v11068_v47, 16 }
 0x2aa   : > { %v10762_v51 = vcombine.low %v6093_v14, %v6103_v35  ;;  %v5581_v38 = vrot.slane %v5579_v5, 7  ;;  %v5606_v11 = vrot.slane %v5604_v63, 7  ;;  %v6609_v54 = vsel %vm12686_vm11, %v10778_v24, %v6608_v46 }
 0x2ab   : > { %v5601_v59 = vor.u32 %v5599_v53, %v5598_v55  ;;  %v5602_v39 = vrot.slane %v5598_v55, 4  ;;  %v5589_v10 = vrot.slane %v5587_v37, 7  ;;  %v6610_v29 = vrot.slane %v6608_v46, 4  ;;  %v6505_v37 = vld [vmem:[#allocation2 + $0x24] sm:$0xe] }
 0x2ac   : > { %9447 = vmatprep.mubr.bf16.mxu1 %v10762_v51  ;;  %v5584_v13 = vor.u32 %v5582_v2, %v5581_v38  ;;  %v5585_v25 = vrot.slane %v5581_v38, 4  ;;  %v5609_v26 = vor.u32 %v5607_v62, %v5606_v11  ;;  %v5611_v3 = vrot.slane %v5606_v11, 4  ;;  %v12368_v2 = vld [vmem:[%s16155_s3 + $0x178] sm:$0xff]  }
 0x2ad   : > { %v5806_v20 = vsel %vm12692_vm12, %v5601_v59, %v5805_v7  ;;  %v5592_v28 = vor.u32 %v5590_v22, %v5589_v10  ;;  %v5594_v12 = vrot.slane %v5589_v10, 4  ;;  %v6612_v24 = vsel %vm12686_vm11, %v6610_v29, %v6611_v0  ;;  %9448 = vmatmul.mubr.bf16.gmra.mrb[136].mxu1 %v12321_v56  ;;  %v6506_v22 = vld [vmem:[#allocation2 + $0x28] sm:$0xf]  ;;  %11790 = vmatprep.subr.bf16.mxu1 %v12368_v2 }
 0x2ae   : > { %5807 = vst [vmem:[#allocation2 + $0x90] sm:$0xf] %v5806_v20  ;;  %v5799_v18 = vsel %vm12692_vm12, %v5584_v13, %v5798_v17  ;;  %v5610_v46 = vsel %vm12698_vm13, %v5602_v39, %v5609_v26  ;;  %v5810_v14 = vsel %vm12649_vm3, %v5611_v3, %v5809_v1  ;;  %v10794_v44 = vcombine.low %v6609_v54, %v6612_v24  ;;  %v5819_v3 = vld [vmem:[#allocation2 + $0xa8] sm:$0xf]  ;;  %v5823_v24 = vld [vmem:[#allocation2 + $0xb0] sm:$0x1] }
 0x2af   : > { %5800 = vst [vmem:[#allocation2 + $0x84] sm:$0xf] %v5799_v18  ;;  %5811 = vst [vmem:[#allocation2 + $0x98] sm:$0x1] %v5810_v14  ;;  %v5593_v23 = vsel %vm12698_vm13, %v5585_v25, %v5592_v28  ;;  %v5803_v0 = vsel %vm12649_vm3, %v5594_v12, %v5802_v43  ;;  %v6105_v42 = vshrl.u32 %v5993_v27, 16  ;;  %v6108_v33 = vshll.u32 %v5993_v27, 16 }
 0x2b0   : > { %5808 = vst [vmem:[#allocation2 + $0x94] sm:$0xf] %v5610_v46  ;;  %5804 = vst [vmem:[#allocation2 + $0x8c] sm:$0x1] %v5803_v0  ;;  %9609 = vmatmul.mubr.bf16.gmra.mrb[168].mxu0 %v10794_v44  ;;  %v6114_v53 = vshll.u32 %v5994_v19, 16  ;;  %v6118_v47 = vshrl.u32 %v5994_v19, 16  ;;  %v5258_v5 = vadd.f32 %v14721_v8, %v14554_v16  ;;  %v5250_v35 = vadd.f32 %v14727_v41, %v14548_v6 }
 0x2b1   : > { %5801 = vst [vmem:[#allocation2 + $0x88] sm:$0xf] %v5593_v23  ;;  %v6124_v7 = vshll.u32 %v5995_v60, 16  ;;  %9616 = vmatprep.mubr.bf16.mxu0 %v12322_v61  ;;  %v6107_v63 = vrot.slane %v6105_v42, 4  ;;  %v6110_v62 = vrot.slane %v6108_v33, 5  ;;  %v5261_v55 = vadd.f32 %v14729_v50, %v14556_v32 }
 0x2b2   : > { %v6116_v51 = vrot.slane %v6114_v53, 5  ;;  %v6120_v38 = vrot.slane %v6118_v47, 4  ;;  %v5306_v11 = vmax.f32 %v5258_v5, 0.0  ;;  %v5304_v8 = vmax.f32 %v5250_v35, 0.0  ;;  %v5812_v28 = vld [vmem:[#allocation2 + $0x9c] sm:$0xf] }
 0x2b3   : > { %v6126_v17 = vrot.slane %v6124_v7, 5  ;;  %v6111_v16 = vor.u32 %v6110_v62, %v6107_v63  ;;  %v5307_v1 = vmax.f32 %v5261_v55, 0.0  ;;  %v5253_v54 = vadd.f32 %v14735_v15, %v14550_v48  ;;  %v6507_v18 = vld [vmem:[#allocation2 + $0x2c] sm:$0x1]  ;;  %v5996_v46 = vld [vmem:[#allocation2 + $0x30] sm:$0xf] }
 0x2b4   : > { %v6121_v59 = vor.u32 %v6120_v38, %v6116_v51  ;;  %v11073_v39 = vpack.c.bf16 %v5306_v11, %v5306_v11  ;;  %v10779_v10 = vrot.slane %v6505_v37, 9  ;;  %v6615_v6 = vrot.slane %v6506_v22, 5  ;;  %v12325_v47 = vld [vmem:[#allocation2 + $0x24] sm:$0xff]   ;;  %v5997_v37 = vld [vmem:[#allocation2 + $0x34] sm:$0xf] }
 0x2b5   : > { %v6112_v41 = vrot.slane %v6111_v16, 4  ;;  %v11071_v43 = vpack.c.bf16 %v5304_v8, %v5304_v8  ;;  %v11074_v32 = vpack.c.bf16 %v5307_v1, %v5307_v1  ;;  %v5305_v50 = vmax.f32 %v5253_v54, 0.0  ;;  %v5816_v16 = vld [vmem:[#allocation2 + $0xa4] sm:$0x1]  ;;  %v5998_v8 = vld [vmem:[#allocation2 + $0x38] sm:$0x1] }
 0x2b6   : > { %v6122_v29 = vrot.slane %v6121_v59, 4  ;;  %v5630_v56 = vshrl.u32 %v11073_v39, 16  ;;  %v5633_v13 = vshll.u32 %v11073_v39, 16  ;;  %v14823_v25 = vsel %vm12686_vm11, %v10779_v10, %v6615_v6  ;;  %v12370_v54 = vld [vmem:[%s16155_s3 + $0x138] sm:$0xff]  }
 0x2b7   : > { %v6117_v26 = vsel %vm12706_vm14, %v6112_v41, %v6116_v51  ;;  %v5613_v48 = vshrl.u32 %v11071_v43, 16  ;;  %v5616_v15 = vshll.u32 %v11071_v43, 16  ;;  %v5638_v27 = vshrl.u32 %v11074_v32, 16  ;;  %v12369_v51 = vld [vmem:[%s16155_s3 + $0x1a0] sm:$0xff]   ;;  %v6508_v43 = vld [vmem:[#allocation2 + $0x30] sm:$0xe]  ;;  %11791 = vmatpush3.bf16.msra.mxu1 %v12370_v54 }
 0x2b8   : > { %v6127_v19 = vsel %vm12706_vm14, %v6122_v29, %v6126_v17  ;;  %v5632_v20 = vrot.slane %v5630_v56, 7  ;;  %v5641_v12 = vshll.u32 %v11074_v32, 16  ;;  %v11072_v60 = vpack.c.bf16 %v5305_v50, %v5305_v50  ;;  %11897 = vmatpush3.bf16.msra.mxu0 %v12369_v51 }
 0x2b9   : > { %v10763_v14 = vcombine.low %v6117_v26, %v6127_v19  ;;  %v5615_v44 = vrot.slane %v5613_v48, 7  ;;  %v5640_v23 = vrot.slane %v5638_v27, 7  ;;  %v6617_v0 = vrot.slane %v6615_v6, 4  ;;  %v12326_v6 = vld [vmem:[#allocation2 + $0x3c] sm:$0xff]   ;;  %v12371_v26 = vld [vmem:[%s16155_s3 + $0x1e8] sm:$0xff]  }
 0x2ba   : > { %v5635_v61 = vor.u32 %v5633_v13, %v5632_v20  ;;  %v5636_v42 = vrot.slane %v5632_v20, 4  ;;  %v5621_v33 = vshrl.u32 %v11072_v60, 16  ;;  %v5624_v53 = vshll.u32 %v11072_v60, 16  ;;  %v6509_v13 = vld [vmem:[#allocation2 + $0x34] sm:$0xf]  ;;  %11898 = vmatprep.subr.bf16.mxu0 %v12371_v26 }
 0x2bb   : > { %9455 = vmatprep.mubr.bf16.mxu1 %v10763_v14  ;;  %v5618_v7 = vor.u32 %v5616_v15, %v5615_v44  ;;  %v5619_v5 = vrot.slane %v5615_v44, 4  ;;  %v5643_v2 = vor.u32 %v5641_v12, %v5640_v23  ;;  %v5645_v63 = vrot.slane %v5640_v23, 4 }
 0x2bc   : > { %v5820_v62 = vsel %vm12692_vm12, %v5635_v61, %v5819_v3  ;;  %v5623_v35 = vrot.slane %v5621_v33, 7  ;;  %v6618_v55 = vrot.slane %v6507_v18, 5  ;;  %9456 = vmatmul.mubr.bf16.gmra.mrb[140].mxu1 %v12325_v47  ;;  %v6129_v22 = vshrl.u32 %v5996_v46, 16  ;;  %v6510_v18 = vld [vmem:[#allocation2 + $0x38] sm:$0x1] }
 0x2bd   : > { %5821 = vst [vmem:[#allocation2 + $0xa8] sm:$0xf] %v5820_v62  ;;  %v5813_v38 = vsel %vm12692_vm12, %v5618_v7, %v5812_v28  ;;  %v5644_v17 = vsel %vm12698_vm13, %v5636_v42, %v5643_v2  ;;  %v5824_v11 = vsel %vm12649_vm3, %v5645_v63, %v5823_v24  ;;  %v6132_v1 = vshll.u32 %v5996_v46, 16  ;;  %v5833_v63 = vld [vmem:[#allocation2 + $0xc0] sm:$0xf] }
 0x2be   : > { %5814 = vst [vmem:[#allocation2 + $0x9c] sm:$0xf] %v5813_v38  ;;  %5825 = vst [vmem:[#allocation2 + $0xb0] sm:$0x1] %v5824_v11  ;;  %v5626_v59 = vor.u32 %v5624_v53, %v5623_v35  ;;  %v5628_v39 = vrot.slane %v5623_v35, 4  ;;  %v6619_v10 = vsel %vm12686_vm11, %v6617_v0, %v6618_v55  ;;  %v6131_v41 = vrot.slane %v6129_v22, 4 }
 0x2bf   : > { %5822 = vst [vmem:[#allocation2 + $0xac] sm:$0xf] %v5644_v17  ;;  %v10795_v32 = vcombine.low %v14823_v25, %v6619_v10  ;;  %v6134_v50 = vrot.slane %v6132_v1, 5  ;;  %v6138_v29 = vshll.u32 %v5997_v37, 16  ;;  %v6142_v56 = vshrl.u32 %v5997_v37, 16  ;;  %v12372_v25 = vld [vmem:[%s16155_s3 + $0x1a8] sm:$0xff]  }
 0x2c0   : > { %v5627_v3 = vsel %vm12698_vm13, %v5619_v5, %v5626_v59  ;;  %v5817_v48 = vsel %vm12649_vm3, %v5628_v39, %v5816_v16  ;;  %v6148_v15 = vshll.u32 %v5998_v8, 16  ;;  %v5274_v27 = vadd.f32 %v14742_v52, %v14584_v40  ;;  %11899 = vmatpush3.bf16.msra.mxu0 %v12372_v25  ;;  %v5999_v37 = vld [vmem:[#allocation2 + $0x3c] sm:$0xf]  ;;  %v5826_v38 = vld [vmem:[#allocation2 + $0xb4] sm:$0xf] }
 0x2c1   : > { %5818 = vst [vmem:[#allocation2 + $0xa4] sm:$0x1] %v5817_v48  ;;  %5815 = vst [vmem:[#allocation2 + $0xa0] sm:$0xf] %v5627_v3  ;;  %9617 = vmatmul.mubr.bf16.gmra.mrb[172].mxu0 %v10795_v32  ;;  %v6135_v19 = vor.u32 %v6134_v50, %v6131_v41  ;;  %v6140_v20 = vrot.slane %v6138_v29, 5  ;;  %v6144_v28 = vrot.slane %v6142_v56, 4  ;;  %v5266_v12 = vadd.f32 %v14748_v31, %v14567_v30 }
 0x2c2   : > { %9624 = vmatprep.mubr.bf16.mxu0 %v12326_v6  ;;  %v6150_v24 = vrot.slane %v6148_v15, 5  ;;  %v5310_v60 = vmax.f32 %v5274_v27, 0.0  ;;  %v5277_v40 = vadd.f32 %v14760_v34, %v14591_v49  ;;  %v5269_v52 = vadd.f32 %v14766_v57, %v14573_v21  ;;  %v12373_v30 = vld [vmem:[%s16155_s3 + $0x1f0] sm:$0xff]   ;;  %v5837_v1 = vld [vmem:[#allocation2 + $0xc8] sm:$0x1] }
 0x2c3   : > { %v6136_v46 = vrot.slane %v6135_v19, 4  ;;  %v6145_v14 = vor.u32 %v6144_v28, %v6140_v20  ;;  %v5308_v44 = vmax.f32 %v5266_v12, 0.0  ;;  %v10780_v23 = vrot.slane %v6508_v43, 9  ;;  %v12375_v49 = vld [vmem:[%s16155_s3 + $0x1b0] sm:$0xff]   ;;  %11900 = vmatprep.subr.bf16.mxu0 %v12373_v30  ;;  %v6000_v10 = vld [vmem:[#allocation2 + $0x40] sm:$0xf] }
 0x2c4   : > { %v11077_v31 = vpack.c.bf16 %v5310_v60, %v5310_v60  ;;  %v5311_v0 = vmax.f32 %v5277_v40, 0.0  ;;  %v5309_v61 = vmax.f32 %v5269_v52, 0.0  ;;  %v6622_v42 = vrot.slane %v6509_v13, 5  ;;  %11901 = vmatpush3.bf16.msra.mxu0 %v12375_v49  ;;  %v12327_v16 = vld [vmem:[#allocation2 + $0x30] sm:$0xff]   ;;  %v5830_v32 = vld [vmem:[#allocation2 + $0xbc] sm:$0x1] }
 0x2c5   : > { %v6141_v21 = vsel %vm12706_vm14, %v6136_v46, %v6140_v20  ;;  %v6146_v34 = vrot.slane %v6145_v14, 4  ;;  %v11075_v57 = vpack.c.bf16 %v5308_v44, %v5308_v44  ;;  %v6625_v33 = vrot.slane %v6510_v18, 5  ;;  %v6001_v50 = vld [vmem:[#allocation2 + $0x44] sm:$0x1]  ;;  %v6511_v48 = vld [vmem:[#allocation2 + $0x3c] sm:$0xe] }
 0x2c6   : > { %v5664_v53 = vshrl.u32 %v11077_v31, 16  ;;  %v5667_v47 = vshll.u32 %v11077_v31, 16  ;;  %v11078_v7 = vpack.c.bf16 %v5311_v0, %v5311_v0  ;;  %v11076_v5 = vpack.c.bf16 %v5309_v61, %v5309_v61  ;;  %v6512_v15 = vld [vmem:[#allocation2 + $0x40] sm:$0xf]  ;;  %v12328_v28 = vld [vmem:[#allocation2 + $0x48] sm:$0xff]  }
 0x2c7   : > { %v6151_v2 = vsel %vm12706_vm14, %v6146_v34, %v6150_v24  ;;  %v5647_v62 = vshrl.u32 %v11075_v57, 16  ;;  %v5650_v35 = vshll.u32 %v11075_v57, 16  ;;  %v6623_v55 = vsel %vm12686_vm11, %v10780_v23, %v6622_v42  ;;  %v6513_v12 = vld [vmem:[#allocation2 + $0x44] sm:$0x1]  ;;  %v6002_v23 = vld [vmem:[#allocation2 + $0x48] sm:$0xf] }
 0x2c8   : > { %v10764_v22 = vcombine.low %v6141_v21, %v6151_v2  ;;  %v5666_v51 = vrot.slane %v5664_v53, 7  ;;  %v5672_v17 = vshrl.u32 %v11078_v7, 16  ;;  %v5675_v11 = vshll.u32 %v11078_v7, 16  ;;  %v6003_v61 = vld [vmem:[#allocation2 + $0x4c] sm:$0xf] }
 0x2c9   : > { %v5649_v8 = vrot.slane %v5647_v62, 7  ;;  %v5655_v54 = vshrl.u32 %v11076_v5, 16  ;;  %v5658_v59 = vshll.u32 %v11076_v5, 16  ;;  %v6624_v39 = vrot.slane %v6622_v42, 4  ;;  %v6004_v57 = vld [vmem:[#allocation2 + $0x50] sm:$0x1] }
 0x2ca   : > { %9463 = vmatprep.mubr.bf16.mxu1 %v10764_v22  ;;  %v5669_v6 = vor.u32 %v5667_v47, %v5666_v51  ;;  %v5670_v41 = vrot.slane %v5666_v51, 4  ;;  %v5674_v43 = vrot.slane %v5672_v17, 7  ;;  %v6153_v29 = vshrl.u32 %v5999_v37, 16  ;;  %v6515_v62 = vld [vmem:[#allocation2 + $0x4c] sm:$0xf] }
 0x2cb   : > { %v5652_v56 = vor.u32 %v5650_v35, %v5649_v8  ;;  %v5653_v13 = vrot.slane %v5649_v8, 4  ;;  %v5657_v26 = vrot.slane %v5655_v54, 7  ;;  %v6626_v3 = vsel %vm12686_vm11, %v6624_v39, %v6625_v33  ;;  %9464 = vmatmul.mubr.bf16.gmra.mrb[144].mxu1 %v12327_v16  ;;  %v6516_v35 = vld [vmem:[#allocation2 + $0x50] sm:$0x1]  ;;  %v6005_v8 = vld [vmem:[#allocation2 + $0x54] sm:$0xf] }
 0x2cc   : > { %v5834_v27 = vsel %vm12692_vm12, %v5669_v6, %v5833_v63  ;;  %v5677_v25 = vor.u32 %v5675_v11, %v5674_v43  ;;  %v5679_v19 = vrot.slane %v5674_v43, 4  ;;  %v10796_v20 = vcombine.low %v6623_v55, %v6626_v3  ;;  %v12377_v6 = vld [vmem:[%s16155_s3 + $0x1b8] sm:$0xff]  }
 0x2cd   : > { %5835 = vst [vmem:[#allocation2 + $0xc0] sm:$0xf] %v5834_v27  ;;  %v5827_v24 = vsel %vm12692_vm12, %v5652_v56, %v5826_v38  ;;  %v5660_v60 = vor.u32 %v5658_v59, %v5657_v26  ;;  %v5662_v40 = vrot.slane %v5657_v26, 4  ;;  %v6155_v52 = vrot.slane %v6153_v29, 4  ;;  %v12332_v43 = vld [vmem:[#allocation2 + $0x54] sm:$0xff]  }
 0x2ce   : > { %5828 = vst [vmem:[#allocation2 + $0xb4] sm:$0xf] %v5827_v24  ;;  %v5678_v18 = vsel %vm12698_vm13, %v5670_v41, %v5677_v25  ;;  %v5838_v46 = vsel %vm12649_vm3, %v5679_v19, %v5837_v1  ;;  %9625 = vmatmul.mubr.bf16.gmra.mrb[176].mxu0 %v10796_v20  ;;  %v6156_v14 = vshll.u32 %v5999_v37, 16  ;;  %v6162_v44 = vshll.u32 %v6000_v10, 16  ;;  %v12376_v1 = vld [vmem:[%s16155_s3 + $0x1f8] sm:$0xff]  }
 0x2cf   : > { %5836 = vst [vmem:[#allocation2 + $0xc4] sm:$0xf] %v5678_v18  ;;  %5839 = vst [vmem:[#allocation2 + $0xc8] sm:$0x1] %v5838_v46  ;;  %v5661_v9 = vsel %vm12698_vm13, %v5653_v13, %v5660_v60  ;;  %v5831_v30 = vsel %vm12649_vm3, %v5662_v40, %v5830_v32  ;;  %9632 = vmatprep.mubr.bf16.mxu0 %v12328_v28  ;;  %v6166_v31 = vshrl.u32 %v6000_v10, 16  ;;  %v6172_v0 = vshll.u32 %v6001_v50, 16 }
 0x2d0   : > { %5832 = vst [vmem:[#allocation2 + $0xbc] sm:$0x1] %v5831_v30  ;;  %5829 = vst [vmem:[#allocation2 + $0xb8] sm:$0xf] %v5661_v9  ;;  %v6158_v42 = vrot.slane %v6156_v14, 5  ;;  %v6164_v49 = vrot.slane %v6162_v44, 5  ;;  %11902 = vmatprep.subr.bf16.mxu0 %v12376_v1 }
 0x2d1   : > { %v10781_v21 = vrot.slane %v6511_v48, 9  ;;  %v6629_v34 = vrot.slane %v6512_v15, 5  ;;  %v6168_v33 = vrot.slane %v6166_v31, 4  ;;  %v6174_v53 = vrot.slane %v6172_v0, 5  ;;  %v6006_v56 = vld [vmem:[#allocation2 + $0x58] sm:$0xf]  ;;  %11903 = vmatpush3.bf16.msra.mxu0 %v12377_v6 }
 0x2d2   : > { %v6632_v47 = vrot.slane %v6513_v12, 5  ;;  %v6177_v7 = vshrl.u32 %v6002_v23, 16  ;;  %v6159_v5 = vor.u32 %v6158_v42, %v6155_v52  ;;  %v6180_v63 = vshll.u32 %v6002_v23, 16  ;;  %v6007_v15 = vld [vmem:[#allocation2 + $0x5c] sm:$0x1]  ;;  %v12379_v0 = vld [vmem:[%s16155_s3 + $0x200] sm:$0xff]  }
 0x2d3   : > { %v6630_v58 = vsel %vm12686_vm11, %v10781_v21, %v6629_v34  ;;  %v6631_v2 = vrot.slane %v6629_v34, 4  ;;  %v6169_v55 = vor.u32 %v6168_v33, %v6164_v49  ;;  %v6186_v22 = vshll.u32 %v6003_v61, 16  ;;  %v6517_v28 = vld [vmem:[#allocation2 + $0x54] sm:$0xe]  ;;  %v6518_v12 = vld [vmem:[#allocation2 + $0x58] sm:$0xf]  ;;  %12072 = vmatprep.subr.bf16.mxu1 %v12379_v0 }
 0x2d4   : > { %v6179_v37 = vrot.slane %v6177_v7, 4  ;;  %v6190_v51 = vshrl.u32 %v6003_v61, 16  ;;  %v6160_v38 = vrot.slane %v6159_v5, 4  ;;  %v6182_v11 = vrot.slane %v6180_v63, 5  ;;  %v6519_v24 = vld [vmem:[#allocation2 + $0x5c] sm:$0x1] }
 0x2d5   : > { %v6633_v17 = vsel %vm12686_vm11, %v6631_v2, %v6632_v47  ;;  %v6196_v16 = vshll.u32 %v6004_v57, 16  ;;  %v6170_v54 = vrot.slane %v6169_v55, 4  ;;  %v6188_v39 = vrot.slane %v6186_v22, 5  ;;  %v12331_v60 = vld [vmem:[#allocation2 + $0x3c] sm:$0xff]   ;;  %v6009_v31 = vld [vmem:[#allocation2 + $0x64] sm:$0xf] }
 0x2d6   : > { %v10797_v59 = vcombine.low %v6630_v58, %v6633_v17  ;;  %v6192_v10 = vrot.slane %v6190_v51, 4  ;;  %v6165_v41 = vsel %vm12706_vm14, %v6160_v38, %v6164_v49  ;;  %v6183_v32 = vor.u32 %v6182_v11, %v6179_v37  ;;  %v6008_v14 = vld [vmem:[#allocation2 + $0x60] sm:$0xf]  ;;  %v6010_v58 = vld [vmem:[#allocation2 + $0x68] sm:$0x1] }
 0x2d7   : > { %v6198_v50 = vrot.slane %v6196_v16, 5  ;;  %v10782_v29 = vrot.slane %v6514_v45, 9  ;;  %v6175_v13 = vsel %vm12706_vm14, %v6170_v54, %v6174_v53  ;;  %v6636_v3 = vrot.slane %v6515_v62, 5  ;;  %v12334_v2 = vld [vmem:[#allocation2 + $0x60] sm:$0xff]  }
 0x2d8   : > { %9633 = vmatmul.mubr.bf16.gmra.mrb[180].mxu0 %v10797_v59  ;;  %v6193_v26 = vor.u32 %v6192_v10, %v6188_v39  ;;  %v6639_v48 = vrot.slane %v6516_v35, 5  ;;  %v10765_v27 = vcombine.low %v6165_v41, %v6175_v13  ;;  %v6184_v25 = vrot.slane %v6183_v32, 4  ;;  %v6520_v37 = vld [vmem:[#allocation2 + $0x60] sm:$0xe]  ;;  %v6521_v11 = vld [vmem:[#allocation2 + $0x64] sm:$0xf] }
 0x2d9   : > { %9640 = vmatprep.mubr.bf16.mxu0 %v12332_v43  ;;  %v6201_v19 = vshrl.u32 %v6005_v8, 16  ;;  %v6204_v20 = vshll.u32 %v6005_v8, 16  ;;  %v6637_v52 = vsel %vm12686_vm11, %v10782_v29, %v6636_v3  ;;  %v6638_v18 = vrot.slane %v6636_v3, 4  ;;  %v6522_v59 = vld [vmem:[#allocation2 + $0x68] sm:$0x1] }
 0x2da   : > { %v6194_v40 = vrot.slane %v6193_v26, 4  ;;  %v6210_v46 = vshll.u32 %v6006_v56, 16  ;;  %9471 = vmatprep.mubr.bf16.mxu1 %v10765_v27  ;;  %v6189_v44 = vsel %vm12706_vm14, %v6184_v25, %v6188_v39  ;;  %v6214_v30 = vshrl.u32 %v6006_v56, 16  ;;  %v12333_v39 = vld [vmem:[#allocation2 + $0x48] sm:$0xff]   ;;  %v6012_v26 = vld [vmem:[#allocation2 + $0x70] sm:$0xf] }
 0x2db   : > { %v6203_v23 = vrot.slane %v6201_v19, 4  ;;  %v6206_v9 = vrot.slane %v6204_v20, 5  ;;  %9472 = vmatmul.mubr.bf16.gmra.mrb[148].mxu1 %v12331_v60  ;;  %v6640_v42 = vsel %vm12686_vm11, %v6638_v18, %v6639_v48  ;;  %v6220_v21 = vshll.u32 %v6007_v15, 16  ;;  %v6011_v32 = vld [vmem:[#allocation2 + $0x6c] sm:$0xf] }
 0x2dc   : > { %v6199_v61 = vsel %vm12706_vm14, %v6194_v40, %v6198_v50  ;;  %v6212_v49 = vrot.slane %v6210_v46, 5  ;;  %v10798_v57 = vcombine.low %v6637_v52, %v6640_v42  ;;  %v6216_v53 = vrot.slane %v6214_v30, 4  ;;  %v6013_v25 = vld [vmem:[#allocation2 + $0x74] sm:$0x1]  ;;  %v6524_v46 = vld [vmem:[#allocation2 + $0x70] sm:$0xf] }
 0x2dd   : > { %v10766_v34 = vcombine.low %v6189_v44, %v6199_v61  ;;  %v6207_v33 = vor.u32 %v6206_v9, %v6203_v23  ;;  %v6222_v47 = vrot.slane %v6220_v21, 5  ;;  %v10783_v7 = vrot.slane %v6517_v28, 9  ;;  %v6014_v21 = vld [vmem:[#allocation2 + $0x78] sm:$0xf] }
 0x2de   : > { %v6643_v45 = vrot.slane %v6518_v12, 5  ;;  %v6646_v5 = vrot.slane %v6519_v24, 5  ;;  %v6217_v62 = vor.u32 %v6216_v53, %v6212_v49  ;;  %v6225_v35 = vshrl.u32 %v6008_v14, 16  ;;  %v6523_v24 = vld [vmem:[#allocation2 + $0x6c] sm:$0xe] }
 0x2df   : > { %9479 = vmatprep.mubr.bf16.mxu1 %v10766_v34  ;;  %v6208_v63 = vrot.slane %v6207_v33, 4  ;;  %v6228_v55 = vshll.u32 %v6008_v14, 16  ;;  %v6234_v38 = vshll.u32 %v6009_v31, 16  ;;  %v6238_v17 = vshrl.u32 %v6009_v31, 16  ;;  %v12338_v14 = vld [vmem:[#allocation2 + $0x6c] sm:$0xff]  }
 0x2e0   : > { %9641 = vmatmul.mubr.bf16.gmra.mrb[184].mxu0 %v10798_v57  ;;  %v6644_v22 = vsel %vm12686_vm11, %v10783_v7, %v6643_v45  ;;  %v6645_v51 = vrot.slane %v6643_v45, 4  ;;  %v6218_v8 = vrot.slane %v6217_v62, 4  ;;  %v6227_v1 = vrot.slane %v6225_v35, 4  ;;  %v6525_v31 = vld [vmem:[#allocation2 + $0x74] sm:$0x1] }
 0x2e1   : > { %9648 = vmatprep.mubr.bf16.mxu0 %v12334_v2  ;;  %v6213_v16 = vsel %vm12706_vm14, %v6208_v63, %v6212_v49  ;;  %v6230_v54 = vrot.slane %v6228_v55, 5  ;;  %v6236_v6 = vrot.slane %v6234_v38, 5  ;;  %v6240_v41 = vrot.slane %v6238_v17, 4  ;;  %v6015_v34 = vld [vmem:[#allocation2 + $0x7c] sm:$0xf]  ;;  %v12337_v57 = vld [vmem:[#allocation2 + $0x54] sm:$0xff]  }
 0x2e2   : > { %v6647_v10 = vsel %vm12686_vm11, %v6645_v51, %v6646_v5  ;;  %v6244_v43 = vshll.u32 %v6010_v58, 16  ;;  %v6223_v50 = vsel %vm12706_vm14, %v6218_v8, %v6222_v47  ;;  %v10784_v13 = vrot.slane %v6520_v37, 9  ;;  %v6016_v63 = vld [vmem:[#allocation2 + $0x80] sm:$0x1] }
 0x2e3   : > { %v10799_v29 = vcombine.low %v6644_v22, %v6647_v10  ;;  %v6231_v56 = vor.u32 %v6230_v54, %v6227_v1  ;;  %9480 = vmatmul.mubr.bf16.gmra.mrb[152].mxu1 %v12333_v39  ;;  %v10767_v3 = vcombine.low %v6213_v16, %v6223_v50  ;;  %v6241_v48 = vor.u32 %v6240_v41, %v6236_v6  ;;  %v6526_v22 = vld [vmem:[#allocation2 + $0x78] sm:$0xe]  ;;  %v6527_v16 = vld [vmem:[#allocation2 + $0x7c] sm:$0xf]  ;;  %v6528_v39 = vld [vmem:[#allocation2 + $0x80] sm:$0x1] }
 0x2e4   : > { %v6246_v15 = vrot.slane %v6244_v43, 5  ;;  %v6650_v27 = vrot.slane %v6521_v11, 5  ;;  %v6653_v20 = vrot.slane %v6522_v59, 5  ;;  %v6249_v28 = vshrl.u32 %v6011_v32, 16  ;;  %v12342_v50 = vld [vmem:[#allocation2 + $0x78] sm:$0xff]  }
 0x2e5   : > { %v6232_v19 = vrot.slane %v6231_v56, 4  ;;  %v6252_v12 = vshll.u32 %v6011_v32, 16  ;;  %9487 = vmatprep.mubr.bf16.mxu1 %v10767_v3  ;;  %v6242_v60 = vrot.slane %v6241_v48, 4  ;;  %v6258_v18 = vshll.u32 %v6012_v26, 16  ;;  %v6017_v32 = vld [vmem:[#allocation2 + $0x84] sm:$0xf] }
 0x2e6   : > { %v6651_v40 = vsel %vm12686_vm11, %v10784_v13, %v6650_v27  ;;  %v6652_v52 = vrot.slane %v6650_v27, 4  ;;  %v6251_v23 = vrot.slane %v6249_v28, 4  ;;  %v6262_v30 = vshrl.u32 %v6012_v26, 16  ;;  %v6018_v3 = vld [vmem:[#allocation2 + $0x88] sm:$0xf] }
 0x2e7   : > { %v6237_v44 = vsel %vm12706_vm14, %v6232_v19, %v6236_v6  ;;  %v6254_v9 = vrot.slane %v6252_v12, 5  ;;  %v6247_v0 = vsel %vm12706_vm14, %v6242_v60, %v6246_v15  ;;  %v6260_v42 = vrot.slane %v6258_v18, 5  ;;  %v6019_v19 = vld [vmem:[#allocation2 + $0x8c] sm:$0x1]  ;;  %v6529_v60 = vld [vmem:[#allocation2 + $0x84] sm:$0xe] }
 0x2e8   : > { %9649 = vmatmul.mubr.bf16.gmra.mrb[188].mxu0 %v10799_v29  ;;  %v6654_v61 = vsel %vm12686_vm11, %v6652_v52, %v6653_v20  ;;  %v6268_v49 = vshll.u32 %v6013_v25, 16  ;;  %v10768_v33 = vcombine.low %v6237_v44, %v6247_v0  ;;  %v6264_v7 = vrot.slane %v6262_v30, 4  ;;  %v12341_v52 = vld [vmem:[#allocation2 + $0x60] sm:$0xff]   ;;  %v6531_v0 = vld [vmem:[#allocation2 + $0x8c] sm:$0x1] }
 0x2e9   : > { %9656 = vmatprep.mubr.bf16.mxu0 %v12338_v14  ;;  %v10800_v53 = vcombine.low %v6651_v40, %v6654_v61  ;;  %v6255_v47 = vor.u32 %v6254_v9, %v6251_v23  ;;  %v10785_v5 = vrot.slane %v6523_v24, 9  ;;  %v6657_v58 = vrot.slane %v6524_v46, 5  ;;  %v6530_v40 = vld [vmem:[#allocation2 + $0x88] sm:$0xf] }
 0x2ea   : > { %v6270_v45 = vrot.slane %v6268_v49, 5  ;;  %v6660_v2 = vrot.slane %v6525_v31, 5  ;;  %v6265_v35 = vor.u32 %v6264_v7, %v6260_v42  ;;  %v6273_v55 = vshrl.u32 %v6014_v21, 16  ;;  %v6021_v7 = vld [vmem:[#allocation2 + $0x94] sm:$0xf] }
 0x2eb   : > { %v6256_v62 = vrot.slane %v6255_v47, 4  ;;  %v6276_v37 = vshll.u32 %v6014_v21, 16  ;;  %9488 = vmatmul.mubr.bf16.gmra.mrb[156].mxu1 %v12337_v57  ;;  %v14933_v51 = vsel %vm12686_vm11, %v10785_v5, %v6657_v58  ;;  %v6659_v38 = vrot.slane %v6657_v58, 4 }
 0x2ec   : > { %v6282_v17 = vshll.u32 %v6015_v34, 16  ;;  %v6286_v11 = vshrl.u32 %v6015_v34, 16  ;;  %9495 = vmatprep.mubr.bf16.mxu1 %v10768_v33  ;;  %v6266_v1 = vrot.slane %v6265_v35, 4  ;;  %v6275_v54 = vrot.slane %v6273_v55, 4  ;;  %v6020_v34 = vld [vmem:[#allocation2 + $0x90] sm:$0xf] }
 0x2ed   : > { %v6261_v8 = vsel %vm12706_vm14, %v6256_v62, %v6260_v42  ;;  %v6278_v59 = vrot.slane %v6276_v37, 5  ;;  %v6661_v10 = vsel %vm12686_vm11, %v6659_v38, %v6660_v2  ;;  %v6292_v43 = vshll.u32 %v6016_v63, 16  ;;  %v6532_v62 = vld [vmem:[#allocation2 + $0x90] sm:$0xe]  ;;  %v12346_v35 = vld [vmem:[#allocation2 + $0x84] sm:$0xff]  }
 0x2ee   : > { %v6284_v6 = vrot.slane %v6282_v17, 5  ;;  %v6288_v41 = vrot.slane %v6286_v11, 4  ;;  %v6271_v29 = vsel %vm12706_vm14, %v6266_v1, %v6270_v45  ;;  %v10801_v56 = vcombine.low %v14933_v51, %v6661_v10  ;;  %v6022_v45 = vld [vmem:[#allocation2 + $0x98] sm:$0x1]  ;;  %v6533_v38 = vld [vmem:[#allocation2 + $0x94] sm:$0xf] }
 0x2ef   : > { %v6279_v13 = vor.u32 %v6278_v59, %v6275_v54  ;;  %v10786_v26 = vrot.slane %v6526_v22, 9  ;;  %v10769_v48 = vcombine.low %v6261_v8, %v6271_v29  ;;  %v6294_v27 = vrot.slane %v6292_v43, 5  ;;  %v6534_v1 = vld [vmem:[#allocation2 + $0x98] sm:$0x1] }
 0x2f0   : > { %9657 = vmatmul.mubr.bf16.gmra.mrb[192].mxu0 %v10800_v53  ;;  %v6289_v15 = vor.u32 %v6288_v41, %v6284_v6  ;;  %v6664_v25 = vrot.slane %v6527_v16, 5  ;;  %v6667_v28 = vrot.slane %v6528_v39, 5  ;;  %v6297_v12 = vshrl.u32 %v6017_v32, 16  ;;  %v12345_v41 = vld [vmem:[#allocation2 + $0x6c] sm:$0xff]  }
 0x2f1   : > { %9664 = vmatprep.mubr.bf16.mxu0 %v12342_v50  ;;  %v6280_v20 = vrot.slane %v6279_v13, 4  ;;  %v6300_v24 = vshll.u32 %v6017_v32, 16  ;;  %v6306_v44 = vshll.u32 %v6018_v3, 16  ;;  %v6310_v31 = vshrl.u32 %v6018_v3, 16 }
 0x2f2   : > { %v6290_v18 = vrot.slane %v6289_v15, 4  ;;  %v14944_v46 = vsel %vm12686_vm11, %v10786_v26, %v6664_v25  ;;  %v6666_v14 = vrot.slane %v6664_v25, 4  ;;  %v6299_v9 = vrot.slane %v6297_v12, 4 }
 0x2f3   : > { %v6285_v23 = vsel %vm12706_vm14, %v6280_v20, %v6284_v6  ;;  %v6302_v30 = vrot.slane %v6300_v24, 5  ;;  %9496 = vmatmul.mubr.bf16.gmra.mrb[160].mxu1 %v12341_v52  ;;  %v6308_v49 = vrot.slane %v6306_v44, 5  ;;  %v6316_v21 = vshll.u32 %v6019_v19, 16  ;;  %v6023_v6 = vld [vmem:[#allocation2 + $0x9c] sm:$0xf] }
 0x2f4   : > { %v6295_v61 = vsel %vm12706_vm14, %v6290_v18, %v6294_v27  ;;  %v14952_v42 = vsel %vm12686_vm11, %v6666_v14, %v6667_v28  ;;  %9503 = vmatprep.mubr.bf16.mxu1 %v10769_v48  ;;  %v6312_v47 = vrot.slane %v6310_v31, 4  ;;  %v10787_v58 = vrot.slane %v6529_v60, 9  ;;  %v6024_v48 = vld [vmem:[#allocation2 + $0xa0] sm:$0xf]  ;;  %v6025_v20 = vld [vmem:[#allocation2 + $0xa4] sm:$0x1] }
 0x2f5   : > { %v10770_v57 = vcombine.low %v6285_v23, %v6295_v61  ;;  %v10802_v33 = vcombine.low %v14944_v46, %v14952_v42  ;;  %v6303_v53 = vor.u32 %v6302_v30, %v6299_v9  ;;  %v6318_v5 = vrot.slane %v6316_v21, 5  ;;  %v6536_v44 = vld [vmem:[#allocation2 + $0xa0] sm:$0xf]  ;;  %v12350_v23 = vld [vmem:[#allocation2 + $0x90] sm:$0xff]   ;;  %v6537_v61 = vld [vmem:[#allocation2 + $0xa4] sm:$0x1] }
 0x2f6   : > { %v6671_v2 = vrot.slane %v6530_v40, 5  ;;  %v6674_v63 = vrot.slane %v6531_v0, 5  ;;  %v6313_v37 = vor.u32 %v6312_v47, %v6308_v49  ;;  %v6321_v22 = vshrl.u32 %v6020_v34, 16  ;;  %v6535_v40 = vld [vmem:[#allocation2 + $0x9c] sm:$0xe] }
 0x2f7   : > { %v6304_v55 = vrot.slane %v6303_v53, 4  ;;  %v6324_v51 = vshll.u32 %v6020_v34, 16  ;;  %v6330_v16 = vshll.u32 %v6021_v7, 16  ;;  %v6334_v8 = vshrl.u32 %v6021_v7, 16  ;;  %v6027_v53 = vld [vmem:[#allocation2 + $0xac] sm:$0xf] }
 0x2f8   : > { %9665 = vmatmul.mubr.bf16.gmra.mrb[196].mxu0 %v10801_v56  ;;  %v14958_v17 = vsel %vm12686_vm11, %v10787_v58, %v6671_v2  ;;  %v6673_v11 = vrot.slane %v6671_v2, 4  ;;  %v6314_v59 = vrot.slane %v6313_v37, 4  ;;  %v6323_v39 = vrot.slane %v6321_v22, 4  ;;  %v12349_v47 = vld [vmem:[#allocation2 + $0x78] sm:$0xff]   ;;  %v6028_v58 = vld [vmem:[#allocation2 + $0xb0] sm:$0x1] }
 0x2f9   : > { %9672 = vmatprep.mubr.bf16.mxu0 %v12346_v35  ;;  %v6309_v54 = vsel %vm12706_vm14, %v6304_v55, %v6308_v49  ;;  %v6326_v10 = vrot.slane %v6324_v51, 5  ;;  %v6332_v32 = vrot.slane %v6330_v16, 5  ;;  %v6336_v50 = vrot.slane %v6334_v8, 4 }
 0x2fa   : > { %v14964_v43 = vsel %vm12686_vm11, %v6673_v11, %v6674_v63  ;;  %v6340_v29 = vshll.u32 %v6022_v45, 16  ;;  %v6319_v56 = vsel %vm12706_vm14, %v6314_v59, %v6318_v5  ;;  %v10788_v3 = vrot.slane %v6532_v62, 9 }
 0x2fb   : > { %v10803_v13 = vcombine.low %v14958_v17, %v14964_v43  ;;  %v6327_v26 = vor.u32 %v6326_v10, %v6323_v39  ;;  %9504 = vmatmul.mubr.bf16.gmra.mrb[164].mxu1 %v12345_v41  ;;  %v10771_v15 = vcombine.low %v6309_v54, %v6319_v56  ;;  %v6337_v27 = vor.u32 %v6336_v50, %v6332_v32  ;;  %v6539_v54 = vld [vmem:[#allocation2 + $0xac] sm:$0xf]  ;;  %v6540_v41 = vld [vmem:[#allocation2 + $0xb0] sm:$0x1] }
 0x2fc   : > { %v6342_v25 = vrot.slane %v6340_v29, 5  ;;  %v6678_v19 = vrot.slane %v6533_v38, 5  ;;  %9511 = vmatprep.mubr.bf16.mxu1 %v10770_v57  ;;  %v6681_v12 = vrot.slane %v6534_v1, 5  ;;  %v6345_v24 = vshrl.u32 %v6023_v6, 16  ;;  %v6026_v57 = vld [vmem:[#allocation2 + $0xa8] sm:$0xf] }
 0x2fd   : > { %v6328_v28 = vrot.slane %v6327_v26, 4  ;;  %v6348_v60 = vshll.u32 %v6023_v6, 16  ;;  %v6338_v52 = vrot.slane %v6337_v27, 4  ;;  %v6354_v14 = vshll.u32 %v6024_v48, 16  ;;  %v6538_v38 = vld [vmem:[#allocation2 + $0xa8] sm:$0xe] }
 0x2fe   : > { %v14972_v18 = vsel %vm12686_vm11, %v10788_v3, %v6678_v19  ;;  %v6680_v46 = vrot.slane %v6678_v19, 4  ;;  %v6347_v30 = vrot.slane %v6345_v24, 4  ;;  %v6358_v0 = vshrl.u32 %v6024_v48, 16  ;;  %v6029_v26 = vld [vmem:[#allocation2 + $0xb4] sm:$0xf]  ;;  %v12354_v3 = vld [vmem:[#allocation2 + $0x9c] sm:$0xff]  }
 0x2ff   : > { %v6333_v9 = vsel %vm12706_vm14, %v6328_v28, %v6332_v32  ;;  %v6350_v31 = vrot.slane %v6348_v60, 5  ;;  %v6343_v42 = vsel %vm12706_vm14, %v6338_v52, %v6342_v25  ;;  %v6356_v21 = vrot.slane %v6354_v14, 5  ;;  %v6030_v19 = vld [vmem:[#allocation2 + $0xb8] sm:$0xf]  ;;  %v6031_v60 = vld [vmem:[#allocation2 + $0xbc] sm:$0x1] }
 0x300   : > { %9673 = vmatmul.mubr.bf16.gmra.mrb[200].mxu0 %v10802_v33  ;;  %v14980_v49 = vsel %vm12686_vm11, %v6680_v46, %v6681_v12  ;;  %v6364_v34 = vshll.u32 %v6025_v20, 16  ;;  %v14982_v7 = vcombine.low %v6333_v9, %v6343_v42  ;;  %v6360_v33 = vrot.slane %v6358_v0, 4  ;;  %v6543_v9 = vld [vmem:[#allocation2 + $0xbc] sm:$0x1] }
 0x301   : > { %9680 = vmatprep.mubr.bf16.mxu0 %v12350_v23  ;;  %v10804_v45 = vcombine.low %v14972_v18, %v14980_v49  ;;  %v6351_v5 = vor.u32 %v6350_v31, %v6347_v30  ;;  %v10789_v63 = vrot.slane %v6535_v40, 9  ;;  %v6685_v62 = vrot.slane %v6536_v44, 5  ;;  %v6541_v44 = vld [vmem:[#allocation2 + $0xb4] sm:$0xe]  ;;  %v6542_v23 = vld [vmem:[#allocation2 + $0xb8] sm:$0xf] }
 0x302   : > { %v6366_v2 = vrot.slane %v6364_v34, 5  ;;  %v6688_v35 = vrot.slane %v6537_v61, 5  ;;  %v6361_v37 = vor.u32 %v6360_v33, %v6356_v21  ;;  %v6369_v22 = vshrl.u32 %v6026_v57, 16  ;;  %v12353_v30 = vld [vmem:[#allocation2 + $0x84] sm:$0xff]   ;;  %v6928_v18 = vld [vmem:[#allocation2 + $0xc] sm:$0xf] }
 0x303   : > { %v6352_v55 = vrot.slane %v6351_v5, 4  ;;  %v6372_v51 = vshll.u32 %v6026_v57, 16  ;;  %9512 = vmatmul.mubr.bf16.gmra.mrb[168].mxu1 %v12349_v47  ;;  %v14988_v11 = vsel %vm12686_vm11, %v10789_v63, %v6685_v62  ;;  %v6687_v16 = vrot.slane %v6685_v62, 4  ;;  %v7872_v5 = vld [vmem:[#allocation2 + $0x18] sm:$0xf]  ;;  %v12358_v33 = vld [vmem:[#allocation2 + $0xa8] sm:$0xff]  }
 0x304   : > { %v6378_v8 = vshll.u32 %v6027_v53, 16  ;;  %v6382_v1 = vshrl.u32 %v6027_v53, 16  ;;  %9519 = vmatprep.mubr.bf16.mxu1 %v10771_v15  ;;  %v6362_v39 = vrot.slane %v6361_v37, 4  ;;  %v6371_v10 = vrot.slane %v6369_v22, 4 }
 0x305   : > { %v6357_v59 = vsel %vm12706_vm14, %v6352_v55, %v6356_v21  ;;  %v6374_v6 = vrot.slane %v6372_v51, 5  ;;  %v14994_v32 = vsel %vm12686_vm11, %v6687_v16, %v6688_v35  ;;  %v6388_v56 = vshll.u32 %v6028_v58, 16  ;;  %v7873_v35 = vld [vmem:[#allocation2 + $0x1c] sm:$0xf]  ;;  %v7874_v55 = vld [vmem:[#allocation2 + $0x20] sm:$0x1] }
 0x306   : > { %v6380_v50 = vrot.slane %v6378_v8, 5  ;;  %v6384_v29 = vrot.slane %v6382_v1, 4  ;;  %v6367_v48 = vsel %vm12706_vm14, %v6362_v39, %v6366_v2  ;;  %v10805_v15 = vcombine.low %v14988_v11, %v14994_v32  ;;  %v7440_v16 = vld [vmem:[#allocation2 + $0xc] sm:$0xe]  ;;  %v15022_v39 = vpop.f32.mrb[128].mxu1 }
 0x307   : > { %v6375_v27 = vor.u32 %v6374_v6, %v6371_v10  ;;  %v10790_v25 = vrot.slane %v6538_v38, 9  ;;  %v15003_v20 = vcombine.low %v6357_v59, %v6367_v48  ;;  %v6390_v12 = vrot.slane %v6388_v56, 5  ;;  %v12357_v10 = vld [vmem:[#allocation2 + $0x90] sm:$0xff]  }
 0x308   : > { %9681 = vmatmul.mubr.bf16.gmra.mrb[204].mxu0 %v10803_v13  ;;  %v6385_v28 = vor.u32 %v6384_v29, %v6380_v50  ;;  %v6692_v24 = vrot.slane %v6539_v54, 5  ;;  %v6695_v52 = vrot.slane %v6540_v41, 5  ;;  %v6393_v46 = vshrl.u32 %v6029_v26, 16  ;;  %v7442_v56 = vld [vmem:[#allocation2 + $0x14] sm:$0x1] }
 0x309   : > { %9688 = vmatprep.mubr.bf16.mxu0 %v12354_v3  ;;  %v6376_v40 = vrot.slane %v6375_v27, 4  ;;  %v6396_v14 = vshll.u32 %v6029_v26, 16  ;;  %v6402_v13 = vshll.u32 %v6030_v19, 16  ;;  %v6406_v21 = vshrl.u32 %v6030_v19, 16  ;;  %v15031_v26 = vpop.f32.mrb[129].mxu1 }
 0x30a   : > { %v6386_v31 = vrot.slane %v6385_v28, 4  ;;  %v15007_v17 = vsel %vm12686_vm11, %v10790_v25, %v6692_v24  ;;  %v6694_v43 = vrot.slane %v6692_v24, 4  ;;  %v6395_v61 = vrot.slane %v6393_v46, 4  ;;  %v15035_v49 = vpop.f32.mrb[130].mxu1  ;;  %v6929_v24 = vld [vmem:[#allocation2 + $0x10] sm:$0xf] }
 0x30b   : > { %v6381_v0 = vsel %vm12706_vm14, %v6376_v40, %v6380_v50  ;;  %v6398_v42 = vrot.slane %v6396_v14, 5  ;;  %9520 = vmatmul.mubr.bf16.gmra.mrb[172].mxu1 %v12353_v30  ;;  %v6404_v53 = vrot.slane %v6402_v13, 5  ;;  %v6412_v47 = vshll.u32 %v6031_v60, 16  ;;  %v15041_v60 = vpop.f32.mrb[131].mxu1  ;;  %v6930_v13 = vld [vmem:[#allocation2 + $0x14] sm:$0x1] }
 0x30c   : > { %v6391_v34 = vsel %vm12706_vm14, %v6386_v31, %v6390_v12  ;;  %v15015_v57 = vsel %vm12686_vm11, %v6694_v43, %v6695_v52  ;;  %9527 = vmatprep.mubr.bf16.mxu1 %v14982_v7  ;;  %v6408_v62 = vrot.slane %v6406_v21, 4  ;;  %v10791_v22 = vrot.slane %v6541_v44, 9  ;;  %v7441_v7 = vld [vmem:[#allocation2 + $0x10] sm:$0xf] }
 0x30d   : > { %v15018_v58 = vcombine.low %v6381_v0, %v6391_v34  ;;  %v10806_v2 = vcombine.low %v15007_v17, %v15015_v57  ;;  %v6399_v63 = vor.u32 %v6398_v42, %v6395_v61  ;;  %v6414_v37 = vrot.slane %v6412_v47, 5  ;;  %v7875_v47 = vld [vmem:[#allocation2 + $0x24] sm:$0xf] }
 0x30e   : > { %v6699_v51 = vrot.slane %v6542_v23, 5  ;;  %v6702_v38 = vrot.slane %v6543_v9, 5  ;;  %v6409_v1 = vor.u32 %v6408_v62, %v6404_v53  ;;  %v7921_v54 = vshrl.u32 %v7872_v5, 16 }
 0x30f   : > { %v6400_v8 = vrot.slane %v6399_v63, 4  ;;  %v7924_v59 = vshll.u32 %v7872_v5, 16  ;;  %v7930_v50 = vshll.u32 %v7873_v35, 16  ;;  %v7934_v29 = vshrl.u32 %v7873_v35, 16  ;;  %v12362_v5 = vld [vmem:[#allocation2 + $0xb4] sm:$0xff]  }
 0x310   : > { %9689 = vmatmul.mubr.bf16.gmra.mrb[208].mxu0 %v10804_v45  ;;  %v15029_v6 = vsel %vm12686_vm11, %v10791_v22, %v6699_v51  ;;  %v6701_v41 = vrot.slane %v6699_v51, 4  ;;  %v6410_v48 = vrot.slane %v6409_v1, 4  ;;  %v7923_v27 = vrot.slane %v7921_v54, 4  ;;  %v7876_v35 = vld [vmem:[#allocation2 + $0x28] sm:$0xf] }
 0x311   : > { %9696 = vmatprep.mubr.bf16.mxu0 %v12358_v33  ;;  %v6405_v3 = vsel %vm12706_vm14, %v6400_v8, %v6404_v53  ;;  %v7926_v25 = vrot.slane %v7924_v59, 5  ;;  %v7932_v19 = vrot.slane %v7930_v50, 5  ;;  %v7936_v28 = vrot.slane %v7934_v29, 4  ;;  %v12361_v8 = vld [vmem:[#allocation2 + $0x9c] sm:$0xff]  }
 0x312   : > { %v15039_v45 = vsel %vm12686_vm11, %v6701_v41, %v6702_v38  ;;  %v7940_v12 = vshll.u32 %v7874_v55, 16  ;;  %v6415_v40 = vsel %vm12706_vm14, %v6410_v48, %v6414_v37  ;;  %v10840_v14 = vrot.slane %v7440_v16, 9  ;;  %v7877_v38 = vld [vmem:[#allocation2 + $0x2c] sm:$0x1]  ;;  %v7443_v16 = vld [vmem:[#allocation2 + $0x18] sm:$0xe] }
 0x313   : > { %v10807_v52 = vcombine.low %v15029_v6, %v15039_v45  ;;  %v7927_v46 = vor.u32 %v7926_v25, %v7923_v27  ;;  %9528 = vmatmul.mubr.bf16.gmra.mrb[176].mxu1 %v12357_v10  ;;  %v15047_v44 = vcombine.low %v6405_v3, %v6415_v40  ;;  %v7937_v23 = vor.u32 %v7936_v28, %v7932_v19  ;;  %v7445_v59 = vld [vmem:[#allocation2 + $0x20] sm:$0x1] }
 0x314   : > { %v7942_v9 = vrot.slane %v7940_v12, 5  ;;  %v7538_v30 = vrot.slane %v7441_v7, 5  ;;  %9535 = vmatprep.mubr.bf16.mxu1 %v15003_v20  ;;  %v7541_v43 = vrot.slane %v7442_v56, 5  ;;  %v6977_v0 = vshrl.u32 %v6928_v18, 16  ;;  %v6931_v7 = vld [vmem:[#allocation2 + $0x18] sm:$0xf] }
 0x315   : > { %v7928_v31 = vrot.slane %v7927_v46, 4  ;;  %v6980_v61 = vshll.u32 %v6928_v18, 16  ;;  %v7938_v42 = vrot.slane %v7937_v23, 4  ;;  %v6986_v53 = vshll.u32 %v6929_v24, 16  ;;  %v6932_v12 = vld [vmem:[#allocation2 + $0x1c] sm:$0xf] }
 0x316   : > { %v15052_v21 = vsel %vm12686_vm11, %v10840_v14, %v7538_v30  ;;  %v7540_v34 = vrot.slane %v7538_v30, 4  ;;  %v6979_v63 = vrot.slane %v6977_v0, 4  ;;  %v6990_v20 = vshrl.u32 %v6929_v24, 16 }
 0x317   : > { %v7933_v33 = vsel %vm12706_vm14, %v7928_v31, %v7932_v19  ;;  %v6982_v62 = vrot.slane %v6980_v61, 5  ;;  %v7943_v55 = vsel %vm12706_vm14, %v7938_v42, %v7942_v9  ;;  %v6988_v22 = vrot.slane %v6986_v53, 5  ;;  %v6933_v61 = vld [vmem:[#allocation2 + $0x20] sm:$0x1] }
 0x318   : > { %9697 = vmatmul.mubr.bf16.gmra.mrb[212].mxu0 %v10805_v15  ;;  %v15063_v37 = vsel %vm12686_vm11, %v7540_v34, %v7541_v43  ;;  %v6996_v51 = vshll.u32 %v6930_v13, 16  ;;  %v15065_v1 = vcombine.low %v7933_v33, %v7943_v55  ;;  %v6992_v32 = vrot.slane %v6990_v20, 4  ;;  %v7444_v15 = vld [vmem:[#allocation2 + $0x1c] sm:$0xf]  ;;  %v12367_v43 = vld [vmem:[#allocation2 + $0xc0] sm:$0xff]  }
 0x319   : > { %9704 = vmatprep.mubr.bf16.mxu0 %v12362_v5  ;;  %v10856_v54 = vcombine.low %v15052_v21, %v15063_v37  ;;  %v6983_v11 = vor.u32 %v6982_v62, %v6979_v63  ;;  %v7945_v41 = vshrl.u32 %v7875_v47, 16  ;;  %v7948_v50 = vshll.u32 %v7875_v47, 16  ;;  %v7878_v63 = vld [vmem:[#allocation2 + $0x30] sm:$0xf]  ;;  %v7451_v37 = vld [vmem:[#allocation2 + $0x38] sm:$0x1] }
 0x31a   : > { %v6998_v10 = vrot.slane %v6996_v51, 5  ;;  %v7954_v29 = vshll.u32 %v7876_v35, 16  ;;  %v6993_v3 = vor.u32 %v6992_v32, %v6988_v22  ;;  %v7958_v48 = vshrl.u32 %v7876_v35, 16 }
 0x31b   : > { %v6984_v56 = vrot.slane %v6983_v11, 4  ;;  %v7964_v27 = vshll.u32 %v7877_v38, 16  ;;  %9536 = vmatmul.mubr.bf16.gmra.mrb[180].mxu1 %v12361_v8  ;;  %v7947_v25 = vrot.slane %v7945_v41, 4  ;;  %v7950_v18 = vrot.slane %v7948_v50, 5  ;;  %v7880_v38 = vld [vmem:[#allocation2 + $0x38] sm:$0x1] }
 0x31c   : > { %v7956_v19 = vrot.slane %v7954_v29, 5  ;;  %v10841_v28 = vrot.slane %v7443_v16, 9  ;;  %9543 = vmatprep.mubr.bf16.mxu1 %v15018_v58  ;;  %v6994_v40 = vrot.slane %v6993_v3, 4  ;;  %v7960_v46 = vrot.slane %v7958_v48, 4  ;;  %v12366_v58 = vld [vmem:[#allocation2 + $0xa8] sm:$0xff]  }
 0x31d   : > { %v6989_v24 = vsel %vm12706_vm14, %v6984_v56, %v6988_v22  ;;  %v7966_v14 = vrot.slane %v7964_v27, 5  ;;  %v7951_v23 = vor.u32 %v7950_v18, %v7947_v25  ;;  %v7545_v9 = vrot.slane %v7444_v15, 5  ;;  %v7879_v22 = vld [vmem:[#allocation2 + $0x34] sm:$0xf]  ;;  %v7446_v15 = vld [vmem:[#allocation2 + $0x24] sm:$0xe] }
 0x31e   : > { %v7548_v30 = vrot.slane %v7445_v59, 5  ;;  %v7001_v31 = vshrl.u32 %v6931_v7, 16  ;;  %v6999_v13 = vsel %vm12706_vm14, %v6994_v40, %v6998_v10  ;;  %v7961_v0 = vor.u32 %v7960_v46, %v7956_v19  ;;  %v7447_v50 = vld [vmem:[#allocation2 + $0x28] sm:$0xf]  ;;  %v7448_v27 = vld [vmem:[#allocation2 + $0x2c] sm:$0x1] }
 0x31f   : > { %v7004_v42 = vshll.u32 %v6931_v7, 16  ;;  %v7010_v34 = vshll.u32 %v6932_v12, 16  ;;  %v15077_v53 = vcombine.low %v6989_v24, %v6999_v13  ;;  %v7952_v47 = vrot.slane %v7951_v23, 4  ;;  %v6935_v23 = vld [vmem:[#allocation2 + $0x28] sm:$0xf] }
 0x320   : > { %9705 = vmatmul.mubr.bf16.gmra.mrb[216].mxu0 %v10806_v2  ;;  %v15081_v5 = vsel %vm12686_vm11, %v10841_v28, %v7545_v9  ;;  %v7547_v33 = vrot.slane %v7545_v9, 4  ;;  %v7962_v62 = vrot.slane %v7961_v0, 4  ;;  %v7003_v20 = vrot.slane %v7001_v31, 4 }
 0x321   : > { %9712 = vmatprep.mubr.bf16.mxu0 %v12367_v43  ;;  %v7006_v35 = vrot.slane %v7004_v42, 5  ;;  %v7012_v55 = vrot.slane %v7010_v34, 5  ;;  %v7957_v17 = vsel %vm12706_vm14, %v7952_v47, %v7956_v19  ;;  %v7014_v2 = vshrl.u32 %v6932_v12, 16  ;;  %v6934_v12 = vld [vmem:[#allocation2 + $0x24] sm:$0xf] }
 0x322   : > { %v15087_v57 = vsel %vm12686_vm11, %v7547_v33, %v7548_v30  ;;  %v7020_v51 = vshll.u32 %v6933_v61, 16  ;;  %v7967_v16 = vsel %vm12706_vm14, %v7962_v62, %v7966_v14  ;;  %v7969_v32 = vshrl.u32 %v7878_v63, 16  ;;  %v6936_v61 = vld [vmem:[#allocation2 + $0x2c] sm:$0x1]  ;;  %v7881_v34 = vld [vmem:[#allocation2 + $0x3c] sm:$0xf] }
 0x323   : > { %v10857_v8 = vcombine.low %v15081_v5, %v15087_v57  ;;  %v7007_v11 = vor.u32 %v7006_v35, %v7003_v20  ;;  %9544 = vmatmul.mubr.bf16.gmra.mrb[184].mxu1 %v12366_v58  ;;  %v15093_v59 = vcombine.low %v7957_v17, %v7967_v16  ;;  %v7016_v7 = vrot.slane %v7014_v2, 4  ;;  %v12374_v58 = vld [vmem:[#allocation2 + $0xb4] sm:$0xff]   ;;  %v7882_v33 = vld [vmem:[#allocation2 + $0x40] sm:$0xf] }
 0x324   : > { %v7022_v10 = vrot.slane %v7020_v51, 5  ;;  %v7972_v41 = vshll.u32 %v7878_v63, 16  ;;  %9551 = vmatprep.mubr.bf16.mxu1 %v15047_v44  ;;  %v7971_v56 = vrot.slane %v7969_v32, 4  ;;  %v7978_v3 = vshll.u32 %v7879_v22, 16  ;;  %v12378_v2 = vld [vmem:[#allocation2 + $0x18] sm:$0xff]  }
 0x325   : > { %v7008_v29 = vrot.slane %v7007_v11, 4  ;;  %v7982_v48 = vshrl.u32 %v7879_v22, 16  ;;  %v7017_v25 = vor.u32 %v7016_v7, %v7012_v55  ;;  %v7988_v19 = vshll.u32 %v7880_v38, 16  ;;  %v7883_v11 = vld [vmem:[#allocation2 + $0x44] sm:$0x1] }
 0x326   : > { %v7974_v18 = vrot.slane %v7972_v41, 5  ;;  %v10842_v28 = vrot.slane %v7446_v15, 9  ;;  %v7980_v40 = vrot.slane %v7978_v3, 5  ;;  %v7552_v14 = vrot.slane %v7447_v50, 5  ;;  %v7449_v50 = vld [vmem:[#allocation2 + $0x30] sm:$0xe] }
 0x327   : > { %v7013_v24 = vsel %vm12706_vm14, %v7008_v29, %v7012_v55  ;;  %v7984_v46 = vrot.slane %v7982_v48, 4  ;;  %v7018_v44 = vrot.slane %v7017_v25, 4  ;;  %v7990_v30 = vrot.slane %v7988_v19, 5  ;;  %v7450_v29 = vld [vmem:[#allocation2 + $0x34] sm:$0xf] }
 0x328   : > { %9713 = vmatmul.mubr.bf16.gmra.mrb[220].mxu0 %v10807_v52  ;;  %v7975_v9 = vor.u32 %v7974_v18, %v7971_v56  ;;  %v7555_v31 = vrot.slane %v7448_v27, 5  ;;  %v15104_v13 = vsel %vm12686_vm11, %v10842_v28, %v7552_v14  ;;  %v7554_v0 = vrot.slane %v7552_v14, 4  ;;  %v6937_v19 = vld [vmem:[#allocation2 + $0x30] sm:$0xf] }
 0x329   : > { %9914 = vmatprep.mubr.bf16.mxu0 %v15065_v1  ;;  %v7985_v43 = vor.u32 %v7984_v46, %v7980_v40  ;;  %v7025_v42 = vshrl.u32 %v6934_v12, 16  ;;  %v7023_v6 = vsel %vm12706_vm14, %v7018_v44, %v7022_v10  ;;  %v7028_v52 = vshll.u32 %v6934_v12, 16  ;;  %v6938_v46 = vld [vmem:[#allocation2 + $0x34] sm:$0xf] }
 0x32a   : > { %v7976_v45 = vrot.slane %v7975_v9, 4  ;;  %v7034_v47 = vshll.u32 %v6935_v23, 16  ;;  %v15108_v63 = vcombine.low %v7013_v24, %v7023_v6  ;;  %v15112_v62 = vsel %vm12686_vm11, %v7554_v0, %v7555_v31  ;;  %v12382_v9 = vld [vmem:[%s16155_s3 + $0x208] sm:$0xff]  }
 0x32b   : > { %v7986_v1 = vrot.slane %v7985_v43, 4  ;;  %v7027_v20 = vrot.slane %v7025_v42, 4  ;;  %9552 = vmatmul.mubr.bf16.gmra.mrb[188].mxu1 %v12374_v58  ;;  %v10858_v55 = vcombine.low %v15104_v13, %v15112_v62  ;;  %v7030_v22 = vrot.slane %v7028_v52, 5  ;;  %v7887_v62 = vld [vmem:[#allocation2 + $0x54] sm:$0xf] }
 0x32c   : > { %v7981_v35 = vsel %vm12706_vm14, %v7976_v45, %v7980_v40  ;;  %v7036_v17 = vrot.slane %v7034_v47, 5  ;;  %9753 = vmatprep.mubr.bf16.mxu1 %v10856_v54  ;;  %v7038_v38 = vshrl.u32 %v6935_v23, 16  ;;  %v7044_v16 = vshll.u32 %v6936_v61, 16  ;;  %v12380_v61 = vld [vmem:[#allocation2 + $0x24] sm:$0xff]  }
 0x32d   : > { %v7991_v51 = vsel %vm12706_vm14, %v7986_v1, %v7990_v30  ;;  %v7993_v32 = vshrl.u32 %v7881_v34, 16  ;;  %v7031_v7 = vor.u32 %v7030_v22, %v7027_v20  ;;  %v7996_v10 = vshll.u32 %v7881_v34, 16  ;;  %v12402_v45 = vld [vmem:[%s16155_s3 + $0x200] sm:$0xff]   ;;  %v7884_v20 = vld [vmem:[#allocation2 + $0x48] sm:$0xf] }
 0x32e   : > { %v15123_v15 = vcombine.low %v7981_v35, %v7991_v51  ;;  %v8002_v41 = vshll.u32 %v7882_v33, 16  ;;  %v7040_v56 = vrot.slane %v7038_v38, 4  ;;  %v7046_v3 = vrot.slane %v7044_v16, 5  ;;  %v7885_v22 = vld [vmem:[#allocation2 + $0x4c] sm:$0xf] }
 0x32f   : > { %v7995_v48 = vrot.slane %v7993_v32, 4  ;;  %v8006_v21 = vshrl.u32 %v7882_v33, 16  ;;  %v7032_v54 = vrot.slane %v7031_v7, 4  ;;  %v7998_v27 = vrot.slane %v7996_v10, 5  ;;  %v6939_v33 = vld [vmem:[#allocation2 + $0x38] sm:$0x1] }
 0x330   : > { %9915 = vmatmul.mubr.bf16.vlgmr.msra.gmra.mrb[224].mxu0 %v12378_v2  ;;  %v8004_v25 = vrot.slane %v8002_v41, 5  ;;  %v8012_v18 = vshll.u32 %v7883_v11, 16  ;;  %v7041_v28 = vor.u32 %v7040_v56, %v7036_v17  ;;  %v10843_v24 = vrot.slane %v7449_v50, 9  ;;  %v12385_v2 = vld [vmem:[%s16155_s3 + $0x210] sm:$0xff]   ;;  %v7452_v32 = vld [vmem:[#allocation2 + $0x3c] sm:$0xe] }
 0x331   : > { %9922 = vmatprep.mubr.bf16.mxu0 %v15093_v59  ;;  %v8008_v12 = vrot.slane %v8006_v21, 4  ;;  %v7559_v40 = vrot.slane %v7450_v29, 5  ;;  %v7037_v14 = vsel %vm12706_vm14, %v7032_v54, %v7036_v17  ;;  %v7999_v23 = vor.u32 %v7998_v27, %v7995_v48  ;;  %v7886_v17 = vld [vmem:[#allocation2 + $0x50] sm:$0x1]  ;;  %v7453_v29 = vld [vmem:[#allocation2 + $0x40] sm:$0xf] }
 0x332   : > { %v8014_v44 = vrot.slane %v8012_v18, 5  ;;  %v7562_v30 = vrot.slane %v7451_v37, 5  ;;  %v7042_v31 = vrot.slane %v7041_v28, 4  ;;  %v7049_v34 = vshrl.u32 %v6937_v19, 16  ;;  %v12388_v56 = vld [vmem:[%s16155_s3 + $0x218] sm:$0xff]  }
 0x333   : > { %v8009_v43 = vor.u32 %v8008_v12, %v8004_v25  ;;  %v15133_v59 = vsel %vm12686_vm11, %v10843_v24, %v7559_v40  ;;  %v7561_v0 = vrot.slane %v7559_v40, 4  ;;  %9754 = vmatmul.mubr.bf16.vlgmr.msra.gmra.mrb[192].mxu1 %v15077_v53  ;;  %v8000_v42 = vrot.slane %v7999_v23, 4  ;;  %v7454_v54 = vld [vmem:[#allocation2 + $0x44] sm:$0x1] }
 0x334   : > { %v7052_v58 = vshll.u32 %v6937_v19, 16  ;;  %v7058_v6 = vshll.u32 %v6938_v46, 16  ;;  %9761 = vmatprep.mubr.bf16.mxu1 %v10857_v8  ;;  %12073 = vmatpush3.bf16.msra.mxu1 %v12402_v45  ;;  %v7047_v52 = vsel %vm12706_vm14, %v7042_v31, %v7046_v3  ;;  %v7062_v1 = vshrl.u32 %v6938_v46, 16  ;;  %v6940_v46 = vld [vmem:[#allocation2 + $0x3c] sm:$0xf] }
 0x335   : > { %v8010_v47 = vrot.slane %v8009_v43, 4  ;;  %v15146_v53 = vsel %vm12686_vm11, %v7561_v0, %v7562_v30  ;;  %v15148_v35 = vcombine.low %v7037_v14, %v7047_v52  ;;  %v8005_v5 = vsel %vm12706_vm14, %v8000_v42, %v8004_v25  ;;  %12074 = vmatprep.subr.bf16.mxu1 %v12382_v9 }
 0x336   : > { %v10859_v57 = vcombine.low %v15133_v59, %v15146_v53  ;;  %v7051_v8 = vrot.slane %v7049_v34, 4  ;;  %v7054_v38 = vrot.slane %v7052_v58, 5  ;;  %v7060_v16 = vrot.slane %v7058_v6, 5 }
 0x337   : > { %v8015_v51 = vsel %vm12706_vm14, %v8010_v47, %v8014_v44  ;;  %v7064_v11 = vrot.slane %v7062_v1, 4  ;;  %v7068_v10 = vshll.u32 %v6939_v33, 16  ;;  %v8017_v41 = vshrl.u32 %v7884_v20, 16  ;;  %v7888_v33 = vld [vmem:[#allocation2 + $0x58] sm:$0xf] }
 0x338   : > { %9923 = vmatmul.mubr.bf16.gmra.mrb[228].mxu0 %v12380_v61  ;;  %v10891_v7 = vcombine.low %v8005_v5, %v8015_v51  ;;  %v8020_v50 = vshll.u32 %v7884_v20, 16  ;;  %12075 = vmatpush3.bf16.msra.mxu1 %v12382_v9  ;;  %v7055_v3 = vor.u32 %v7054_v38, %v7051_v8  ;;  %v8026_v21 = vshll.u32 %v7885_v22, 16  ;;  %v6941_v9 = vld [vmem:[#allocation2 + $0x40] sm:$0xf]  ;;  %v6942_v61 = vld [vmem:[#allocation2 + $0x44] sm:$0x1] }
 0x339   : > { %9930 = vmatprep.mubr.bf16.mxu0 %v15123_v15  ;;  %v7065_v48 = vor.u32 %v7064_v11, %v7060_v16  ;;  %v8030_v37 = vshrl.u32 %v7885_v22, 16  ;;  %v7070_v27 = vrot.slane %v7068_v10, 5  ;;  %v8019_v25 = vrot.slane %v8017_v41, 4  ;;  %12076 = vmatprep.subr.bf16.mxu1 %v12385_v2  ;;  %v7889_v22 = vld [vmem:[#allocation2 + $0x5c] sm:$0x1] }
 0x33a   : > { %v8022_v18 = vrot.slane %v8020_v50, 5  ;;  %v8036_v19 = vshll.u32 %v7886_v17, 16  ;;  %v7056_v28 = vrot.slane %v7055_v3, 4  ;;  %v8028_v24 = vrot.slane %v8026_v21, 5  ;;  %v7455_v17 = vld [vmem:[#allocation2 + $0x48] sm:$0xe] }
 0x33b   : > { %v7066_v12 = vrot.slane %v7065_v48, 4  ;;  %v8032_v40 = vrot.slane %v8030_v37, 4  ;;  %9762 = vmatmul.mubr.bf16.gmra.mrb[196].mxu1 %v15108_v63  ;;  %v10844_v23 = vrot.slane %v7452_v32, 9  ;;  %v7566_v44 = vrot.slane %v7453_v29, 5  ;;  %v12381_v63 = vld [vmem:[#allocation2 + $0x30] sm:$0xff]   ;;  %v12394_v29 = vld [vmem:[%s16155_s3 + $0x228] sm:$0xff]  }
 0x33c   : > { %v8023_v14 = vor.u32 %v8022_v18, %v8019_v25  ;;  %v8038_v15 = vrot.slane %v8036_v19, 5  ;;  %9769 = vmatprep.mubr.bf16.mxu1 %v10858_v55  ;;  %v7061_v30 = vsel %vm12706_vm14, %v7056_v28, %v7060_v16  ;;  %v7569_v0 = vrot.slane %v7454_v54, 5  ;;  %12077 = vmatpush3.bf16.msra.mxu1 %v12385_v2  ;;  %v12391_v55 = vld [vmem:[%s16155_s3 + $0x220] sm:$0xff]   ;;  %v7456_v11 = vld [vmem:[#allocation2 + $0x4c] sm:$0xf] }
 0x33d   : > { %v7071_v31 = vsel %vm12706_vm14, %v7066_v12, %v7070_v27  ;;  %v8033_v43 = vor.u32 %v8032_v40, %v8028_v24  ;;  %v15175_v58 = vsel %vm12686_vm11, %v10844_v23, %v7566_v44  ;;  %v7568_v13 = vrot.slane %v7566_v44, 4  ;;  %12078 = vmatprep.subr.bf16.mxu1 %v12388_v56  ;;  %v7457_v37 = vld [vmem:[#allocation2 + $0x50] sm:$0x1]  ;;  %v6943_v18 = vld [vmem:[#allocation2 + $0x48] sm:$0xf]  ;;  %v12383_v40 = vld [vmem:[#allocation2 + $0x3c] sm:$0xff]  }
 0x33e   : > { %v15171_v42 = vcombine.low %v7061_v30, %v7071_v31  ;;  %v8024_v34 = vrot.slane %v8023_v14, 4  ;;  %v7073_v45 = vshrl.u32 %v6940_v46, 16  ;;  %v7076_v52 = vshll.u32 %v6940_v46, 16 }
 0x33f   : > { %v8034_v6 = vrot.slane %v8033_v43, 4  ;;  %v7082_v47 = vshll.u32 %v6941_v9, 16  ;;  %v15184_v20 = vsel %vm12686_vm11, %v7568_v13, %v7569_v0  ;;  %v7086_v5 = vshrl.u32 %v6941_v9, 16 }
 0x340   : > { %9931 = vmatmul.mubr.bf16.gmra.mrb[232].mxu0 %v12381_v63  ;;  %v8029_v1 = vsel %vm12706_vm14, %v8024_v34, %v8028_v24  ;;  %v7092_v8 = vshll.u32 %v6942_v61, 16  ;;  %v10860_v51 = vcombine.low %v15175_v58, %v15184_v20  ;;  %v7075_v38 = vrot.slane %v7073_v45, 4  ;;  %12079 = vmatpush3.bf16.msra.mxu1 %v12388_v56  ;;  %v6945_v61 = vld [vmem:[#allocation2 + $0x50] sm:$0x1]  ;;  %v7890_v63 = vld [vmem:[#allocation2 + $0x60] sm:$0xf] }
 0x341   : > { %9938 = vmatprep.mubr.bf16.mxu0 %v10891_v7  ;;  %v8039_v2 = vsel %vm12706_vm14, %v8034_v6, %v8038_v15  ;;  %v7078_v16 = vrot.slane %v7076_v52, 5  ;;  %v7084_v10 = vrot.slane %v7082_v47, 5  ;;  %v7088_v41 = vrot.slane %v7086_v5, 4  ;;  %12080 = vmatprep.subr.bf16.mxu1 %v12391_v55  ;;  %v7891_v6 = vld [vmem:[#allocation2 + $0x64] sm:$0xf] }
 0x342   : > { %v10892_v32 = vcombine.low %v8029_v1, %v8039_v2  ;;  %v7094_v50 = vrot.slane %v7092_v8, 5  ;;  %v8041_v3 = vshrl.u32 %v7887_v62, 16  ;;  %v8044_v48 = vshll.u32 %v7887_v62, 16  ;;  %v12400_v1 = vld [vmem:[%s16155_s3 + $0x238] sm:$0xff]   ;;  %v7892_v2 = vld [vmem:[#allocation2 + $0x68] sm:$0x1] }
 0x343   : > { %v7079_v7 = vor.u32 %v7078_v16, %v7075_v38  ;;  %v8050_v21 = vshll.u32 %v7888_v33, 16  ;;  %9770 = vmatmul.mubr.bf16.gmra.mrb[200].mxu1 %v15148_v35  ;;  %v7089_v54 = vor.u32 %v7088_v41, %v7084_v10  ;;  %v8054_v27 = vshrl.u32 %v7888_v33, 16  ;;  %v12397_v35 = vld [vmem:[%s16155_s3 + $0x230] sm:$0xff]  }
 0x344   : > { %v8060_v25 = vshll.u32 %v7889_v22, 16  ;;  %v10845_v56 = vrot.slane %v7455_v17, 9  ;;  %9777 = vmatprep.mubr.bf16.mxu1 %v10859_v57  ;;  %v8043_v28 = vrot.slane %v8041_v3, 4  ;;  %v8046_v12 = vrot.slane %v8044_v48, 5  ;;  %12081 = vmatpush3.bf16.msra.mxu1 %v12391_v55  ;;  %v6944_v57 = vld [vmem:[#allocation2 + $0x4c] sm:$0xf] }
 0x345   : > { %v7080_v19 = vrot.slane %v7079_v7, 4  ;;  %v8052_v24 = vrot.slane %v8050_v21, 5  ;;  %v7090_v46 = vrot.slane %v7089_v54, 4  ;;  %v8056_v14 = vrot.slane %v8054_v27, 4  ;;  %12082 = vmatprep.subr.bf16.mxu1 %v12394_v29  ;;  %v7459_v3 = vld [vmem:[#allocation2 + $0x58] sm:$0xf] }
 0x346   : > { %v8062_v15 = vrot.slane %v8060_v25, 5  ;;  %v7573_v23 = vrot.slane %v7456_v11, 5  ;;  %v8047_v59 = vor.u32 %v8046_v12, %v8043_v28  ;;  %v7576_v53 = vrot.slane %v7457_v37, 5  ;;  %v12384_v48 = vld [vmem:[#allocation2 + $0x48] sm:$0xff]   ;;  %v7460_v27 = vld [vmem:[#allocation2 + $0x5c] sm:$0x1] }
 0x347   : > { %v7085_v44 = vsel %vm12706_vm14, %v7080_v19, %v7084_v10  ;;  %v7097_v9 = vshrl.u32 %v6943_v18, 16  ;;  %v7095_v30 = vsel %vm12706_vm14, %v7090_v46, %v7094_v50  ;;  %v8057_v31 = vor.u32 %v8056_v14, %v8052_v24  ;;  %v7458_v10 = vld [vmem:[#allocation2 + $0x54] sm:$0xe] }
 0x348   : > { %9939 = vmatmul.mubr.bf16.gmra.mrb[236].mxu0 %v12383_v40  ;;  %v15206_v43 = vsel %vm12686_vm11, %v10845_v56, %v7573_v23  ;;  %v7575_v0 = vrot.slane %v7573_v23, 4  ;;  %v15208_v34 = vcombine.low %v7085_v44, %v7095_v30  ;;  %v8048_v13 = vrot.slane %v8047_v59, 4  ;;  %12083 = vmatpush3.bf16.msra.mxu1 %v12394_v29  ;;  %v6946_v12 = vld [vmem:[#allocation2 + $0x54] sm:$0xf]  ;;  %v6948_v23 = vld [vmem:[#allocation2 + $0x5c] sm:$0x1] }
 0x349   : > { %9946 = vmatprep.mubr.bf16.mxu0 %v10892_v32  ;;  %v7099_v62 = vrot.slane %v7097_v9, 4  ;;  %v7100_v55 = vshll.u32 %v6943_v18, 16  ;;  %v8058_v45 = vrot.slane %v8057_v31, 4  ;;  %v7106_v47 = vshll.u32 %v6944_v57, 16  ;;  %12084 = vmatprep.subr.bf16.mxu1 %v12397_v35 }
 0x34a   : > { %v15212_v52 = vsel %vm12686_vm11, %v7575_v0, %v7576_v53  ;;  %v7110_v33 = vshrl.u32 %v6944_v57, 16  ;;  %v8053_v5 = vsel %vm12706_vm14, %v8048_v13, %v8052_v24  ;;  %v7116_v17 = vshll.u32 %v6945_v61, 16 }
 0x34b   : > { %v10861_v8 = vcombine.low %v15206_v43, %v15212_v52  ;;  %v7102_v22 = vrot.slane %v7100_v55, 5  ;;  %9778 = vmatmul.mubr.bf16.gmra.mrb[204].mxu1 %v15171_v42  ;;  %v8063_v38 = vsel %vm12706_vm14, %v8058_v45, %v8062_v15  ;;  %v7108_v16 = vrot.slane %v7106_v47, 5  ;;  %v6947_v15 = vld [vmem:[#allocation2 + $0x58] sm:$0xf]  ;;  %v7893_v43 = vld [vmem:[#allocation2 + $0x6c] sm:$0xf] }
 0x34c   : > { %v7112_v11 = vrot.slane %v7110_v33, 4  ;;  %v8065_v32 = vshrl.u32 %v7890_v63, 16  ;;  %9785 = vmatprep.mubr.bf16.mxu1 %v10860_v51  ;;  %v10893_v41 = vcombine.low %v8053_v5, %v8063_v38  ;;  %v7118_v29 = vrot.slane %v7116_v17, 5  ;;  %12085 = vmatpush3.bf16.msra.mxu1 %v12397_v35  ;;  %v7461_v38 = vld [vmem:[#allocation2 + $0x60] sm:$0xe] }
 0x34d   : > { %v7103_v50 = vor.u32 %v7102_v22, %v7099_v62  ;;  %v8068_v7 = vshll.u32 %v7890_v63, 16  ;;  %v8074_v37 = vshll.u32 %v7891_v6, 16  ;;  %v8078_v54 = vshrl.u32 %v7891_v6, 16  ;;  %12086 = vmatprep.subr.bf16.mxu1 %v12400_v1  ;;  %v7894_v62 = vld [vmem:[#allocation2 + $0x70] sm:$0xf]  ;;  %v12386_v6 = vld [vmem:[#allocation2 + $0x54] sm:$0xff]  }
 0x34e   : > { %v7113_v21 = vor.u32 %v7112_v11, %v7108_v16  ;;  %v8067_v42 = vrot.slane %v8065_v32, 4  ;;  %v8084_v18 = vshll.u32 %v7892_v2, 16  ;;  %v10846_v19 = vrot.slane %v7458_v10, 9 }
 0x34f   : > { %v7104_v25 = vrot.slane %v7103_v50, 4  ;;  %v8070_v56 = vrot.slane %v8068_v7, 5  ;;  %v8076_v20 = vrot.slane %v8074_v37, 5  ;;  %v8080_v51 = vrot.slane %v8078_v54, 4 }
 0x350   : > { %9947 = vmatmul.mubr.bf16.gmra.mrb[240].mxu0 %v12384_v48  ;;  %v7114_v58 = vrot.slane %v7113_v21, 4  ;;  %v7580_v28 = vrot.slane %v7459_v3, 5  ;;  %v8086_v46 = vrot.slane %v8084_v18, 5  ;;  %v7583_v14 = vrot.slane %v7460_v27, 5  ;;  %12087 = vmatpush3.bf16.msra.mxu1 %v12400_v1  ;;  %v7895_v1 = vld [vmem:[#allocation2 + $0x74] sm:$0x1] }
 0x351   : > { %9954 = vmatprep.mubr.bf16.mxu0 %v10893_v41  ;;  %v7109_v24 = vsel %vm12706_vm14, %v7104_v25, %v7108_v16  ;;  %v8071_v40 = vor.u32 %v8070_v56, %v8067_v42  ;;  %v8081_v44 = vor.u32 %v8080_v51, %v8076_v20  ;;  %v7121_v30 = vshrl.u32 %v6946_v12, 16  ;;  %v15236_v55 = vpop.f32.mrb[160].mxu0  ;;  %v7462_v41 = vld [vmem:[#allocation2 + $0x64] sm:$0xf]  ;;  %v7463_v21 = vld [vmem:[#allocation2 + $0x68] sm:$0x1] }
 0x352   : > { %v7119_v35 = vsel %vm12706_vm14, %v7114_v58, %v7118_v29  ;;  %v7581_v59 = vsel %vm12686_vm11, %v10846_v19, %v7580_v28  ;;  %v7582_v53 = vrot.slane %v7580_v28, 4  ;;  %v7124_v31 = vshll.u32 %v6946_v12, 16  ;;  %v15240_v5 = vpop.f32.mrb[161].mxu0  ;;  %v6949_v25 = vld [vmem:[#allocation2 + $0x60] sm:$0xf] }
 0x353   : > { %v10829_v57 = vcombine.low %v7109_v24, %v7119_v35  ;;  %v8072_v9 = vrot.slane %v8071_v40, 4  ;;  %9786 = vmatmul.mubr.bf16.gmra.mrb[208].mxu1 %v15208_v34  ;;  %v8082_v0 = vrot.slane %v8081_v44, 4  ;;  %v7130_v63 = vshll.u32 %v6947_v15, 16  ;;  %v15244_v16 = vpop.f32.mrb[162].mxu0  ;;  %v6950_v24 = vld [vmem:[#allocation2 + $0x64] sm:$0xf] }
 0x354   : > { %v7584_v61 = vsel %vm12686_vm11, %v7582_v53, %v7583_v14  ;;  %v7134_v13 = vshrl.u32 %v6947_v15, 16  ;;  %9793 = vmatprep.mubr.bf16.mxu1 %v10861_v8  ;;  %v7123_v47 = vrot.slane %v7121_v30, 4  ;;  %v7126_v33 = vrot.slane %v7124_v31, 5  ;;  %v15246_v50 = vpop.f32.mrb[163].mxu0  ;;  %v6951_v15 = vld [vmem:[#allocation2 + $0x68] sm:$0x1] }
 0x355   : > { %v8077_v45 = vsel %vm12706_vm14, %v8072_v9, %v8076_v20  ;;  %v10862_v52 = vcombine.low %v7581_v59, %v7584_v61  ;;  %v8087_v34 = vsel %vm12706_vm14, %v8082_v0, %v8086_v46  ;;  %v7132_v22 = vrot.slane %v7130_v63, 5  ;;  %v12387_v35 = vld [vmem:[#allocation2 + $0x60] sm:$0xff]  }
 0x356   : > { %v7136_v17 = vrot.slane %v7134_v13, 4  ;;  %v7140_v2 = vshll.u32 %v6948_v23, 16  ;;  %v10894_v8 = vcombine.low %v8077_v45, %v8087_v34  ;;  %v7127_v11 = vor.u32 %v7126_v33, %v7123_v47  ;;  %v7464_v34 = vld [vmem:[#allocation2 + $0x6c] sm:$0xe] }
 0x357   : > { %v8089_v32 = vshrl.u32 %v7893_v43, 16  ;;  %v8092_v10 = vshll.u32 %v7893_v43, 16  ;;  %v8098_v3 = vshll.u32 %v7894_v62, 16  ;;  %v8102_v48 = vshrl.u32 %v7894_v62, 16 }
 0x358   : > { %9955 = vmatmul.mubr.bf16.gmra.mrb[244].mxu0 %v12386_v6  ;;  %v7137_v29 = vor.u32 %v7136_v17, %v7132_v22  ;;  %v7142_v7 = vrot.slane %v7140_v2, 5  ;;  %v7128_v42 = vrot.slane %v7127_v11, 4  ;;  %v8108_v27 = vshll.u32 %v7895_v1, 16  ;;  %v7897_v6 = vld [vmem:[#allocation2 + $0x7c] sm:$0xf] }
 0x359   : > { %9962 = vmatprep.mubr.bf16.mxu0 %v10894_v8  ;;  %v8091_v37 = vrot.slane %v8089_v32, 4  ;;  %v8094_v54 = vrot.slane %v8092_v10, 5  ;;  %v8100_v18 = vrot.slane %v8098_v3, 5  ;;  %v8104_v19 = vrot.slane %v8102_v48, 4  ;;  %v7898_v1 = vld [vmem:[#allocation2 + $0x80] sm:$0x1] }
 0x35a   : > { %v7138_v56 = vrot.slane %v7137_v29, 4  ;;  %v10847_v58 = vrot.slane %v7461_v38, 9  ;;  %v7133_v20 = vsel %vm12706_vm14, %v7128_v42, %v7132_v22  ;;  %v8110_v28 = vrot.slane %v8108_v27, 5  ;;  %v7465_v8 = vld [vmem:[#allocation2 + $0x70] sm:$0xf] }
 0x35b   : > { %v8095_v51 = vor.u32 %v8094_v54, %v8091_v37  ;;  %v7587_v12 = vrot.slane %v7462_v41, 5  ;;  %9794 = vmatmul.mubr.bf16.gmra.mrb[212].mxu1 %v10829_v57  ;;  %v8105_v46 = vor.u32 %v8104_v19, %v8100_v18  ;;  %v7590_v14 = vrot.slane %v7463_v21, 5  ;;  %v7896_v57 = vld [vmem:[#allocation2 + $0x78] sm:$0xf]  ;;  %v7466_v29 = vld [vmem:[#allocation2 + $0x74] sm:$0x1] }
 0x35c   : > { %v7143_v40 = vsel %vm12706_vm14, %v7138_v56, %v7142_v7  ;;  %v7145_v23 = vshrl.u32 %v6949_v25, 16  ;;  %9801 = vmatprep.mubr.bf16.mxu1 %v10862_v52  ;;  %v7148_v43 = vshll.u32 %v6949_v25, 16  ;;  %v7154_v0 = vshll.u32 %v6950_v24, 16  ;;  %v6952_v42 = vld [vmem:[#allocation2 + $0x6c] sm:$0xf] }
 0x35d   : > { %v10830_v44 = vcombine.low %v7133_v20, %v7143_v40  ;;  %v8096_v59 = vrot.slane %v8095_v51, 4  ;;  %v7588_v53 = vsel %vm12686_vm11, %v10847_v58, %v7587_v12  ;;  %v7589_v9 = vrot.slane %v7587_v12, 4  ;;  %v12389_v20 = vld [vmem:[#allocation2 + $0x6c] sm:$0xff]  }
 0x35e   : > { %v8106_v30 = vrot.slane %v8105_v46, 4  ;;  %v7147_v31 = vrot.slane %v7145_v23, 4  ;;  %v7158_v13 = vshrl.u32 %v6950_v24, 16  ;;  %v7164_v62 = vshll.u32 %v6951_v15, 16  ;;  %v6953_v24 = vld [vmem:[#allocation2 + $0x70] sm:$0xf] }
 0x35f   : > { %v8101_v61 = vsel %vm12706_vm14, %v8096_v59, %v8100_v18  ;;  %v7591_v63 = vsel %vm12686_vm11, %v7589_v9, %v7590_v14  ;;  %v7150_v47 = vrot.slane %v7148_v43, 5  ;;  %v7156_v33 = vrot.slane %v7154_v0, 5  ;;  %v6954_v23 = vld [vmem:[#allocation2 + $0x74] sm:$0x1] }
 0x360   : > { %9963 = vmatmul.mubr.bf16.gmra.mrb[248].mxu0 %v12387_v35  ;;  %v8111_v45 = vsel %vm12706_vm14, %v8106_v30, %v8110_v28  ;;  %v10863_v52 = vcombine.low %v7588_v53, %v7591_v63  ;;  %v7160_v17 = vrot.slane %v7158_v13, 4  ;;  %v7166_v2 = vrot.slane %v7164_v62, 5  ;;  %v7899_v30 = vld [vmem:[#allocation2 + $0x84] sm:$0xf] }
 0x361   : > { %v10895_v22 = vcombine.low %v8101_v61, %v8111_v45  ;;  %v8113_v38 = vshrl.u32 %v7896_v57, 16  ;;  %v7151_v11 = vor.u32 %v7150_v47, %v7147_v31  ;;  %v8116_v32 = vshll.u32 %v7896_v57, 16  ;;  %v7900_v61 = vld [vmem:[#allocation2 + $0x88] sm:$0xf]  ;;  %v7901_v45 = vld [vmem:[#allocation2 + $0x8c] sm:$0x1] }
 0x362   : > { %v8122_v10 = vshll.u32 %v7897_v6, 16  ;;  %v8126_v41 = vshrl.u32 %v7897_v6, 16  ;;  %v7161_v7 = vor.u32 %v7160_v17, %v7156_v33  ;;  %v8132_v48 = vshll.u32 %v7898_v1, 16 }
 0x363   : > { %9970 = vmatprep.mubr.bf16.mxu0 %v10895_v22  ;;  %v8115_v3 = vrot.slane %v8113_v38, 4  ;;  %v10848_v21 = vrot.slane %v7464_v34, 9  ;;  %9802 = vmatmul.mubr.bf16.gmra.mrb[216].mxu1 %v10830_v44  ;;  %v7152_v37 = vrot.slane %v7151_v11, 4  ;;  %v8118_v54 = vrot.slane %v8116_v32, 5  ;;  %v7467_v34 = vld [vmem:[#allocation2 + $0x78] sm:$0xe] }
 0x364   : > { %v8124_v27 = vrot.slane %v8122_v10, 5  ;;  %v8128_v25 = vrot.slane %v8126_v41, 4  ;;  %9809 = vmatprep.mubr.bf16.mxu1 %v10863_v52  ;;  %v7162_v56 = vrot.slane %v7161_v7, 4  ;;  %v8134_v18 = vrot.slane %v8132_v48, 5  ;;  %v7468_v22 = vld [vmem:[#allocation2 + $0x7c] sm:$0xf] }
 0x365   : > { %v7594_v19 = vrot.slane %v7465_v8, 5  ;;  %v7597_v58 = vrot.slane %v7466_v29, 5  ;;  %v7157_v51 = vsel %vm12706_vm14, %v7152_v37, %v7156_v33  ;;  %v8119_v28 = vor.u32 %v8118_v54, %v8115_v3  ;;  %v7469_v11 = vld [vmem:[#allocation2 + $0x80] sm:$0x1]  ;;  %v12390_v32 = vld [vmem:[#allocation2 + $0x78] sm:$0xff]  }
 0x366   : > { %v8129_v12 = vor.u32 %v8128_v25, %v8124_v27  ;;  %v7169_v40 = vshrl.u32 %v6952_v42, 16  ;;  %v7167_v46 = vsel %vm12706_vm14, %v7162_v56, %v7166_v2  ;;  %v7172_v35 = vshll.u32 %v6952_v42, 16  ;;  %v6955_v3 = vld [vmem:[#allocation2 + $0x78] sm:$0xf]  ;;  %v6956_v54 = vld [vmem:[#allocation2 + $0x7c] sm:$0xf] }
 0x367   : > { %v7595_v14 = vsel %vm12686_vm11, %v10848_v21, %v7594_v19  ;;  %v7596_v15 = vrot.slane %v7594_v19, 4  ;;  %v10831_v44 = vcombine.low %v7157_v51, %v7167_v46  ;;  %v8120_v59 = vrot.slane %v8119_v28, 4 }
 0x368   : > { %9971 = vmatmul.mubr.bf16.gmra.mrb[252].mxu0 %v12389_v20  ;;  %v8130_v53 = vrot.slane %v8129_v12, 4  ;;  %v7171_v9 = vrot.slane %v7169_v40, 4  ;;  %v7174_v43 = vrot.slane %v7172_v35, 5  ;;  %v7178_v0 = vshll.u32 %v6953_v24, 16 }
 0x369   : > { %v7598_v31 = vsel %vm12686_vm11, %v7596_v15, %v7597_v58  ;;  %v7182_v57 = vshrl.u32 %v6953_v24, 16  ;;  %v8125_v63 = vsel %vm12706_vm14, %v8120_v59, %v8124_v27  ;;  %v7188_v6 = vshll.u32 %v6954_v23, 16  ;;  %v6957_v24 = vld [vmem:[#allocation2 + $0x80] sm:$0x1] }
 0x36a   : > { %v8135_v13 = vsel %vm12706_vm14, %v8130_v53, %v8134_v18  ;;  %v10864_v62 = vcombine.low %v7595_v14, %v7598_v31  ;;  %v7175_v47 = vor.u32 %v7174_v43, %v7171_v9  ;;  %v7180_v33 = vrot.slane %v7178_v0, 5  ;;  %v7903_v31 = vld [vmem:[#allocation2 + $0x94] sm:$0xf] }
 0x36b   : > { %v10896_v52 = vcombine.low %v8125_v63, %v8135_v13  ;;  %v7184_v1 = vrot.slane %v7182_v57, 4  ;;  %9810 = vmatmul.mubr.bf16.gmra.mrb[220].mxu1 %v10831_v44  ;;  %v7190_v17 = vrot.slane %v7188_v6, 5  ;;  %v8137_v2 = vshrl.u32 %v7899_v30, 16  ;;  %v7902_v44 = vld [vmem:[#allocation2 + $0x90] sm:$0xf] }
 0x36c   : > { %v8140_v38 = vshll.u32 %v7899_v30, 16  ;;  %v8146_v8 = vshll.u32 %v7900_v61, 16  ;;  %9817 = vmatprep.mubr.bf16.mxu1 %v10864_v62  ;;  %v7176_v10 = vrot.slane %v7175_v47, 4  ;;  %v8150_v29 = vshrl.u32 %v7900_v61, 16  ;;  %v7904_v63 = vld [vmem:[#allocation2 + $0x98] sm:$0x1] }
 0x36d   : > { %9978 = vmatprep.mubr.bf16.mxu0 %v10896_v52  ;;  %v7185_v41 = vor.u32 %v7184_v1, %v7180_v33  ;;  %v8156_v7 = vshll.u32 %v7901_v45, 16  ;;  %v8139_v48 = vrot.slane %v8137_v2, 4  ;;  %v10849_v37 = vrot.slane %v7467_v34, 9  ;;  %v7470_v13 = vld [vmem:[#allocation2 + $0x84] sm:$0xe] }
 0x36e   : > { %v8142_v21 = vrot.slane %v8140_v38, 5  ;;  %v8148_v42 = vrot.slane %v8146_v8, 5  ;;  %v7181_v27 = vsel %vm12706_vm14, %v7176_v10, %v7180_v33  ;;  %v8152_v56 = vrot.slane %v8150_v29, 4  ;;  %v7471_v47 = vld [vmem:[#allocation2 + $0x88] sm:$0xf] }
 0x36f   : > { %v7186_v25 = vrot.slane %v7185_v41, 4  ;;  %v8158_v18 = vrot.slane %v8156_v7, 5  ;;  %v7601_v58 = vrot.slane %v7468_v22, 5  ;;  %v7604_v20 = vrot.slane %v7469_v11, 5  ;;  %v7472_v33 = vld [vmem:[#allocation2 + $0x8c] sm:$0x1] }
 0x370   : > { %9979 = vmatmul.mubr.bf16.gmra.mrb[0].mxu0 %v12390_v32  ;;  %v8143_v19 = vor.u32 %v8142_v21, %v8139_v48  ;;  %v7193_v51 = vshrl.u32 %v6955_v3, 16  ;;  %v8153_v12 = vor.u32 %v8152_v56, %v8148_v42  ;;  %v7196_v40 = vshll.u32 %v6955_v3, 16  ;;  %v12392_v34 = vld [vmem:[#allocation2 + $0x84] sm:$0xff]  }
 0x371   : > { %v7191_v28 = vsel %vm12706_vm14, %v7186_v25, %v7190_v17  ;;  %v7202_v46 = vshll.u32 %v6956_v54, 16  ;;  %v7602_v23 = vsel %vm12686_vm11, %v10849_v37, %v7601_v58  ;;  %v7603_v35 = vrot.slane %v7601_v58, 4  ;;  %v6958_v38 = vld [vmem:[#allocation2 + $0x84] sm:$0xf]  ;;  %v6959_v41 = vld [vmem:[#allocation2 + $0x88] sm:$0xf] }
 0x372   : > { %v10832_v14 = vcombine.low %v7181_v27, %v7191_v28  ;;  %v8144_v15 = vrot.slane %v8143_v19, 4  ;;  %v8154_v59 = vrot.slane %v8153_v12, 4  ;;  %v7195_v53 = vrot.slane %v7193_v51, 4 }
 0x373   : > { %v7198_v9 = vrot.slane %v7196_v40, 5  ;;  %v7204_v30 = vrot.slane %v7202_v46, 5  ;;  %v7605_v0 = vsel %vm12686_vm11, %v7603_v35, %v7604_v20  ;;  %v7206_v57 = vshrl.u32 %v6956_v54, 16 }
 0x374   : > { %9818 = vmatmul.mubr.bf16.gmra.mrb[224].mxu1 %v10832_v14  ;;  %v8149_v43 = vsel %vm12706_vm14, %v8144_v15, %v8148_v42  ;;  %v7212_v61 = vshll.u32 %v6957_v24, 16  ;;  %v8159_v62 = vsel %vm12706_vm14, %v8154_v59, %v8158_v18  ;;  %v10865_v6 = vcombine.low %v7602_v23, %v7605_v0  ;;  %v6960_v23 = vld [vmem:[#allocation2 + $0x8c] sm:$0x1] }
 0x375   : > { %v7199_v45 = vor.u32 %v7198_v9, %v7195_v53  ;;  %v8161_v52 = vshrl.u32 %v7902_v44, 16  ;;  %v10897_v1 = vcombine.low %v8149_v43, %v8159_v62  ;;  %v7208_v22 = vrot.slane %v7206_v57, 4 }
 0x376   : > { %v7214_v17 = vrot.slane %v7212_v61, 5  ;;  %v8164_v2 = vshll.u32 %v7902_v44, 16  ;;  %9825 = vmatprep.mubr.bf16.mxu1 %v10865_v6  ;;  %v8170_v32 = vshll.u32 %v7903_v31, 16  ;;  %v8174_v10 = vshrl.u32 %v7903_v31, 16  ;;  %v15284_v29 = vpop.f32.mrb[164].mxu0  ;;  %v15286_v7 = vpop.f32.mrb[132].mxu1 }
 0x377   : > { %v7200_v8 = vrot.slane %v7199_v45, 4  ;;  %v8163_v11 = vrot.slane %v8161_v52, 4  ;;  %9986 = vmatprep.mubr.bf16.mxu0 %v10897_v1  ;;  %v7209_v3 = vor.u32 %v7208_v22, %v7204_v30  ;;  %v8180_v21 = vshll.u32 %v7904_v63, 16  ;;  %v15288_v37 = vpop.f32.mrb[165].mxu0  ;;  %v15290_v54 = vpop.f32.mrb[133].mxu1 }
 0x378   : > { %v8166_v48 = vrot.slane %v8164_v2, 5  ;;  %v10850_v42 = vrot.slane %v7470_v13, 9  ;;  %9987 = vmatmul.mubr.bf16.gmra.mrb[4].mxu0 %v12392_v34  ;;  %v8172_v25 = vrot.slane %v8170_v32, 5  ;;  %v8176_v56 = vrot.slane %v8174_v10, 4  ;;  %v15294_v19 = vpop.f32.mrb[166].mxu0  ;;  %v15296_v58 = vpop.f32.mrb[134].mxu1 }
 0x379   : > { %v7205_v27 = vsel %vm12706_vm14, %v7200_v8, %v7204_v30  ;;  %v7608_v18 = vrot.slane %v7471_v47, 5  ;;  %v7210_v20 = vrot.slane %v7209_v3, 4  ;;  %v8182_v28 = vrot.slane %v8180_v21, 5  ;;  %v15298_v24 = vpop.f32.mrb[167].mxu0  ;;  %v15300_v40 = vpop.f32.mrb[135].mxu1  ;;  %v12393_v32 = vld [vmem:[#allocation2 + $0x90] sm:$0xff]  }
 0x37a   : > { %v8167_v51 = vor.u32 %v8166_v48, %v8163_v11  ;;  %v7611_v12 = vrot.slane %v7472_v33, 5  ;;  %v8177_v46 = vor.u32 %v8176_v56, %v8172_v25  ;;  %v7217_v35 = vshrl.u32 %v6958_v38, 16  ;;  %v7905_v30 = vld [vmem:[#allocation2 + $0x9c] sm:$0xf]  ;;  %v7906_v61 = vld [vmem:[#allocation2 + $0xa0] sm:$0xf] }
 0x37b   : > { %v7609_v14 = vsel %vm12686_vm11, %v10850_v42, %v7608_v18  ;;  %v7610_v15 = vrot.slane %v7608_v18, 4  ;;  %v7215_v44 = vsel %vm12706_vm14, %v7210_v20, %v7214_v17  ;;  %v7220_v53 = vshll.u32 %v6958_v38, 16  ;;  %v7907_v45 = vld [vmem:[#allocation2 + $0xa4] sm:$0x1]  ;;  %v7473_v34 = vld [vmem:[#allocation2 + $0x90] sm:$0xe] }
 0x37c   : > { %v8168_v59 = vrot.slane %v8167_v51, 4  ;;  %v7226_v9 = vshll.u32 %v6959_v41, 16  ;;  %v10833_v31 = vcombine.low %v7205_v27, %v7215_v44  ;;  %v8178_v43 = vrot.slane %v8177_v46, 4  ;;  %v7474_v8 = vld [vmem:[#allocation2 + $0x94] sm:$0xf] }
 0x37d   : > { %v7612_v0 = vsel %vm12686_vm11, %v7610_v15, %v7611_v12  ;;  %v7219_v57 = vrot.slane %v7217_v35, 4  ;;  %v7222_v62 = vrot.slane %v7220_v53, 5  ;;  %v7230_v47 = vshrl.u32 %v6959_v41, 16  ;;  %v7475_v11 = vld [vmem:[#allocation2 + $0x98] sm:$0x1] }
 0x37e   : > { %v8173_v63 = vsel %vm12706_vm14, %v8168_v59, %v8172_v25  ;;  %v10866_v13 = vcombine.low %v7609_v14, %v7612_v0  ;;  %v7228_v6 = vrot.slane %v7226_v9, 5  ;;  %9826 = vmatmul.mubr.bf16.gmra.mrb[228].mxu1 %v10833_v31  ;;  %v8183_v52 = vsel %vm12706_vm14, %v8178_v43, %v8182_v28  ;;  %v15329_v43 = vld [vmem:[%s16156_s4] ss:$0 sm:$0xff] }
 0x37f   : > { %v7236_v33 = vshll.u32 %v6960_v23, 16  ;;  %v8185_v1 = vshrl.u32 %v7905_v30, 16  ;;  %v10898_v22 = vcombine.low %v8173_v63, %v8183_v52  ;;  %v7223_v17 = vor.u32 %v7222_v62, %v7219_v57  ;;  %v6961_v62 = vld [vmem:[#allocation2 + $0x90] sm:$0xf] }
 0x380   : > { %9833 = vmatprep.mubr.bf16.mxu1 %v10866_v13  ;;  %v8188_v2 = vshll.u32 %v7905_v30, 16  ;;  %v8194_v38 = vshll.u32 %v7906_v61, 16  ;;  %v7232_v10 = vrot.slane %v7230_v47, 4  ;;  %v8198_v21 = vshrl.u32 %v7906_v61, 16  ;;  %v15312_v42 = vpop.f32.mrb[136].mxu1 }
 0x381   : > { %v7238_v3 = vrot.slane %v7236_v33, 5  ;;  %v8187_v48 = vrot.slane %v8185_v1, 4  ;;  %9994 = vmatprep.mubr.bf16.mxu0 %v10898_v22  ;;  %v7224_v27 = vrot.slane %v7223_v17, 4  ;;  %v8204_v56 = vshll.u32 %v7907_v45, 16  ;;  %v15314_v18 = vpop.f32.mrb[137].mxu1 }
 0x382   : > { %v8190_v41 = vrot.slane %v8188_v2, 5  ;;  %v8196_v25 = vrot.slane %v8194_v38, 5  ;;  %9995 = vmatmul.mubr.bf16.gmra.mrb[8].mxu0 %v12393_v32  ;;  %v7233_v20 = vor.u32 %v7232_v10, %v7228_v6  ;;  %v8200_v51 = vrot.slane %v8198_v21, 4  ;;  %v15316_v46 = vpop.f32.mrb[138].mxu1  ;;  %v6963_v1 = vld [vmem:[#allocation2 + $0x98] sm:$0x1] }
 0x383   : > { %v10851_v28 = vrot.slane %v7473_v34, 9  ;;  %v7615_v12 = vrot.slane %v7474_v8, 5  ;;  %v7229_v14 = vsel %vm12706_vm14, %v7224_v27, %v7228_v6  ;;  %v8206_v23 = vrot.slane %v8204_v56, 5  ;;  %v15320_v44 = vpop.f32.mrb[168].mxu0  ;;  %v15322_v59 = vpop.f32.mrb[139].mxu1 }
 0x384   : > { %v8191_v15 = vor.u32 %v8190_v41, %v8187_v48  ;;  %v7618_v35 = vrot.slane %v7475_v11, 5  ;;  %v7234_v53 = vrot.slane %v7233_v20, 4  ;;  %v8201_v9 = vor.u32 %v8200_v51, %v8196_v25  ;;  %v15331_v0 = vpop.f32.mrb[169].mxu0  ;;  %v7908_v38 = vld [vmem:[#allocation2 + $0xa8] sm:$0xf] }
 0x385   : > { %v7616_v30 = vsel %vm12686_vm11, %v10851_v28, %v7615_v12  ;;  %v7617_v31 = vrot.slane %v7615_v12, 4  ;;  %v11570_v61 = vadd.f32 %v15031_v26, %v15022_v39  ;;  %v11573_v63 = vadd.f32 %v15041_v60, %v15035_v49  ;;  %v15339_v6 = vpop.f32.mrb[170].mxu0  ;;  %v6962_v39 = vld [vmem:[#allocation2 + $0x94] sm:$0xf]  ;;  %v7909_v32 = vld [vmem:[#allocation2 + $0xac] sm:$0xf] }
 0x386   : > { %v8192_v57 = vrot.slane %v8191_v15, 4  ;;  %v11682_v13 = vadd.f32 %v15240_v5, %v15236_v55  ;;  %v7239_v45 = vsel %vm12706_vm14, %v7234_v53, %v7238_v3  ;;  %v8202_v52 = vrot.slane %v8201_v9, 4  ;;  %v15347_v26 = vpop.f32.mrb[171].mxu0  ;;  %v12395_v3 = vld [vmem:[#allocation2 + $0x9c] sm:$0xff]   ;;  %v7910_v41 = vld [vmem:[#allocation2 + $0xb0] sm:$0x1] }
 0x387   : > { %v7619_v47 = vsel %vm12686_vm11, %v7617_v31, %v7618_v35  ;;  %v11685_v33 = vadd.f32 %v15246_v50, %v15244_v16  ;;  %v10834_v49 = vcombine.low %v7229_v14, %v7239_v45  ;;  %v9434_v5 = vadd.f32 %v11570_v61, %v15329_v43  ;;  %v7476_v15 = vld [vmem:[#allocation2 + $0x9c] sm:$0xe] }
 0x388   : > { %v8197_v60 = vsel %vm12706_vm14, %v8192_v57, %v8196_v25  ;;  %v10867_v55 = vcombine.low %v7616_v30, %v7619_v47  ;;  %v8207_v34 = vsel %vm12706_vm14, %v8202_v52, %v8206_v23  ;;  %v9437_v22 = vadd.f32 %v11573_v63, %v15329_v43  ;;  %v7477_v23 = vld [vmem:[#allocation2 + $0xa0] sm:$0xf] }
 0x389   : > { %v7241_v17 = vshrl.u32 %v6961_v62, 16  ;;  %v7244_v2 = vshll.u32 %v6961_v62, 16  ;;  %9834 = vmatmul.mubr.bf16.gmra.mrb[232].mxu1 %v10834_v49  ;;  %v10899_v16 = vcombine.low %v8197_v60, %v8207_v34  ;;  %v15355_v50 = vadd.f32 %v11682_v13, %v9434_v5  ;;  %v7478_v13 = vld [vmem:[#allocation2 + $0xa4] sm:$0x1]  ;;  %v6964_v5 = vld [vmem:[#allocation2 + $0x9c] sm:$0xf] }
 0x38a   : > { %v7250_v8 = vshll.u32 %v6962_v39, 16  ;;  %v7254_v11 = vshrl.u32 %v6962_v39, 16  ;;  %9841 = vmatprep.mubr.bf16.mxu1 %v10867_v55  ;;  %v15357_v10 = vadd.f32 %v11685_v33, %v9437_v22  ;;  %v7260_v27 = vshll.u32 %v6963_v1, 16 }
 0x38b   : > { %16306 = vst [vmem:[#allocation43_spill] sm:$0xff] %v15355_v50  ;;  %v7243_v48 = vrot.slane %v7241_v17, 4  ;;  %v7246_v21 = vrot.slane %v7244_v2, 5  ;;  %10002 = vmatprep.mubr.bf16.mxu0 %v10899_v16  ;;  %v8209_v20 = vshrl.u32 %v7908_v38, 16  ;;  %v8212_v51 = vshll.u32 %v7908_v38, 16 }
 0x38c   : > { %16307 = vst [vmem:[#allocation44_spill] sm:$0xff] %v15357_v10  ;;  %v7252_v25 = vrot.slane %v7250_v8, 5  ;;  %v7256_v56 = vrot.slane %v7254_v11, 4  ;;  %10003 = vmatmul.mubr.bf16.gmra.mrb[12].mxu0 %v12395_v3  ;;  %v8218_v12 = vshll.u32 %v7909_v32, 16  ;;  %v8222_v14 = vshrl.u32 %v7909_v32, 16 }
 0x38d   : > { %v7247_v28 = vor.u32 %v7246_v21, %v7243_v48  ;;  %v8211_v53 = vrot.slane %v8209_v20, 4  ;;  %v8214_v9 = vrot.slane %v8212_v51, 5  ;;  %v8228_v30 = vshll.u32 %v7910_v41, 16  ;;  %v7913_v20 = vld [vmem:[#allocation2 + $0xbc] sm:$0x1] }
 0x38e   : > { %v7257_v35 = vor.u32 %v7256_v56, %v7252_v25  ;;  %v7262_v57 = vrot.slane %v7260_v27, 5  ;;  %v8220_v61 = vrot.slane %v8218_v12, 5  ;;  %v8224_v63 = vrot.slane %v8222_v14, 4  ;;  %v6966_v27 = vld [vmem:[#allocation2 + $0xa4] sm:$0x1] }
 0x38f   : > { %v7248_v31 = vrot.slane %v7247_v28, 4  ;;  %v8215_v45 = vor.u32 %v8214_v9, %v8211_v53  ;;  %v10852_v52 = vrot.slane %v7476_v15, 9  ;;  %v7622_v47 = vrot.slane %v7477_v23, 5  ;;  %v15359_v33 = vpop.f32.mrb[140].mxu1  ;;  %v7912_v56 = vld [vmem:[#allocation2 + $0xb8] sm:$0xf] }
 0x390   : > { %v7258_v62 = vrot.slane %v7257_v35, 4  ;;  %v8225_v49 = vor.u32 %v8224_v63, %v8220_v61  ;;  %v8230_v60 = vrot.slane %v8228_v30, 5  ;;  %v15365_v55 = vadd.f32 %v15288_v37, %v15284_v29  ;;  %v15367_v1 = vpop.f32.mrb[141].mxu1  ;;  %v6965_v37 = vld [vmem:[#allocation2 + $0xa0] sm:$0xf]  ;;  %v12396_v15 = vld [vmem:[#allocation2 + $0xa8] sm:$0xff]  }
 0x391   : > { %v7253_v39 = vsel %vm12706_vm14, %v7248_v31, %v7252_v25  ;;  %v8216_v22 = vrot.slane %v8215_v45, 4  ;;  %v7624_v17 = vrot.slane %v7622_v47, 4  ;;  %v7625_v2 = vrot.slane %v7478_v13, 5  ;;  %v15371_v38 = vpop.f32.mrb[142].mxu1 }
 0x392   : > { %v7263_v34 = vsel %vm12706_vm14, %v7258_v62, %v7262_v57  ;;  %v8226_v8 = vrot.slane %v8225_v49, 4  ;;  %v15375_v11 = vadd.f32 %v15290_v54, %v15286_v7  ;;  %v15379_v29 = vadd.f32 %v15298_v24, %v15294_v19  ;;  %v15381_v32 = vpop.f32.mrb[143].mxu1  ;;  %v7911_v54 = vld [vmem:[#allocation2 + $0xb4] sm:$0xf] }
 0x393   : > { %v10835_v16 = vcombine.low %v7253_v39, %v7263_v34  ;;  %v7623_v3 = vsel %vm12686_vm11, %v10852_v52, %v7622_v47  ;;  %v7626_v48 = vsel %vm12686_vm11, %v7624_v17, %v7625_v2  ;;  %v15389_v21 = vadd.f32 %v15300_v40, %v15296_v58  ;;  %v7480_v40 = vld [vmem:[#allocation2 + $0xac] sm:$0xf]  ;;  %v7479_v47 = vld [vmem:[#allocation2 + $0xa8] sm:$0xe]  ;;  %v7481_v34 = vld [vmem:[#allocation2 + $0xb0] sm:$0x1] }
 0x394   : > { %v7265_v7 = vshrl.u32 %v6964_v5, 16  ;;  %v8221_v19 = vsel %vm12706_vm14, %v8216_v22, %v8220_v61  ;;  %v8231_v24 = vsel %vm12706_vm14, %v8226_v8, %v8230_v60  ;;  %v10868_v41 = vcombine.low %v7623_v3, %v7626_v48  ;;  %v15395_v51 = vpop.f32.mrb[172].mxu0 }
 0x395   : > { %9842 = vmatmul.mubr.bf16.gmra.mrb[236].mxu1 %v10835_v16  ;;  %v7268_v25 = vshll.u32 %v6964_v5, 16  ;;  %v10900_v28 = vcombine.low %v8221_v19, %v8231_v24  ;;  %v7274_v58 = vshll.u32 %v6965_v37, 16  ;;  %v15397_v14 = vpop.f32.mrb[173].mxu0  ;;  %v7278_v35 = vshrl.u32 %v6965_v37, 16 }
 0x396   : > { %v7267_v12 = vrot.slane %v7265_v7, 4  ;;  %9849 = vmatprep.mubr.bf16.mxu1 %v10868_v41  ;;  %v7284_v53 = vshll.u32 %v6966_v27, 16  ;;  %v8233_v9 = vshrl.u32 %v7911_v54, 16  ;;  %v15399_v30 = vpop.f32.mrb[174].mxu0  ;;  %v8236_v57 = vshll.u32 %v7911_v54, 16 }
 0x397   : > { %v7270_v23 = vrot.slane %v7268_v25, 5  ;;  %10010 = vmatprep.mubr.bf16.mxu0 %v10900_v28  ;;  %v7276_v31 = vrot.slane %v7274_v58, 5  ;;  %v8242_v61 = vshll.u32 %v7912_v56, 16  ;;  %v8246_v63 = vshrl.u32 %v7912_v56, 16  ;;  %v15401_v13 = vpop.f32.mrb[175].mxu0 }
 0x398   : > { %10011 = vmatmul.mubr.bf16.gmra.mrb[16].mxu0 %v12396_v15  ;;  %v7280_v45 = vrot.slane %v7278_v35, 4  ;;  %v8235_v52 = vrot.slane %v8233_v9, 4  ;;  %v8238_v39 = vrot.slane %v8236_v57, 5  ;;  %v8252_v5 = vshll.u32 %v7913_v20, 16  ;;  %v6967_v20 = vld [vmem:[#allocation2 + $0xa8] sm:$0xf] }
 0x399   : > { %v7271_v62 = vor.u32 %v7270_v23, %v7267_v12  ;;  %v8244_v49 = vrot.slane %v8242_v61, 5  ;;  %v8248_v60 = vrot.slane %v8246_v63, 4  ;;  %v7286_v2 = vrot.slane %v7284_v53, 5  ;;  %v12398_v9 = vld [vmem:[#allocation2 + $0xb4] sm:$0xff]   ;;  %v7916_v57 = vld [vmem:[#allocation2 + $0xc8] sm:$0x1] }
 0x39a   : > { %v7281_v17 = vor.u32 %v7280_v45, %v7276_v31  ;;  %v7629_v16 = vrot.slane %v7480_v40, 5  ;;  %v8239_v8 = vor.u32 %v8238_v39, %v8235_v52  ;;  %v8254_v3 = vrot.slane %v8252_v5, 5  ;;  %v7483_v39 = vld [vmem:[#allocation2 + $0xb8] sm:$0xf] }
 0x39b   : > { %v7272_v22 = vrot.slane %v7271_v62, 4  ;;  %v8249_v37 = vor.u32 %v8248_v60, %v8244_v49  ;;  %v10853_v48 = vrot.slane %v7479_v47, 9  ;;  %v7632_v19 = vrot.slane %v7481_v34, 5  ;;  %v7482_v47 = vld [vmem:[#allocation2 + $0xb4] sm:$0xe] }
 0x39c   : > { %v7282_v7 = vrot.slane %v7281_v17, 4  ;;  %v7631_v54 = vrot.slane %v7629_v16, 4  ;;  %v8240_v24 = vrot.slane %v8239_v8, 4  ;;  %v15407_v25 = vadd.f32 %v15331_v0, %v15320_v44  ;;  %v6968_v44 = vld [vmem:[#allocation2 + $0xac] sm:$0xf] }
 0x39d   : > { %v7277_v27 = vsel %vm12706_vm14, %v7272_v22, %v7276_v31  ;;  %v8250_v41 = vrot.slane %v8249_v37, 4  ;;  %v15411_v56 = vadd.f32 %v15314_v18, %v15312_v42  ;;  %v15419_v58 = vadd.f32 %v15347_v26, %v15339_v6  ;;  %v6969_v0 = vld [vmem:[#allocation2 + $0xb0] sm:$0x1]  ;;  %v7914_v6 = vld [vmem:[#allocation2 + $0xc0] sm:$0xf] }
 0x39e   : > { %v7287_v28 = vsel %vm12706_vm14, %v7282_v7, %v7286_v2  ;;  %v7633_v12 = vsel %vm12686_vm11, %v7631_v54, %v7632_v19  ;;  %v15423_v40 = vadd.f32 %v15322_v59, %v15316_v46  ;;  %v15425_v15 = vpop.f32.mrb[144].mxu1  ;;  %v8245_v18 = vsel %vm12706_vm14, %v8240_v24, %v8244_v49  ;;  %v7915_v26 = vld [vmem:[#allocation2 + $0xc4] sm:$0xf] }
 0x39f   : > { %v10836_v42 = vcombine.low %v7277_v27, %v7287_v28  ;;  %v8255_v23 = vsel %vm12706_vm14, %v8250_v41, %v8254_v3  ;;  %v7630_v35 = vsel %vm12686_vm11, %v10853_v48, %v7629_v16  ;;  %v15433_v53 = vpop.f32.mrb[145].mxu1  ;;  %v7289_v31 = vshrl.u32 %v6967_v20, 16  ;;  %v7484_v3 = vld [vmem:[#allocation2 + $0xbc] sm:$0x1] }
 0x3a0   : > { %v10901_v46 = vcombine.low %v8245_v18, %v8255_v23  ;;  %v10869_v59 = vcombine.low %v7630_v35, %v7633_v12  ;;  %v15435_v61 = vpop.f32.mrb[146].mxu1  ;;  %v7292_v63 = vshll.u32 %v6967_v20, 16  ;;  %v7298_v62 = vshll.u32 %v6968_v44, 16 }
 0x3a1   : > { %9850 = vmatmul.mubr.bf16.gmra.mrb[240].mxu1 %v10836_v42  ;;  %v7302_v45 = vshrl.u32 %v6968_v44, 16  ;;  %v7308_v52 = vshll.u32 %v6969_v0, 16  ;;  %v15437_v49 = vpop.f32.mrb[176].mxu0  ;;  %v15439_v60 = vpop.f32.mrb[147].mxu1  ;;  %v7291_v5 = vrot.slane %v7289_v31, 4  ;;  %v8257_v34 = vshrl.u32 %v7914_v6, 16 }
 0x3a2   : > { %10018 = vmatprep.mubr.bf16.mxu0 %v10901_v46  ;;  %9857 = vmatprep.mubr.bf16.mxu1 %v10869_v59  ;;  %v8260_v22 = vshll.u32 %v7914_v6, 16  ;;  %v8266_v17 = vshll.u32 %v7915_v26, 16  ;;  %v15441_v2 = vpop.f32.mrb[177].mxu0  ;;  %v7294_v16 = vrot.slane %v7292_v63, 5  ;;  %v7300_v8 = vrot.slane %v7298_v62, 5 }
 0x3a3   : > { %10019 = vmatmul.mubr.bf16.gmra.mrb[20].mxu0 %v12398_v9  ;;  %v7304_v37 = vrot.slane %v7302_v45, 4  ;;  %v15443_v48 = vpop.f32.mrb[178].mxu0  ;;  %v8259_v27 = vrot.slane %v8257_v34, 4  ;;  %v8270_v19 = vshrl.u32 %v7915_v26, 16  ;;  %v7310_v28 = vrot.slane %v7308_v52, 5 }
 0x3a4   : > { %v8262_v7 = vrot.slane %v8260_v22, 5  ;;  %v8268_v54 = vrot.slane %v8266_v17, 5  ;;  %v15445_v24 = vpop.f32.mrb[179].mxu0  ;;  %v7295_v41 = vor.u32 %v7294_v16, %v7291_v5  ;;  %v8276_v12 = vshll.u32 %v7916_v57, 16  ;;  %v6970_v63 = vld [vmem:[#allocation2 + $0xb4] sm:$0xf] }
 0x3a5   : > { %v7305_v20 = vor.u32 %v7304_v37, %v7300_v8  ;;  %v8272_v0 = vrot.slane %v8270_v19, 4  ;;  %v10854_v42 = vrot.slane %v7482_v47, 9  ;;  %v7636_v18 = vrot.slane %v7483_v39, 5  ;;  %v7485_v17 = vld [vmem:[#allocation2 + $0xc0] sm:$0xe] }
 0x3a6   : > { %v8263_v44 = vor.u32 %v8262_v7, %v8259_v27  ;;  %v7296_v23 = vrot.slane %v7295_v41, 4  ;;  %v7639_v6 = vrot.slane %v7484_v3, 5  ;;  %v15449_v46 = vadd.f32 %v15397_v14, %v15395_v51  ;;  %v6971_v51 = vld [vmem:[#allocation2 + $0xb8] sm:$0xf]  ;;  %v7486_v7 = vld [vmem:[#allocation2 + $0xc4] sm:$0xf] }
 0x3a7   : > { %v7306_v35 = vrot.slane %v7305_v20, 4  ;;  %v8273_v9 = vor.u32 %v8272_v0, %v8268_v54  ;;  %v8278_v26 = vrot.slane %v8276_v12, 5  ;;  %v7638_v31 = vrot.slane %v7636_v18, 4 }
 0x3a8   : > { %v8264_v59 = vrot.slane %v8263_v44, 4  ;;  %v7301_v62 = vsel %vm12706_vm14, %v7296_v23, %v7300_v8  ;;  %v15457_v45 = vadd.f32 %v15367_v1, %v15359_v33  ;;  %v15461_v52 = vadd.f32 %v15401_v13, %v15399_v30  ;;  %v6972_v30 = vld [vmem:[#allocation2 + $0xbc] sm:$0x1] }
 0x3a9   : > { %v7311_v57 = vsel %vm12706_vm14, %v7306_v35, %v7310_v28  ;;  %v8274_v47 = vrot.slane %v8273_v9, 4  ;;  %v7637_v39 = vsel %vm12686_vm11, %v10854_v42, %v7636_v18  ;;  %v7640_v5 = vsel %vm12686_vm11, %v7638_v31, %v7639_v6  ;;  %v12399_v28 = vld [vmem:[#allocation2 + $0xc0] sm:$0xff]  }
 0x3aa   : > { %v10837_v14 = vcombine.low %v7301_v62, %v7311_v57  ;;  %v8269_v22 = vsel %vm12706_vm14, %v8264_v59, %v8268_v54  ;;  %v10870_v33 = vcombine.low %v7637_v39, %v7640_v5  ;;  %v15473_v1 = vadd.f32 %v15381_v32, %v15371_v38  ;;  %v7487_v38 = vld [vmem:[#allocation2 + $0xc8] sm:$0x1]  ;;  %v6973_v32 = vld [vmem:[#allocation2 + $0xc0] sm:$0xf]  ;;  %v6974_v62 = vld [vmem:[#allocation2 + $0xc4] sm:$0xf] }
 0x3ab   : > { %v15467_v34 = vpop.f32.mrb[180].mxu0  ;;  %v7313_v13 = vshrl.u32 %v6970_v63, 16  ;;  %v8279_v8 = vsel %vm12706_vm14, %v8274_v47, %v8278_v26  ;;  %v7316_v37 = vshll.u32 %v6970_v63, 16  ;;  %v7322_v3 = vshll.u32 %v6971_v51, 16  ;;  %v6975_v57 = vld [vmem:[#allocation2 + $0xc8] sm:$0x1] }
 0x3ac   : > { %v15475_v16 = vpop.f32.mrb[181].mxu0  ;;  %9858 = vmatmul.mubr.bf16.gmra.mrb[244].mxu1 %v10837_v14  ;;  %v7326_v27 = vshrl.u32 %v6971_v51, 16  ;;  %v10902_v54 = vcombine.low %v8269_v22, %v8279_v8  ;;  %v7332_v42 = vshll.u32 %v6972_v30, 16  ;;  %v10855_v23 = vrot.slane %v7485_v17, 9  ;;  %v7917_v39 = vld [vmem:[#allocation2 + $0xcc] sm:$0xf] }
 0x3ad   : > { %v15479_v19 = vpop.f32.mrb[182].mxu0  ;;  %9865 = vmatprep.mubr.bf16.mxu1 %v10870_v33  ;;  %v7315_v41 = vrot.slane %v7313_v13, 4  ;;  %v7318_v12 = vrot.slane %v7316_v37, 5  ;;  %v7324_v44 = vrot.slane %v7322_v3, 5  ;;  %v7643_v35 = vrot.slane %v7486_v7, 5 }
 0x3ae   : > { %v15481_v20 = vpop.f32.mrb[183].mxu0  ;;  %v7328_v0 = vrot.slane %v7326_v27, 4  ;;  %v15483_v18 = vpop.f32.mrb[148].mxu1  ;;  %10026 = vmatprep.mubr.bf16.mxu0 %v10902_v54  ;;  %v15487_v6 = vadd.f32 %v15441_v2, %v15437_v49  ;;  %v15493_v31 = vadd.f32 %v15433_v53, %v15425_v15  ;;  %v15497_v63 = vadd.f32 %v15445_v24, %v15443_v48  ;;  %v7919_v7 = vld [vmem:[#allocation2 + $0xd4] sm:$0x1] }
 0x3af   : > { %v15489_v59 = vpop.f32.mrb[149].mxu1  ;;  %10027 = vmatmul.mubr.bf16.gmra.mrb[24].mxu0 %v12399_v28  ;;  %v7319_v9 = vor.u32 %v7318_v12, %v7315_v41  ;;  %v7645_v14 = vrot.slane %v7643_v35, 4  ;;  %v7646_v49 = vrot.slane %v7487_v38, 5  ;;  %v15503_v2 = vadd.f32 %v15439_v60, %v15435_v61  ;;  %v7918_v61 = vld [vmem:[#allocation2 + $0xd0] sm:$0xf] }
 0x3b0   : > { %v7329_v26 = vor.u32 %v7328_v0, %v7324_v44  ;;  %v15499_v51 = vpop.f32.mrb[150].mxu1  ;;  %v7337_v47 = vshrl.u32 %v6973_v32, 16  ;;  %v7334_v22 = vrot.slane %v7332_v42, 5  ;;  %v7340_v33 = vshll.u32 %v6973_v32, 16 }
 0x3b1   : > { %v15505_v5 = vpop.f32.mrb[151].mxu1  ;;  %v7320_v15 = vrot.slane %v7319_v9, 4  ;;  %v7644_v24 = vsel %vm12686_vm11, %v10855_v23, %v7643_v35  ;;  %v7647_v30 = vsel %vm12686_vm11, %v7645_v14, %v7646_v49  ;;  %v7346_v17 = vshll.u32 %v6974_v62, 16  ;;  %v8384_v9 = vld [vmem:[#allocation2 + $0x18] sm:$0xe] }
 0x3b2   : > { %v7330_v53 = vrot.slane %v7329_v26, 4  ;;  %v7339_v13 = vrot.slane %v7337_v47, 4  ;;  %v10871_v3 = vcombine.low %v7644_v24, %v7647_v30  ;;  %v7342_v27 = vrot.slane %v7340_v33, 5  ;;  %v8385_v47 = vld [vmem:[#allocation2 + $0x1c] sm:$0xf] }
 0x3b3   : > { %v15507_v48 = vpop.f32.mrb[184].mxu0  ;;  %v7325_v8 = vsel %vm12706_vm14, %v7320_v15, %v7324_v44  ;;  %v7348_v38 = vrot.slane %v7346_v17, 5  ;;  %v7350_v32 = vshrl.u32 %v6974_v62, 16  ;;  %v7356_v28 = vshll.u32 %v6975_v57, 16 }
 0x3b4   : > { %v15513_v60 = vpop.f32.mrb[185].mxu0  ;;  %v7335_v37 = vsel %vm12706_vm14, %v7330_v53, %v7334_v22  ;;  %v7343_v0 = vor.u32 %v7342_v27, %v7339_v13  ;;  %v8281_v42 = vshrl.u32 %v7917_v39, 16  ;;  %v8284_v23 = vshll.u32 %v7917_v39, 16  ;;  %v8386_v13 = vld [vmem:[#allocation2 + $0x20] sm:$0x1] }
 0x3b5   : > { %v15519_v54 = vpop.f32.mrb[186].mxu0  ;;  %v10838_v41 = vcombine.low %v7325_v8, %v7335_v37  ;;  %v8290_v35 = vshll.u32 %v7918_v61, 16  ;;  %v7352_v26 = vrot.slane %v7350_v32, 4  ;;  %v8294_v14 = vshrl.u32 %v7918_v61, 16 }
 0x3b6   : > { %v15521_v12 = vpop.f32.mrb[187].mxu0  ;;  %v15523_v44 = vpop.f32.mrb[152].mxu1  ;;  %v8300_v49 = vshll.u32 %v7919_v7, 16  ;;  %v8283_v53 = vrot.slane %v8281_v42, 4  ;;  %v8286_v22 = vrot.slane %v8284_v23, 5  ;;  %v7344_v33 = vrot.slane %v7343_v0, 4 }
 0x3b7   : > { %9866 = vmatmul.mubr.bf16.gmra.mrb[248].mxu1 %v10838_v41  ;;  %v11605_v15 = vpop.f32.mrb[153].mxu1  ;;  %v8292_v62 = vrot.slane %v8290_v35, 5  ;;  %v7353_v24 = vor.u32 %v7352_v26, %v7348_v38  ;;  %v7358_v30 = vrot.slane %v7356_v28, 5  ;;  %v8296_v39 = vrot.slane %v8294_v14, 4  ;;  %v8388_v26 = vld [vmem:[#allocation2 + $0x28] sm:$0xf] }
 0x3b8   : > { %9873 = vmatprep.mubr.bf16.mxu1 %v10871_v3  ;;  %v15525_v57 = vpop.f32.mrb[154].mxu1  ;;  %v8287_v8 = vor.u32 %v8286_v22, %v8283_v53  ;;  %v8302_v37 = vrot.slane %v8300_v49, 5  ;;  %v10904_v27 = vrot.slane %v8384_v9, 9  ;;  %v8482_v41 = vrot.slane %v8385_v47, 5  ;;  %v8387_v22 = vld [vmem:[#allocation2 + $0x24] sm:$0xe] }
 0x3b9   : > { %v11608_v17 = vpop.f32.mrb[155].mxu1  ;;  %v7354_v7 = vrot.slane %v7353_v24, 4  ;;  %v8297_v32 = vor.u32 %v8296_v39, %v8292_v62  ;;  %v15531_v3 = vadd.f32 %v15475_v16, %v15467_v34  ;;  %v15535_v0 = vadd.f32 %v15489_v59, %v15483_v18  ;;  %v8391_v59 = vld [vmem:[#allocation2 + $0x34] sm:$0xf] }
 0x3ba   : > { %v8288_v42 = vrot.slane %v8287_v8, 4  ;;  %v8484_v23 = vrot.slane %v8482_v41, 4  ;;  %v8485_v35 = vrot.slane %v8386_v13, 5  ;;  %v15539_v9 = vadd.f32 %v15481_v20, %v15479_v19  ;;  %v8392_v13 = vld [vmem:[#allocation2 + $0x38] sm:$0x1] }
 0x3bb   : > { %v15527_v61 = vpop.f32.mrb[188].mxu0  ;;  %v7349_v49 = vsel %vm12706_vm14, %v7344_v33, %v7348_v38  ;;  %v7359_v34 = vsel %vm12706_vm14, %v7354_v7, %v7358_v30  ;;  %v8298_v16 = vrot.slane %v8297_v32, 4  ;;  %v15547_v18 = vadd.f32 %v15505_v5, %v15499_v51  ;;  %v8389_v33 = vld [vmem:[#allocation2 + $0x2c] sm:$0x1] }
 0x3bc   : > { %v11723_v28 = vpop.f32.mrb[189].mxu0  ;;  %v10839_v53 = vcombine.low %v7349_v49, %v7359_v34  ;;  %v8293_v19 = vsel %vm12706_vm14, %v8288_v42, %v8292_v62  ;;  %v8483_v20 = vsel %vm12686_vm11, %v10904_v27, %v8482_v41  ;;  %v8486_v38 = vsel %vm12686_vm11, %v8484_v23, %v8485_v35  ;;  %v12401_v5 = vld [vmem:[#allocation2 + $0xcc] sm:$0xff]   ;;  %v15557_v42 = vld [vmem:[#allocation2 + $0x40] sm:$0xf] }
 0x3bd   : > { %v11725_v14 = vpop.f32.mrb[190].mxu0  ;;  %v8303_v30 = vsel %vm12706_vm14, %v8298_v16, %v8302_v37  ;;  %v10920_v51 = vcombine.low %v8483_v20, %v8486_v38  ;;  %v8489_v39 = vrot.slane %v8388_v26, 5  ;;  %v8390_v62 = vld [vmem:[#allocation2 + $0x30] sm:$0xe]  ;;  %v8496_v32 = vrot.slane %v8391_v59, 5 }
 0x3be   : > { %v11726_v47 = vpop.f32.mrb[191].mxu0  ;;  %v11610_v24 = vpop.f32.mrb[156].mxu1  ;;  %v10903_v7 = vcombine.low %v8293_v19, %v8303_v30  ;;  %v10905_v41 = vrot.slane %v8387_v22, 9  ;;  %v8492_v35 = vrot.slane %v8389_v33, 5  ;;  %v15561_v36 = vadd.f32 %v15513_v60, %v15507_v48  ;;  %v8397_v20 = vld [vmem:[#allocation2 + $0x4c] sm:$0xf] }
 0x3bf   : > { %v11611_v8 = vpop.f32.mrb[157].mxu1  ;;  %9874 = vmatmul.mubr.bf16.gmra.mrb[252].mxu1 %v10839_v53  ;;  %v8491_v23 = vrot.slane %v8489_v39, 4  ;;  %v8498_v26 = vrot.slane %v8496_v32, 4  ;;  %v8499_v49 = vrot.slane %v8392_v13, 5  ;;  %v15564_v34 = vadd.f32 %v11605_v15, %v15523_v44 }
 0x3c0   : > { %v11613_v27 = vpop.f32.mrb[158].mxu1  ;;  %12088 = vmatprep.mubr.bf16.mxu1 %v10920_v51  ;;  %10034 = vmatprep.mubr.bf16.mxu0 %v10903_v7  ;;  %v15568_v16 = vadd.f32 %v15521_v12, %v15519_v54  ;;  %v10906_v19 = vrot.slane %v8390_v62, 9  ;;  %v15573_v48 = vadd.f32 %v11608_v17, %v15525_v57  ;;  %v8503_v60 = vrot.slane %v15557_v42, 5  ;;  %v8395_v51 = vld [vmem:[#allocation2 + $0x44] sm:$0x1] }
 0x3c1   : > { %v11614_v37 = vpop.f32.mrb[159].mxu1  ;;  %10035 = vmatmul.mubr.bf16.gmra.mrb[28].mxu0 %v12401_v5  ;;  %v8493_v53 = vsel %vm12686_vm11, %v8491_v23, %v8492_v35  ;;  %v8500_v44 = vsel %vm12686_vm11, %v8498_v26, %v8499_v49  ;;  %v8490_v54 = vsel %vm12686_vm11, %v10905_v41, %v8489_v39  ;;  %v8510_v57 = vrot.slane %v8397_v20, 5  ;;  %v8398_v7 = vld [vmem:[#allocation2 + $0x50] sm:$0x1]  ;;  %v15591_v39 = vld [vmem:[#allocation2 + $0x58] sm:$0xf] }
 0x3c2   : > { %v8497_v12 = vsel %vm12686_vm11, %v10906_v19, %v8496_v32  ;;  %v10921_v33 = vcombine.low %v8490_v54, %v8493_v53  ;;  %v15583_v17 = vadd.f32 %v11723_v28, %v15527_v61  ;;  %v8505_v13 = vrot.slane %v8503_v60, 4  ;;  %v8393_v41 = vld [vmem:[#allocation2 + $0x3c] sm:$0xe]  ;;  %v8396_v35 = vld [vmem:[#allocation2 + $0x48] sm:$0xe] }
 0x3c3   : > { %v11728_v59 = vpop.f32.mrb[192].mxu0  ;;  %v10922_v30 = vcombine.low %v8497_v12, %v8500_v44  ;;  %v15585_v62 = vadd.f32 %v11611_v8, %v11610_v24  ;;  %v15587_v42 = vadd.f32 %v11726_v47, %v11725_v14  ;;  %v15589_v23 = vadd.f32 %v11614_v37, %v11613_v27  ;;  %v15593_v28 = vld [vmem:[#allocation2 + $0x64] sm:$0xf] }
 0x3c4   : > { %v11729_v38 = vpop.f32.mrb[193].mxu0  ;;  %v8512_v26 = vrot.slane %v8510_v57, 4  ;;  %v8506_v61 = vrot.slane %v8395_v51, 5  ;;  %v8513_v19 = vrot.slane %v8398_v7, 5  ;;  %v8517_v24 = vrot.slane %v15591_v39, 5 }
 0x3c5   : > { %v11731_v15 = vpop.f32.mrb[194].mxu0  ;;  %v10907_v47 = vrot.slane %v8393_v41, 9  ;;  %v10908_v27 = vrot.slane %v8396_v35, 9  ;;  %v15598_v37 = vadd.f32 %v11729_v38, %v11728_v59  ;;  %v8524_v54 = vrot.slane %v15593_v28, 5  ;;  %v8401_v7 = vld [vmem:[#allocation2 + $0x5c] sm:$0x1] }
 0x3c6   : > { %v11732_v22 = vpop.f32.mrb[195].mxu0  ;;  %v11616_v5 = vpop.f32.mrb[160].mxu1  ;;  %v8507_v8 = vsel %vm12686_vm11, %v8505_v13, %v8506_v61  ;;  %v8514_v44 = vsel %vm12686_vm11, %v8512_v26, %v8513_v19  ;;  %v8399_v41 = vld [vmem:[#allocation2 + $0x54] sm:$0xe]  ;;  %v8519_v35 = vrot.slane %v8517_v24, 4  ;;  %v8520_v61 = vrot.slane %v8401_v7, 5 }
 0x3c7   : > { %v11617_v32 = vpop.f32.mrb[161].mxu1  ;;  %12089 = vmatmul.mubr.bf16.vlgmr.msra.gmra.mrb[0].mxu1 %v10921_v33  ;;  %16308 = vst [vmem:[#allocation47_spill] sm:$0xff] %v15598_v37  ;;  %v15605_v33 = vadd.f32 %v11732_v22, %v11731_v15  ;;  %v8504_v51 = vsel %vm12686_vm11, %v10907_v47, %v8503_v60  ;;  %v8511_v38 = vsel %vm12686_vm11, %v10908_v27, %v8510_v57  ;;  %v8404_v22 = vld [vmem:[#allocation2 + $0x68] sm:$0x1]  ;;  %v8402_v28 = vld [vmem:[#allocation2 + $0x60] sm:$0xe] }
 0x3c8   : > { %v11619_v49 = vpop.f32.mrb[162].mxu1  ;;  %12092 = vmatprep.mubr.bf16.mxu1 %v10922_v30  ;;  %v15603_v12 = vadd.f32 %v11617_v32, %v11616_v5  ;;  %v10923_v59 = vcombine.low %v8504_v51, %v8507_v8  ;;  %v15615_v5 = vadd.f32 %v15375_v11, %v15329_v43  ;;  %v10924_v15 = vcombine.low %v8511_v38, %v8514_v44  ;;  %v15617_v32 = vld [vmem:[#allocation2 + $0x70] sm:$0xf]  ;;  %v15629_v8 = vld [vmem:[#allocation2 + $0x7c] sm:$0xf] }
 0x3c9   : > { %v11620_v53 = vpop.f32.mrb[163].mxu1  ;;  %16309 = vst [vmem:[#allocation23_spill] sm:$0xff] %v15605_v33  ;;  %v8526_v57 = vrot.slane %v8524_v54, 4  ;;  %v15627_v11 = vadd.f32 %v15411_v56, %v15329_v43  ;;  %v10909_v47 = vrot.slane %v8399_v41, 9  ;;  %v8521_v51 = vsel %vm12686_vm11, %v8519_v35, %v8520_v61  ;;  %v15652_v41 = vld [vmem:[#allocation2 + $0x88] sm:$0xf] }
 0x3ca   : > { %v15609_v39 = vadd.f32 %v11620_v53, %v11619_v49  ;;  %v15621_v49 = vadd.f32 %v15389_v21, %v15329_v43  ;;  %v8527_v7 = vrot.slane %v8404_v22, 5  ;;  %v15642_v56 = vadd.f32 %v15423_v40, %v15329_v43  ;;  %v15654_v35 = vld [vmem:[#allocation2 + $0x94] sm:$0xf] }
 0x3cb   : > { %v11734_v14 = vpop.f32.mrb[196].mxu0  ;;  %v15646_v38 = vadd.f32 %v15457_v45, %v15329_v43  ;;  %v8518_v40 = vsel %vm12686_vm11, %v10909_v47, %v8517_v24  ;;  %v8538_v22 = vrot.slane %v15629_v8, 5  ;;  %v8410_v47 = vld [vmem:[#allocation2 + $0x80] sm:$0x1]  ;;  %v8552_v8 = vrot.slane %v15654_v35, 5 }
 0x3cc   : > { %v11735_v20 = vpop.f32.mrb[197].mxu0  ;;  %v8528_v45 = vsel %vm12686_vm11, %v8526_v57, %v8527_v7  ;;  %v8545_v57 = vrot.slane %v15652_v41, 5  ;;  %v15691_v35 = vadd.f32 %v15573_v48, %v15329_v43  ;;  %v8416_v48 = vld [vmem:[#allocation2 + $0x98] sm:$0x1] }
 0x3cd   : > { %v11737_v30 = vpop.f32.mrb[198].mxu0  ;;  %v15623_v53 = vadd.f32 %v11735_v20, %v11734_v14  ;;  %v8531_v14 = vrot.slane %v15617_v32, 5  ;;  %v15667_v32 = vadd.f32 %v15503_v2, %v15329_v43  ;;  %v15679_v2 = vadd.f32 %v15535_v0, %v15329_v43  ;;  %v8411_v0 = vld [vmem:[#allocation2 + $0x84] sm:$0xe] }
 0x3ce   : > { %v11738_v13 = vpop.f32.mrb[199].mxu0  ;;  %v11622_v26 = vpop.f32.mrb[164].mxu1 }
 0x3cf   : > { %v11623_v60 = vpop.f32.mrb[165].mxu1  ;;  %12093 = vmatmul.mubr.bf16.gmra.mrb[4].mxu1 %v10923_v59  ;;  %16310 = vst [vmem:[#allocation24_spill] sm:$0xff] %v15623_v53  ;;  %v15633_v44 = vadd.f32 %v11738_v13, %v11737_v30  ;;  %v15650_v30 = vadd.f32 %v15473_v1, %v15329_v43  ;;  %v10910_v13 = vrot.slane %v8402_v28, 9  ;;  %v8405_v28 = vld [vmem:[#allocation2 + $0x6c] sm:$0xe]  ;;  %v8533_v24 = vrot.slane %v8531_v14, 4 }
 0x3d0   : > { %v11625_v19 = vpop.f32.mrb[166].mxu1  ;;  %12096 = vmatprep.mubr.bf16.mxu1 %v10924_v15  ;;  %v15631_v27 = vadd.f32 %v11623_v60, %v11622_v26  ;;  %v15658_v15 = vadd.f32 %v15493_v31, %v15329_v43  ;;  %v10925_v60 = vcombine.low %v8518_v40, %v8521_v51  ;;  %v8407_v31 = vld [vmem:[#allocation2 + $0x74] sm:$0x1]  ;;  %v15687_v51 = vadd.f32 %v15564_v34, %v15329_v43  ;;  %v15717_v53 = vld [vmem:[#allocation2 + $0xac] sm:$0xf] }
 0x3d1   : > { %16311 = vst [vmem:[#allocation41_spill] sm:$0xff] %v15633_v44  ;;  %v11626_v21 = vpop.f32.mrb[167].mxu1  ;;  %v8525_v61 = vsel %vm12686_vm11, %v10910_v13, %v8524_v54  ;;  %v15683_v54 = vadd.f32 %v15547_v18, %v15329_v43  ;;  %v8408_v13 = vld [vmem:[#allocation2 + $0x78] sm:$0xe]  ;;  %v8540_v40 = vrot.slane %v8538_v22, 4  ;;  %v15695_v18 = vadd.f32 %v15585_v62, %v15329_v43 }
 0x3d2   : > { %v15638_v20 = vadd.f32 %v11626_v21, %v11625_v19  ;;  %v15699_v34 = vadd.f32 %v15589_v23, %v15329_v43  ;;  %v15705_v62 = vadd.f32 %v15603_v12, %v15329_v43  ;;  %v15709_v23 = vadd.f32 %v15609_v39, %v15329_v43 }
 0x3d3   : > { %v11740_v59 = vpop.f32.mrb[200].mxu0 }
 0x3d4   : > { %v11741_v26 = vpop.f32.mrb[201].mxu0  ;;  %16314 = vst [vmem:[#allocation12_spill] sm:$0xff] %v15709_v23  ;;  %v10913_v23 = vrot.slane %v8411_v0, 9 }
 0x3d5   : > { %v11743_v1 = vpop.f32.mrb[202].mxu0  ;;  %v15671_v19 = vadd.f32 %v11741_v26, %v11740_v59  ;;  %v10926_v59 = vcombine.low %v8525_v61, %v8528_v45  ;;  %v8534_v26 = vrot.slane %v8407_v31, 5  ;;  %v10911_v45 = vrot.slane %v8405_v28, 9 }
 0x3d6   : > { %v11744_v21 = vpop.f32.mrb[203].mxu0  ;;  %v11628_v7 = vpop.f32.mrb[168].mxu1  ;;  %v8541_v61 = vrot.slane %v8410_v47, 5  ;;  %v8547_v31 = vrot.slane %v8545_v57, 4  ;;  %v10912_v47 = vrot.slane %v8408_v13, 9 }
 0x3d7   : > { %16312 = vst [vmem:[#allocation11_spill] sm:$0xff] %v15671_v19  ;;  %v15675_v10 = vadd.f32 %v11744_v21, %v11743_v1  ;;  %v11629_v41 = vpop.f32.mrb[169].mxu1  ;;  %12097 = vmatmul.mubr.bf16.gmra.mrb[8].mxu1 %v10925_v60  ;;  %v8413_v1 = vld [vmem:[#allocation2 + $0x8c] sm:$0x1]  ;;  %v8535_v60 = vsel %vm12686_vm11, %v8533_v24, %v8534_v26  ;;  %v8414_v19 = vld [vmem:[#allocation2 + $0x90] sm:$0xe]  ;;  %v8532_v28 = vsel %vm12686_vm11, %v10911_v45, %v8531_v14 }
 0x3d8   : > { %v11630_v21 = vadd.f32 %v11629_v41, %v11628_v7  ;;  %v11631_v50 = vpop.f32.mrb[170].mxu1  ;;  %12100 = vmatprep.mubr.bf16.mxu1 %v10926_v59  ;;  %v8554_v7 = vrot.slane %v8552_v8, 4  ;;  %v15713_v59 = vld [vmem:[#allocation2 + $0xa0] sm:$0xf]  ;;  %v8542_v26 = vsel %vm12686_vm11, %v8540_v40, %v8541_v61  ;;  %v10927_v37 = vcombine.low %v8532_v28, %v8535_v60 }
 0x3d9   : > { %16313 = vst [vmem:[#allocation42_spill] sm:$0xff] %v15675_v10  ;;  %v11632_v10 = vpop.f32.mrb[171].mxu1  ;;  %v8539_v39 = vsel %vm12686_vm11, %v10912_v47, %v8538_v22  ;;  %v10914_v14 = vrot.slane %v8414_v19, 9  ;;  %v9506_v60 = vadd.f32 %v15631_v27, %v15329_v43  ;;  %v8566_v22 = vrot.slane %v15717_v53, 5 }
 0x3da   : > { %v11633_v41 = vadd.f32 %v11632_v10, %v11631_v50  ;;  %v8548_v50 = vrot.slane %v8413_v1, 5  ;;  %v8555_v10 = vrot.slane %v8416_v48, 5  ;;  %v8559_v1 = vrot.slane %v15713_v59, 5  ;;  %v8423_v59 = vld [vmem:[#allocation2 + $0xb4] sm:$0xe] }
 0x3db   : > { %v11746_v44 = vpop.f32.mrb[204].mxu0  ;;  %v15735_v19 = vadd.f32 %v15365_v55, %v15615_v5  ;;  %v8553_v43 = vsel %vm12686_vm11, %v10914_v14, %v8552_v8  ;;  %v15750_v47 = vadd.f32 %v15379_v29, %v15621_v49  ;;  %v8568_v29 = vrot.slane %v8566_v22, 4  ;;  %v8419_v14 = vld [vmem:[#allocation2 + $0xa4] sm:$0x1] }
 0x3dc   : > { %v11747_v24 = vpop.f32.mrb[205].mxu0  ;;  %v8549_v45 = vsel %vm12686_vm11, %v8547_v31, %v8548_v50  ;;  %v8556_v40 = vsel %vm12686_vm11, %v8554_v7, %v8555_v10  ;;  %v15740_v31 = vld [vmem:[%s16156_s4] ss:$0 sm:$0xff]  ;;  %v8546_v7 = vsel %vm12686_vm11, %v10913_v23, %v8545_v57  ;;  %v8561_v57 = vrot.slane %v8559_v1, 4 }
 0x3dd   : > { %v15719_v12 = vadd.f32 %v11747_v24, %v11746_v44  ;;  %v11749_v33 = vpop.f32.mrb[206].mxu0  ;;  %v10928_v44 = vcombine.low %v8539_v39, %v8542_v26  ;;  %v10929_v55 = vcombine.low %v8546_v7, %v8549_v45  ;;  %v10930_v5 = vcombine.low %v8553_v43, %v8556_v40  ;;  %v16319_v40 = vld [vmem:[#allocation41_spill] sm:$0xff] }
 0x3de   : > { %v11750_v13 = vpop.f32.mrb[207].mxu0  ;;  %v11634_v61 = vpop.f32.mrb[172].mxu1  ;;  %v15754_v24 = vadd.f32 %v15407_v25, %v15627_v11  ;;  %v15761_v26 = vadd.f32 %v15419_v58, %v15642_v56  ;;  %v9517_v50 = vadd.f32 %v15740_v31, %v11633_v41  ;;  %v15768_v25 = vadd.f32 %v15449_v46, %v15646_v38 }
 0x3df   : > { %v15728_v48 = vadd.f32 %v11750_v13, %v11749_v33  ;;  %v11635_v0 = vpop.f32.mrb[173].mxu1  ;;  %12101 = vmatmul.mubr.bf16.gmra.mrb[12].mxu1 %v10927_v37  ;;  %v9509_v33 = vadd.f32 %v15740_v31, %v15638_v20  ;;  %v9514_v20 = vadd.f32 %v15740_v31, %v11630_v21  ;;  %v15772_v11 = vadd.f32 %v15461_v52, %v15650_v30  ;;  %v16317_v13 = vld [vmem:[#allocation23_spill] sm:$0xff] }
 0x3e0   : > { %v11636_v27 = vadd.f32 %v11635_v0, %v11634_v61  ;;  %v11637_v28 = vpop.f32.mrb[174].mxu1  ;;  %12104 = vmatprep.mubr.bf16.mxu1 %v10928_v44  ;;  %v15780_v41 = vadd.f32 %v15487_v6, %v15658_v15  ;;  %v15784_v46 = vadd.f32 %v15497_v63, %v15667_v32  ;;  %v15788_v52 = vadd.f32 %v15531_v3, %v15679_v2  ;;  %v8422_v32 = vld [vmem:[#allocation2 + $0xb0] sm:$0x1]  ;;  %v16320_v44 = vld [vmem:[#allocation11_spill] sm:$0xff] }
 0x3e1   : > { %v11638_v37 = vpop.f32.mrb[175].mxu1  ;;  %v15792_v38 = vadd.f32 %v15539_v9, %v15683_v54  ;;  %v15796_v30 = vadd.f32 %v15561_v36, %v15687_v51  ;;  %v15802_v63 = vadd.f32 %v15568_v16, %v15691_v35  ;;  %v15806_v3 = vadd.f32 %v15583_v17, %v15695_v18  ;;  %v16315_v36 = vld [vmem:[#allocation47_spill] sm:$0xff]  ;;  %v16316_v51 = vld [vmem:[#allocation12_spill] sm:$0xff] }
 0x3e2   : > { %v11639_v8 = vadd.f32 %v11638_v37, %v11637_v28  ;;  %v9522_v21 = vadd.f32 %v15740_v31, %v11636_v27  ;;  %v15810_v9 = vadd.f32 %v15587_v42, %v15699_v34  ;;  %v15814_v54 = vadd.f32 %v16315_v36, %v15705_v62  ;;  %v16318_v16 = vld [vmem:[#allocation24_spill] sm:$0xff]  ;;  %v8417_v18 = vld [vmem:[#allocation2 + $0x9c] sm:$0xe]  ;;  %v15826_v42 = vld [vmem:[#allocation2 + $0xb8] sm:$0xf] }
 0x3e3   : > { %v11752_v23 = vpop.f32.mrb[208].mxu0  ;;  %v15818_v45 = vadd.f32 %v16317_v13, %v16316_v51  ;;  %v15821_v35 = vadd.f32 %v16318_v16, %v9506_v60  ;;  %v15824_v17 = vadd.f32 %v16319_v40, %v9509_v33  ;;  %v15829_v0 = vadd.f32 %v16320_v44, %v9514_v20  ;;  %v16321_v62 = vld [vmem:[#allocation42_spill] sm:$0xff]  ;;  %v8420_v27 = vld [vmem:[#allocation2 + $0xa8] sm:$0xe]  ;;  %v8427_v33 = vld [vmem:[#allocation2 + $0xc4] sm:$0xf] }
 0x3e4   : > { %v11753_v49 = vpop.f32.mrb[209].mxu0  ;;  %v9525_v10 = vadd.f32 %v15740_v31, %v11639_v8  ;;  %v15832_v7 = vadd.f32 %v16321_v62, %v9517_v50  ;;  %v15835_v43 = vadd.f32 %v15719_v12, %v9522_v21  ;;  %v8562_v60 = vrot.slane %v8419_v14, 5  ;;  %v8428_v16 = vld [vmem:[#allocation2 + $0xc8] sm:$0x1] }
 0x3e5   : > { %v15776_v58 = vadd.f32 %v11753_v49, %v11752_v23  ;;  %v11755_v56 = vpop.f32.mrb[210].mxu0  ;;  %v10915_v23 = vrot.slane %v8417_v18, 9  ;;  %v8573_v20 = vrot.slane %v15826_v42, 5  ;;  %v10916_v12 = vrot.slane %v8420_v27, 9  ;;  %v8426_v18 = vld [vmem:[#allocation2 + $0xc0] sm:$0xe] }
 0x3e6   : > { %v11756_v39 = vpop.f32.mrb[211].mxu0  ;;  %v11640_v6 = vpop.f32.mrb[176].mxu1  ;;  %v8563_v49 = vsel %vm12686_vm11, %v8561_v57, %v8562_v60  ;;  %v15841_v50 = vadd.f32 %v15728_v48, %v9525_v10  ;;  %v8580_v21 = vrot.slane %v8427_v33, 5  ;;  %v8425_v10 = vld [vmem:[#allocation2 + $0xbc] sm:$0x1]  ;;  %v8583_v60 = vrot.slane %v8428_v16, 5 }
 0x3e7   : > { %v15798_v15 = vadd.f32 %v11756_v39, %v11755_v56  ;;  %v11641_v2 = vpop.f32.mrb[177].mxu1  ;;  %12105 = vmatmul.mubr.bf16.gmra.mrb[16].mxu1 %v10929_v55  ;;  %v8569_v55 = vrot.slane %v8422_v32, 5  ;;  %v8567_v48 = vsel %vm12686_vm11, %v10916_v12, %v8566_v22  ;;  %v8575_v13 = vrot.slane %v8573_v20, 4  ;;  %v8429_v27 = vld [vmem:[#allocation2 + $0xcc] sm:$0xe] }
 0x3e8   : > { %v11642_v34 = vadd.f32 %v11641_v2, %v11640_v6  ;;  %v11643_v61 = vpop.f32.mrb[178].mxu1  ;;  %12108 = vmatprep.mubr.bf16.mxu1 %v10930_v5  ;;  %v8560_v6 = vsel %vm12686_vm11, %v10915_v23, %v8559_v1  ;;  %v8430_v2 = vld [vmem:[#allocation2 + $0xd0] sm:$0xf]  ;;  %v8582_v1 = vrot.slane %v8580_v21, 4  ;;  %v8576_v44 = vrot.slane %v8425_v10, 5 }
 0x3e9   : > { %v11644_v28 = vpop.f32.mrb[179].mxu1  ;;  %v8570_v5 = vsel %vm12686_vm11, %v8568_v29, %v8569_v55  ;;  %v10931_v32 = vcombine.low %v8560_v6, %v8563_v49  ;;  %v8587_v22 = vrot.slane %v8430_v2, 5  ;;  %v8431_v33 = vld [vmem:[#allocation2 + $0xd4] sm:$0x1]  ;;  %v10918_v49 = vrot.slane %v8426_v18, 9 }
 0x3ea   : > { %v11645_v37 = vadd.f32 %v11644_v28, %v11643_v61  ;;  %v10932_v51 = vcombine.low %v8567_v48, %v8570_v5  ;;  %v9530_v42 = vadd.f32 %v15740_v31, %v11642_v34  ;;  %v8577_v23 = vsel %vm12686_vm11, %v8575_v13, %v8576_v44 }
 0x3eb   : > { %v11758_v8 = vpop.f32.mrb[212].mxu0  ;;  %v8584_v34 = vsel %vm12686_vm11, %v8582_v1, %v8583_v60  ;;  %v8589_v48 = vrot.slane %v8587_v22, 4  ;;  %v8590_v10 = vrot.slane %v8431_v33, 5 }
 0x3ec   : > { %v11759_v56 = vpop.f32.mrb[213].mxu0  ;;  %v9533_v12 = vadd.f32 %v15740_v31, %v11645_v37  ;;  %v15864_v6 = vadd.f32 %v15776_v58, %v9530_v42 }
 0x3ed   : > { %v15845_v39 = vadd.f32 %v11759_v56, %v11758_v8  ;;  %v11761_v14 = vpop.f32.mrb[214].mxu0  ;;  %v10917_v8 = vrot.slane %v8423_v59, 9  ;;  %v8591_v1 = vsel %vm12686_vm11, %v8589_v48, %v8590_v10 }
 0x3ee   : > { %v11762_v57 = vpop.f32.mrb[215].mxu0  ;;  %v11646_v36 = vpop.f32.mrb[180].mxu1  ;;  %v15871_v58 = vadd.f32 %v15798_v15, %v9533_v12 }
 0x3ef   : > { %v15855_v29 = vadd.f32 %v11762_v57, %v11761_v14  ;;  %v11647_v40 = vpop.f32.mrb[181].mxu1  ;;  %12109 = vmatmul.mubr.bf16.gmra.mrb[20].mxu1 %v10931_v32  ;;  %v8574_v57 = vsel %vm12686_vm11, %v10917_v8, %v8573_v20  ;;  %v10919_v32 = vrot.slane %v8429_v27, 9 }
 0x3f0   : > { %v11648_v61 = vadd.f32 %v11647_v40, %v11646_v36  ;;  %v11649_v53 = vpop.f32.mrb[182].mxu1  ;;  %12112 = vmatprep.mubr.bf16.mxu1 %v10932_v51  ;;  %v10933_v36 = vcombine.low %v8574_v57, %v8577_v23  ;;  %v8581_v51 = vsel %vm12686_vm11, %v10918_v49, %v8580_v21 }
 0x3f1   : > { %v11650_v62 = vpop.f32.mrb[183].mxu1  ;;  %v10934_v40 = vcombine.low %v8581_v51, %v8584_v34  ;;  %v8588_v20 = vsel %vm12686_vm11, %v10919_v32, %v8587_v22 }
 0x3f2   : > { %v11651_v28 = vadd.f32 %v11650_v62, %v11649_v53  ;;  %v9538_v44 = vadd.f32 %v15740_v31, %v11648_v61  ;;  %v10935_v60 = vcombine.low %v8588_v20, %v8591_v1 }
 0x3f3   : > { %v11764_v55 = vpop.f32.mrb[216].mxu0 }
 0x3f4   : > { %v11765_v56 = vpop.f32.mrb[217].mxu0  ;;  %v9541_v23 = vadd.f32 %v15740_v31, %v11651_v28  ;;  %v15880_v22 = vadd.f32 %v15845_v39, %v9538_v44  ;;  %v16323_v44 = vld [vmem:[#allocation44_spill] sm:$0xff] }
 0x3f5   : > { %v11766_v5 = vadd.f32 %v11765_v56, %v11764_v55  ;;  %v11767_v14 = vpop.f32.mrb[218].mxu0 }
 0x3f6   : > { %v11768_v2 = vpop.f32.mrb[219].mxu0  ;;  %v11652_v13 = vpop.f32.mrb[184].mxu1  ;;  %v15883_v57 = vadd.f32 %v15855_v29, %v9541_v23 }
 0x3f7   : > { %v11769_v16 = vadd.f32 %v11768_v2, %v11767_v14  ;;  %v11653_v37 = vpop.f32.mrb[185].mxu1  ;;  %12113 = vmatmul.mubr.bf16.gmra.mrb[24].mxu1 %v10933_v36 }
 0x3f8   : > { %v11654_v59 = vadd.f32 %v11653_v37, %v11652_v13  ;;  %v11655_v18 = vpop.f32.mrb[186].mxu1  ;;  %12116 = vmatprep.mubr.bf16.mxu1 %v10934_v40 }
 0x3f9   : > { %v11656_v42 = vpop.f32.mrb[187].mxu1 }
 0x3fa   : > { %v11657_v53 = vadd.f32 %v11656_v42, %v11655_v18  ;;  %v9546_v28 = vadd.f32 %v15740_v31, %v11654_v59  ;;  %v16322_v18 = vld [vmem:[#allocation43_spill] sm:$0xff] }
 0x3fb   : > { %v11770_v21 = vpop.f32.mrb[220].mxu0 }
 0x3fc   : > { %v11771_v62 = vpop.f32.mrb[221].mxu0  ;;  %v9549_v37 = vadd.f32 %v15740_v31, %v11657_v53  ;;  %v15892_v42 = vadd.f32 %v11766_v5, %v9546_v28 }
 0x3fd   : > { %v11772_v27 = vadd.f32 %v11771_v62, %v11770_v21  ;;  %v11773_v33 = vpop.f32.mrb[222].mxu0 }
 0x3fe   : > { %v11774_v55 = vpop.f32.mrb[223].mxu0  ;;  %v11658_v8 = vpop.f32.mrb[188].mxu1  ;;  %v15895_v23 = vadd.f32 %v11769_v16, %v9549_v37 }
 0x3ff   : > { %v11775_v15 = vadd.f32 %v11774_v55, %v11773_v33  ;;  %v11659_v49 = vpop.f32.mrb[189].mxu1  ;;  %12117 = vmatmul.mubr.bf16.gmra.mrb[28].mxu1 %v10935_v60 }
 0x400   : > { %v11660_v4 = vadd.f32 %v11659_v49, %v11658_v8  ;;  %v11661_v56 = vpop.f32.mrb[190].mxu1 }
 0x401   : > { %v11662_v34 = vpop.f32.mrb[191].mxu1 }
 0x402   : > { %v11663_v12 = vadd.f32 %v11662_v34, %v11661_v56  ;;  %v9554_v49 = vadd.f32 %v15740_v31, %v11660_v4 }
 0x403   : > { %v11904_v14 = vpop.f32.mrb[224].mxu0 }
 0x404   : > { %v11905_v61 = vpop.f32.mrb[225].mxu0 }
 0x405   : > { %v15885_v32 = vadd.f32 %v11905_v61, %v11904_v14  ;;  %v11907_v48 = vpop.f32.mrb[226].mxu0 }
 0x406   : > { %v11908_v10 = vpop.f32.mrb[227].mxu0  ;;  %v11792_v2 = vpop.f32.mrb[192].mxu1 }
 0x407   : > { %v15888_v36 = vadd.f32 %v11908_v10, %v11907_v48  ;;  %v11793_v39 = vpop.f32.mrb[193].mxu1  ;;  %v9557_v10 = vadd.f32 %v15740_v31, %v11663_v12 }
 0x408   : > { %v11794_v51 = vadd.f32 %v11793_v39, %v11792_v2  ;;  %v11795_v13 = vpop.f32.mrb[194].mxu1  ;;  %v15900_v2 = vadd.f32 %v11772_v27, %v9554_v49 }
 0x409   : > { %v11796_v40 = vpop.f32.mrb[195].mxu1 }
 0x40a   : > { %v9756_v20 = vadd.f32 %v11794_v51, %v16322_v18  ;;  %v11797_v1 = vadd.f32 %v11796_v40, %v11795_v13  ;;  %v15903_v18 = vadd.f32 %v11775_v15, %v9557_v10 }
 0x40b   : > { %v11910_v29 = vpop.f32.mrb[228].mxu0 }
 0x40c   : > { %v11911_v21 = vpop.f32.mrb[229].mxu0  ;;  %v9759_v62 = vadd.f32 %v11797_v1, %v16323_v44  ;;  %v15911_v10 = vadd.f32 %v15885_v32, %v9756_v20 }
 0x40d   : > { %v11912_v60 = vadd.f32 %v11911_v21, %v11910_v29  ;;  %v11913_v59 = vpop.f32.mrb[230].mxu0 }
 0x40e   : > { %v11914_v33 = vpop.f32.mrb[231].mxu0  ;;  %v11798_v55 = vpop.f32.mrb[196].mxu1 }
 0x40f   : > { %v11915_v8 = vadd.f32 %v11914_v33, %v11913_v59  ;;  %v11799_v56 = vpop.f32.mrb[197].mxu1 }
 0x410   : > { %v11800_v53 = vadd.f32 %v11799_v56, %v11798_v55  ;;  %v11801_v34 = vpop.f32.mrb[198].mxu1 }
 0x411   : > { %v11802_v14 = vpop.f32.mrb[199].mxu1 }
 0x412   : > { %v9764_v61 = vadd.f32 %v11800_v53, %v15735_v19  ;;  %v11803_v5 = vadd.f32 %v11802_v14, %v11801_v34 }
 0x413   : > { %v11916_v48 = vpop.f32.mrb[232].mxu0 }
 0x414   : > { %v11917_v28 = vpop.f32.mrb[233].mxu0  ;;  %v9767_v39 = vadd.f32 %v11803_v5, %v15750_v47  ;;  %v15906_v12 = vadd.f32 %v11912_v60, %v9764_v61 }
 0x415   : > { %v11918_v51 = vadd.f32 %v11917_v28, %v11916_v48  ;;  %v11919_v16 = vpop.f32.mrb[234].mxu0 }
 0x416   : > { %v11920_v13 = vpop.f32.mrb[235].mxu0  ;;  %v11804_v40 = vpop.f32.mrb[200].mxu1  ;;  %v15913_v61 = vadd.f32 %v11915_v8, %v9767_v39 }
 0x417   : > { %v11921_v4 = vadd.f32 %v11920_v13, %v11919_v16  ;;  %v11805_v37 = vpop.f32.mrb[201].mxu1  ;;  %v15917_v13 = vadd.f32 %v15888_v36, %v9759_v62 }
 0x418   : > { %v11806_v1 = vadd.f32 %v11805_v37, %v11804_v40  ;;  %v11807_v29 = vpop.f32.mrb[202].mxu1 }
 0x419   : > { %v11808_v19 = vpop.f32.mrb[203].mxu1 }
 0x41a   : > { %v9772_v21 = vadd.f32 %v11806_v1, %v15754_v24  ;;  %v11809_v44 = vadd.f32 %v11808_v19, %v11807_v29 }
 0x41b   : > { %v11922_v31 = vpop.f32.mrb[236].mxu0 }
 0x41c   : > { %v11923_v27 = vpop.f32.mrb[237].mxu0  ;;  %v9775_v47 = vadd.f32 %v11809_v44, %v15761_v26 }
 0x41d   : > { %v11924_v59 = vadd.f32 %v11923_v27, %v11922_v31  ;;  %v11925_v33 = vpop.f32.mrb[238].mxu0  ;;  %v15922_v31 = vadd.f32 %v11918_v51, %v9772_v21 }
 0x41e   : > { %v11926_v55 = vpop.f32.mrb[239].mxu0  ;;  %v11810_v49 = vpop.f32.mrb[204].mxu1 }
 0x41f   : > { %v11927_v56 = vadd.f32 %v11926_v55, %v11925_v33  ;;  %v11811_v53 = vpop.f32.mrb[205].mxu1  ;;  %v15927_v33 = vadd.f32 %v11921_v4, %v9775_v47 }
 0x420   : > { %v11812_v15 = vadd.f32 %v11811_v53, %v11810_v49  ;;  %v11813_v34 = vpop.f32.mrb[206].mxu1 }
 0x421   : > { %v11814_v14 = vpop.f32.mrb[207].mxu1 }
 0x422   : > { %v9780_v5 = vadd.f32 %v11812_v15, %v15768_v25  ;;  %v11815_v48 = vadd.f32 %v11814_v14, %v11813_v34 }
 0x423   : > { %v11928_v24 = vpop.f32.mrb[240].mxu0 }
 0x424   : > { %v11929_v60 = vpop.f32.mrb[241].mxu0  ;;  %v9783_v26 = vadd.f32 %v11815_v48, %v15772_v11  ;;  %v15919_v37 = vadd.f32 %v11924_v59, %v9780_v5 }
 0x425   : > { %v11930_v28 = vadd.f32 %v11929_v60, %v11928_v24  ;;  %v11931_v16 = vpop.f32.mrb[242].mxu0 }
 0x426   : > { %v11932_v40 = vpop.f32.mrb[243].mxu0  ;;  %v11816_v1 = vpop.f32.mrb[208].mxu1  ;;  %v15924_v27 = vadd.f32 %v11927_v56, %v9783_v26 }
 0x427   : > { %v11933_v25 = vadd.f32 %v11932_v40, %v11931_v16  ;;  %v11817_v29 = vpop.f32.mrb[209].mxu1 }
 0x428   : > { %v11818_v19 = vadd.f32 %v11817_v29, %v11816_v1  ;;  %v11819_v44 = vpop.f32.mrb[210].mxu1 }
 0x429   : > { %v11820_v32 = vpop.f32.mrb[211].mxu1 }
 0x42a   : > { %v9788_v20 = vadd.f32 %v11818_v19, %v15780_v41  ;;  %v11821_v8 = vadd.f32 %v11820_v32, %v11819_v44 }
 0x42b   : > { %v11934_v39 = vpop.f32.mrb[244].mxu0 }
 0x42c   : > { %v11935_v11 = vpop.f32.mrb[245].mxu0  ;;  %v9791_v36 = vadd.f32 %v11821_v8, %v15784_v46  ;;  %v15930_v48 = vadd.f32 %v11930_v28, %v9788_v20 }
 0x42d   : > { %v11936_v62 = vadd.f32 %v11935_v11, %v11934_v39  ;;  %v11937_v59 = vpop.f32.mrb[246].mxu0 }
 0x42e   : > { %v11938_v55 = vpop.f32.mrb[247].mxu0  ;;  %v11822_v49 = vpop.f32.mrb[212].mxu1  ;;  %v15935_v47 = vadd.f32 %v11933_v25, %v9791_v36 }
 0x42f   : > { %v11939_v53 = vadd.f32 %v11938_v55, %v11937_v59  ;;  %v11823_v15 = vpop.f32.mrb[213].mxu1 }
 0x430   : > { %v11824_v34 = vadd.f32 %v11823_v15, %v11822_v49  ;;  %v11825_v14 = vpop.f32.mrb[214].mxu1 }
 0x431   : > { %v11826_v41 = vpop.f32.mrb[215].mxu1 }
 0x432   : > { %v9796_v5 = vadd.f32 %v11824_v34, %v15788_v52  ;;  %v11827_v51 = vadd.f32 %v11826_v41, %v11825_v14 }
 0x433   : > { %v11940_v21 = vpop.f32.mrb[248].mxu0 }
 0x434   : > { %v11941_v56 = vpop.f32.mrb[249].mxu0  ;;  %v9799_v46 = vadd.f32 %v11827_v51, %v15792_v38  ;;  %v15933_v4 = vadd.f32 %v11936_v62, %v9796_v5 }
 0x435   : > { %v11942_v24 = vadd.f32 %v11941_v56, %v11940_v21  ;;  %v11943_v60 = vpop.f32.mrb[250].mxu0 }
 0x436   : > { %v11944_v26 = vpop.f32.mrb[251].mxu0  ;;  %v11828_v16 = vpop.f32.mrb[216].mxu1  ;;  %v15937_v1 = vadd.f32 %v11939_v53, %v9799_v46 }
 0x437   : > { %v11945_v40 = vadd.f32 %v11944_v26, %v11943_v60  ;;  %v11829_v29 = vpop.f32.mrb[217].mxu1 }
 0x438   : > { %v11830_v52 = vadd.f32 %v11829_v29, %v11828_v16  ;;  %v11831_v19 = vpop.f32.mrb[218].mxu1 }
 0x439   : > { %v11832_v44 = vpop.f32.mrb[219].mxu1 }
 0x43a   : > { %v9804_v28 = vadd.f32 %v11830_v52, %v15796_v30  ;;  %v11833_v32 = vadd.f32 %v11832_v44, %v11831_v19 }
 0x43b   : > { %v11946_v20 = vpop.f32.mrb[252].mxu0 }
 0x43c   : > { %v11947_v38 = vpop.f32.mrb[253].mxu0  ;;  %v9807_v8 = vadd.f32 %v11833_v32, %v15802_v63  ;;  %v15941_v25 = vadd.f32 %v11942_v24, %v9804_v28 }
 0x43d   : > { %v11948_v39 = vadd.f32 %v11947_v38, %v11946_v20  ;;  %v11949_v11 = vpop.f32.mrb[254].mxu0 }
 0x43e   : > { %v11950_v36 = vpop.f32.mrb[255].mxu0  ;;  %v11834_v62 = vpop.f32.mrb[220].mxu1  ;;  %v15943_v55 = vadd.f32 %v11945_v40, %v9807_v8 }
 0x43f   : > { %v11951_v59 = vadd.f32 %v11950_v36, %v11949_v11  ;;  %v11835_v49 = vpop.f32.mrb[221].mxu1 }
 0x440   : > { %v11836_v53 = vadd.f32 %v11835_v49, %v11834_v62  ;;  %v11837_v15 = vpop.f32.mrb[222].mxu1 }
 0x441   : > { %v11838_v34 = vpop.f32.mrb[223].mxu1 }
 0x442   : > { %v9812_v30 = vadd.f32 %v11836_v53, %v15806_v3  ;;  %v11839_v14 = vadd.f32 %v11838_v34, %v11837_v15 }
 0x443   : > { %v11952_v41 = vpop.f32.mrb[0].mxu0 }
 0x444   : > { %v11953_v5 = vpop.f32.mrb[1].mxu0  ;;  %v9815_v63 = vadd.f32 %v11839_v14, %v15810_v9  ;;  %v15947_v56 = vadd.f32 %v11948_v39, %v9812_v30 }
 0x445   : > { %v11954_v51 = vadd.f32 %v11953_v5, %v11952_v41  ;;  %v11955_v21 = vpop.f32.mrb[2].mxu0 }
 0x446   : > { %v11956_v46 = vpop.f32.mrb[3].mxu0  ;;  %v15949_v26 = vadd.f32 %v11951_v59, %v9815_v63 }
 0x447   : > { %v11840_v24 = vpop.f32.mrb[224].mxu1  ;;  %v11957_v60 = vadd.f32 %v11956_v46, %v11955_v21 }
 0x448   : > { %v11841_v16 = vpop.f32.mrb[225].mxu1 }
 0x449   : > { %v11842_v40 = vadd.f32 %v11841_v16, %v11840_v24  ;;  %v11843_v29 = vpop.f32.mrb[226].mxu1 }
 0x44a   : > { %v11844_v52 = vpop.f32.mrb[227].mxu1 }
 0x44b   : > { %v9820_v3 = vadd.f32 %v11842_v40, %v15814_v54  ;;  %v11845_v19 = vadd.f32 %v11844_v52, %v11843_v29  ;;  %v11958_v44 = vpop.f32.mrb[4].mxu0 }
 0x44c   : > { %v11959_v9 = vpop.f32.mrb[5].mxu0 }
 0x44d   : > { %v9823_v28 = vadd.f32 %v11845_v19, %v15818_v45  ;;  %v15953_v32 = vadd.f32 %v11954_v51, %v9820_v3  ;;  %v11960_v20 = vadd.f32 %v11959_v9, %v11958_v44  ;;  %v11961_v38 = vpop.f32.mrb[6].mxu0 }
 0x44e   : > { %v11962_v8 = vpop.f32.mrb[7].mxu0 }
 0x44f   : > { %v15955_v39 = vadd.f32 %v11957_v60, %v9823_v28  ;;  %v11963_v11 = vadd.f32 %v11962_v8, %v11961_v38 }
 0x451   : > { %v11846_v36 = vpop.f32.mrb[228].mxu1 }
 0x452   : > { %v11847_v62 = vpop.f32.mrb[229].mxu1 }
 0x453   : > { %v11848_v59 = vadd.f32 %v11847_v62, %v11846_v36  ;;  %v11849_v49 = vpop.f32.mrb[230].mxu1 }
 0x454   : > { %v11850_v53 = vpop.f32.mrb[231].mxu1 }
 0x455   : > { %v9828_v54 = vadd.f32 %v11848_v59, %v15821_v35  ;;  %v11851_v15 = vadd.f32 %v11850_v53, %v11849_v49  ;;  %v11964_v34 = vpop.f32.mrb[8].mxu0 }
 0x456   : > { %v11965_v30 = vpop.f32.mrb[9].mxu0 }
 0x457   : > { %v9831_v45 = vadd.f32 %v11851_v15, %v15824_v17  ;;  %v11966_v14 = vadd.f32 %v11965_v30, %v11964_v34  ;;  %v11967_v41 = vpop.f32.mrb[10].mxu0  ;;  %v15959_v5 = vadd.f32 %v11960_v20, %v9828_v54 }
 0x458   : > { %v11968_v63 = vpop.f32.mrb[11].mxu0 }
 0x459   : > { %v11969_v51 = vadd.f32 %v11968_v63, %v11967_v41  ;;  %v15961_v21 = vadd.f32 %v11963_v11, %v9831_v45 }
 0x45c   : > { %v11852_v46 = vpop.f32.mrb[232].mxu1 }
 0x45d   : > { %v11853_v24 = vpop.f32.mrb[233].mxu1 }
 0x45e   : > { %v11854_v60 = vadd.f32 %v11853_v24, %v11852_v46  ;;  %v11855_v16 = vpop.f32.mrb[234].mxu1 }
 0x45f   : > { %v11856_v40 = vpop.f32.mrb[235].mxu1  ;;  %v11970_v29 = vpop.f32.mrb[12].mxu0 }
 0x460   : > { %v9836_v35 = vadd.f32 %v11854_v60, %v15829_v0  ;;  %v11857_v52 = vadd.f32 %v11856_v40, %v11855_v16  ;;  %v11971_v3 = vpop.f32.mrb[13].mxu0 }
 0x461   : > { %v11972_v19 = vadd.f32 %v11971_v3, %v11970_v29  ;;  %v11973_v17 = vpop.f32.mrb[14].mxu0 }
 0x462   : > { %v9839_v44 = vadd.f32 %v11857_v52, %v15832_v7  ;;  %v11974_v28 = vpop.f32.mrb[15].mxu0  ;;  %v15965_v9 = vadd.f32 %v11966_v14, %v9836_v35 }
 0x463   : > { %v11975_v20 = vadd.f32 %v11974_v28, %v11973_v17 }
 0x464   : > { %v15967_v38 = vadd.f32 %v11969_v51, %v9839_v44 }
 0x468   : > { %v11858_v8 = vpop.f32.mrb[236].mxu1 }
 0x469   : > { %v11859_v11 = vpop.f32.mrb[237].mxu1 }
 0x46a   : > { %v11860_v36 = vadd.f32 %v11859_v11, %v11858_v8  ;;  %v11861_v62 = vpop.f32.mrb[238].mxu1 }
 0x46b   : > { %v11862_v59 = vpop.f32.mrb[239].mxu1  ;;  %v11976_v53 = vpop.f32.mrb[16].mxu0 }
 0x46c   : > { %v9844_v49 = vadd.f32 %v11860_v36, %v15835_v43  ;;  %v11863_v0 = vadd.f32 %v11862_v59, %v11861_v62  ;;  %v11977_v54 = vpop.f32.mrb[17].mxu0 }
 0x46d   : > { %v11978_v34 = vadd.f32 %v11977_v54, %v11976_v53  ;;  %v11979_v7 = vpop.f32.mrb[18].mxu0 }
 0x46e   : > { %v9847_v15 = vadd.f32 %v11863_v0, %v15841_v50  ;;  %v15971_v30 = vadd.f32 %v11972_v19, %v9844_v49  ;;  %v11980_v45 = vpop.f32.mrb[19].mxu0 }
 0x46f   : > { %v11981_v14 = vadd.f32 %v11980_v45, %v11979_v7 }
 0x470   : > { %v15973_v41 = vadd.f32 %v11975_v20, %v9847_v15 }
 0x474   : > { %v11864_v63 = vpop.f32.mrb[240].mxu1 }
 0x475   : > { %v11865_v51 = vpop.f32.mrb[241].mxu1 }
 0x476   : > { %v11866_v46 = vadd.f32 %v11865_v51, %v11864_v63  ;;  %v11867_v24 = vpop.f32.mrb[242].mxu1  ;;  %v11982_v60 = vpop.f32.mrb[20].mxu0 }
 0x477   : > { %v11868_v16 = vpop.f32.mrb[243].mxu1  ;;  %v11983_v43 = vpop.f32.mrb[21].mxu0 }
 0x478   : > { %v9852_v40 = vadd.f32 %v11866_v46, %v15864_v6  ;;  %v11869_v29 = vadd.f32 %v11868_v16, %v11867_v24  ;;  %v11984_v35 = vadd.f32 %v11983_v43, %v11982_v60  ;;  %v11985_v50 = vpop.f32.mrb[22].mxu0 }
 0x479   : > { %v11986_v52 = vpop.f32.mrb[23].mxu0 }
 0x47a   : > { %v9855_v3 = vadd.f32 %v11869_v29, %v15871_v58  ;;  %v11987_v19 = vadd.f32 %v11986_v52, %v11985_v50  ;;  %v15977_v17 = vadd.f32 %v11978_v34, %v9852_v40 }
 0x47c   : > { %v15979_v44 = vadd.f32 %v11981_v14, %v9855_v3 }
 0x47f   : > { %v11870_v28 = vpop.f32.mrb[244].mxu1 }
 0x480   : > { %v11871_v20 = vpop.f32.mrb[245].mxu1 }
 0x481   : > { %v11872_v8 = vadd.f32 %v11871_v20, %v11870_v28  ;;  %v11873_v11 = vpop.f32.mrb[246].mxu1 }
 0x482   : > { %v11874_v36 = vpop.f32.mrb[247].mxu1  ;;  %v11988_v6 = vpop.f32.mrb[24].mxu0 }
 0x483   : > { %v9860_v62 = vadd.f32 %v11872_v8, %v15880_v22  ;;  %v11875_v59 = vadd.f32 %v11874_v36, %v11873_v11  ;;  %v11989_v49 = vpop.f32.mrb[25].mxu0 }
 0x484   : > { %v11990_v53 = vadd.f32 %v11989_v49, %v11988_v6  ;;  %v11991_v54 = vpop.f32.mrb[26].mxu0  ;;  %v10204_v49 = vld [vmem:[%s12668_s9] sm:$0xff] }
 0x485   : > { %v9863_v0 = vadd.f32 %v11875_v59, %v15883_v57  ;;  %v15983_v58 = vadd.f32 %v11984_v35, %v9860_v62  ;;  %v11992_v15 = vpop.f32.mrb[27].mxu0  ;;  %v10206_v59 = vld [vmem:[%s12668_s9 + $0x10] sm:$0xff] }
 0x486   : > { %v11993_v34 = vadd.f32 %v11992_v15, %v11991_v54 }
 0x487   : > { %v15985_v7 = vadd.f32 %v11987_v19, %v9863_v0 }
 0x48a   : > { %v11876_v45 = vpop.f32.mrb[248].mxu1 }
 0x48b   : > { %v11877_v14 = vpop.f32.mrb[249].mxu1 }
 0x48c   : > { %v11878_v63 = vadd.f32 %v11877_v14, %v11876_v45  ;;  %v11879_v51 = vpop.f32.mrb[250].mxu1  ;;  %v10205_v14 = vld [vmem:[%s12668_s9 + $0x8] sm:$0xff] }
 0x48d   : > { %v11880_v46 = vpop.f32.mrb[251].mxu1 }
 0x48e   : > { %v9868_v22 = vadd.f32 %v11878_v63, %v15892_v42  ;;  %v11881_v24 = vadd.f32 %v11880_v46, %v11879_v51 }
 0x490   : > { %v9871_v60 = vadd.f32 %v11881_v24, %v15895_v23  ;;  %v15989_v57 = vadd.f32 %v11990_v53, %v9868_v22 }
 0x492   : > { %v15991_v16 = vadd.f32 %v11993_v34, %v9871_v60  ;;  %v11882_v43 = vpop.f32.mrb[252].mxu1 }
 0x493   : > { %v11883_v40 = vpop.f32.mrb[253].mxu1 }
 0x494   : > { %v11884_v29 = vadd.f32 %v11883_v40, %v11882_v43  ;;  %v11885_v35 = vpop.f32.mrb[254].mxu1  ;;  %v11994_v50 = vpop.f32.mrb[28].mxu0  ;;  %v10210_v43 = vld [vmem:[%s12668_s9 + $0x30] sm:$0xff] }
 0x495   : > { %v11886_v52 = vpop.f32.mrb[255].mxu1  ;;  %v11995_v19 = vpop.f32.mrb[29].mxu0 }
 0x496   : > { %v9876_v3 = vadd.f32 %v11884_v29, %v15900_v2  ;;  %v11887_v42 = vadd.f32 %v11886_v52, %v11885_v35  ;;  %v11996_v28 = vadd.f32 %v11995_v19, %v11994_v50  ;;  %v11997_v23 = vpop.f32.mrb[30].mxu0  ;;  %v10208_v29 = vld [vmem:[%s12668_s9 + $0x20] sm:$0xff]  ;;  %v10211_v52 = vld [vmem:[%s12668_s9 + $0x38] sm:$0xff] }
 0x497   : > { %v11998_v8 = vpop.f32.mrb[31].mxu0 }
 0x498   : > { %v9879_v20 = vadd.f32 %v11887_v42, %v15903_v18  ;;  %v11999_v11 = vadd.f32 %v11998_v8, %v11997_v23  ;;  %v15996_v36 = vadd.f32 %v11996_v28, %v9876_v3  ;;  %v10207_v18 = vld [vmem:[%s12668_s9 + $0x18] sm:$0xff]  ;;  %v10209_v28 = vld [vmem:[%s12668_s9 + $0x28] sm:$0xff] }
 0x49a   : > { %v12090_v62 = vpop.f32.mrb[0].mxu1  ;;  %v16003_v0 = vadd.f32 %v11999_v11, %v9879_v20 }
 0x49b   : > { %v10086_v6 = vadd.f32 %v12090_v62, %v15906_v12  ;;  %v10077_v2 = vpop.f32.mrb[1].mxu1 }
 0x49c   : > { %v10078_v53 = vadd.f32 %v10077_v2, %v15911_v10  ;;  %v12091_v54 = vpop.f32.mrb[2].mxu1  ;;  %v10214_v2 = vld [vmem:[%s12668_s9 + $0x50] sm:$0xff] }
 0x49d   : > { %v10238_v15 = vadd.f32 %v10206_v59, %v10086_v6  ;;  %v10089_v34 = vadd.f32 %v12091_v54, %v15913_v61  ;;  %v10080_v45 = vpop.f32.mrb[3].mxu1 }
 0x49e   : > { %v10236_v63 = vadd.f32 %v10204_v49, %v10078_v53  ;;  %v10081_v51 = vadd.f32 %v10080_v45, %v15917_v13  ;;  %v10212_v53 = vld [vmem:[%s12668_s9 + $0x40] sm:$0xff] }
 0x49f   : > { %v10270_v46 = vmax.f32 %v10238_v15, 0.0  ;;  %v10239_v12 = vadd.f32 %v10207_v18, %v10089_v34  ;;  %v10215_v18 = vld [vmem:[%s12668_s9 + $0x58] sm:$0xff] }
 0x4a0   : > { %v10268_v22 = vmax.f32 %v10236_v63, 0.0  ;;  %v10237_v24 = vadd.f32 %v10205_v14, %v10081_v51  ;;  %v10213_v14 = vld [vmem:[%s12668_s9 + $0x48] sm:$0xff] }
 0x4a1   : > { %10302 = vst [vmem:[%s16010_s25 + $0x10] sm:$0xff] %v10270_v46  ;;  %v10271_v10 = vmax.f32 %v10239_v12, 0.0 }
 0x4a2   : > { %10300 = vst [vmem:[%s16010_s25] sm:$0xff] %v10268_v22  ;;  %v10269_v61 = vmax.f32 %v10237_v24, 0.0  ;;  %v12094_v60 = vpop.f32.mrb[4].mxu1 }
 0x4a3   : > { %10303 = vst [vmem:[%s16010_s25 + $0x18] sm:$0xff] %v10271_v10  ;;  %v10102_v13 = vadd.f32 %v12094_v60, %v15919_v37  ;;  %v10093_v40 = vpop.f32.mrb[5].mxu1 }
 0x4a4   : > { %10301 = vst [vmem:[%s16010_s25 + $0x8] sm:$0xff] %v10269_v61  ;;  %v10094_v35 = vadd.f32 %v10093_v40, %v15922_v31  ;;  %v12095_v50 = vpop.f32.mrb[6].mxu1  ;;  %v10218_v61 = vld [vmem:[%s12668_s9 + $0x70] sm:$0xff]  ;;  %v10219_v40 = vld [vmem:[%s12668_s9 + $0x78] sm:$0xff] }
 0x4a5   : > { %v10242_v3 = vadd.f32 %v10210_v43, %v10102_v13  ;;  %v10105_v42 = vadd.f32 %v12095_v50, %v15924_v27  ;;  %v10096_v19 = vpop.f32.mrb[7].mxu1  ;;  %v10216_v43 = vld [vmem:[%s12668_s9 + $0x60] sm:$0xff] }
 0x4a6   : > { %v10240_v23 = vadd.f32 %v10208_v29, %v10094_v35  ;;  %v10097_v37 = vadd.f32 %v10096_v19, %v15927_v33 }
 0x4a7   : > { %v10274_v20 = vmax.f32 %v10242_v3, 0.0  ;;  %v10243_v8 = vadd.f32 %v10211_v52, %v10105_v42  ;;  %v10217_v52 = vld [vmem:[%s12668_s9 + $0x68] sm:$0xff] }
 0x4a8   : > { %v10272_v11 = vmax.f32 %v10240_v23, 0.0  ;;  %v10241_v62 = vadd.f32 %v10209_v28, %v10097_v37 }
 0x4a9   : > { %10306 = vst [vmem:[%s16010_s25 + $0x30] sm:$0xff] %v10274_v20  ;;  %v10275_v31 = vmax.f32 %v10243_v8, 0.0  ;;  %v10222_v8 = vld [vmem:[%s12668_s9 + $0x90] sm:$0xff] }
 0x4aa   : > { %10304 = vst [vmem:[%s16010_s25 + $0x20] sm:$0xff] %v10272_v11  ;;  %v10273_v59 = vmax.f32 %v10241_v62, 0.0  ;;  %v12098_v6 = vpop.f32.mrb[8].mxu1  ;;  %v10220_v62 = vld [vmem:[%s12668_s9 + $0x80] sm:$0xff] }
 0x4ab   : > { %10307 = vst [vmem:[%s16010_s25 + $0x38] sm:$0xff] %v10275_v31  ;;  %v10118_v27 = vadd.f32 %v12098_v6, %v15933_v4  ;;  %v10109_v49 = vpop.f32.mrb[9].mxu1 }
 0x4ac   : > { %10305 = vst [vmem:[%s16010_s25 + $0x28] sm:$0xff] %v10273_v59  ;;  %v10110_v33 = vadd.f32 %v10109_v49, %v15930_v48  ;;  %v12099_v54 = vpop.f32.mrb[10].mxu1  ;;  %v10223_v59 = vld [vmem:[%s12668_s9 + $0x98] sm:$0xff]  ;;  %v10221_v49 = vld [vmem:[%s12668_s9 + $0x88] sm:$0xff] }
 0x4ad   : > { %v10246_v15 = vadd.f32 %v10214_v2, %v10118_v27  ;;  %v10121_v34 = vadd.f32 %v12099_v54, %v15937_v1  ;;  %v10112_v45 = vpop.f32.mrb[11].mxu1 }
 0x4ae   : > { %v10244_v63 = vadd.f32 %v10212_v53, %v10110_v33  ;;  %v10113_v4 = vadd.f32 %v10112_v45, %v15935_v47 }
 0x4af   : > { %v10278_v51 = vmax.f32 %v10246_v15, 0.0  ;;  %v10247_v46 = vadd.f32 %v10215_v18, %v10121_v34 }
 0x4b0   : > { %v10276_v12 = vmax.f32 %v10244_v63, 0.0  ;;  %v10245_v22 = vadd.f32 %v10213_v14, %v10113_v4  ;;  %v10226_v14 = vld [vmem:[%s12668_s9 + $0xb0] sm:$0xff]  ;;  %v10224_v4 = vld [vmem:[%s12668_s9 + $0xa0] sm:$0xff] }
 0x4b1   : > { %10310 = vst [vmem:[%s16010_s25 + $0x50] sm:$0xff] %v10278_v51  ;;  %v10279_v48 = vmax.f32 %v10247_v46, 0.0  ;;  %v10227_v46 = vld [vmem:[%s12668_s9 + $0xb8] sm:$0xff] }
 0x4b2   : > { %10308 = vst [vmem:[%s16010_s25 + $0x40] sm:$0xff] %v10276_v12  ;;  %v10277_v24 = vmax.f32 %v10245_v22, 0.0  ;;  %v12102_v10 = vpop.f32.mrb[12].mxu1 }
 0x4b3   : > { %10311 = vst [vmem:[%s16010_s25 + $0x58] sm:$0xff] %v10279_v48  ;;  %v10134_v1 = vadd.f32 %v12102_v10, %v15947_v56  ;;  %v10125_v60 = vpop.f32.mrb[13].mxu1 }
 0x4b4   : > { %10309 = vst [vmem:[%s16010_s25 + $0x48] sm:$0xff] %v10277_v24  ;;  %v10126_v47 = vadd.f32 %v10125_v60, %v15941_v25  ;;  %v12103_v13 = vpop.f32.mrb[14].mxu1  ;;  %v10225_v24 = vld [vmem:[%s12668_s9 + $0xa8] sm:$0xff] }
 0x4b5   : > { %v10250_v29 = vadd.f32 %v10218_v61, %v10134_v1  ;;  %v10137_v35 = vadd.f32 %v12103_v13, %v15949_v26  ;;  %v10128_v50 = vpop.f32.mrb[15].mxu1 }
 0x4b6   : > { %v10248_v3 = vadd.f32 %v10216_v43, %v10126_v47  ;;  %v10129_v56 = vadd.f32 %v10128_v50, %v15943_v55 }
 0x4b7   : > { %v10282_v42 = vmax.f32 %v10250_v29, 0.0  ;;  %v10251_v19 = vadd.f32 %v10219_v40, %v10137_v35  ;;  %v10230_v40 = vld [vmem:[%s12668_s9 + $0xd0] sm:$0xff]  ;;  %v10228_v35 = vld [vmem:[%s12668_s9 + $0xc0] sm:$0xff] }
 0x4b8   : > { %v10280_v28 = vmax.f32 %v10248_v3, 0.0  ;;  %v10249_v23 = vadd.f32 %v10217_v52, %v10129_v56  ;;  %v10231_v52 = vld [vmem:[%s12668_s9 + $0xd8] sm:$0xff] }
 0x4b9   : > { %10314 = vst [vmem:[%s16010_s25 + $0x70] sm:$0xff] %v10282_v42  ;;  %v10283_v25 = vmax.f32 %v10251_v19, 0.0  ;;  %v10229_v19 = vld [vmem:[%s12668_s9 + $0xc8] sm:$0xff] }
 0x4ba   : > { %10312 = vst [vmem:[%s16010_s25 + $0x60] sm:$0xff] %v10280_v28  ;;  %v10281_v37 = vmax.f32 %v10249_v23, 0.0  ;;  %v12106_v20 = vpop.f32.mrb[16].mxu1 }
 0x4bb   : > { %10315 = vst [vmem:[%s16010_s25 + $0x78] sm:$0xff] %v10283_v25  ;;  %v10150_v26 = vadd.f32 %v12106_v20, %v15959_v5  ;;  %v10141_v11 = vpop.f32.mrb[17].mxu1 }
 0x4bc   : > { %10313 = vst [vmem:[%s16010_s25 + $0x68] sm:$0xff] %v10281_v37  ;;  %v10142_v55 = vadd.f32 %v10141_v11, %v15953_v32  ;;  %v12107_v31 = vpop.f32.mrb[18].mxu1 }
 0x4bd   : > { %v10254_v6 = vadd.f32 %v10222_v8, %v10150_v26  ;;  %v10153_v2 = vadd.f32 %v12107_v31, %v15961_v21  ;;  %v10144_v27 = vpop.f32.mrb[19].mxu1 }
 0x4be   : > { %v10252_v53 = vadd.f32 %v10220_v62, %v10142_v55  ;;  %v10145_v5 = vadd.f32 %v10144_v27, %v15955_v39  ;;  %v10232_v55 = vld [vmem:[%s12668_s9 + $0xe0] sm:$0xff] }
 0x4bf   : > { %v10286_v33 = vmax.f32 %v10254_v6, 0.0  ;;  %v10255_v54 = vadd.f32 %v10223_v59, %v10153_v2  ;;  %v10235_v59 = vld [vmem:[%s12668_s9 + $0xf8] sm:$0xff] }
 0x4c0   : > { %v10284_v18 = vmax.f32 %v10252_v53, 0.0  ;;  %v10253_v15 = vadd.f32 %v10221_v49, %v10145_v5  ;;  %v10233_v49 = vld [vmem:[%s12668_s9 + $0xe8] sm:$0xff] }
 0x4c1   : > { %10318 = vst [vmem:[%s16010_s25 + $0x90] sm:$0xff] %v10286_v33  ;;  %v10287_v32 = vmax.f32 %v10255_v54, 0.0 }
 0x4c2   : > { %10316 = vst [vmem:[%s16010_s25 + $0x80] sm:$0xff] %v10284_v18  ;;  %v10285_v34 = vmax.f32 %v10253_v15, 0.0  ;;  %v12110_v45 = vpop.f32.mrb[20].mxu1 }
 0x4c3   : > { %10319 = vst [vmem:[%s16010_s25 + $0x98] sm:$0xff] %v10287_v32  ;;  %v10166_v21 = vadd.f32 %v12110_v45, %v15971_v30  ;;  %v10157_v63 = vpop.f32.mrb[21].mxu1 }
 0x4c4   : > { %10317 = vst [vmem:[%s16010_s25 + $0x88] sm:$0xff] %v10285_v34  ;;  %v10158_v39 = vadd.f32 %v10157_v63, %v15965_v9  ;;  %v12111_v51 = vpop.f32.mrb[22].mxu1 }
 0x4c5   : > { %v10258_v12 = vadd.f32 %v10226_v14, %v10166_v21  ;;  %v10169_v22 = vadd.f32 %v12111_v51, %v15973_v41  ;;  %v10160_v48 = vpop.f32.mrb[23].mxu1 }
 0x4c6   : > { %v10256_v10 = vadd.f32 %v10224_v4, %v10158_v39  ;;  %v10161_v30 = vadd.f32 %v10160_v48, %v15967_v38 }
 0x4c7   : > { %v10290_v61 = vmax.f32 %v10258_v12, 0.0  ;;  %v10259_v1 = vadd.f32 %v10227_v46, %v10169_v22 }
 0x4c8   : > { %v10288_v60 = vmax.f32 %v10256_v10, 0.0  ;;  %v10257_v43 = vadd.f32 %v10225_v24, %v10161_v30 }
 0x4c9   : > { %10322 = vst [vmem:[%s16010_s25 + $0xb0] sm:$0xff] %v10290_v61  ;;  %v10291_v9 = vmax.f32 %v10259_v1, 0.0 }
 0x4ca   : > { %10320 = vst [vmem:[%s16010_s25 + $0xa0] sm:$0xff] %v10288_v60  ;;  %v10289_v47 = vmax.f32 %v10257_v43, 0.0  ;;  %v12114_v13 = vpop.f32.mrb[24].mxu1 }
 0x4cb   : > { %10323 = vst [vmem:[%s16010_s25 + $0xb8] sm:$0xff] %v10291_v9  ;;  %v10182_v41 = vadd.f32 %v12114_v13, %v15983_v58  ;;  %v10173_v29 = vpop.f32.mrb[25].mxu1 }
 0x4cc   : > { %10321 = vst [vmem:[%s16010_s25 + $0xa8] sm:$0xff] %v10289_v47  ;;  %v10174_v38 = vadd.f32 %v10173_v29, %v15977_v17  ;;  %v12115_v50 = vpop.f32.mrb[26].mxu1 }
 0x4cd   : > { %v10262_v3 = vadd.f32 %v10230_v40, %v10182_v41  ;;  %v10185_v56 = vadd.f32 %v12115_v50, %v15985_v7  ;;  %v10176_v42 = vpop.f32.mrb[27].mxu1  ;;  %v10234_v7 = vld [vmem:[%s12668_s9 + $0xf0] sm:$0xff]  ;;  %s12404_s9 = scalar_lea.vmem %s16104_s30, 4096 }
 0x4ce   : > { %v10260_v28 = vadd.f32 %v10228_v35, %v10174_v38  ;;  %v10177_v58 = vadd.f32 %v10176_v42, %v15979_v44  ;;  %p12405_p11 = scmp.ne.s32.totalorder %s16104_s30, %s12404_s9  ;;  %p12412_p1 = scmp.lt.s32.totalorder %s12410_s12, %s12404_s9 }
 0x4cf   : > { %v10294_v23 = vmax.f32 %v10262_v3, 0.0  ;;  %v10263_v25 = vadd.f32 %v10231_v52, %v10185_v56 }
 0x4d0   : > { %v10292_v37 = vmax.f32 %v10260_v28, 0.0  ;;  %v10261_v20 = vadd.f32 %v10229_v19, %v10177_v58  ;;  %p12406_p12 = pnand %p12405_p11, %p12540_p5  ;;  %p12413_p2 = por %p12412_p1, %p12411_p0 }
 0x4d1   : > { %10326 = vst [vmem:[%s16010_s25 + $0xd0] sm:$0xff] %v10294_v23  ;;  %v10295_v17 = vmax.f32 %v10263_v25, 0.0 }
 0x4d2   : > { %10324 = vst [vmem:[%s16010_s25 + $0xc0] sm:$0xff] %v10292_v37  ;;  %v10293_v8 = vmax.f32 %v10261_v20, 0.0  ;;  %v12118_v26 = vpop.f32.mrb[28].mxu1  ;;  %p12407_p13 = pneg %p12406_p12 }
 0x4d3   : > { %10327 = vst [vmem:[%s16010_s25 + $0xd8] sm:$0xff] %v10295_v17  ;;  %v10198_v11 = vadd.f32 %v12118_v26, %v15996_v36  ;;  %v10189_v62 = vpop.f32.mrb[29].mxu1 }
 0x4d4   : > { %10325 = vst [vmem:[%s16010_s25 + $0xc8] sm:$0xff] %v10293_v8  ;;  %v10190_v44 = vadd.f32 %v10189_v62, %v15989_v57  ;;  %v12119_v31 = vpop.f32.mrb[30].mxu1  ;;  %p12414_p3 = pnand %p12413_p2, %p12407_p13 }
 0x4d5   : > { %v10266_v6 = vadd.f32 %v10234_v7, %v10198_v11  ;;  %v10201_v2 = vadd.f32 %v12119_v31, %v16003_v0  ;;  %v10192_v27 = vpop.f32.mrb[31].mxu1 }
 0x4d6   : > { %v10264_v53 = vadd.f32 %v10232_v55, %v10190_v44  ;;  %v10193_v36 = vadd.f32 %v10192_v27, %v15991_v16 }
 0x4d7   : > { %v10298_v5 = vmax.f32 %v10266_v6, 0.0  ;;  %v10267_v33 = vadd.f32 %v10235_v59, %v10201_v2 }
 0x4d8   : > { %v10296_v57 = vmax.f32 %v10264_v53, 0.0  ;;  %v10265_v54 = vadd.f32 %v10233_v49, %v10193_v36 }
 0x4d9   : > { %10330 = vst [vmem:[%s16010_s25 + $0xf0] sm:$0xff] %v10298_v5  ;;  %v10299_v18 = vmax.f32 %v10267_v33, 0.0 }
 0x4da   : > { %10328 = vst [vmem:[%s16010_s25 + $0xe0] sm:$0xff] %v10296_v57  ;;  %v10297_v16 = vmax.f32 %v10265_v54, 0.0 }
 0x4db   : > { %10331 = vst [vmem:[%s16010_s25 + $0xf8] sm:$0xff] %v10299_v18 }
 0x4dc   : > { %10329 = vst [vmem:[%s16010_s25 + $0xe8] sm:$0xff] %v10297_v16 }
 0x4dd   : > { %12417 = shalt.err (!%p12414_p3)
}
 0x4de   : > { %s12418_s13 = scalar_lea.hbm %s16102_s8, 4096  ;;  %s12422_s16 = scalar_lea.hbm %s16157_s5, 8192 }
 0x4df   : > { %p12419_p4 = scmp.ne.s32.totalorder %s16102_s8, %s12418_s13  ;;  %p12423_p9 = scmp.lt.u32.totalorder %s16102_s8, %s16157_s5 }
 0x4e0   : > { %p12424_p10 = scmp.lt.u32.totalorder %s12422_s16, %s12418_s13  ;;  %p12426_p12 = scmp.lt.u32.totalorder %s12418_s13, %s16102_s8 }
 0x4e1   : > { %p12420_p7 = pnand %p12419_p4, %p12540_p5 }
 0x4e2   : > { %p12425_p11 = por %p12424_p10, %p12423_p9 }
 0x4e3   : > { %p12421_p8 = pneg %p12420_p7 }
 0x4e4   : > { %p12427_p13 = por %p12426_p12, %p12425_p11 }
 0x4e6   : > { %p12428_p0 = pnand %p12427_p13, %p12421_p8 }
 0x4e8   : > { %12431 = shalt.err (!%p12428_p0)
}
 0x4e9   : > { %s12470_s25 = smov 128   ;;  %s12471_s26 = smov 8  }
 0x4ea   : > { %12120 = dma.vmem_to_hbm [thread:$0]  (%p12540_p5), %s16104_s30, 4096, %s16102_s8, %s16111_s22, %s12470_s25, %s12470_s25, %s12471_s26  }
 0x4eb PF: > { %p12126_p1 = scmp.ge.s32.totalorder %s12466_s21, 2  ;;  %s10361_s6 = sand.u32 1, %s12454_s18  }
 0x4ec   : > { %s10362_s7 = scalar_lea.sflag [#allocation5], %s10361_s6 }
 0x4ed   : > { %p12123_p2 = pnand %p12126_p1, %p12544_p6 }
 0x4ef   : > { %12449 = dma.done.wait (!%p12123_p2), %s10362_s7, 4096  }
 0x4f0   : > { %12451 = vsyncadd (!%p12123_p2), %s10362_s7, 4294963200  ;;  %p15_p3 = scmp.ge.s32.totalorder %s12527_s24, 4   ;;  %s16324_s18 = smov %s12458_s19 }
 0x4f1   : > { %s16325_s19 = smov %s12462_s20  ;;  %s16326_s20 = smov %s12538_s27 }
 0x4f2   : > { %s16327_s21 = smov %s12527_s24  ;;  %17 = sbr.rel (!%p15_p3) target bundleno = 3 (0x3), region = 78 }
 0x4f9   :  { %10367 = vsyncpa [#allocation5], 1 }
 0x4fa   :  { %10369 = vsyncpa [#allocation5 + $0x1], 1 }

</bundles_post_ra>
